<compile_context>
chip_gen: v6e
topology: v6e:2x2x1
jax: 0.10.0
libtpu: 0.0.40
codegen_flags: <defaults>
</compile_context>

<pallas_src>
import functools

import numpy as np
import jax
import jax.numpy as jnp
from jax.experimental import pallas as pl
from jax.experimental.pallas import tpu as pltpu

_BF16 = jnp.bfloat16
_VMEM_LIMIT = 64 * 1024 * 1024


def _cparams(n_parallel):
    return pltpu.CompilerParams(
        dimension_semantics=("parallel",) * n_parallel,
        vmem_limit_bytes=_VMEM_LIMIT)


# ----------------------------------------------------------------------------
# Pallas kernels
# ----------------------------------------------------------------------------

def _conv3x3_core(X, w_ref, b_ref):
    """3x3 conv on one row-window.

    X      : (R+2, W, Cin) bf16 -- rows already contain the 1-row top/bottom
             halo (or zeros at the image boundary); columns are NOT padded.
    w_ref  : (9, Cin, Cout) taps ordered t = dy*3 + dx (torch w[:, :, dy, dx]).
    b_ref  : (1, Cout) f32.
    returns: (R*W, Cout) f32 accumulator (bias added).
    """
    Rp2, W, Cin = X.shape
    R = Rp2 - 2
    Cout = w_ref.shape[2]
    zcol = jnp.zeros((Rp2, 1, Cin), X.dtype)
    acc = jnp.zeros((R * W, Cout), jnp.float32)
    for dx in range(3):
        # Column-shifted slab: B[r, j] = X[r, j + dx - 1] with zero fill.
        if dx == 0:
            B = jnp.concatenate([zcol, X[:, :W - 1, :]], axis=1)
        elif dx == 1:
            B = X
        else:
            B = jnp.concatenate([X[:, 1:, :], zcol], axis=1)
        F = B.reshape(Rp2 * W, Cin)
        for dy in range(3):
            # Output flat row o = i*W + j reads F[o + dy*W]; dy*W + R*W <= (R+2)*W,
            # so every slice is in-bounds (fixes the previous OOB for dy=2 taps).
            acc = acc + jnp.dot(F[dy * W: dy * W + R * W, :],
                                w_ref[dy * 3 + dx],
                                preferred_element_type=jnp.float32)
    return acc + b_ref[...]


def _conv3x3_kernel(xt_ref, xm_ref, xb_ref, w_ref, b_ref, *rest, has_res):
    # xt/xb: (1, 1, W, Cin) halo rows (clamped fetch, masked at boundaries)
    # xm   : (1, TH, W, Cin) main rows of this tile
    if has_res:
        r_ref, o_ref = rest
    else:
        (o_ref,) = rest
    t = pl.program_id(1)
    nt = pl.num_programs(1)
    zero_row = jnp.zeros(xt_ref.shape[1:], xt_ref.dtype)           # (1, W, Cin)
    top = jnp.where(t > 0, xt_ref[0], zero_row)
    bot = jnp.where(t < nt - 1, xb_ref[0], zero_row)
    X = jnp.concatenate([top, xm_ref[0], bot], axis=0)             # (TH+2, W, Cin)

    acc = _conv3x3_core(X, w_ref, b_ref)                           # (TH*W, Cout)

    TH, W = xm_ref.shape[1], xm_ref.shape[2]
    Cout = w_ref.shape[2]
    y = acc.reshape(TH, W, Cout)
    if has_res:
        y = y + r_ref[0].astype(jnp.float32)
    o_ref[0] = y.astype(o_ref.dtype)


def _conv3x3_up_kernel(x_ref, w_ref, b_ref, o_ref):
    # Fused 2x nearest upsample + conv3x3.  x_ref: (1, H, W, Cin) bf16.
    x = x_ref[0]
    H, W, Cin = x.shape
    Cout = w_ref.shape[2]
    # 2x nearest in VMEM (never materialized in HBM).
    x = jnp.broadcast_to(x[:, :, None, :], (H, W, 2, Cin)).reshape(H, 2 * W, Cin)
    x = jnp.broadcast_to(x[:, None, :, :], (H, 2, 2 * W, Cin)).reshape(2 * H, 2 * W, Cin)
    H2, W2 = 2 * H, 2 * W
    zrow = jnp.zeros((1, W2, Cin), x.dtype)
    X = jnp.concatenate([zrow, x, zrow], axis=0)                   # (H2+2, W2, Cin)
    acc = _conv3x3_core(X, w_ref, b_ref)
    o_ref[0] = acc.reshape(H2, W2, Cout).astype(o_ref.dtype)


def _conv1x1_kernel(x_ref, w_ref, b_ref, *rest, has_res):
    # x_ref: (TM, Cin) bf16, w_ref: (Cin, Cout) bf16, b_ref: (1, Cout) f32
    if has_res:
        r_ref, o_ref = rest
    else:
        (o_ref,) = rest
    acc = jnp.dot(x_ref[...], w_ref[...], preferred_element_type=jnp.float32)
    acc = acc + b_ref[...]
    if has_res:
        acc = acc + r_ref[...].astype(jnp.float32)
    o_ref[...] = acc.astype(o_ref.dtype)


def _gn_kernel(x_ref, g_ref, b_ref, agg_ref, o_ref, *, eps, apply_silu):
    # x_ref: (1, H, W, C).  agg_ref: (C, C) group-aggregation matrix already
    # scaled by 1/(cg*H*W), so (per-channel sums) @ agg = per-channel group mean.
    x = x_ref[0].astype(jnp.float32)
    H, W, C = x.shape
    x2 = x.reshape(H * W, C)
    s1 = jnp.sum(x2, axis=0, keepdims=True)                         # (1, C)
    s2 = jnp.sum(x2 * x2, axis=0, keepdims=True)                    # (1, C)
    mean = jnp.dot(s1, agg_ref[...], preferred_element_type=jnp.float32)
    ex2 = jnp.dot(s2, agg_ref[...], preferred_element_type=jnp.float32)
    var = ex2 - mean * mean                                         # biased (torch GN)
    rstd = jax.lax.rsqrt(var + eps)
    y = (x2 - mean) * (rstd * g_ref[...]) + b_ref[...]
    if apply_silu:
        y = y / (1.0 + jnp.exp(-y))                                 # SiLU
    o_ref[0] = y.reshape(H, W, C).astype(o_ref.dtype)


def _attn_kernel(q_ref, k_ref, v_ref, o_ref):
    # q/k/v: (1, S, C) bf16 rows; the 1/sqrt(C) scale is already folded into q.
    q = q_ref[0]
    k = k_ref[0]
    v = v_ref[0]
    s = jax.lax.dot_general(q, k, (((1,), (1,)), ((), ())),
                            preferred_element_type=jnp.float32)     # (S, S)
    m = jnp.max(s, axis=-1, keepdims=True)
    e = jnp.exp(s - m)
    p = e * pl.reciprocal(jnp.sum(e, axis=-1, keepdims=True), approx=True)
    out = jnp.dot(p.astype(jnp.bfloat16), v, preferred_element_type=jnp.float32)
    o_ref[0] = out.astype(o_ref.dtype)


# ----------------------------------------------------------------------------
# Tile-size helpers
# ----------------------------------------------------------------------------

def _pick_tile_m(M, cin, cout, has_res, budget=12 << 20):
    def bytes_for(tm):
        return (2 * tm * cin * 2                       # double-buffered input
                + 2 * tm * cout * 2 * (2 if has_res else 1)
                + tm * cout * 4                        # f32 accumulator
                + 2 * cin * cout * 2 + 2 * cout * 4)   # weights + bias
    if bytes_for(M) <= budget:
        return M
    cands = [d for d in range(16, M, 16) if M % d == 0]
    for tm in sorted(cands, reverse=True):
        if bytes_for(tm) <= budget:
            return tm
    return cands[0] if cands else M


def _pick_tile_h(H, W, cin, cout, has_res, budget=12 << 20):
    def bytes_for(th):
        inp = 2 * (th + 2) * W * cin * 2               # main + halos, double-buffered
        out = 2 * th * W * cout * 2 * (2 if has_res else 1)
        wgt = 2 * 9 * cin * cout * 2
        tmp = 3 * (th + 2) * W * cin * 2 + th * W * cout * 4
        return inp + out + wgt + tmp
    for th in sorted((d for d in range(1, H + 1) if H % d == 0), reverse=True):
        if bytes_for(th) <= budget:
            return th
    return 1


# ----------------------------------------------------------------------------
# Op wrappers (NHWC activations, bf16 in HBM)
# ----------------------------------------------------------------------------

def conv1x1(x_rows, w, b, *, residual=None, out_dtype=_BF16):
    """x_rows: (M, Cin). w: torch (Cout, Cin, 1, 1). b: (Cout,)."""
    M, Cin = x_rows.shape
    Cout = w.shape[0]
    w2 = jnp.transpose(w.reshape(Cout, Cin), (1, 0)).astype(_BF16)
    b2 = b.reshape(1, Cout).astype(jnp.float32)
    has_res = residual is not None
    tm = _pick_tile_m(M, Cin, Cout, has_res)

    in_specs = [pl.BlockSpec((tm, Cin), lambda i: (i, 0)),
                pl.BlockSpec((Cin, Cout), lambda i: (0, 0)),
                pl.BlockSpec((1, Cout), lambda i: (0, 0))]
    args = [x_rows.astype(_BF16), w2, b2]
    if has_res:
        in_specs.append(pl.BlockSpec((tm, Cout), lambda i: (i, 0)))
        args.append(residual.astype(_BF16))

    kern = functools.partial(_conv1x1_kernel, has_res=has_res)
    return pl.pallas_call(
        kern,
        grid=(M // tm,),
        in_specs=in_specs,
        out_specs=pl.BlockSpec((tm, Cout), lambda i: (i, 0)),
        out_shape=jax.ShapeDtypeStruct((M, Cout), out_dtype),
        compiler_params=_cparams(1),
    )(*args)


def _conv3x3_weights(w, b):
    Cout, Cin = w.shape[0], w.shape[1]
    wt = jnp.transpose(w, (2, 3, 1, 0)).reshape(9, Cin, Cout).astype(_BF16)
    bb = b.reshape(1, Cout).astype(jnp.float32)
    return wt, bb


def conv3x3(x, w, b, *, residual=None, out_dtype=_BF16):
    """x: (N, H, W, Cin) NHWC (unpadded). w: torch (Cout, Cin, 3, 3). padding=1."""
    N, H, W, Cin = x.shape
    Cout = w.shape[0]
    wt, bb = _conv3x3_weights(w, b)
    has_res = residual is not None
    TH = _pick_tile_h(H, W, Cin, Cout, has_res)
    nt = H // TH
    xb = x.astype(_BF16)

    in_specs = [
        # top halo row (clamped; masked to zero at t == 0 inside the kernel)
        pl.BlockSpec((1, 1, W, Cin),
                     lambda n, t: (n, jnp.maximum(t * TH - 1, 0), 0, 0)),
        # main TH rows
        pl.BlockSpec((1, TH, W, Cin), lambda n, t: (n, t, 0, 0)),
        # bottom halo row (clamped; masked at the last tile)
        pl.BlockSpec((1, 1, W, Cin),
                     lambda n, t: (n, jnp.minimum((t + 1) * TH, H - 1), 0, 0)),
        pl.BlockSpec((9, Cin, Cout), lambda n, t: (0, 0, 0)),
        pl.BlockSpec((1, Cout), lambda n, t: (0, 0)),
    ]
    args = [xb, xb, xb, wt, bb]
    if has_res:
        in_specs.append(pl.BlockSpec((1, TH, W, Cout), lambda n, t: (n, t, 0, 0)))
        args.append(residual.astype(_BF16))

    kern = functools.partial(_conv3x3_kernel, has_res=has_res)
    return pl.pallas_call(
        kern,
        grid=(N, nt),
        in_specs=in_specs,
        out_specs=pl.BlockSpec((1, TH, W, Cout), lambda n, t: (n, t, 0, 0)),
        out_shape=jax.ShapeDtypeStruct((N, H, W, Cout), out_dtype),
        compiler_params=_cparams(2),
    )(*args)


def conv3x3_upsample(x, w, b, *, out_dtype=_BF16):
    """Fused 2x nearest upsample + conv3x3.  x: (N, H, W, Cin)."""
    # TODO(synk): spatial tiling of the fused upsample-conv for large H*W.
    N, H, W, Cin = x.shape
    Cout = w.shape[0]
    wt, bb = _conv3x3_weights(w, b)
    return pl.pallas_call(
        _conv3x3_up_kernel,
        grid=(N,),
        in_specs=[pl.BlockSpec((1, H, W, Cin), lambda n: (n, 0, 0, 0)),
                  pl.BlockSpec((9, Cin, Cout), lambda n: (0, 0, 0)),
                  pl.BlockSpec((1, Cout), lambda n: (0, 0))],
        out_specs=pl.BlockSpec((1, 2 * H, 2 * W, Cout), lambda n: (n, 0, 0, 0)),
        out_shape=jax.ShapeDtypeStruct((N, 2 * H, 2 * W, Cout), out_dtype),
        compiler_params=_cparams(1),
    )(x.astype(_BF16), wt, bb)


def groupnorm(x, gamma, beta, *, apply_silu, num_groups=32, eps=1e-6,
              out_dtype=_BF16):
    """torch.nn.GroupNorm(32, C, eps=1e-6, affine=True), optionally fused SiLU."""
    # TODO(synk): spatially tile stats / fold the apply into the next conv.
    N, H, W, C = x.shape
    G = num_groups
    cg = C // G
    agg = np.kron(np.eye(G, dtype=np.float32), np.ones((cg, cg), np.float32))
    agg = jnp.asarray(agg / float(cg * H * W))
    g2 = gamma.reshape(1, C).astype(jnp.float32)
    b2 = beta.reshape(1, C).astype(jnp.float32)

    kern = functools.partial(_gn_kernel, eps=eps, apply_silu=apply_silu)
    return pl.pallas_call(
        kern,
        grid=(N,),
        in_specs=[pl.BlockSpec((1, H, W, C), lambda n: (n, 0, 0, 0)),
                  pl.BlockSpec((1, C), lambda n: (0, 0)),
                  pl.BlockSpec((1, C), lambda n: (0, 0)),
                  pl.BlockSpec((C, C), lambda n: (0, 0))],
        out_specs=pl.BlockSpec((1, H, W, C), lambda n: (n, 0, 0, 0)),
        out_shape=jax.ShapeDtypeStruct((N, H, W, C), out_dtype),
        compiler_params=_cparams(1),
    )(x.astype(_BF16), g2, b2, agg)


def attention(q, k, v, *, out_dtype=_BF16):
    """q/k/v: (N, S, C); the softmax scale is already folded into q."""
    # TODO(synk): flash-style KV tiling for S large enough that the (S,S) score
    #             matrix does not fit VMEM (v7x 64 MiB).
    N, S, C = q.shape
    spec = pl.BlockSpec((1, S, C), lambda n: (n, 0, 0))
    return pl.pallas_call(
        _attn_kernel,
        grid=(N,),
        in_specs=[spec, spec, spec],
        out_specs=spec,
        out_shape=jax.ShapeDtypeStruct((N, S, C), out_dtype),
        compiler_params=_cparams(1),
    )(q.astype(_BF16), k.astype(_BF16), v.astype(_BF16))


# ----------------------------------------------------------------------------
# Module-level forward functions (mirroring the PyTorch modules, NHWC)
# ----------------------------------------------------------------------------

def resnet_block(p, x):
    # temb_channels == 0 -> temb is None; Dropout(p, eval) is identity.
    h = groupnorm(x, p["norm1"]["gamma"], p["norm1"]["beta"], apply_silu=True)
    h = conv3x3(h, p["conv1"]["w"], p["conv1"]["b"])
    h = groupnorm(h, p["norm2"]["gamma"], p["norm2"]["beta"], apply_silu=True)
    shortcut = x
    if "nin_shortcut" in p:                       # in_channels != out_channels
        N, H, W, Cin = x.shape
        Cout = p["nin_shortcut"]["w"].shape[0]
        shortcut = conv1x1(x.reshape(N * H * W, Cin),
                           p["nin_shortcut"]["w"],
                           p["nin_shortcut"]["b"]).reshape(N, H, W, Cout)
    # residual add fused into conv2's epilogue
    return conv3x3(h, p["conv2"]["w"], p["conv2"]["b"], residual=shortcut)


def attn_block(p, x):
    N, H, W, C = x.shape
    S = H * W
    h = groupnorm(x, p["norm"]["gamma"], p["norm"]["beta"], apply_silu=False)
    hr = h.reshape(N * S, C)
    scale = float(C) ** (-0.5)
    # softmax scale folded into the q projection (weight + bias)
    q = conv1x1(hr, p["q"]["w"] * scale, p["q"]["b"] * scale).reshape(N, S, C)
    k = conv1x1(hr, p["k"]["w"], p["k"]["b"]).reshape(N, S, C)
    v = conv1x1(hr, p["v"]["w"], p["v"]["b"]).reshape(N, S, C)
    a = attention(q, k, v).reshape(N * S, C)
    # residual add fused into proj_out's epilogue
    out = conv1x1(a, p["proj_out"]["w"], p["proj_out"]["b"],
                  residual=x.reshape(N * S, C))
    return out.reshape(N, H, W, C)


def upsample(p, x):
    # torch: interpolate(2x nearest) then conv; nearest just copies values, so
    # doing the repeat in VMEM inside the conv kernel is exact (resamp_with_conv).
    return conv3x3_upsample(x, p["w"], p["b"])


def decoder_forward(params, z, *, cfg):
    # z: (N, C, H, W) like the torch module; convert to NHWC once and keep it.
    h = jnp.transpose(z, (0, 2, 3, 1)).astype(_BF16)
    h = conv3x3(h, params["conv_in"]["w"], params["conv_in"]["b"])
    h = resnet_block(params["mid"]["block_1"], h)
    h = attn_block(params["mid"]["attn_1"], h)
    h = resnet_block(params["mid"]["block_2"], h)
    num_resolutions = len(cfg["ch_mult"])
    for i_level in reversed(range(num_resolutions)):
        lvl = params["up"][i_level]
        for i_block in range(cfg["num_res_blocks"] + 1):
            h = resnet_block(lvl["block"][i_block], h)
            if len(lvl["attn"]) > 0:
                h = attn_block(lvl["attn"][i_block], h)
        if i_level != 0:
            h = upsample(lvl["upsample"], h)
    # give_pre_end=False
    h = groupnorm(h, params["norm_out"]["gamma"], params["norm_out"]["beta"],
                  apply_silu=True)
    h = conv3x3(h, params["conv_out"]["w"], params["conv_out"]["b"],
                out_dtype=jnp.float32)
    return jnp.transpose(h, (0, 3, 1, 2))         # back to NCHW


# ----------------------------------------------------------------------------
# Deterministic parameter construction (synthetic weights, torch layouts)
# ----------------------------------------------------------------------------

class ParamGen:
    def __init__(self, key):
        self.key = key

    def normal(self, shape, scale=0.05):
        self.key, sub = jax.random.split(self.key)
        return scale * jax.random.normal(sub, shape, jnp.float32)


def conv_p(gen, cin, cout, k):
    return {"w": gen.normal((cout, cin, k, k)), "b": gen.normal((cout,), 0.01)}


def gn_p(c):
    return {"gamma": jnp.ones((c,), jnp.float32),
            "beta": jnp.zeros((c,), jnp.float32)}


def resnet_p(gen, cin, cout):
    p = {"norm1": gn_p(cin), "conv1": conv_p(gen, cin, cout, 3),
         "norm2": gn_p(cout), "conv2": conv_p(gen, cout, cout, 3)}
    if cin != cout:
        p["nin_shortcut"] = conv_p(gen, cin, cout, 1)   # use_conv_shortcut=False
    return p


def attn_p(gen, c):
    return {"norm": gn_p(c),
            "q": conv_p(gen, c, c, 1), "k": conv_p(gen, c, c, 1),
            "v": conv_p(gen, c, c, 1), "proj_out": conv_p(gen, c, c, 1)}


def build_decoder_params(cfg, key):
    gen = ParamGen(key)
    ch, ch_mult = cfg["ch"], cfg["ch_mult"]
    num_resolutions = len(ch_mult)
    block_in = ch * ch_mult[num_resolutions - 1]
    curr_res = cfg["resolution"] // 2 ** (num_resolutions - 1)
    params = {"conv_in": conv_p(gen, cfg["decoder_in_channels"], block_in, 3)}
    params["mid"] = {"block_1": resnet_p(gen, block_in, block_in),
                     "attn_1": attn_p(gen, block_in),
                     "block_2": resnet_p(gen, block_in, block_in)}
    up = [None] * num_resolutions
    for i_level in reversed(range(num_resolutions)):
        block_out = ch * ch_mult[i_level]
        blocks, attns = [], []
        for _ in range(cfg["num_res_blocks"] + 1):
            blocks.append(resnet_p(gen, block_in, block_out))
            block_in = block_out
            if curr_res in cfg["attn_resolutions"]:
                attns.append(attn_p(gen, block_in))
        lvl = {"block": blocks, "attn": attns}
        if i_level != 0:
            lvl["upsample"] = conv_p(gen, block_in, block_in, 3)
            curr_res *= 2
        up[i_level] = lvl
    params["up"] = up
    params["norm_out"] = gn_p(block_in)
    params["conv_out"] = conv_p(gen, block_in, cfg["out_ch"], 3)
    return params


# ----------------------------------------------------------------------------
# Demo
# ----------------------------------------------------------------------------

CFG = dict(ch=32, out_ch=3, ch_mult=(1, 2), num_res_blocks=1,
           attn_resolutions=(4,), resolution=8, decoder_in_channels=16)

if __name__ == "__main__":
    key = jax.random.PRNGKey(0)
    pkey, zkey = jax.random.split(key)
    params = build_decoder_params(CFG, pkey)

    num_resolutions = len(CFG["ch_mult"])
    curr_res = CFG["resolution"] // 2 ** (num_resolutions - 1)    # = 4
    z = jax.random.normal(zkey, (2, CFG["decoder_in_channels"], curr_res, curr_res),
                          jnp.float32)                             # (2, 16, 4, 4)

    fwd = jax.jit(functools.partial(decoder_forward, cfg=CFG))
    out = fwd(params, z)
    jax.block_until_ready(out)
    assert out.shape == (2, CFG["out_ch"], CFG["resolution"], CFG["resolution"]), out.shape
    assert out.dtype == jnp.float32
    print("KERNEL_OK")
</pallas_src>

<mosaic_0001>
module attributes {stable_mosaic.version = 11 : i64} {
  func.func @_gn_kernel(%arg0: i32, %arg1: memref<1x4x4x64xbf16, #tpu.memory_space<vmem>>, %arg2: memref<1x64xf32, #tpu.memory_space<vmem>>, %arg3: memref<1x64xf32, #tpu.memory_space<vmem>>, %arg4: memref<64x64xf32, #tpu.memory_space<vmem>>, %arg5: memref<1x4x4x64xbf16, #tpu.memory_space<vmem>>) attributes {dimension_semantics = [#tpu.dimension_semantics<parallel>], iteration_bounds = array<i64: 2>, scalar_prefetch = 0 : i64, scratch_operands = 0 : i64, tpu.core_type = #tpu.core_type<tc>, window_params = [{transform_indices = @transform_0, window_bounds = array<i64: 1, 4, 4, 64>}, {pipeline_mode = #tpu.pipeline_mode<synchronous>, transform_indices = @transform_1, window_bounds = array<i64: 1, 64>}, {pipeline_mode = #tpu.pipeline_mode<synchronous>, transform_indices = @transform_2, window_bounds = array<i64: 1, 64>}, {pipeline_mode = #tpu.pipeline_mode<synchronous>, transform_indices = @transform_3, window_bounds = array<i64: 64, 64>}, {transform_indices = @transform_4, window_bounds = array<i64: 1, 4, 4, 64>}]} {
    %c0 = arith.constant 0 : index
    %c0_0 = arith.constant 0 : index
    %c0_1 = arith.constant 0 : index
    %c0_2 = arith.constant 0 : index
    %0 = vector.load %arg1[%c0, %c0_0, %c0_1, %c0_2] : memref<1x4x4x64xbf16, #tpu.memory_space<vmem>>, vector<1x4x4x64xbf16>
    %1 = vector.shape_cast %0 : vector<1x4x4x64xbf16> to vector<4x4x64xbf16>
    %2 = arith.extf %1 : vector<4x4x64xbf16> to vector<4x4x64xf32>
    %3 = vector.shape_cast %2 : vector<4x4x64xf32> to vector<16x64xf32>
    %cst = arith.constant dense<0.000000e+00> : vector<64xf32>
    %4 = vector.multi_reduction <add>, %3, %cst [0] : vector<16x64xf32> to vector<64xf32>
    %5 = vector.shape_cast %4 : vector<64xf32> to vector<1x64xf32>
    %6 = arith.mulf %3, %3 : vector<16x64xf32>
    %cst_3 = arith.constant dense<0.000000e+00> : vector<64xf32>
    %7 = vector.multi_reduction <add>, %6, %cst_3 [0] : vector<16x64xf32> to vector<64xf32>
    %8 = vector.shape_cast %7 : vector<64xf32> to vector<1x64xf32>
    %c0_4 = arith.constant 0 : index
    %c0_5 = arith.constant 0 : index
    %9 = vector.load %arg4[%c0_4, %c0_5] : memref<64x64xf32, #tpu.memory_space<vmem>>, vector<64x64xf32>
    %cst_6 = arith.constant dense<0.000000e+00> : vector<1x64xf32>
    %10 = tpu.matmul %5, %9, %cst_6 {dimension_numbers = #tpu.dot_dimension_numbers<[1], [0], [0], [1], [0, 0, 1, 1], [], []>} : vector<1x64xf32>, vector<64x64xf32>, vector<1x64xf32> -> vector<1x64xf32>
    %c0_7 = arith.constant 0 : index
    %c0_8 = arith.constant 0 : index
    %11 = vector.load %arg4[%c0_7, %c0_8] : memref<64x64xf32, #tpu.memory_space<vmem>>, vector<64x64xf32>
    %cst_9 = arith.constant dense<0.000000e+00> : vector<1x64xf32>
    %12 = tpu.matmul %8, %11, %cst_9 {dimension_numbers = #tpu.dot_dimension_numbers<[1], [0], [0], [1], [0, 0, 1, 1], [], []>} : vector<1x64xf32>, vector<64x64xf32>, vector<1x64xf32> -> vector<1x64xf32>
    %13 = arith.mulf %10, %10 : vector<1x64xf32>
    %14 = arith.subf %12, %13 : vector<1x64xf32>
    %cst_10 = arith.constant 9.99999997E-7 : f32
    %15 = vector.broadcast %cst_10 : f32 to vector<1x64xf32>
    %16 = arith.addf %14, %15 : vector<1x64xf32>
    %17 = math.rsqrt %16 : vector<1x64xf32>
    %18 = vector.broadcast %10 : vector<1x64xf32> to vector<16x64xf32>
    %19 = arith.subf %3, %18 : vector<16x64xf32>
    %c0_11 = arith.constant 0 : index
    %c0_12 = arith.constant 0 : index
    %20 = vector.load %arg2[%c0_11, %c0_12] : memref<1x64xf32, #tpu.memory_space<vmem>>, vector<1x64xf32>
    %21 = arith.mulf %17, %20 : vector<1x64xf32>
    %22 = vector.broadcast %21 : vector<1x64xf32> to vector<16x64xf32>
    %23 = arith.mulf %19, %22 : vector<16x64xf32>
    %c0_13 = arith.constant 0 : index
    %c0_14 = arith.constant 0 : index
    %24 = vector.load %arg3[%c0_13, %c0_14] : memref<1x64xf32, #tpu.memory_space<vmem>>, vector<1x64xf32>
    %25 = vector.broadcast %24 : vector<1x64xf32> to vector<16x64xf32>
    %26 = arith.addf %23, %25 : vector<16x64xf32>
    %cst_15 = arith.constant 0.000000e+00 : f32
    %27 = vector.broadcast %cst_15 : f32 to vector<16x64xf32>
    %28 = arith.subf %27, %26 : vector<16x64xf32>
    %29 = math.exp %28 : vector<16x64xf32>
    %cst_16 = arith.constant 1.000000e+00 : f32
    %30 = vector.broadcast %cst_16 : f32 to vector<16x64xf32>
    %31 = arith.addf %30, %29 : vector<16x64xf32>
    %32 = arith.divf %26, %31 : vector<16x64xf32>
    %33 = vector.shape_cast %32 : vector<16x64xf32> to vector<4x4x64xf32>
    %34 = arith.truncf %33 : vector<4x4x64xf32> to vector<4x4x64xbf16>
    %c0_17 = arith.constant 0 : index
    %c0_18 = arith.constant 0 : index
    %c0_19 = arith.constant 0 : index
    %c0_20 = arith.constant 0 : index
    %35 = vector.load %arg5[%c0_17, %c0_18, %c0_19, %c0_20] : memref<1x4x4x64xbf16, #tpu.memory_space<vmem>>, vector<1x4x4x64xbf16>
    %36 = vector.shape_cast %35 : vector<1x4x4x64xbf16> to vector<4x4x64xbf16>
    %37 = vector.shape_cast %34 : vector<4x4x64xbf16> to vector<1x4x4x64xbf16>
    tpu.vector_store %arg5[%c0_17, %c0_18, %c0_19, %c0_20], %37 {strides = array<i32>} : memref<1x4x4x64xbf16, #tpu.memory_space<vmem>>, vector<1x4x4x64xbf16>,
    return
  }
  func.func @transform_0(%arg0: i32) -> (i32, i32, i32, i32) {
    %c0_i32 = arith.constant 0 : i32
    %c0_i32_0 = arith.constant 0 : i32
    %c0_i32_1 = arith.constant 0 : i32
    %c0_i32_2 = arith.constant 0 : i32
    return %arg0, %c0_i32, %c0_i32_0, %c0_i32_1 : i32, i32, i32, i32
  }
  func.func @transform_1(%arg0: i32) -> (i32, i32) {
    %c0_i32 = arith.constant 0 : i32
    %c0_i32_0 = arith.constant 0 : i32
    %c0_i32_1 = arith.constant 0 : i32
    return %c0_i32, %c0_i32_0 : i32, i32
  }
  func.func @transform_2(%arg0: i32) -> (i32, i32) {
    %c0_i32 = arith.constant 0 : i32
    %c0_i32_0 = arith.constant 0 : i32
    %c0_i32_1 = arith.constant 0 : i32
    return %c0_i32, %c0_i32_0 : i32, i32
  }
  func.func @transform_3(%arg0: i32) -> (i32, i32) {
    %c0_i32 = arith.constant 0 : i32
    %c0_i32_0 = arith.constant 0 : i32
    %c0_i32_1 = arith.constant 0 : i32
    return %c0_i32, %c0_i32_0 : i32, i32
  }
  func.func @transform_4(%arg0: i32) -> (i32, i32, i32, i32) {
    %c0_i32 = arith.constant 0 : i32
    %c0_i32_0 = arith.constant 0 : i32
    %c0_i32_1 = arith.constant 0 : i32
    %c0_i32_2 = arith.constant 0 : i32
    return %arg0, %c0_i32, %c0_i32_0, %c0_i32_1 : i32, i32, i32, i32
  }
}

module attributes {stable_mosaic.version = 11 : i64} {
  func.func @_conv3x3_kernel(%arg0: i32, %arg1: i32, %arg2: memref<1x1x4x16xbf16, #tpu.memory_space<vmem>>, %arg3: memref<1x4x4x16xbf16, #tpu.memory_space<vmem>>, %arg4: memref<1x1x4x16xbf16, #tpu.memory_space<vmem>>, %arg5: memref<9x16x64xbf16, #tpu.memory_space<vmem>>, %arg6: memref<1x64xf32, #tpu.memory_space<vmem>>, %arg7: memref<1x4x4x64xbf16, #tpu.memory_space<vmem>>) attributes {dimension_semantics = [#tpu.dimension_semantics<parallel>, #tpu.dimension_semantics<parallel>], iteration_bounds = array<i64: 2, 1>, scalar_prefetch = 0 : i64, scratch_operands = 0 : i64, tpu.core_type = #tpu.core_type<tc>, window_params = [{transform_indices = @transform_0, window_bounds = array<i64: 1, 1, 4, 16>}, {transform_indices = @transform_1, window_bounds = array<i64: 1, 4, 4, 16>}, {transform_indices = @transform_2, window_bounds = array<i64: 1, 1, 4, 16>}, {pipeline_mode = #tpu.pipeline_mode<synchronous>, transform_indices = @transform_3, window_bounds = array<i64: 9, 16, 64>}, {pipeline_mode = #tpu.pipeline_mode<synchronous>, transform_indices = @transform_4, window_bounds = array<i64: 1, 64>}, {transform_indices = @transform_5, window_bounds = array<i64: 1, 4, 4, 64>}]} {
    %cst = arith.constant 0.000000e+00 : bf16
    %0 = vector.broadcast %cst : bf16 to vector<1x4x16xbf16>
    %c0_i32 = arith.constant 0 : i32
    %1 = arith.cmpi sgt, %arg1, %c0_i32 : i32
    %c0 = arith.constant 0 : index
    %c0_0 = arith.constant 0 : index
    %c0_1 = arith.constant 0 : index
    %c0_2 = arith.constant 0 : index
    %2 = vector.load %arg2[%c0, %c0_0, %c0_1, %c0_2] : memref<1x1x4x16xbf16, #tpu.memory_space<vmem>>, vector<1x1x4x16xbf16>
    %3 = vector.shape_cast %2 : vector<1x1x4x16xbf16> to vector<1x4x16xbf16>
    %4 = arith.select %1, %3, %0 : vector<1x4x16xbf16>
    %c0_i32_3 = arith.constant 0 : i32
    %5 = arith.cmpi slt, %arg1, %c0_i32_3 : i32
    %c0_4 = arith.constant 0 : index
    %c0_5 = arith.constant 0 : index
    %c0_6 = arith.constant 0 : index
    %c0_7 = arith.constant 0 : index
    %6 = vector.load %arg4[%c0_4, %c0_5, %c0_6, %c0_7] : memref<1x1x4x16xbf16, #tpu.memory_space<vmem>>, vector<1x1x4x16xbf16>
    %7 = vector.shape_cast %6 : vector<1x1x4x16xbf16> to vector<1x4x16xbf16>
    %8 = arith.select %5, %7, %0 : vector<1x4x16xbf16>
    %c0_8 = arith.constant 0 : index
    %c0_9 = arith.constant 0 : index
    %c0_10 = arith.constant 0 : index
    %c0_11 = arith.constant 0 : index
    %9 = vector.load %arg3[%c0_8, %c0_9, %c0_10, %c0_11] : memref<1x4x4x16xbf16, #tpu.memory_space<vmem>>, vector<1x4x4x16xbf16>
    %10 = vector.shape_cast %9 : vector<1x4x4x16xbf16> to vector<4x4x16xbf16>
    %11 = tpu.concatenate %4, %10, %8 in 0 : vector<1x4x16xbf16>, vector<4x4x16xbf16>, vector<1x4x16xbf16> -> vector<6x4x16xbf16>
    %cst_12 = arith.constant 0.000000e+00 : bf16
    %12 = vector.broadcast %cst_12 : bf16 to vector<6x1x16xbf16>
    %cst_13 = arith.constant 0.000000e+00 : f32
    %13 = vector.broadcast %cst_13 : f32 to vector<16x64xf32>
    %14 = vector.extract_strided_slice %11 {offsets = [0, 0, 0], sizes = [6, 3, 16], strides = [1, 1, 1]} : vector<6x4x16xbf16> to vector<6x3x16xbf16>
    %15 = tpu.concatenate %12, %14 in 1 : vector<6x1x16xbf16>, vector<6x3x16xbf16> -> vector<6x4x16xbf16>
    %16 = vector.shape_cast %15 : vector<6x4x16xbf16> to vector<24x16xbf16>
    %17 = vector.extract_strided_slice %16 {offsets = [0, 0], sizes = [16, 16], strides = [1, 1]} : vector<24x16xbf16> to vector<16x16xbf16>
    %c0_14 = arith.constant 0 : index
    %c0_15 = arith.constant 0 : index
    %c0_16 = arith.constant 0 : index
    %18 = vector.load %arg5[%c0_14, %c0_15, %c0_16] : memref<9x16x64xbf16, #tpu.memory_space<vmem>>, vector<1x16x64xbf16>
    %19 = vector.shape_cast %18 : vector<1x16x64xbf16> to vector<16x64xbf16>
    %cst_17 = arith.constant dense<0.000000e+00> : vector<16x64xf32>
    %20 = tpu.matmul %17, %19, %cst_17 {dimension_numbers = #tpu.dot_dimension_numbers<[1], [0], [0], [1], [0, 0, 1, 1], [], []>} : vector<16x16xbf16>, vector<16x64xbf16>, vector<16x64xf32> -> vector<16x64xf32>
    %21 = arith.addf %13, %20 : vector<16x64xf32>
    %22 = vector.extract_strided_slice %16 {offsets = [4, 0], sizes = [16, 16], strides = [1, 1]} : vector<24x16xbf16> to vector<16x16xbf16>
    %c3 = arith.constant 3 : index
    %c0_18 = arith.constant 0 : index
    %c0_19 = arith.constant 0 : index
    %23 = vector.load %arg5[%c3, %c0_18, %c0_19] : memref<9x16x64xbf16, #tpu.memory_space<vmem>>, vector<1x16x64xbf16>
    %24 = vector.shape_cast %23 : vector<1x16x64xbf16> to vector<16x64xbf16>
    %cst_20 = arith.constant dense<0.000000e+00> : vector<16x64xf32>
    %25 = tpu.matmul %22, %24, %cst_20 {dimension_numbers = #tpu.dot_dimension_numbers<[1], [0], [0], [1], [0, 0, 1, 1], [], []>} : vector<16x16xbf16>, vector<16x64xbf16>, vector<16x64xf32> -> vector<16x64xf32>
    %26 = arith.addf %21, %25 : vector<16x64xf32>
    %27 = vector.extract_strided_slice %16 {offsets = [8, 0], sizes = [16, 16], strides = [1, 1]} : vector<24x16xbf16> to vector<16x16xbf16>
    %c6 = arith.constant 6 : index
    %c0_21 = arith.constant 0 : index
    %c0_22 = arith.constant 0 : index
    %28 = vector.load %arg5[%c6, %c0_21, %c0_22] : memref<9x16x64xbf16, #tpu.memory_space<vmem>>, vector<1x16x64xbf16>
    %29 = vector.shape_cast %28 : vector<1x16x64xbf16> to vector<16x64xbf16>
    %cst_23 = arith.constant dense<0.000000e+00> : vector<16x64xf32>
    %30 = tpu.matmul %27, %29, %cst_23 {dimension_numbers = #tpu.dot_dimension_numbers<[1], [0], [0], [1], [0, 0, 1, 1], [], []>} : vector<16x16xbf16>, vector<16x64xbf16>, vector<16x64xf32> -> vector<16x64xf32>
    %31 = arith.addf %26, %30 : vector<16x64xf32>
    %32 = vector.shape_cast %11 : vector<6x4x16xbf16> to vector<24x16xbf16>
    %33 = vector.extract_strided_slice %32 {offsets = [0, 0], sizes = [16, 16], strides = [1, 1]} : vector<24x16xbf16> to vector<16x16xbf16>
    %c1 = arith.constant 1 : index
    %c0_24 = arith.constant 0 : index
    %c0_25 = arith.constant 0 : index
    %34 = vector.load %arg5[%c1, %c0_24, %c0_25] : memref<9x16x64xbf16, #tpu.memory_space<vmem>>, vector<1x16x64xbf16>
    %35 = vector.shape_cast %34 : vector<1x16x64xbf16> to vector<16x64xbf16>
    %cst_26 = arith.constant dense<0.000000e+00> : vector<16x64xf32>
    %36 = tpu.matmul %33, %35, %cst_26 {dimension_numbers = #tpu.dot_dimension_numbers<[1], [0], [0], [1], [0, 0, 1, 1], [], []>} : vector<16x16xbf16>, vector<16x64xbf16>, vector<16x64xf32> -> vector<16x64xf32>
    %37 = arith.addf %31, %36 : vector<16x64xf32>
    %38 = vector.extract_strided_slice %32 {offsets = [4, 0], sizes = [16, 16], strides = [1, 1]} : vector<24x16xbf16> to vector<16x16xbf16>
    %c4 = arith.constant 4 : index
    %c0_27 = arith.constant 0 : index
    %c0_28 = arith.constant 0 : index
    %39 = vector.load %arg5[%c4, %c0_27, %c0_28] : memref<9x16x64xbf16, #tpu.memory_space<vmem>>, vector<1x16x64xbf16>
    %40 = vector.shape_cast %39 : vector<1x16x64xbf16> to vector<16x64xbf16>
    %cst_29 = arith.constant dense<0.000000e+00> : vector<16x64xf32>
    %41 = tpu.matmul %38, %40, %cst_29 {dimension_numbers = #tpu.dot_dimension_numbers<[1], [0], [0], [1], [0, 0, 1, 1], [], []>} : vector<16x16xbf16>, vector<16x64xbf16>, vector<16x64xf32> -> vector<16x64xf32>
    %42 = arith.addf %37, %41 : vector<16x64xf32>
    %43 = vector.extract_strided_slice %32 {offsets = [8, 0], sizes = [16, 16], strides = [1, 1]} : vector<24x16xbf16> to vector<16x16xbf16>
    %c7 = arith.constant 7 : index
    %c0_30 = arith.constant 0 : index
    %c0_31 = arith.constant 0 : index
    %44 = vector.load %arg5[%c7, %c0_30, %c0_31] : memref<9x16x64xbf16, #tpu.memory_space<vmem>>, vector<1x16x64xbf16>
    %45 = vector.shape_cast %44 : vector<1x16x64xbf16> to vector<16x64xbf16>
    %cst_32 = arith.constant dense<0.000000e+00> : vector<16x64xf32>
    %46 = tpu.matmul %43, %45, %cst_32 {dimension_numbers = #tpu.dot_dimension_numbers<[1], [0], [0], [1], [0, 0, 1, 1], [], []>} : vector<16x16xbf16>, vector<16x64xbf16>, vector<16x64xf32> -> vector<16x64xf32>
    %47 = arith.addf %42, %46 : vector<16x64xf32>
    %48 = vector.extract_strided_slice %11 {offsets = [0, 1, 0], sizes = [6, 3, 16], strides = [1, 1, 1]} : vector<6x4x16xbf16> to vector<6x3x16xbf16>
    %49 = tpu.concatenate %48, %12 in 1 : vector<6x3x16xbf16>, vector<6x1x16xbf16> -> vector<6x4x16xbf16>
    %50 = vector.shape_cast %49 : vector<6x4x16xbf16> to vector<24x16xbf16>
    %51 = vector.extract_strided_slice %50 {offsets = [0, 0], sizes = [16, 16], strides = [1, 1]} : vector<24x16xbf16> to vector<16x16xbf16>
    %c2 = arith.constant 2 : index
    %c0_33 = arith.constant 0 : index
    %c0_34 = arith.constant 0 : index
    %52 = vector.load %arg5[%c2, %c0_33, %c0_34] : memref<9x16x64xbf16, #tpu.memory_space<vmem>>, vector<1x16x64xbf16>
    %53 = vector.shape_cast %52 : vector<1x16x64xbf16> to vector<16x64xbf16>
    %cst_35 = arith.constant dense<0.000000e+00> : vector<16x64xf32>
    %54 = tpu.matmul %51, %53, %cst_35 {dimension_numbers = #tpu.dot_dimension_numbers<[1], [0], [0], [1], [0, 0, 1, 1], [], []>} : vector<16x16xbf16>, vector<16x64xbf16>, vector<16x64xf32> -> vector<16x64xf32>
    %55 = arith.addf %47, %54 : vector<16x64xf32>
    %56 = vector.extract_strided_slice %50 {offsets = [4, 0], sizes = [16, 16], strides = [1, 1]} : vector<24x16xbf16> to vector<16x16xbf16>
    %c5 = arith.constant 5 : index
    %c0_36 = arith.constant 0 : index
    %c0_37 = arith.constant 0 : index
    %57 = vector.load %arg5[%c5, %c0_36, %c0_37] : memref<9x16x64xbf16, #tpu.memory_space<vmem>>, vector<1x16x64xbf16>
    %58 = vector.shape_cast %57 : vector<1x16x64xbf16> to vector<16x64xbf16>
    %cst_38 = arith.constant dense<0.000000e+00> : vector<16x64xf32>
    %59 = tpu.matmul %56, %58, %cst_38 {dimension_numbers = #tpu.dot_dimension_numbers<[1], [0], [0], [1], [0, 0, 1, 1], [], []>} : vector<16x16xbf16>, vector<16x64xbf16>, vector<16x64xf32> -> vector<16x64xf32>
    %60 = arith.addf %55, %59 : vector<16x64xf32>
    %61 = vector.extract_strided_slice %50 {offsets = [8, 0], sizes = [16, 16], strides = [1, 1]} : vector<24x16xbf16> to vector<16x16xbf16>
    %c8 = arith.constant 8 : index
    %c0_39 = arith.constant 0 : index
    %c0_40 = arith.constant 0 : index
    %62 = vector.load %arg5[%c8, %c0_39, %c0_40] : memref<9x16x64xbf16, #tpu.memory_space<vmem>>, vector<1x16x64xbf16>
    %63 = vector.shape_cast %62 : vector<1x16x64xbf16> to vector<16x64xbf16>
    %cst_41 = arith.constant dense<0.000000e+00> : vector<16x64xf32>
    %64 = tpu.matmul %61, %63, %cst_41 {dimension_numbers = #tpu.dot_dimension_numbers<[1], [0], [0], [1], [0, 0, 1, 1], [], []>} : vector<16x16xbf16>, vector<16x64xbf16>, vector<16x64xf32> -> vector<16x64xf32>
    %65 = arith.addf %60, %64 : vector<16x64xf32>
    %c0_42 = arith.constant 0 : index
    %c0_43 = arith.constant 0 : index
    %66 = vector.load %arg6[%c0_42, %c0_43] : memref<1x64xf32, #tpu.memory_space<vmem>>, vector<1x64xf32>
    %67 = vector.broadcast %66 : vector<1x64xf32> to vector<16x64xf32>
    %68 = arith.addf %65, %67 : vector<16x64xf32>
    %69 = vector.shape_cast %68 : vector<16x64xf32> to vector<4x4x64xf32>
    %70 = arith.truncf %69 : vector<4x4x64xf32> to vector<4x4x64xbf16>
    %c0_44 = arith.constant 0 : index
    %c0_45 = arith.constant 0 : index
    %c0_46 = arith.constant 0 : index
    %c0_47 = arith.constant 0 : index
    %71 = vector.load %arg7[%c0_44, %c0_45, %c0_46, %c0_47] : memref<1x4x4x64xbf16, #tpu.memory_space<vmem>>, vector<1x4x4x64xbf16>
    %72 = vector.shape_cast %71 : vector<1x4x4x64xbf16> to vector<4x4x64xbf16>
    %73 = vector.shape_cast %70 : vector<4x4x64xbf16> to vector<1x4x4x64xbf16>
    tpu.vector_store %arg7[%c0_44, %c0_45, %c0_46, %c0_47], %73 {strides = array<i32>} : memref<1x4x4x64xbf16, #tpu.memory_space<vmem>>, vector<1x4x4x64xbf16>,
    return
  }
  func.func @transform_0(%arg0: i32, %arg1: i32) -> (i32, i32, i32, i32) {
    %c4_i32 = arith.constant 4 : i32
    %0 = arith.muli %arg1, %c4_i32 : i32
    %c1_i32 = arith.constant 1 : i32
    %1 = arith.subi %0, %c1_i32 : i32
    %c0_i32 = arith.constant 0 : i32
    %2 = arith.maxsi %1, %c0_i32 : i32
    %c0_i32_0 = arith.constant 0 : i32
    %c0_i32_1 = arith.constant 0 : i32
    %c0_i32_2 = arith.constant 0 : i32
    return %arg0, %2, %c0_i32_0, %c0_i32_1 : i32, i32, i32, i32
  }
  func.func @transform_1(%arg0: i32, %arg1: i32) -> (i32, i32, i32, i32) {
    %c0_i32 = arith.constant 0 : i32
    %c0_i32_0 = arith.constant 0 : i32
    %c0_i32_1 = arith.constant 0 : i32
    return %arg0, %arg1, %c0_i32, %c0_i32_0 : i32, i32, i32, i32
  }
  func.func @transform_2(%arg0: i32, %arg1: i32) -> (i32, i32, i32, i32) {
    %c1_i32 = arith.constant 1 : i32
    %0 = arith.addi %arg1, %c1_i32 : i32
    %c4_i32 = arith.constant 4 : i32
    %1 = arith.muli %0, %c4_i32 : i32
    %c3_i32 = arith.constant 3 : i32
    %2 = arith.minsi %1, %c3_i32 : i32
    %c0_i32 = arith.constant 0 : i32
    %c0_i32_0 = arith.constant 0 : i32
    %c0_i32_1 = arith.constant 0 : i32
    return %arg0, %2, %c0_i32, %c0_i32_0 : i32, i32, i32, i32
  }
  func.func @transform_3(%arg0: i32, %arg1: i32) -> (i32, i32, i32) {
    %c0_i32 = arith.constant 0 : i32
    %c0_i32_0 = arith.constant 0 : i32
    %c0_i32_1 = arith.constant 0 : i32
    %c0_i32_2 = arith.constant 0 : i32
    return %c0_i32, %c0_i32_0, %c0_i32_1 : i32, i32, i32
  }
  func.func @transform_4(%arg0: i32, %arg1: i32) -> (i32, i32) {
    %c0_i32 = arith.constant 0 : i32
    %c0_i32_0 = arith.constant 0 : i32
    %c0_i32_1 = arith.constant 0 : i32
    return %c0_i32, %c0_i32_0 : i32, i32
  }
  func.func @transform_5(%arg0: i32, %arg1: i32) -> (i32, i32, i32, i32) {
    %c0_i32 = arith.constant 0 : i32
    %c0_i32_0 = arith.constant 0 : i32
    %c0_i32_1 = arith.constant 0 : i32
    return %arg0, %arg1, %c0_i32, %c0_i32_0 : i32, i32, i32, i32
  }
}

module attributes {stable_mosaic.version = 11 : i64} {
  func.func @_conv3x3_kernel(%arg0: i32, %arg1: i32, %arg2: memref<1x1x4x64xbf16, #tpu.memory_space<vmem>>, %arg3: memref<1x4x4x64xbf16, #tpu.memory_space<vmem>>, %arg4: memref<1x1x4x64xbf16, #tpu.memory_space<vmem>>, %arg5: memref<9x64x64xbf16, #tpu.memory_space<vmem>>, %arg6: memref<1x64xf32, #tpu.memory_space<vmem>>, %arg7: memref<1x4x4x64xbf16, #tpu.memory_space<vmem>>) attributes {dimension_semantics = [#tpu.dimension_semantics<parallel>, #tpu.dimension_semantics<parallel>], iteration_bounds = array<i64: 2, 1>, scalar_prefetch = 0 : i64, scratch_operands = 0 : i64, tpu.core_type = #tpu.core_type<tc>, window_params = [{transform_indices = @transform_0, window_bounds = array<i64: 1, 1, 4, 64>}, {transform_indices = @transform_1, window_bounds = array<i64: 1, 4, 4, 64>}, {transform_indices = @transform_2, window_bounds = array<i64: 1, 1, 4, 64>}, {pipeline_mode = #tpu.pipeline_mode<synchronous>, transform_indices = @transform_3, window_bounds = array<i64: 9, 64, 64>}, {pipeline_mode = #tpu.pipeline_mode<synchronous>, transform_indices = @transform_4, window_bounds = array<i64: 1, 64>}, {transform_indices = @transform_5, window_bounds = array<i64: 1, 4, 4, 64>}]} {
    %cst = arith.constant 0.000000e+00 : bf16
    %0 = vector.broadcast %cst : bf16 to vector<1x4x64xbf16>
    %c0_i32 = arith.constant 0 : i32
    %1 = arith.cmpi sgt, %arg1, %c0_i32 : i32
    %c0 = arith.constant 0 : index
    %c0_0 = arith.constant 0 : index
    %c0_1 = arith.constant 0 : index
    %c0_2 = arith.constant 0 : index
    %2 = vector.load %arg2[%c0, %c0_0, %c0_1, %c0_2] : memref<1x1x4x64xbf16, #tpu.memory_space<vmem>>, vector<1x1x4x64xbf16>
    %3 = vector.shape_cast %2 : vector<1x1x4x64xbf16> to vector<1x4x64xbf16>
    %4 = arith.select %1, %3, %0 : vector<1x4x64xbf16>
    %c0_i32_3 = arith.constant 0 : i32
    %5 = arith.cmpi slt, %arg1, %c0_i32_3 : i32
    %c0_4 = arith.constant 0 : index
    %c0_5 = arith.constant 0 : index
    %c0_6 = arith.constant 0 : index
    %c0_7 = arith.constant 0 : index
    %6 = vector.load %arg4[%c0_4, %c0_5, %c0_6, %c0_7] : memref<1x1x4x64xbf16, #tpu.memory_space<vmem>>, vector<1x1x4x64xbf16>
    %7 = vector.shape_cast %6 : vector<1x1x4x64xbf16> to vector<1x4x64xbf16>
    %8 = arith.select %5, %7, %0 : vector<1x4x64xbf16>
    %c0_8 = arith.constant 0 : index
    %c0_9 = arith.constant 0 : index
    %c0_10 = arith.constant 0 : index
    %c0_11 = arith.constant 0 : index
    %9 = vector.load %arg3[%c0_8, %c0_9, %c0_10, %c0_11] : memref<1x4x4x64xbf16, #tpu.memory_space<vmem>>, vector<1x4x4x64xbf16>
    %10 = vector.shape_cast %9 : vector<1x4x4x64xbf16> to vector<4x4x64xbf16>
    %11 = tpu.concatenate %4, %10, %8 in 0 : vector<1x4x64xbf16>, vector<4x4x64xbf16>, vector<1x4x64xbf16> -> vector<6x4x64xbf16>
    %cst_12 = arith.constant 0.000000e+00 : bf16
    %12 = vector.broadcast %cst_12 : bf16 to vector<6x1x64xbf16>
    %cst_13 = arith.constant 0.000000e+00 : f32
    %13 = vector.broadcast %cst_13 : f32 to vector<16x64xf32>
    %14 = vector.extract_strided_slice %11 {offsets = [0, 0, 0], sizes = [6, 3, 64], strides = [1, 1, 1]} : vector<6x4x64xbf16> to vector<6x3x64xbf16>
    %15 = tpu.concatenate %12, %14 in 1 : vector<6x1x64xbf16>, vector<6x3x64xbf16> -> vector<6x4x64xbf16>
    %16 = vector.shape_cast %15 : vector<6x4x64xbf16> to vector<24x64xbf16>
    %17 = vector.extract_strided_slice %16 {offsets = [0, 0], sizes = [16, 64], strides = [1, 1]} : vector<24x64xbf16> to vector<16x64xbf16>
    %c0_14 = arith.constant 0 : index
    %c0_15 = arith.constant 0 : index
    %c0_16 = arith.constant 0 : index
    %18 = vector.load %arg5[%c0_14, %c0_15, %c0_16] : memref<9x64x64xbf16, #tpu.memory_space<vmem>>, vector<1x64x64xbf16>
    %19 = vector.shape_cast %18 : vector<1x64x64xbf16> to vector<64x64xbf16>
    %cst_17 = arith.constant dense<0.000000e+00> : vector<16x64xf32>
    %20 = tpu.matmul %17, %19, %cst_17 {dimension_numbers = #tpu.dot_dimension_numbers<[1], [0], [0], [1], [0, 0, 1, 1], [], []>} : vector<16x64xbf16>, vector<64x64xbf16>, vector<16x64xf32> -> vector<16x64xf32>
    %21 = arith.addf %13, %20 : vector<16x64xf32>
    %22 = vector.extract_strided_slice %16 {offsets = [4, 0], sizes = [16, 64], strides = [1, 1]} : vector<24x64xbf16> to vector<16x64xbf16>
    %c3 = arith.constant 3 : index
    %c0_18 = arith.constant 0 : index
    %c0_19 = arith.constant 0 : index
    %23 = vector.load %arg5[%c3, %c0_18, %c0_19] : memref<9x64x64xbf16, #tpu.memory_space<vmem>>, vector<1x64x64xbf16>
    %24 = vector.shape_cast %23 : vector<1x64x64xbf16> to vector<64x64xbf16>
    %cst_20 = arith.constant dense<0.000000e+00> : vector<16x64xf32>
    %25 = tpu.matmul %22, %24, %cst_20 {dimension_numbers = #tpu.dot_dimension_numbers<[1], [0], [0], [1], [0, 0, 1, 1], [], []>} : vector<16x64xbf16>, vector<64x64xbf16>, vector<16x64xf32> -> vector<16x64xf32>
    %26 = arith.addf %21, %25 : vector<16x64xf32>
    %27 = vector.extract_strided_slice %16 {offsets = [8, 0], sizes = [16, 64], strides = [1, 1]} : vector<24x64xbf16> to vector<16x64xbf16>
    %c6 = arith.constant 6 : index
    %c0_21 = arith.constant 0 : index
    %c0_22 = arith.constant 0 : index
    %28 = vector.load %arg5[%c6, %c0_21, %c0_22] : memref<9x64x64xbf16, #tpu.memory_space<vmem>>, vector<1x64x64xbf16>
    %29 = vector.shape_cast %28 : vector<1x64x64xbf16> to vector<64x64xbf16>
    %cst_23 = arith.constant dense<0.000000e+00> : vector<16x64xf32>
    %30 = tpu.matmul %27, %29, %cst_23 {dimension_numbers = #tpu.dot_dimension_numbers<[1], [0], [0], [1], [0, 0, 1, 1], [], []>} : vector<16x64xbf16>, vector<64x64xbf16>, vector<16x64xf32> -> vector<16x64xf32>
    %31 = arith.addf %26, %30 : vector<16x64xf32>
    %32 = vector.shape_cast %11 : vector<6x4x64xbf16> to vector<24x64xbf16>
    %33 = vector.extract_strided_slice %32 {offsets = [0, 0], sizes = [16, 64], strides = [1, 1]} : vector<24x64xbf16> to vector<16x64xbf16>
    %c1 = arith.constant 1 : index
    %c0_24 = arith.constant 0 : index
    %c0_25 = arith.constant 0 : index
    %34 = vector.load %arg5[%c1, %c0_24, %c0_25] : memref<9x64x64xbf16, #tpu.memory_space<vmem>>, vector<1x64x64xbf16>
    %35 = vector.shape_cast %34 : vector<1x64x64xbf16> to vector<64x64xbf16>
    %cst_26 = arith.constant dense<0.000000e+00> : vector<16x64xf32>
    %36 = tpu.matmul %33, %35, %cst_26 {dimension_numbers = #tpu.dot_dimension_numbers<[1], [0], [0], [1], [0, 0, 1, 1], [], []>} : vector<16x64xbf16>, vector<64x64xbf16>, vector<16x64xf32> -> vector<16x64xf32>
    %37 = arith.addf %31, %36 : vector<16x64xf32>
    %38 = vector.extract_strided_slice %32 {offsets = [4, 0], sizes = [16, 64], strides = [1, 1]} : vector<24x64xbf16> to vector<16x64xbf16>
    %c4 = arith.constant 4 : index
    %c0_27 = arith.constant 0 : index
    %c0_28 = arith.constant 0 : index
    %39 = vector.load %arg5[%c4, %c0_27, %c0_28] : memref<9x64x64xbf16, #tpu.memory_space<vmem>>, vector<1x64x64xbf16>
    %40 = vector.shape_cast %39 : vector<1x64x64xbf16> to vector<64x64xbf16>
    %cst_29 = arith.constant dense<0.000000e+00> : vector<16x64xf32>
    %41 = tpu.matmul %38, %40, %cst_29 {dimension_numbers = #tpu.dot_dimension_numbers<[1], [0], [0], [1], [0, 0, 1, 1], [], []>} : vector<16x64xbf16>, vector<64x64xbf16>, vector<16x64xf32> -> vector<16x64xf32>
    %42 = arith.addf %37, %41 : vector<16x64xf32>
    %43 = vector.extract_strided_slice %32 {offsets = [8, 0], sizes = [16, 64], strides = [1, 1]} : vector<24x64xbf16> to vector<16x64xbf16>
    %c7 = arith.constant 7 : index
    %c0_30 = arith.constant 0 : index
    %c0_31 = arith.constant 0 : index
    %44 = vector.load %arg5[%c7, %c0_30, %c0_31] : memref<9x64x64xbf16, #tpu.memory_space<vmem>>, vector<1x64x64xbf16>
    %45 = vector.shape_cast %44 : vector<1x64x64xbf16> to vector<64x64xbf16>
    %cst_32 = arith.constant dense<0.000000e+00> : vector<16x64xf32>
    %46 = tpu.matmul %43, %45, %cst_32 {dimension_numbers = #tpu.dot_dimension_numbers<[1], [0], [0], [1], [0, 0, 1, 1], [], []>} : vector<16x64xbf16>, vector<64x64xbf16>, vector<16x64xf32> -> vector<16x64xf32>
    %47 = arith.addf %42, %46 : vector<16x64xf32>
    %48 = vector.extract_strided_slice %11 {offsets = [0, 1, 0], sizes = [6, 3, 64], strides = [1, 1, 1]} : vector<6x4x64xbf16> to vector<6x3x64xbf16>
    %49 = tpu.concatenate %48, %12 in 1 : vector<6x3x64xbf16>, vector<6x1x64xbf16> -> vector<6x4x64xbf16>
    %50 = vector.shape_cast %49 : vector<6x4x64xbf16> to vector<24x64xbf16>
    %51 = vector.extract_strided_slice %50 {offsets = [0, 0], sizes = [16, 64], strides = [1, 1]} : vector<24x64xbf16> to vector<16x64xbf16>
    %c2 = arith.constant 2 : index
    %c0_33 = arith.constant 0 : index
    %c0_34 = arith.constant 0 : index
    %52 = vector.load %arg5[%c2, %c0_33, %c0_34] : memref<9x64x64xbf16, #tpu.memory_space<vmem>>, vector<1x64x64xbf16>
    %53 = vector.shape_cast %52 : vector<1x64x64xbf16> to vector<64x64xbf16>
    %cst_35 = arith.constant dense<0.000000e+00> : vector<16x64xf32>
    %54 = tpu.matmul %51, %53, %cst_35 {dimension_numbers = #tpu.dot_dimension_numbers<[1], [0], [0], [1], [0, 0, 1, 1], [], []>} : vector<16x64xbf16>, vector<64x64xbf16>, vector<16x64xf32> -> vector<16x64xf32>
    %55 = arith.addf %47, %54 : vector<16x64xf32>
    %56 = vector.extract_strided_slice %50 {offsets = [4, 0], sizes = [16, 64], strides = [1, 1]} : vector<24x64xbf16> to vector<16x64xbf16>
    %c5 = arith.constant 5 : index
    %c0_36 = arith.constant 0 : index
    %c0_37 = arith.constant 0 : index
    %57 = vector.load %arg5[%c5, %c0_36, %c0_37] : memref<9x64x64xbf16, #tpu.memory_space<vmem>>, vector<1x64x64xbf16>
    %58 = vector.shape_cast %57 : vector<1x64x64xbf16> to vector<64x64xbf16>
    %cst_38 = arith.constant dense<0.000000e+00> : vector<16x64xf32>
    %59 = tpu.matmul %56, %58, %cst_38 {dimension_numbers = #tpu.dot_dimension_numbers<[1], [0], [0], [1], [0, 0, 1, 1], [], []>} : vector<16x64xbf16>, vector<64x64xbf16>, vector<16x64xf32> -> vector<16x64xf32>
    %60 = arith.addf %55, %59 : vector<16x64xf32>
    %61 = vector.extract_strided_slice %50 {offsets = [8, 0], sizes = [16, 64], strides = [1, 1]} : vector<24x64xbf16> to vector<16x64xbf16>
    %c8 = arith.constant 8 : index
    %c0_39 = arith.constant 0 : index
    %c0_40 = arith.constant 0 : index
    %62 = vector.load %arg5[%c8, %c0_39, %c0_40] : memref<9x64x64xbf16, #tpu.memory_space<vmem>>, vector<1x64x64xbf16>
    %63 = vector.shape_cast %62 : vector<1x64x64xbf16> to vector<64x64xbf16>
    %cst_41 = arith.constant dense<0.000000e+00> : vector<16x64xf32>
    %64 = tpu.matmul %61, %63, %cst_41 {dimension_numbers = #tpu.dot_dimension_numbers<[1], [0], [0], [1], [0, 0, 1, 1], [], []>} : vector<16x64xbf16>, vector<64x64xbf16>, vector<16x64xf32> -> vector<16x64xf32>
    %65 = arith.addf %60, %64 : vector<16x64xf32>
    %c0_42 = arith.constant 0 : index
    %c0_43 = arith.constant 0 : index
    %66 = vector.load %arg6[%c0_42, %c0_43] : memref<1x64xf32, #tpu.memory_space<vmem>>, vector<1x64xf32>
    %67 = vector.broadcast %66 : vector<1x64xf32> to vector<16x64xf32>
    %68 = arith.addf %65, %67 : vector<16x64xf32>
    %69 = vector.shape_cast %68 : vector<16x64xf32> to vector<4x4x64xf32>
    %70 = arith.truncf %69 : vector<4x4x64xf32> to vector<4x4x64xbf16>
    %c0_44 = arith.constant 0 : index
    %c0_45 = arith.constant 0 : index
    %c0_46 = arith.constant 0 : index
    %c0_47 = arith.constant 0 : index
    %71 = vector.load %arg7[%c0_44, %c0_45, %c0_46, %c0_47] : memref<1x4x4x64xbf16, #tpu.memory_space<vmem>>, vector<1x4x4x64xbf16>
    %72 = vector.shape_cast %71 : vector<1x4x4x64xbf16> to vector<4x4x64xbf16>
    %73 = vector.shape_cast %70 : vector<4x4x64xbf16> to vector<1x4x4x64xbf16>
    tpu.vector_store %arg7[%c0_44, %c0_45, %c0_46, %c0_47], %73 {strides = array<i32>} : memref<1x4x4x64xbf16, #tpu.memory_space<vmem>>, vector<1x4x4x64xbf16>,
    return
  }
  func.func @transform_0(%arg0: i32, %arg1: i32) -> (i32, i32, i32, i32) {
    %c4_i32 = arith.constant 4 : i32
    %0 = arith.muli %arg1, %c4_i32 : i32
    %c1_i32 = arith.constant 1 : i32
    %1 = arith.subi %0, %c1_i32 : i32
    %c0_i32 = arith.constant 0 : i32
    %2 = arith.maxsi %1, %c0_i32 : i32
    %c0_i32_0 = arith.constant 0 : i32
    %c0_i32_1 = arith.constant 0 : i32
    %c0_i32_2 = arith.constant 0 : i32
    return %arg0, %2, %c0_i32_0, %c0_i32_1 : i32, i32, i32, i32
  }
  func.func @transform_1(%arg0: i32, %arg1: i32) -> (i32, i32, i32, i32) {
    %c0_i32 = arith.constant 0 : i32
    %c0_i32_0 = arith.constant 0 : i32
    %c0_i32_1 = arith.constant 0 : i32
    return %arg0, %arg1, %c0_i32, %c0_i32_0 : i32, i32, i32, i32
  }
  func.func @transform_2(%arg0: i32, %arg1: i32) -> (i32, i32, i32, i32) {
    %c1_i32 = arith.constant 1 : i32
    %0 = arith.addi %arg1, %c1_i32 : i32
    %c4_i32 = arith.constant 4 : i32
    %1 = arith.muli %0, %c4_i32 : i32
    %c3_i32 = arith.constant 3 : i32
    %2 = arith.minsi %1, %c3_i32 : i32
    %c0_i32 = arith.constant 0 : i32
    %c0_i32_0 = arith.constant 0 : i32
    %c0_i32_1 = arith.constant 0 : i32
    return %arg0, %2, %c0_i32, %c0_i32_0 : i32, i32, i32, i32
  }
  func.func @transform_3(%arg0: i32, %arg1: i32) -> (i32, i32, i32) {
    %c0_i32 = arith.constant 0 : i32
    %c0_i32_0 = arith.constant 0 : i32
    %c0_i32_1 = arith.constant 0 : i32
    %c0_i32_2 = arith.constant 0 : i32
    return %c0_i32, %c0_i32_0, %c0_i32_1 : i32, i32, i32
  }
  func.func @transform_4(%arg0: i32, %arg1: i32) -> (i32, i32) {
    %c0_i32 = arith.constant 0 : i32
    %c0_i32_0 = arith.constant 0 : i32
    %c0_i32_1 = arith.constant 0 : i32
    return %c0_i32, %c0_i32_0 : i32, i32
  }
  func.func @transform_5(%arg0: i32, %arg1: i32) -> (i32, i32, i32, i32) {
    %c0_i32 = arith.constant 0 : i32
    %c0_i32_0 = arith.constant 0 : i32
    %c0_i32_1 = arith.constant 0 : i32
    return %arg0, %arg1, %c0_i32, %c0_i32_0 : i32, i32, i32, i32
  }
}

module attributes {stable_mosaic.version = 11 : i64} {
  func.func @_conv3x3_kernel(%arg0: i32, %arg1: i32, %arg2: memref<1x1x4x64xbf16, #tpu.memory_space<vmem>>, %arg3: memref<1x4x4x64xbf16, #tpu.memory_space<vmem>>, %arg4: memref<1x1x4x64xbf16, #tpu.memory_space<vmem>>, %arg5: memref<9x64x64xbf16, #tpu.memory_space<vmem>>, %arg6: memref<1x64xf32, #tpu.memory_space<vmem>>, %arg7: memref<1x4x4x64xbf16, #tpu.memory_space<vmem>>, %arg8: memref<1x4x4x64xbf16, #tpu.memory_space<vmem>>) attributes {dimension_semantics = [#tpu.dimension_semantics<parallel>, #tpu.dimension_semantics<parallel>], iteration_bounds = array<i64: 2, 1>, scalar_prefetch = 0 : i64, scratch_operands = 0 : i64, tpu.core_type = #tpu.core_type<tc>, window_params = [{transform_indices = @transform_0, window_bounds = array<i64: 1, 1, 4, 64>}, {transform_indices = @transform_1, window_bounds = array<i64: 1, 4, 4, 64>}, {transform_indices = @transform_2, window_bounds = array<i64: 1, 1, 4, 64>}, {pipeline_mode = #tpu.pipeline_mode<synchronous>, transform_indices = @transform_3, window_bounds = array<i64: 9, 64, 64>}, {pipeline_mode = #tpu.pipeline_mode<synchronous>, transform_indices = @transform_4, window_bounds = array<i64: 1, 64>}, {transform_indices = @transform_5, window_bounds = array<i64: 1, 4, 4, 64>}, {transform_indices = @transform_6, window_bounds = array<i64: 1, 4, 4, 64>}]} {
    %cst = arith.constant 0.000000e+00 : bf16
    %0 = vector.broadcast %cst : bf16 to vector<1x4x64xbf16>
    %c0_i32 = arith.constant 0 : i32
    %1 = arith.cmpi sgt, %arg1, %c0_i32 : i32
    %c0 = arith.constant 0 : index
    %c0_0 = arith.constant 0 : index
    %c0_1 = arith.constant 0 : index
    %c0_2 = arith.constant 0 : index
    %2 = vector.load %arg2[%c0, %c0_0, %c0_1, %c0_2] : memref<1x1x4x64xbf16, #tpu.memory_space<vmem>>, vector<1x1x4x64xbf16>
    %3 = vector.shape_cast %2 : vector<1x1x4x64xbf16> to vector<1x4x64xbf16>
    %4 = arith.select %1, %3, %0 : vector<1x4x64xbf16>
    %c0_i32_3 = arith.constant 0 : i32
    %5 = arith.cmpi slt, %arg1, %c0_i32_3 : i32
    %c0_4 = arith.constant 0 : index
    %c0_5 = arith.constant 0 : index
    %c0_6 = arith.constant 0 : index
    %c0_7 = arith.constant 0 : index
    %6 = vector.load %arg4[%c0_4, %c0_5, %c0_6, %c0_7] : memref<1x1x4x64xbf16, #tpu.memory_space<vmem>>, vector<1x1x4x64xbf16>
    %7 = vector.shape_cast %6 : vector<1x1x4x64xbf16> to vector<1x4x64xbf16>
    %8 = arith.select %5, %7, %0 : vector<1x4x64xbf16>
    %c0_8 = arith.constant 0 : index
    %c0_9 = arith.constant 0 : index
    %c0_10 = arith.constant 0 : index
    %c0_11 = arith.constant 0 : index
    %9 = vector.load %arg3[%c0_8, %c0_9, %c0_10, %c0_11] : memref<1x4x4x64xbf16, #tpu.memory_space<vmem>>, vector<1x4x4x64xbf16>
    %10 = vector.shape_cast %9 : vector<1x4x4x64xbf16> to vector<4x4x64xbf16>
    %11 = tpu.concatenate %4, %10, %8 in 0 : vector<1x4x64xbf16>, vector<4x4x64xbf16>, vector<1x4x64xbf16> -> vector<6x4x64xbf16>
    %cst_12 = arith.constant 0.000000e+00 : bf16
    %12 = vector.broadcast %cst_12 : bf16 to vector<6x1x64xbf16>
    %cst_13 = arith.constant 0.000000e+00 : f32
    %13 = vector.broadcast %cst_13 : f32 to vector<16x64xf32>
    %14 = vector.extract_strided_slice %11 {offsets = [0, 0, 0], sizes = [6, 3, 64], strides = [1, 1, 1]} : vector<6x4x64xbf16> to vector<6x3x64xbf16>
    %15 = tpu.concatenate %12, %14 in 1 : vector<6x1x64xbf16>, vector<6x3x64xbf16> -> vector<6x4x64xbf16>
    %16 = vector.shape_cast %15 : vector<6x4x64xbf16> to vector<24x64xbf16>
    %17 = vector.extract_strided_slice %16 {offsets = [0, 0], sizes = [16, 64], strides = [1, 1]} : vector<24x64xbf16> to vector<16x64xbf16>
    %c0_14 = arith.constant 0 : index
    %c0_15 = arith.constant 0 : index
    %c0_16 = arith.constant 0 : index
    %18 = vector.load %arg5[%c0_14, %c0_15, %c0_16] : memref<9x64x64xbf16, #tpu.memory_space<vmem>>, vector<1x64x64xbf16>
    %19 = vector.shape_cast %18 : vector<1x64x64xbf16> to vector<64x64xbf16>
    %cst_17 = arith.constant dense<0.000000e+00> : vector<16x64xf32>
    %20 = tpu.matmul %17, %19, %cst_17 {dimension_numbers = #tpu.dot_dimension_numbers<[1], [0], [0], [1], [0, 0, 1, 1], [], []>} : vector<16x64xbf16>, vector<64x64xbf16>, vector<16x64xf32> -> vector<16x64xf32>
    %21 = arith.addf %13, %20 : vector<16x64xf32>
    %22 = vector.extract_strided_slice %16 {offsets = [4, 0], sizes = [16, 64], strides = [1, 1]} : vector<24x64xbf16> to vector<16x64xbf16>
    %c3 = arith.constant 3 : index
    %c0_18 = arith.constant 0 : index
    %c0_19 = arith.constant 0 : index
    %23 = vector.load %arg5[%c3, %c0_18, %c0_19] : memref<9x64x64xbf16, #tpu.memory_space<vmem>>, vector<1x64x64xbf16>
    %24 = vector.shape_cast %23 : vector<1x64x64xbf16> to vector<64x64xbf16>
    %cst_20 = arith.constant dense<0.000000e+00> : vector<16x64xf32>
    %25 = tpu.matmul %22, %24, %cst_20 {dimension_numbers = #tpu.dot_dimension_numbers<[1], [0], [0], [1], [0, 0, 1, 1], [], []>} : vector<16x64xbf16>, vector<64x64xbf16>, vector<16x64xf32> -> vector<16x64xf32>
    %26 = arith.addf %21, %25 : vector<16x64xf32>
    %27 = vector.extract_strided_slice %16 {offsets = [8, 0], sizes = [16, 64], strides = [1, 1]} : vector<24x64xbf16> to vector<16x64xbf16>
    %c6 = arith.constant 6 : index
    %c0_21 = arith.constant 0 : index
    %c0_22 = arith.constant 0 : index
    %28 = vector.load %arg5[%c6, %c0_21, %c0_22] : memref<9x64x64xbf16, #tpu.memory_space<vmem>>, vector<1x64x64xbf16>
    %29 = vector.shape_cast %28 : vector<1x64x64xbf16> to vector<64x64xbf16>
    %cst_23 = arith.constant dense<0.000000e+00> : vector<16x64xf32>
    %30 = tpu.matmul %27, %29, %cst_23 {dimension_numbers = #tpu.dot_dimension_numbers<[1], [0], [0], [1], [0, 0, 1, 1], [], []>} : vector<16x64xbf16>, vector<64x64xbf16>, vector<16x64xf32> -> vector<16x64xf32>
    %31 = arith.addf %26, %30 : vector<16x64xf32>
    %32 = vector.shape_cast %11 : vector<6x4x64xbf16> to vector<24x64xbf16>
    %33 = vector.extract_strided_slice %32 {offsets = [0, 0], sizes = [16, 64], strides = [1, 1]} : vector<24x64xbf16> to vector<16x64xbf16>
    %c1 = arith.constant 1 : index
    %c0_24 = arith.constant 0 : index
    %c0_25 = arith.constant 0 : index
    %34 = vector.load %arg5[%c1, %c0_24, %c0_25] : memref<9x64x64xbf16, #tpu.memory_space<vmem>>, vector<1x64x64xbf16>
    %35 = vector.shape_cast %34 : vector<1x64x64xbf16> to vector<64x64xbf16>
    %cst_26 = arith.constant dense<0.000000e+00> : vector<16x64xf32>
    %36 = tpu.matmul %33, %35, %cst_26 {dimension_numbers = #tpu.dot_dimension_numbers<[1], [0], [0], [1], [0, 0, 1, 1], [], []>} : vector<16x64xbf16>, vector<64x64xbf16>, vector<16x64xf32> -> vector<16x64xf32>
    %37 = arith.addf %31, %36 : vector<16x64xf32>
    %38 = vector.extract_strided_slice %32 {offsets = [4, 0], sizes = [16, 64], strides = [1, 1]} : vector<24x64xbf16> to vector<16x64xbf16>
    %c4 = arith.constant 4 : index
    %c0_27 = arith.constant 0 : index
    %c0_28 = arith.constant 0 : index
    %39 = vector.load %arg5[%c4, %c0_27, %c0_28] : memref<9x64x64xbf16, #tpu.memory_space<vmem>>, vector<1x64x64xbf16>
    %40 = vector.shape_cast %39 : vector<1x64x64xbf16> to vector<64x64xbf16>
    %cst_29 = arith.constant dense<0.000000e+00> : vector<16x64xf32>
    %41 = tpu.matmul %38, %40, %cst_29 {dimension_numbers = #tpu.dot_dimension_numbers<[1], [0], [0], [1], [0, 0, 1, 1], [], []>} : vector<16x64xbf16>, vector<64x64xbf16>, vector<16x64xf32> -> vector<16x64xf32>
    %42 = arith.addf %37, %41 : vector<16x64xf32>
    %43 = vector.extract_strided_slice %32 {offsets = [8, 0], sizes = [16, 64], strides = [1, 1]} : vector<24x64xbf16> to vector<16x64xbf16>
    %c7 = arith.constant 7 : index
    %c0_30 = arith.constant 0 : index
    %c0_31 = arith.constant 0 : index
    %44 = vector.load %arg5[%c7, %c0_30, %c0_31] : memref<9x64x64xbf16, #tpu.memory_space<vmem>>, vector<1x64x64xbf16>
    %45 = vector.shape_cast %44 : vector<1x64x64xbf16> to vector<64x64xbf16>
    %cst_32 = arith.constant dense<0.000000e+00> : vector<16x64xf32>
    %46 = tpu.matmul %43, %45, %cst_32 {dimension_numbers = #tpu.dot_dimension_numbers<[1], [0], [0], [1], [0, 0, 1, 1], [], []>} : vector<16x64xbf16>, vector<64x64xbf16>, vector<16x64xf32> -> vector<16x64xf32>
    %47 = arith.addf %42, %46 : vector<16x64xf32>
    %48 = vector.extract_strided_slice %11 {offsets = [0, 1, 0], sizes = [6, 3, 64], strides = [1, 1, 1]} : vector<6x4x64xbf16> to vector<6x3x64xbf16>
    %49 = tpu.concatenate %48, %12 in 1 : vector<6x3x64xbf16>, vector<6x1x64xbf16> -> vector<6x4x64xbf16>
    %50 = vector.shape_cast %49 : vector<6x4x64xbf16> to vector<24x64xbf16>
    %51 = vector.extract_strided_slice %50 {offsets = [0, 0], sizes = [16, 64], strides = [1, 1]} : vector<24x64xbf16> to vector<16x64xbf16>
    %c2 = arith.constant 2 : index
    %c0_33 = arith.constant 0 : index
    %c0_34 = arith.constant 0 : index
    %52 = vector.load %arg5[%c2, %c0_33, %c0_34] : memref<9x64x64xbf16, #tpu.memory_space<vmem>>, vector<1x64x64xbf16>
    %53 = vector.shape_cast %52 : vector<1x64x64xbf16> to vector<64x64xbf16>
    %cst_35 = arith.constant dense<0.000000e+00> : vector<16x64xf32>
    %54 = tpu.matmul %51, %53, %cst_35 {dimension_numbers = #tpu.dot_dimension_numbers<[1], [0], [0], [1], [0, 0, 1, 1], [], []>} : vector<16x64xbf16>, vector<64x64xbf16>, vector<16x64xf32> -> vector<16x64xf32>
    %55 = arith.addf %47, %54 : vector<16x64xf32>
    %56 = vector.extract_strided_slice %50 {offsets = [4, 0], sizes = [16, 64], strides = [1, 1]} : vector<24x64xbf16> to vector<16x64xbf16>
    %c5 = arith.constant 5 : index
    %c0_36 = arith.constant 0 : index
    %c0_37 = arith.constant 0 : index
    %57 = vector.load %arg5[%c5, %c0_36, %c0_37] : memref<9x64x64xbf16, #tpu.memory_space<vmem>>, vector<1x64x64xbf16>
    %58 = vector.shape_cast %57 : vector<1x64x64xbf16> to vector<64x64xbf16>
    %cst_38 = arith.constant dense<0.000000e+00> : vector<16x64xf32>
    %59 = tpu.matmul %56, %58, %cst_38 {dimension_numbers = #tpu.dot_dimension_numbers<[1], [0], [0], [1], [0, 0, 1, 1], [], []>} : vector<16x64xbf16>, vector<64x64xbf16>, vector<16x64xf32> -> vector<16x64xf32>
    %60 = arith.addf %55, %59 : vector<16x64xf32>
    %61 = vector.extract_strided_slice %50 {offsets = [8, 0], sizes = [16, 64], strides = [1, 1]} : vector<24x64xbf16> to vector<16x64xbf16>
    %c8 = arith.constant 8 : index
    %c0_39 = arith.constant 0 : index
    %c0_40 = arith.constant 0 : index
    %62 = vector.load %arg5[%c8, %c0_39, %c0_40] : memref<9x64x64xbf16, #tpu.memory_space<vmem>>, vector<1x64x64xbf16>
    %63 = vector.shape_cast %62 : vector<1x64x64xbf16> to vector<64x64xbf16>
    %cst_41 = arith.constant dense<0.000000e+00> : vector<16x64xf32>
    %64 = tpu.matmul %61, %63, %cst_41 {dimension_numbers = #tpu.dot_dimension_numbers<[1], [0], [0], [1], [0, 0, 1, 1], [], []>} : vector<16x64xbf16>, vector<64x64xbf16>, vector<16x64xf32> -> vector<16x64xf32>
    %65 = arith.addf %60, %64 : vector<16x64xf32>
    %c0_42 = arith.constant 0 : index
    %c0_43 = arith.constant 0 : index
    %66 = vector.load %arg6[%c0_42, %c0_43] : memref<1x64xf32, #tpu.memory_space<vmem>>, vector<1x64xf32>
    %67 = vector.broadcast %66 : vector<1x64xf32> to vector<16x64xf32>
    %68 = arith.addf %65, %67 : vector<16x64xf32>
    %69 = vector.shape_cast %68 : vector<16x64xf32> to vector<4x4x64xf32>
    %c0_44 = arith.constant 0 : index
    %c0_45 = arith.constant 0 : index
    %c0_46 = arith.constant 0 : index
    %c0_47 = arith.constant 0 : index
    %70 = vector.load %arg7[%c0_44, %c0_45, %c0_46, %c0_47] : memref<1x4x4x64xbf16, #tpu.memory_space<vmem>>, vector<1x4x4x64xbf16>
    %71 = vector.shape_cast %70 : vector<1x4x4x64xbf16> to vector<4x4x64xbf16>
    %72 = arith.extf %71 : vector<4x4x64xbf16> to vector<4x4x64xf32>
    %73 = arith.addf %69, %72 : vector<4x4x64xf32>
    %74 = arith.truncf %73 : vector<4x4x64xf32> to vector<4x4x64xbf16>
    %c0_48 = arith.constant 0 : index
    %c0_49 = arith.constant 0 : index
    %c0_50 = arith.constant 0 : index
    %c0_51 = arith.constant 0 : index
    %75 = vector.load %arg8[%c0_48, %c0_49, %c0_50, %c0_51] : memref<1x4x4x64xbf16, #tpu.memory_space<vmem>>, vector<1x4x4x64xbf16>
    %76 = vector.shape_cast %75 : vector<1x4x4x64xbf16> to vector<4x4x64xbf16>
    %77 = vector.shape_cast %74 : vector<4x4x64xbf16> to vector<1x4x4x64xbf16>
    tpu.vector_store %arg8[%c0_48, %c0_49, %c0_50, %c0_51], %77 {strides = array<i32>} : memref<1x4x4x64xbf16, #tpu.memory_space<vmem>>, vector<1x4x4x64xbf16>,
    return
  }
  func.func @transform_0(%arg0: i32, %arg1: i32) -> (i32, i32, i32, i32) {
    %c4_i32 = arith.constant 4 : i32
    %0 = arith.muli %arg1, %c4_i32 : i32
    %c1_i32 = arith.constant 1 : i32
    %1 = arith.subi %0, %c1_i32 : i32
    %c0_i32 = arith.constant 0 : i32
    %2 = arith.maxsi %1, %c0_i32 : i32
    %c0_i32_0 = arith.constant 0 : i32
    %c0_i32_1 = arith.constant 0 : i32
    %c0_i32_2 = arith.constant 0 : i32
    return %arg0, %2, %c0_i32_0, %c0_i32_1 : i32, i32, i32, i32
  }
  func.func @transform_1(%arg0: i32, %arg1: i32) -> (i32, i32, i32, i32) {
    %c0_i32 = arith.constant 0 : i32
    %c0_i32_0 = arith.constant 0 : i32
    %c0_i32_1 = arith.constant 0 : i32
    return %arg0, %arg1, %c0_i32, %c0_i32_0 : i32, i32, i32, i32
  }
  func.func @transform_2(%arg0: i32, %arg1: i32) -> (i32, i32, i32, i32) {
    %c1_i32 = arith.constant 1 : i32
    %0 = arith.addi %arg1, %c1_i32 : i32
    %c4_i32 = arith.constant 4 : i32
    %1 = arith.muli %0, %c4_i32 : i32
    %c3_i32 = arith.constant 3 : i32
    %2 = arith.minsi %1, %c3_i32 : i32
    %c0_i32 = arith.constant 0 : i32
    %c0_i32_0 = arith.constant 0 : i32
    %c0_i32_1 = arith.constant 0 : i32
    return %arg0, %2, %c0_i32, %c0_i32_0 : i32, i32, i32, i32
  }
  func.func @transform_3(%arg0: i32, %arg1: i32) -> (i32, i32, i32) {
    %c0_i32 = arith.constant 0 : i32
    %c0_i32_0 = arith.constant 0 : i32
    %c0_i32_1 = arith.constant 0 : i32
    %c0_i32_2 = arith.constant 0 : i32
    return %c0_i32, %c0_i32_0, %c0_i32_1 : i32, i32, i32
  }
  func.func @transform_4(%arg0: i32, %arg1: i32) -> (i32, i32) {
    %c0_i32 = arith.constant 0 : i32
    %c0_i32_0 = arith.constant 0 : i32
    %c0_i32_1 = arith.constant 0 : i32
    return %c0_i32, %c0_i32_0 : i32, i32
  }
  func.func @transform_5(%arg0: i32, %arg1: i32) -> (i32, i32, i32, i32) {
    %c0_i32 = arith.constant 0 : i32
    %c0_i32_0 = arith.constant 0 : i32
    %c0_i32_1 = arith.constant 0 : i32
    return %arg0, %arg1, %c0_i32, %c0_i32_0 : i32, i32, i32, i32
  }
  func.func @transform_6(%arg0: i32, %arg1: i32) -> (i32, i32, i32, i32) {
    %c0_i32 = arith.constant 0 : i32
    %c0_i32_0 = arith.constant 0 : i32
    %c0_i32_1 = arith.constant 0 : i32
    return %arg0, %arg1, %c0_i32, %c0_i32_0 : i32, i32, i32, i32
  }
}

module attributes {stable_mosaic.version = 11 : i64} {
  func.func @_gn_kernel(%arg0: i32, %arg1: memref<1x4x4x64xbf16, #tpu.memory_space<vmem>>, %arg2: memref<1x64xf32, #tpu.memory_space<vmem>>, %arg3: memref<1x64xf32, #tpu.memory_space<vmem>>, %arg4: memref<64x64xf32, #tpu.memory_space<vmem>>, %arg5: memref<1x4x4x64xbf16, #tpu.memory_space<vmem>>) attributes {dimension_semantics = [#tpu.dimension_semantics<parallel>], iteration_bounds = array<i64: 2>, scalar_prefetch = 0 : i64, scratch_operands = 0 : i64, tpu.core_type = #tpu.core_type<tc>, window_params = [{transform_indices = @transform_0, window_bounds = array<i64: 1, 4, 4, 64>}, {pipeline_mode = #tpu.pipeline_mode<synchronous>, transform_indices = @transform_1, window_bounds = array<i64: 1, 64>}, {pipeline_mode = #tpu.pipeline_mode<synchronous>, transform_indices = @transform_2, window_bounds = array<i64: 1, 64>}, {pipeline_mode = #tpu.pipeline_mode<synchronous>, transform_indices = @transform_3, window_bounds = array<i64: 64, 64>}, {transform_indices = @transform_4, window_bounds = array<i64: 1, 4, 4, 64>}]} {
    %c0 = arith.constant 0 : index
    %c0_0 = arith.constant 0 : index
    %c0_1 = arith.constant 0 : index
    %c0_2 = arith.constant 0 : index
    %0 = vector.load %arg1[%c0, %c0_0, %c0_1, %c0_2] : memref<1x4x4x64xbf16, #tpu.memory_space<vmem>>, vector<1x4x4x64xbf16>
    %1 = vector.shape_cast %0 : vector<1x4x4x64xbf16> to vector<4x4x64xbf16>
    %2 = arith.extf %1 : vector<4x4x64xbf16> to vector<4x4x64xf32>
    %3 = vector.shape_cast %2 : vector<4x4x64xf32> to vector<16x64xf32>
    %cst = arith.constant dense<0.000000e+00> : vector<64xf32>
    %4 = vector.multi_reduction <add>, %3, %cst [0] : vector<16x64xf32> to vector<64xf32>
    %5 = vector.shape_cast %4 : vector<64xf32> to vector<1x64xf32>
    %6 = arith.mulf %3, %3 : vector<16x64xf32>
    %cst_3 = arith.constant dense<0.000000e+00> : vector<64xf32>
    %7 = vector.multi_reduction <add>, %6, %cst_3 [0] : vector<16x64xf32> to vector<64xf32>
    %8 = vector.shape_cast %7 : vector<64xf32> to vector<1x64xf32>
    %c0_4 = arith.constant 0 : index
    %c0_5 = arith.constant 0 : index
    %9 = vector.load %arg4[%c0_4, %c0_5] : memref<64x64xf32, #tpu.memory_space<vmem>>, vector<64x64xf32>
    %cst_6 = arith.constant dense<0.000000e+00> : vector<1x64xf32>
    %10 = tpu.matmul %5, %9, %cst_6 {dimension_numbers = #tpu.dot_dimension_numbers<[1], [0], [0], [1], [0, 0, 1, 1], [], []>} : vector<1x64xf32>, vector<64x64xf32>, vector<1x64xf32> -> vector<1x64xf32>
    %c0_7 = arith.constant 0 : index
    %c0_8 = arith.constant 0 : index
    %11 = vector.load %arg4[%c0_7, %c0_8] : memref<64x64xf32, #tpu.memory_space<vmem>>, vector<64x64xf32>
    %cst_9 = arith.constant dense<0.000000e+00> : vector<1x64xf32>
    %12 = tpu.matmul %8, %11, %cst_9 {dimension_numbers = #tpu.dot_dimension_numbers<[1], [0], [0], [1], [0, 0, 1, 1], [], []>} : vector<1x64xf32>, vector<64x64xf32>, vector<1x64xf32> -> vector<1x64xf32>
    %13 = arith.mulf %10, %10 : vector<1x64xf32>
    %14 = arith.subf %12, %13 : vector<1x64xf32>
    %cst_10 = arith.constant 9.99999997E-7 : f32
    %15 = vector.broadcast %cst_10 : f32 to vector<1x64xf32>
    %16 = arith.addf %14, %15 : vector<1x64xf32>
    %17 = math.rsqrt %16 : vector<1x64xf32>
    %18 = vector.broadcast %10 : vector<1x64xf32> to vector<16x64xf32>
    %19 = arith.subf %3, %18 : vector<16x64xf32>
    %c0_11 = arith.constant 0 : index
    %c0_12 = arith.constant 0 : index
    %20 = vector.load %arg2[%c0_11, %c0_12] : memref<1x64xf32, #tpu.memory_space<vmem>>, vector<1x64xf32>
    %21 = arith.mulf %17, %20 : vector<1x64xf32>
    %22 = vector.broadcast %21 : vector<1x64xf32> to vector<16x64xf32>
    %23 = arith.mulf %19, %22 : vector<16x64xf32>
    %c0_13 = arith.constant 0 : index
    %c0_14 = arith.constant 0 : index
    %24 = vector.load %arg3[%c0_13, %c0_14] : memref<1x64xf32, #tpu.memory_space<vmem>>, vector<1x64xf32>
    %25 = vector.broadcast %24 : vector<1x64xf32> to vector<16x64xf32>
    %26 = arith.addf %23, %25 : vector<16x64xf32>
    %27 = vector.shape_cast %26 : vector<16x64xf32> to vector<4x4x64xf32>
    %28 = arith.truncf %27 : vector<4x4x64xf32> to vector<4x4x64xbf16>
    %c0_15 = arith.constant 0 : index
    %c0_16 = arith.constant 0 : index
    %c0_17 = arith.constant 0 : index
    %c0_18 = arith.constant 0 : index
    %29 = vector.load %arg5[%c0_15, %c0_16, %c0_17, %c0_18] : memref<1x4x4x64xbf16, #tpu.memory_space<vmem>>, vector<1x4x4x64xbf16>
    %30 = vector.shape_cast %29 : vector<1x4x4x64xbf16> to vector<4x4x64xbf16>
    %31 = vector.shape_cast %28 : vector<4x4x64xbf16> to vector<1x4x4x64xbf16>
    tpu.vector_store %arg5[%c0_15, %c0_16, %c0_17, %c0_18], %31 {strides = array<i32>} : memref<1x4x4x64xbf16, #tpu.memory_space<vmem>>, vector<1x4x4x64xbf16>,
    return
  }
  func.func @transform_0(%arg0: i32) -> (i32, i32, i32, i32) {
    %c0_i32 = arith.constant 0 : i32
    %c0_i32_0 = arith.constant 0 : i32
    %c0_i32_1 = arith.constant 0 : i32
    %c0_i32_2 = arith.constant 0 : i32
    return %arg0, %c0_i32, %c0_i32_0, %c0_i32_1 : i32, i32, i32, i32
  }
  func.func @transform_1(%arg0: i32) -> (i32, i32) {
    %c0_i32 = arith.constant 0 : i32
    %c0_i32_0 = arith.constant 0 : i32
    %c0_i32_1 = arith.constant 0 : i32
    return %c0_i32, %c0_i32_0 : i32, i32
  }
  func.func @transform_2(%arg0: i32) -> (i32, i32) {
    %c0_i32 = arith.constant 0 : i32
    %c0_i32_0 = arith.constant 0 : i32
    %c0_i32_1 = arith.constant 0 : i32
    return %c0_i32, %c0_i32_0 : i32, i32
  }
  func.func @transform_3(%arg0: i32) -> (i32, i32) {
    %c0_i32 = arith.constant 0 : i32
    %c0_i32_0 = arith.constant 0 : i32
    %c0_i32_1 = arith.constant 0 : i32
    return %c0_i32, %c0_i32_0 : i32, i32
  }
  func.func @transform_4(%arg0: i32) -> (i32, i32, i32, i32) {
    %c0_i32 = arith.constant 0 : i32
    %c0_i32_0 = arith.constant 0 : i32
    %c0_i32_1 = arith.constant 0 : i32
    %c0_i32_2 = arith.constant 0 : i32
    return %arg0, %c0_i32, %c0_i32_0, %c0_i32_1 : i32, i32, i32, i32
  }
}

module attributes {stable_mosaic.version = 11 : i64} {
  func.func @_conv1x1_kernel(%arg0: i32, %arg1: memref<32x64xbf16, #tpu.memory_space<vmem>>, %arg2: memref<64x64xbf16, #tpu.memory_space<vmem>>, %arg3: memref<1x64xf32, #tpu.memory_space<vmem>>, %arg4: memref<32x64xbf16, #tpu.memory_space<vmem>>) attributes {dimension_semantics = [#tpu.dimension_semantics<parallel>], iteration_bounds = array<i64: 1>, scalar_prefetch = 0 : i64, scratch_operands = 0 : i64, tpu.core_type = #tpu.core_type<tc>, window_params = [{transform_indices = @transform_0, window_bounds = array<i64: 32, 64>}, {pipeline_mode = #tpu.pipeline_mode<synchronous>, transform_indices = @transform_1, window_bounds = array<i64: 64, 64>}, {pipeline_mode = #tpu.pipeline_mode<synchronous>, transform_indices = @transform_2, window_bounds = array<i64: 1, 64>}, {transform_indices = @transform_3, window_bounds = array<i64: 32, 64>}]} {
    %c0 = arith.constant 0 : index
    %c0_0 = arith.constant 0 : index
    %0 = vector.load %arg1[%c0, %c0_0] : memref<32x64xbf16, #tpu.memory_space<vmem>>, vector<32x64xbf16>
    %c0_1 = arith.constant 0 : index
    %c0_2 = arith.constant 0 : index
    %1 = vector.load %arg2[%c0_1, %c0_2] : memref<64x64xbf16, #tpu.memory_space<vmem>>, vector<64x64xbf16>
    %cst = arith.constant dense<0.000000e+00> : vector<32x64xf32>
    %2 = tpu.matmul %0, %1, %cst {dimension_numbers = #tpu.dot_dimension_numbers<[1], [0], [0], [1], [0, 0, 1, 1], [], []>} : vector<32x64xbf16>, vector<64x64xbf16>, vector<32x64xf32> -> vector<32x64xf32>
    %c0_3 = arith.constant 0 : index
    %c0_4 = arith.constant 0 : index
    %3 = vector.load %arg3[%c0_3, %c0_4] : memref<1x64xf32, #tpu.memory_space<vmem>>, vector<1x64xf32>
    %4 = vector.broadcast %3 : vector<1x64xf32> to vector<32x64xf32>
    %5 = arith.addf %2, %4 : vector<32x64xf32>
    %6 = arith.truncf %5 : vector<32x64xf32> to vector<32x64xbf16>
    %c0_5 = arith.constant 0 : index
    %c0_6 = arith.constant 0 : index
    %7 = vector.load %arg4[%c0_5, %c0_6] : memref<32x64xbf16, #tpu.memory_space<vmem>>, vector<32x64xbf16>
    tpu.vector_store %arg4[%c0_5, %c0_6], %6 {strides = array<i32>} : memref<32x64xbf16, #tpu.memory_space<vmem>>, vector<32x64xbf16>,
    return
  }
  func.func @transform_0(%arg0: i32) -> (i32, i32) {
    %c0_i32 = arith.constant 0 : i32
    %c0_i32_0 = arith.constant 0 : i32
    return %arg0, %c0_i32 : i32, i32
  }
  func.func @transform_1(%arg0: i32) -> (i32, i32) {
    %c0_i32 = arith.constant 0 : i32
    %c0_i32_0 = arith.constant 0 : i32
    %c0_i32_1 = arith.constant 0 : i32
    return %c0_i32, %c0_i32_0 : i32, i32
  }
  func.func @transform_2(%arg0: i32) -> (i32, i32) {
    %c0_i32 = arith.constant 0 : i32
    %c0_i32_0 = arith.constant 0 : i32
    %c0_i32_1 = arith.constant 0 : i32
    return %c0_i32, %c0_i32_0 : i32, i32
  }
  func.func @transform_3(%arg0: i32) -> (i32, i32) {
    %c0_i32 = arith.constant 0 : i32
    %c0_i32_0 = arith.constant 0 : i32
    return %arg0, %c0_i32 : i32, i32
  }
}

module attributes {stable_mosaic.version = 11 : i64} {
  func.func @_attn_kernel(%arg0: i32, %arg1: memref<1x16x64xbf16, #tpu.memory_space<vmem>>, %arg2: memref<1x16x64xbf16, #tpu.memory_space<vmem>>, %arg3: memref<1x16x64xbf16, #tpu.memory_space<vmem>>, %arg4: memref<1x16x64xbf16, #tpu.memory_space<vmem>>) attributes {dimension_semantics = [#tpu.dimension_semantics<parallel>], iteration_bounds = array<i64: 2>, scalar_prefetch = 0 : i64, scratch_operands = 0 : i64, tpu.core_type = #tpu.core_type<tc>, window_params = [{transform_indices = @transform_0, window_bounds = array<i64: 1, 16, 64>}, {transform_indices = @transform_1, window_bounds = array<i64: 1, 16, 64>}, {transform_indices = @transform_2, window_bounds = array<i64: 1, 16, 64>}, {transform_indices = @transform_3, window_bounds = array<i64: 1, 16, 64>}]} {
    %c0 = arith.constant 0 : index
    %c0_0 = arith.constant 0 : index
    %c0_1 = arith.constant 0 : index
    %0 = vector.load %arg1[%c0, %c0_0, %c0_1] : memref<1x16x64xbf16, #tpu.memory_space<vmem>>, vector<1x16x64xbf16>
    %1 = vector.shape_cast %0 : vector<1x16x64xbf16> to vector<16x64xbf16>
    %c0_2 = arith.constant 0 : index
    %c0_3 = arith.constant 0 : index
    %c0_4 = arith.constant 0 : index
    %2 = vector.load %arg2[%c0_2, %c0_3, %c0_4] : memref<1x16x64xbf16, #tpu.memory_space<vmem>>, vector<1x16x64xbf16>
    %3 = vector.shape_cast %2 : vector<1x16x64xbf16> to vector<16x64xbf16>
    %c0_5 = arith.constant 0 : index
    %c0_6 = arith.constant 0 : index
    %c0_7 = arith.constant 0 : index
    %4 = vector.load %arg3[%c0_5, %c0_6, %c0_7] : memref<1x16x64xbf16, #tpu.memory_space<vmem>>, vector<1x16x64xbf16>
    %5 = vector.shape_cast %4 : vector<1x16x64xbf16> to vector<16x64xbf16>
    %cst = arith.constant dense<0.000000e+00> : vector<16x16xf32>
    %6 = tpu.matmul %1, %3, %cst {dimension_numbers = #tpu.dot_dimension_numbers<[1], [1], [0], [0], [0, 0, 1, 0], [], []>} : vector<16x64xbf16>, vector<16x64xbf16>, vector<16x16xf32> -> vector<16x16xf32>
    %cst_8 = arith.constant dense<0xFF800000> : vector<16xf32>
    %7 = vector.multi_reduction <maximumf>, %6, %cst_8 [1] : vector<16x16xf32> to vector<16xf32>
    %8 = vector.shape_cast %7 : vector<16xf32> to vector<16x1xf32>
    %9 = vector.broadcast %8 : vector<16x1xf32> to vector<16x16xf32>
    %10 = arith.subf %6, %9 : vector<16x16xf32>
    %11 = math.exp %10 : vector<16x16xf32>
    %cst_9 = arith.constant dense<0.000000e+00> : vector<16xf32>
    %12 = vector.multi_reduction <add>, %11, %cst_9 [1] : vector<16x16xf32> to vector<16xf32>
    %13 = vector.shape_cast %12 : vector<16xf32> to vector<16x1xf32>
    %14 = tpu.reciprocal %13 {approx = true} : vector<16x1xf32> -> vector<16x1xf32>
    %15 = vector.broadcast %14 : vector<16x1xf32> to vector<16x16xf32>
    %16 = arith.mulf %11, %15 : vector<16x16xf32>
    %17 = arith.truncf %16 : vector<16x16xf32> to vector<16x16xbf16>
    %cst_10 = arith.constant dense<0.000000e+00> : vector<16x64xf32>
    %18 = tpu.matmul %17, %5, %cst_10 {dimension_numbers = #tpu.dot_dimension_numbers<[1], [0], [0], [1], [0, 0, 1, 1], [], []>} : vector<16x16xbf16>, vector<16x64xbf16>, vector<16x64xf32> -> vector<16x64xf32>
    %19 = arith.truncf %18 : vector<16x64xf32> to vector<16x64xbf16>
    %c0_11 = arith.constant 0 : index
    %c0_12 = arith.constant 0 : index
    %c0_13 = arith.constant 0 : index
    %20 = vector.load %arg4[%c0_11, %c0_12, %c0_13] : memref<1x16x64xbf16, #tpu.memory_space<vmem>>, vector<1x16x64xbf16>
    %21 = vector.shape_cast %20 : vector<1x16x64xbf16> to vector<16x64xbf16>
    %22 = vector.shape_cast %19 : vector<16x64xbf16> to vector<1x16x64xbf16>
    tpu.vector_store %arg4[%c0_11, %c0_12, %c0_13], %22 {strides = array<i32>} : memref<1x16x64xbf16, #tpu.memory_space<vmem>>, vector<1x16x64xbf16>,
    return
  }
  func.func @transform_0(%arg0: i32) -> (i32, i32, i32) {
    %c0_i32 = arith.constant 0 : i32
    %c0_i32_0 = arith.constant 0 : i32
    %c0_i32_1 = arith.constant 0 : i32
    return %arg0, %c0_i32, %c0_i32_0 : i32, i32, i32
  }
  func.func @transform_1(%arg0: i32) -> (i32, i32, i32) {
    %c0_i32 = arith.constant 0 : i32
    %c0_i32_0 = arith.constant 0 : i32
    %c0_i32_1 = arith.constant 0 : i32
    return %arg0, %c0_i32, %c0_i32_0 : i32, i32, i32
  }
  func.func @transform_2(%arg0: i32) -> (i32, i32, i32) {
    %c0_i32 = arith.constant 0 : i32
    %c0_i32_0 = arith.constant 0 : i32
    %c0_i32_1 = arith.constant 0 : i32
    return %arg0, %c0_i32, %c0_i32_0 : i32, i32, i32
  }
  func.func @transform_3(%arg0: i32) -> (i32, i32, i32) {
    %c0_i32 = arith.constant 0 : i32
    %c0_i32_0 = arith.constant 0 : i32
    %c0_i32_1 = arith.constant 0 : i32
    return %arg0, %c0_i32, %c0_i32_0 : i32, i32, i32
  }
}

module attributes {stable_mosaic.version = 11 : i64} {
  func.func @_conv1x1_kernel(%arg0: i32, %arg1: memref<32x64xbf16, #tpu.memory_space<vmem>>, %arg2: memref<64x64xbf16, #tpu.memory_space<vmem>>, %arg3: memref<1x64xf32, #tpu.memory_space<vmem>>, %arg4: memref<32x64xbf16, #tpu.memory_space<vmem>>, %arg5: memref<32x64xbf16, #tpu.memory_space<vmem>>) attributes {dimension_semantics = [#tpu.dimension_semantics<parallel>], iteration_bounds = array<i64: 1>, scalar_prefetch = 0 : i64, scratch_operands = 0 : i64, tpu.core_type = #tpu.core_type<tc>, window_params = [{transform_indices = @transform_0, window_bounds = array<i64: 32, 64>}, {pipeline_mode = #tpu.pipeline_mode<synchronous>, transform_indices = @transform_1, window_bounds = array<i64: 64, 64>}, {pipeline_mode = #tpu.pipeline_mode<synchronous>, transform_indices = @transform_2, window_bounds = array<i64: 1, 64>}, {transform_indices = @transform_3, window_bounds = array<i64: 32, 64>}, {transform_indices = @transform_4, window_bounds = array<i64: 32, 64>}]} {
    %c0 = arith.constant 0 : index
    %c0_0 = arith.constant 0 : index
    %0 = vector.load %arg1[%c0, %c0_0] : memref<32x64xbf16, #tpu.memory_space<vmem>>, vector<32x64xbf16>
    %c0_1 = arith.constant 0 : index
    %c0_2 = arith.constant 0 : index
    %1 = vector.load %arg2[%c0_1, %c0_2] : memref<64x64xbf16, #tpu.memory_space<vmem>>, vector<64x64xbf16>
    %cst = arith.constant dense<0.000000e+00> : vector<32x64xf32>
    %2 = tpu.matmul %0, %1, %cst {dimension_numbers = #tpu.dot_dimension_numbers<[1], [0], [0], [1], [0, 0, 1, 1], [], []>} : vector<32x64xbf16>, vector<64x64xbf16>, vector<32x64xf32> -> vector<32x64xf32>
    %c0_3 = arith.constant 0 : index
    %c0_4 = arith.constant 0 : index
    %3 = vector.load %arg3[%c0_3, %c0_4] : memref<1x64xf32, #tpu.memory_space<vmem>>, vector<1x64xf32>
    %4 = vector.broadcast %3 : vector<1x64xf32> to vector<32x64xf32>
    %5 = arith.addf %2, %4 : vector<32x64xf32>
    %c0_5 = arith.constant 0 : index
    %c0_6 = arith.constant 0 : index
    %6 = vector.load %arg4[%c0_5, %c0_6] : memref<32x64xbf16, #tpu.memory_space<vmem>>, vector<32x64xbf16>
    %7 = arith.extf %6 : vector<32x64xbf16> to vector<32x64xf32>
    %8 = arith.addf %5, %7 : vector<32x64xf32>
    %9 = arith.truncf %8 : vector<32x64xf32> to vector<32x64xbf16>
    %c0_7 = arith.constant 0 : index
    %c0_8 = arith.constant 0 : index
    %10 = vector.load %arg5[%c0_7, %c0_8] : memref<32x64xbf16, #tpu.memory_space<vmem>>, vector<32x64xbf16>
    tpu.vector_store %arg5[%c0_7, %c0_8], %9 {strides = array<i32>} : memref<32x64xbf16, #tpu.memory_space<vmem>>, vector<32x64xbf16>,
    return
  }
  func.func @transform_0(%arg0: i32) -> (i32, i32) {
    %c0_i32 = arith.constant 0 : i32
    %c0_i32_0 = arith.constant 0 : i32
    return %arg0, %c0_i32 : i32, i32
  }
  func.func @transform_1(%arg0: i32) -> (i32, i32) {
    %c0_i32 = arith.constant 0 : i32
    %c0_i32_0 = arith.constant 0 : i32
    %c0_i32_1 = arith.constant 0 : i32
    return %c0_i32, %c0_i32_0 : i32, i32
  }
  func.func @transform_2(%arg0: i32) -> (i32, i32) {
    %c0_i32 = arith.constant 0 : i32
    %c0_i32_0 = arith.constant 0 : i32
    %c0_i32_1 = arith.constant 0 : i32
    return %c0_i32, %c0_i32_0 : i32, i32
  }
  func.func @transform_3(%arg0: i32) -> (i32, i32) {
    %c0_i32 = arith.constant 0 : i32
    %c0_i32_0 = arith.constant 0 : i32
    return %arg0, %c0_i32 : i32, i32
  }
  func.func @transform_4(%arg0: i32) -> (i32, i32) {
    %c0_i32 = arith.constant 0 : i32
    %c0_i32_0 = arith.constant 0 : i32
    return %arg0, %c0_i32 : i32, i32
  }
}

module attributes {stable_mosaic.version = 11 : i64} {
  func.func @_gn_kernel(%arg0: i32, %arg1: memref<1x8x8x64xbf16, #tpu.memory_space<vmem>>, %arg2: memref<1x64xf32, #tpu.memory_space<vmem>>, %arg3: memref<1x64xf32, #tpu.memory_space<vmem>>, %arg4: memref<64x64xf32, #tpu.memory_space<vmem>>, %arg5: memref<1x8x8x64xbf16, #tpu.memory_space<vmem>>) attributes {dimension_semantics = [#tpu.dimension_semantics<parallel>], iteration_bounds = array<i64: 2>, scalar_prefetch = 0 : i64, scratch_operands = 0 : i64, tpu.core_type = #tpu.core_type<tc>, window_params = [{transform_indices = @transform_0, window_bounds = array<i64: 1, 8, 8, 64>}, {pipeline_mode = #tpu.pipeline_mode<synchronous>, transform_indices = @transform_1, window_bounds = array<i64: 1, 64>}, {pipeline_mode = #tpu.pipeline_mode<synchronous>, transform_indices = @transform_2, window_bounds = array<i64: 1, 64>}, {pipeline_mode = #tpu.pipeline_mode<synchronous>, transform_indices = @transform_3, window_bounds = array<i64: 64, 64>}, {transform_indices = @transform_4, window_bounds = array<i64: 1, 8, 8, 64>}]} {
    %c0 = arith.constant 0 : index
    %c0_0 = arith.constant 0 : index
    %c0_1 = arith.constant 0 : index
    %c0_2 = arith.constant 0 : index
    %0 = vector.load %arg1[%c0, %c0_0, %c0_1, %c0_2] : memref<1x8x8x64xbf16, #tpu.memory_space<vmem>>, vector<1x8x8x64xbf16>
    %1 = vector.shape_cast %0 : vector<1x8x8x64xbf16> to vector<8x8x64xbf16>
    %2 = arith.extf %1 : vector<8x8x64xbf16> to vector<8x8x64xf32>
    %3 = vector.shape_cast %2 : vector<8x8x64xf32> to vector<64x64xf32>
    %cst = arith.constant dense<0.000000e+00> : vector<64xf32>
    %4 = vector.multi_reduction <add>, %3, %cst [0] : vector<64x64xf32> to vector<64xf32>
    %5 = vector.shape_cast %4 : vector<64xf32> to vector<1x64xf32>
    %6 = arith.mulf %3, %3 : vector<64x64xf32>
    %cst_3 = arith.constant dense<0.000000e+00> : vector<64xf32>
    %7 = vector.multi_reduction <add>, %6, %cst_3 [0] : vector<64x64xf32> to vector<64xf32>
    %8 = vector.shape_cast %7 : vector<64xf32> to vector<1x64xf32>
    %c0_4 = arith.constant 0 : index
    %c0_5 = arith.constant 0 : index
    %9 = vector.load %arg4[%c0_4, %c0_5] : memref<64x64xf32, #tpu.memory_space<vmem>>, vector<64x64xf32>
    %cst_6 = arith.constant dense<0.000000e+00> : vector<1x64xf32>
    %10 = tpu.matmul %5, %9, %cst_6 {dimension_numbers = #tpu.dot_dimension_numbers<[1], [0], [0], [1], [0, 0, 1, 1], [], []>} : vector<1x64xf32>, vector<64x64xf32>, vector<1x64xf32> -> vector<1x64xf32>
    %c0_7 = arith.constant 0 : index
    %c0_8 = arith.constant 0 : index
    %11 = vector.load %arg4[%c0_7, %c0_8] : memref<64x64xf32, #tpu.memory_space<vmem>>, vector<64x64xf32>
    %cst_9 = arith.constant dense<0.000000e+00> : vector<1x64xf32>
    %12 = tpu.matmul %8, %11, %cst_9 {dimension_numbers = #tpu.dot_dimension_numbers<[1], [0], [0], [1], [0, 0, 1, 1], [], []>} : vector<1x64xf32>, vector<64x64xf32>, vector<1x64xf32> -> vector<1x64xf32>
    %13 = arith.mulf %10, %10 : vector<1x64xf32>
    %14 = arith.subf %12, %13 : vector<1x64xf32>
    %cst_10 = arith.constant 9.99999997E-7 : f32
    %15 = vector.broadcast %cst_10 : f32 to vector<1x64xf32>
    %16 = arith.addf %14, %15 : vector<1x64xf32>
    %17 = math.rsqrt %16 : vector<1x64xf32>
    %18 = vector.broadcast %10 : vector<1x64xf32> to vector<64x64xf32>
    %19 = arith.subf %3, %18 : vector<64x64xf32>
    %c0_11 = arith.constant 0 : index
    %c0_12 = arith.constant 0 : index
    %20 = vector.load %arg2[%c0_11, %c0_12] : memref<1x64xf32, #tpu.memory_space<vmem>>, vector<1x64xf32>
    %21 = arith.mulf %17, %20 : vector<1x64xf32>
    %22 = vector.broadcast %21 : vector<1x64xf32> to vector<64x64xf32>
    %23 = arith.mulf %19, %22 : vector<64x64xf32>
    %c0_13 = arith.constant 0 : index
    %c0_14 = arith.constant 0 : index
    %24 = vector.load %arg3[%c0_13, %c0_14] : memref<1x64xf32, #tpu.memory_space<vmem>>, vector<1x64xf32>
    %25 = vector.broadcast %24 : vector<1x64xf32> to vector<64x64xf32>
    %26 = arith.addf %23, %25 : vector<64x64xf32>
    %cst_15 = arith.constant 0.000000e+00 : f32
    %27 = vector.broadcast %cst_15 : f32 to vector<64x64xf32>
    %28 = arith.subf %27, %26 : vector<64x64xf32>
    %29 = math.exp %28 : vector<64x64xf32>
    %cst_16 = arith.constant 1.000000e+00 : f32
    %30 = vector.broadcast %cst_16 : f32 to vector<64x64xf32>
    %31 = arith.addf %30, %29 : vector<64x64xf32>
    %32 = arith.divf %26, %31 : vector<64x64xf32>
    %33 = vector.shape_cast %32 : vector<64x64xf32> to vector<8x8x64xf32>
    %34 = arith.truncf %33 : vector<8x8x64xf32> to vector<8x8x64xbf16>
    %c0_17 = arith.constant 0 : index
    %c0_18 = arith.constant 0 : index
    %c0_19 = arith.constant 0 : index
    %c0_20 = arith.constant 0 : index
    %35 = vector.load %arg5[%c0_17, %c0_18, %c0_19, %c0_20] : memref<1x8x8x64xbf16, #tpu.memory_space<vmem>>, vector<1x8x8x64xbf16>
    %36 = vector.shape_cast %35 : vector<1x8x8x64xbf16> to vector<8x8x64xbf16>
    %37 = vector.shape_cast %34 : vector<8x8x64xbf16> to vector<1x8x8x64xbf16>
    tpu.vector_store %arg5[%c0_17, %c0_18, %c0_19, %c0_20], %37 {strides = array<i32>} : memref<1x8x8x64xbf16, #tpu.memory_space<vmem>>, vector<1x8x8x64xbf16>,
    return
  }
  func.func @transform_0(%arg0: i32) -> (i32, i32, i32, i32) {
    %c0_i32 = arith.constant 0 : i32
    %c0_i32_0 = arith.constant 0 : i32
    %c0_i32_1 = arith.constant 0 : i32
    %c0_i32_2 = arith.constant 0 : i32
    return %arg0, %c0_i32, %c0_i32_0, %c0_i32_1 : i32, i32, i32, i32
  }
  func.func @transform_1(%arg0: i32) -> (i32, i32) {
    %c0_i32 = arith.constant 0 : i32
    %c0_i32_0 = arith.constant 0 : i32
    %c0_i32_1 = arith.constant 0 : i32
    return %c0_i32, %c0_i32_0 : i32, i32
  }
  func.func @transform_2(%arg0: i32) -> (i32, i32) {
    %c0_i32 = arith.constant 0 : i32
    %c0_i32_0 = arith.constant 0 : i32
    %c0_i32_1 = arith.constant 0 : i32
    return %c0_i32, %c0_i32_0 : i32, i32
  }
  func.func @transform_3(%arg0: i32) -> (i32, i32) {
    %c0_i32 = arith.constant 0 : i32
    %c0_i32_0 = arith.constant 0 : i32
    %c0_i32_1 = arith.constant 0 : i32
    return %c0_i32, %c0_i32_0 : i32, i32
  }
  func.func @transform_4(%arg0: i32) -> (i32, i32, i32, i32) {
    %c0_i32 = arith.constant 0 : i32
    %c0_i32_0 = arith.constant 0 : i32
    %c0_i32_1 = arith.constant 0 : i32
    %c0_i32_2 = arith.constant 0 : i32
    return %arg0, %c0_i32, %c0_i32_0, %c0_i32_1 : i32, i32, i32, i32
  }
}

module attributes {stable_mosaic.version = 11 : i64} {
  func.func @_conv3x3_up_kernel(%arg0: i32, %arg1: memref<1x4x4x64xbf16, #tpu.memory_space<vmem>>, %arg2: memref<9x64x64xbf16, #tpu.memory_space<vmem>>, %arg3: memref<1x64xf32, #tpu.memory_space<vmem>>, %arg4: memref<1x8x8x64xbf16, #tpu.memory_space<vmem>>) attributes {dimension_semantics = [#tpu.dimension_semantics<parallel>], iteration_bounds = array<i64: 2>, scalar_prefetch = 0 : i64, scratch_operands = 0 : i64, tpu.core_type = #tpu.core_type<tc>, window_params = [{transform_indices = @transform_0, window_bounds = array<i64: 1, 4, 4, 64>}, {pipeline_mode = #tpu.pipeline_mode<synchronous>, transform_indices = @transform_1, window_bounds = array<i64: 9, 64, 64>}, {pipeline_mode = #tpu.pipeline_mode<synchronous>, transform_indices = @transform_2, window_bounds = array<i64: 1, 64>}, {transform_indices = @transform_3, window_bounds = array<i64: 1, 8, 8, 64>}]} {
    %c0 = arith.constant 0 : index
    %c0_0 = arith.constant 0 : index
    %c0_1 = arith.constant 0 : index
    %c0_2 = arith.constant 0 : index
    %0 = vector.load %arg1[%c0, %c0_0, %c0_1, %c0_2] : memref<1x4x4x64xbf16, #tpu.memory_space<vmem>>, vector<1x4x4x64xbf16>
    %1 = vector.shape_cast %0 : vector<1x4x4x64xbf16> to vector<4x4x64xbf16>
    %2 = vector.shape_cast %1 : vector<4x4x64xbf16> to vector<4x4x1x64xbf16>
    %3 = vector.shape_cast %2 : vector<4x4x1x64xbf16> to vector<4x4x1x64xbf16>
    %4 = vector.broadcast %3 : vector<4x4x1x64xbf16> to vector<4x4x2x64xbf16>
    %5 = vector.shape_cast %4 : vector<4x4x2x64xbf16> to vector<4x8x64xbf16>
    %6 = vector.shape_cast %5 : vector<4x8x64xbf16> to vector<4x1x8x64xbf16>
    %7 = vector.shape_cast %6 : vector<4x1x8x64xbf16> to vector<4x1x8x64xbf16>
    %8 = vector.broadcast %7 : vector<4x1x8x64xbf16> to vector<4x2x8x64xbf16>
    %9 = vector.shape_cast %8 : vector<4x2x8x64xbf16> to vector<8x8x64xbf16>
    %cst = arith.constant 0.000000e+00 : bf16
    %10 = vector.broadcast %cst : bf16 to vector<1x8x64xbf16>
    %11 = tpu.concatenate %10, %9, %10 in 0 : vector<1x8x64xbf16>, vector<8x8x64xbf16>, vector<1x8x64xbf16> -> vector<10x8x64xbf16>
    %cst_3 = arith.constant 0.000000e+00 : bf16
    %12 = vector.broadcast %cst_3 : bf16 to vector<10x1x64xbf16>
    %cst_4 = arith.constant 0.000000e+00 : f32
    %13 = vector.broadcast %cst_4 : f32 to vector<64x64xf32>
    %14 = vector.extract_strided_slice %11 {offsets = [0, 0, 0], sizes = [10, 7, 64], strides = [1, 1, 1]} : vector<10x8x64xbf16> to vector<10x7x64xbf16>
    %15 = tpu.concatenate %12, %14 in 1 : vector<10x1x64xbf16>, vector<10x7x64xbf16> -> vector<10x8x64xbf16>
    %16 = vector.shape_cast %15 : vector<10x8x64xbf16> to vector<80x64xbf16>
    %17 = vector.extract_strided_slice %16 {offsets = [0, 0], sizes = [64, 64], strides = [1, 1]} : vector<80x64xbf16> to vector<64x64xbf16>
    %c0_5 = arith.constant 0 : index
    %c0_6 = arith.constant 0 : index
    %c0_7 = arith.constant 0 : index
    %18 = vector.load %arg2[%c0_5, %c0_6, %c0_7] : memref<9x64x64xbf16, #tpu.memory_space<vmem>>, vector<1x64x64xbf16>
    %19 = vector.shape_cast %18 : vector<1x64x64xbf16> to vector<64x64xbf16>
    %cst_8 = arith.constant dense<0.000000e+00> : vector<64x64xf32>
    %20 = tpu.matmul %17, %19, %cst_8 {dimension_numbers = #tpu.dot_dimension_numbers<[1], [0], [0], [1], [0, 0, 1, 1], [], []>} : vector<64x64xbf16>, vector<64x64xbf16>, vector<64x64xf32> -> vector<64x64xf32>
    %21 = arith.addf %13, %20 : vector<64x64xf32>
    %22 = vector.extract_strided_slice %16 {offsets = [8, 0], sizes = [64, 64], strides = [1, 1]} : vector<80x64xbf16> to vector<64x64xbf16>
    %c3 = arith.constant 3 : index
    %c0_9 = arith.constant 0 : index
    %c0_10 = arith.constant 0 : index
    %23 = vector.load %arg2[%c3, %c0_9, %c0_10] : memref<9x64x64xbf16, #tpu.memory_space<vmem>>, vector<1x64x64xbf16>
    %24 = vector.shape_cast %23 : vector<1x64x64xbf16> to vector<64x64xbf16>
    %cst_11 = arith.constant dense<0.000000e+00> : vector<64x64xf32>
    %25 = tpu.matmul %22, %24, %cst_11 {dimension_numbers = #tpu.dot_dimension_numbers<[1], [0], [0], [1], [0, 0, 1, 1], [], []>} : vector<64x64xbf16>, vector<64x64xbf16>, vector<64x64xf32> -> vector<64x64xf32>
    %26 = arith.addf %21, %25 : vector<64x64xf32>
    %27 = vector.extract_strided_slice %16 {offsets = [16, 0], sizes = [64, 64], strides = [1, 1]} : vector<80x64xbf16> to vector<64x64xbf16>
    %c6 = arith.constant 6 : index
    %c0_12 = arith.constant 0 : index
    %c0_13 = arith.constant 0 : index
    %28 = vector.load %arg2[%c6, %c0_12, %c0_13] : memref<9x64x64xbf16, #tpu.memory_space<vmem>>, vector<1x64x64xbf16>
    %29 = vector.shape_cast %28 : vector<1x64x64xbf16> to vector<64x64xbf16>
    %cst_14 = arith.constant dense<0.000000e+00> : vector<64x64xf32>
    %30 = tpu.matmul %27, %29, %cst_14 {dimension_numbers = #tpu.dot_dimension_numbers<[1], [0], [0], [1], [0, 0, 1, 1], [], []>} : vector<64x64xbf16>, vector<64x64xbf16>, vector<64x64xf32> -> vector<64x64xf32>
    %31 = arith.addf %26, %30 : vector<64x64xf32>
    %32 = vector.shape_cast %11 : vector<10x8x64xbf16> to vector<80x64xbf16>
    %33 = vector.extract_strided_slice %32 {offsets = [0, 0], sizes = [64, 64], strides = [1, 1]} : vector<80x64xbf16> to vector<64x64xbf16>
    %c1 = arith.constant 1 : index
    %c0_15 = arith.constant 0 : index
    %c0_16 = arith.constant 0 : index
    %34 = vector.load %arg2[%c1, %c0_15, %c0_16] : memref<9x64x64xbf16, #tpu.memory_space<vmem>>, vector<1x64x64xbf16>
    %35 = vector.shape_cast %34 : vector<1x64x64xbf16> to vector<64x64xbf16>
    %cst_17 = arith.constant dense<0.000000e+00> : vector<64x64xf32>
    %36 = tpu.matmul %33, %35, %cst_17 {dimension_numbers = #tpu.dot_dimension_numbers<[1], [0], [0], [1], [0, 0, 1, 1], [], []>} : vector<64x64xbf16>, vector<64x64xbf16>, vector<64x64xf32> -> vector<64x64xf32>
    %37 = arith.addf %31, %36 : vector<64x64xf32>
    %38 = vector.extract_strided_slice %32 {offsets = [8, 0], sizes = [64, 64], strides = [1, 1]} : vector<80x64xbf16> to vector<64x64xbf16>
    %c4 = arith.constant 4 : index
    %c0_18 = arith.constant 0 : index
    %c0_19 = arith.constant 0 : index
    %39 = vector.load %arg2[%c4, %c0_18, %c0_19] : memref<9x64x64xbf16, #tpu.memory_space<vmem>>, vector<1x64x64xbf16>
    %40 = vector.shape_cast %39 : vector<1x64x64xbf16> to vector<64x64xbf16>
    %cst_20 = arith.constant dense<0.000000e+00> : vector<64x64xf32>
    %41 = tpu.matmul %38, %40, %cst_20 {dimension_numbers = #tpu.dot_dimension_numbers<[1], [0], [0], [1], [0, 0, 1, 1], [], []>} : vector<64x64xbf16>, vector<64x64xbf16>, vector<64x64xf32> -> vector<64x64xf32>
    %42 = arith.addf %37, %41 : vector<64x64xf32>
    %43 = vector.extract_strided_slice %32 {offsets = [16, 0], sizes = [64, 64], strides = [1, 1]} : vector<80x64xbf16> to vector<64x64xbf16>
    %c7 = arith.constant 7 : index
    %c0_21 = arith.constant 0 : index
    %c0_22 = arith.constant 0 : index
    %44 = vector.load %arg2[%c7, %c0_21, %c0_22] : memref<9x64x64xbf16, #tpu.memory_space<vmem>>, vector<1x64x64xbf16>
    %45 = vector.shape_cast %44 : vector<1x64x64xbf16> to vector<64x64xbf16>
    %cst_23 = arith.constant dense<0.000000e+00> : vector<64x64xf32>
    %46 = tpu.matmul %43, %45, %cst_23 {dimension_numbers = #tpu.dot_dimension_numbers<[1], [0], [0], [1], [0, 0, 1, 1], [], []>} : vector<64x64xbf16>, vector<64x64xbf16>, vector<64x64xf32> -> vector<64x64xf32>
    %47 = arith.addf %42, %46 : vector<64x64xf32>
    %48 = vector.extract_strided_slice %11 {offsets = [0, 1, 0], sizes = [10, 7, 64], strides = [1, 1, 1]} : vector<10x8x64xbf16> to vector<10x7x64xbf16>
    %49 = tpu.concatenate %48, %12 in 1 : vector<10x7x64xbf16>, vector<10x1x64xbf16> -> vector<10x8x64xbf16>
    %50 = vector.shape_cast %49 : vector<10x8x64xbf16> to vector<80x64xbf16>
    %51 = vector.extract_strided_slice %50 {offsets = [0, 0], sizes = [64, 64], strides = [1, 1]} : vector<80x64xbf16> to vector<64x64xbf16>
    %c2 = arith.constant 2 : index
    %c0_24 = arith.constant 0 : index
    %c0_25 = arith.constant 0 : index
    %52 = vector.load %arg2[%c2, %c0_24, %c0_25] : memref<9x64x64xbf16, #tpu.memory_space<vmem>>, vector<1x64x64xbf16>
    %53 = vector.shape_cast %52 : vector<1x64x64xbf16> to vector<64x64xbf16>
    %cst_26 = arith.constant dense<0.000000e+00> : vector<64x64xf32>
    %54 = tpu.matmul %51, %53, %cst_26 {dimension_numbers = #tpu.dot_dimension_numbers<[1], [0], [0], [1], [0, 0, 1, 1], [], []>} : vector<64x64xbf16>, vector<64x64xbf16>, vector<64x64xf32> -> vector<64x64xf32>
    %55 = arith.addf %47, %54 : vector<64x64xf32>
    %56 = vector.extract_strided_slice %50 {offsets = [8, 0], sizes = [64, 64], strides = [1, 1]} : vector<80x64xbf16> to vector<64x64xbf16>
    %c5 = arith.constant 5 : index
    %c0_27 = arith.constant 0 : index
    %c0_28 = arith.constant 0 : index
    %57 = vector.load %arg2[%c5, %c0_27, %c0_28] : memref<9x64x64xbf16, #tpu.memory_space<vmem>>, vector<1x64x64xbf16>
    %58 = vector.shape_cast %57 : vector<1x64x64xbf16> to vector<64x64xbf16>
    %cst_29 = arith.constant dense<0.000000e+00> : vector<64x64xf32>
    %59 = tpu.matmul %56, %58, %cst_29 {dimension_numbers = #tpu.dot_dimension_numbers<[1], [0], [0], [1], [0, 0, 1, 1], [], []>} : vector<64x64xbf16>, vector<64x64xbf16>, vector<64x64xf32> -> vector<64x64xf32>
    %60 = arith.addf %55, %59 : vector<64x64xf32>
    %61 = vector.extract_strided_slice %50 {offsets = [16, 0], sizes = [64, 64], strides = [1, 1]} : vector<80x64xbf16> to vector<64x64xbf16>
    %c8 = arith.constant 8 : index
    %c0_30 = arith.constant 0 : index
    %c0_31 = arith.constant 0 : index
    %62 = vector.load %arg2[%c8, %c0_30, %c0_31] : memref<9x64x64xbf16, #tpu.memory_space<vmem>>, vector<1x64x64xbf16>
    %63 = vector.shape_cast %62 : vector<1x64x64xbf16> to vector<64x64xbf16>
    %cst_32 = arith.constant dense<0.000000e+00> : vector<64x64xf32>
    %64 = tpu.matmul %61, %63, %cst_32 {dimension_numbers = #tpu.dot_dimension_numbers<[1], [0], [0], [1], [0, 0, 1, 1], [], []>} : vector<64x64xbf16>, vector<64x64xbf16>, vector<64x64xf32> -> vector<64x64xf32>
    %65 = arith.addf %60, %64 : vector<64x64xf32>
    %c0_33 = arith.constant 0 : index
    %c0_34 = arith.constant 0 : index
    %66 = vector.load %arg3[%c0_33, %c0_34] : memref<1x64xf32, #tpu.memory_space<vmem>>, vector<1x64xf32>
    %67 = vector.broadcast %66 : vector<1x64xf32> to vector<64x64xf32>
    %68 = arith.addf %65, %67 : vector<64x64xf32>
    %69 = vector.shape_cast %68 : vector<64x64xf32> to vector<8x8x64xf32>
    %70 = arith.truncf %69 : vector<8x8x64xf32> to vector<8x8x64xbf16>
    %c0_35 = arith.constant 0 : index
    %c0_36 = arith.constant 0 : index
    %c0_37 = arith.constant 0 : index
    %c0_38 = arith.constant 0 : index
    %71 = vector.load %arg4[%c0_35, %c0_36, %c0_37, %c0_38] : memref<1x8x8x64xbf16, #tpu.memory_space<vmem>>, vector<1x8x8x64xbf16>
    %72 = vector.shape_cast %71 : vector<1x8x8x64xbf16> to vector<8x8x64xbf16>
    %73 = vector.shape_cast %70 : vector<8x8x64xbf16> to vector<1x8x8x64xbf16>
    tpu.vector_store %arg4[%c0_35, %c0_36, %c0_37, %c0_38], %73 {strides = array<i32>} : memref<1x8x8x64xbf16, #tpu.memory_space<vmem>>, vector<1x8x8x64xbf16>,
    return
  }
  func.func @transform_0(%arg0: i32) -> (i32, i32, i32, i32) {
    %c0_i32 = arith.constant 0 : i32
    %c0_i32_0 = arith.constant 0 : i32
    %c0_i32_1 = arith.constant 0 : i32
    %c0_i32_2 = arith.constant 0 : i32
    return %arg0, %c0_i32, %c0_i32_0, %c0_i32_1 : i32, i32, i32, i32
  }
  func.func @transform_1(%arg0: i32) -> (i32, i32, i32) {
    %c0_i32 = arith.constant 0 : i32
    %c0_i32_0 = arith.constant 0 : i32
    %c0_i32_1 = arith.constant 0 : i32
    %c0_i32_2 = arith.constant 0 : i32
    return %c0_i32, %c0_i32_0, %c0_i32_1 : i32, i32, i32
  }
  func.func @transform_2(%arg0: i32) -> (i32, i32) {
    %c0_i32 = arith.constant 0 : i32
    %c0_i32_0 = arith.constant 0 : i32
    %c0_i32_1 = arith.constant 0 : i32
    return %c0_i32, %c0_i32_0 : i32, i32
  }
  func.func @transform_3(%arg0: i32) -> (i32, i32, i32, i32) {
    %c0_i32 = arith.constant 0 : i32
    %c0_i32_0 = arith.constant 0 : i32
    %c0_i32_1 = arith.constant 0 : i32
    %c0_i32_2 = arith.constant 0 : i32
    return %arg0, %c0_i32, %c0_i32_0, %c0_i32_1 : i32, i32, i32, i32
  }
}

module attributes {stable_mosaic.version = 11 : i64} {
  func.func @_conv3x3_kernel(%arg0: i32, %arg1: i32, %arg2: memref<1x1x8x64xbf16, #tpu.memory_space<vmem>>, %arg3: memref<1x8x8x64xbf16, #tpu.memory_space<vmem>>, %arg4: memref<1x1x8x64xbf16, #tpu.memory_space<vmem>>, %arg5: memref<9x64x32xbf16, #tpu.memory_space<vmem>>, %arg6: memref<1x32xf32, #tpu.memory_space<vmem>>, %arg7: memref<1x8x8x32xbf16, #tpu.memory_space<vmem>>) attributes {dimension_semantics = [#tpu.dimension_semantics<parallel>, #tpu.dimension_semantics<parallel>], iteration_bounds = array<i64: 2, 1>, scalar_prefetch = 0 : i64, scratch_operands = 0 : i64, tpu.core_type = #tpu.core_type<tc>, window_params = [{transform_indices = @transform_0, window_bounds = array<i64: 1, 1, 8, 64>}, {transform_indices = @transform_1, window_bounds = array<i64: 1, 8, 8, 64>}, {transform_indices = @transform_2, window_bounds = array<i64: 1, 1, 8, 64>}, {pipeline_mode = #tpu.pipeline_mode<synchronous>, transform_indices = @transform_3, window_bounds = array<i64: 9, 64, 32>}, {pipeline_mode = #tpu.pipeline_mode<synchronous>, transform_indices = @transform_4, window_bounds = array<i64: 1, 32>}, {transform_indices = @transform_5, window_bounds = array<i64: 1, 8, 8, 32>}]} {
    %cst = arith.constant 0.000000e+00 : bf16
    %0 = vector.broadcast %cst : bf16 to vector<1x8x64xbf16>
    %c0_i32 = arith.constant 0 : i32
    %1 = arith.cmpi sgt, %arg1, %c0_i32 : i32
    %c0 = arith.constant 0 : index
    %c0_0 = arith.constant 0 : index
    %c0_1 = arith.constant 0 : index
    %c0_2 = arith.constant 0 : index
    %2 = vector.load %arg2[%c0, %c0_0, %c0_1, %c0_2] : memref<1x1x8x64xbf16, #tpu.memory_space<vmem>>, vector<1x1x8x64xbf16>
    %3 = vector.shape_cast %2 : vector<1x1x8x64xbf16> to vector<1x8x64xbf16>
    %4 = arith.select %1, %3, %0 : vector<1x8x64xbf16>
    %c0_i32_3 = arith.constant 0 : i32
    %5 = arith.cmpi slt, %arg1, %c0_i32_3 : i32
    %c0_4 = arith.constant 0 : index
    %c0_5 = arith.constant 0 : index
    %c0_6 = arith.constant 0 : index
    %c0_7 = arith.constant 0 : index
    %6 = vector.load %arg4[%c0_4, %c0_5, %c0_6, %c0_7] : memref<1x1x8x64xbf16, #tpu.memory_space<vmem>>, vector<1x1x8x64xbf16>
    %7 = vector.shape_cast %6 : vector<1x1x8x64xbf16> to vector<1x8x64xbf16>
    %8 = arith.select %5, %7, %0 : vector<1x8x64xbf16>
    %c0_8 = arith.constant 0 : index
    %c0_9 = arith.constant 0 : index
    %c0_10 = arith.constant 0 : index
    %c0_11 = arith.constant 0 : index
    %9 = vector.load %arg3[%c0_8, %c0_9, %c0_10, %c0_11] : memref<1x8x8x64xbf16, #tpu.memory_space<vmem>>, vector<1x8x8x64xbf16>
    %10 = vector.shape_cast %9 : vector<1x8x8x64xbf16> to vector<8x8x64xbf16>
    %11 = tpu.concatenate %4, %10, %8 in 0 : vector<1x8x64xbf16>, vector<8x8x64xbf16>, vector<1x8x64xbf16> -> vector<10x8x64xbf16>
    %cst_12 = arith.constant 0.000000e+00 : bf16
    %12 = vector.broadcast %cst_12 : bf16 to vector<10x1x64xbf16>
    %cst_13 = arith.constant 0.000000e+00 : f32
    %13 = vector.broadcast %cst_13 : f32 to vector<64x32xf32>
    %14 = vector.extract_strided_slice %11 {offsets = [0, 0, 0], sizes = [10, 7, 64], strides = [1, 1, 1]} : vector<10x8x64xbf16> to vector<10x7x64xbf16>
    %15 = tpu.concatenate %12, %14 in 1 : vector<10x1x64xbf16>, vector<10x7x64xbf16> -> vector<10x8x64xbf16>
    %16 = vector.shape_cast %15 : vector<10x8x64xbf16> to vector<80x64xbf16>
    %17 = vector.extract_strided_slice %16 {offsets = [0, 0], sizes = [64, 64], strides = [1, 1]} : vector<80x64xbf16> to vector<64x64xbf16>
    %c0_14 = arith.constant 0 : index
    %c0_15 = arith.constant 0 : index
    %c0_16 = arith.constant 0 : index
    %18 = vector.load %arg5[%c0_14, %c0_15, %c0_16] : memref<9x64x32xbf16, #tpu.memory_space<vmem>>, vector<1x64x32xbf16>
    %19 = vector.shape_cast %18 : vector<1x64x32xbf16> to vector<64x32xbf16>
    %cst_17 = arith.constant dense<0.000000e+00> : vector<64x32xf32>
    %20 = tpu.matmul %17, %19, %cst_17 {dimension_numbers = #tpu.dot_dimension_numbers<[1], [0], [0], [1], [0, 0, 1, 1], [], []>} : vector<64x64xbf16>, vector<64x32xbf16>, vector<64x32xf32> -> vector<64x32xf32>
    %21 = arith.addf %13, %20 : vector<64x32xf32>
    %22 = vector.extract_strided_slice %16 {offsets = [8, 0], sizes = [64, 64], strides = [1, 1]} : vector<80x64xbf16> to vector<64x64xbf16>
    %c3 = arith.constant 3 : index
    %c0_18 = arith.constant 0 : index
    %c0_19 = arith.constant 0 : index
    %23 = vector.load %arg5[%c3, %c0_18, %c0_19] : memref<9x64x32xbf16, #tpu.memory_space<vmem>>, vector<1x64x32xbf16>
    %24 = vector.shape_cast %23 : vector<1x64x32xbf16> to vector<64x32xbf16>
    %cst_20 = arith.constant dense<0.000000e+00> : vector<64x32xf32>
    %25 = tpu.matmul %22, %24, %cst_20 {dimension_numbers = #tpu.dot_dimension_numbers<[1], [0], [0], [1], [0, 0, 1, 1], [], []>} : vector<64x64xbf16>, vector<64x32xbf16>, vector<64x32xf32> -> vector<64x32xf32>
    %26 = arith.addf %21, %25 : vector<64x32xf32>
    %27 = vector.extract_strided_slice %16 {offsets = [16, 0], sizes = [64, 64], strides = [1, 1]} : vector<80x64xbf16> to vector<64x64xbf16>
    %c6 = arith.constant 6 : index
    %c0_21 = arith.constant 0 : index
    %c0_22 = arith.constant 0 : index
    %28 = vector.load %arg5[%c6, %c0_21, %c0_22] : memref<9x64x32xbf16, #tpu.memory_space<vmem>>, vector<1x64x32xbf16>
    %29 = vector.shape_cast %28 : vector<1x64x32xbf16> to vector<64x32xbf16>
    %cst_23 = arith.constant dense<0.000000e+00> : vector<64x32xf32>
    %30 = tpu.matmul %27, %29, %cst_23 {dimension_numbers = #tpu.dot_dimension_numbers<[1], [0], [0], [1], [0, 0, 1, 1], [], []>} : vector<64x64xbf16>, vector<64x32xbf16>, vector<64x32xf32> -> vector<64x32xf32>
    %31 = arith.addf %26, %30 : vector<64x32xf32>
    %32 = vector.shape_cast %11 : vector<10x8x64xbf16> to vector<80x64xbf16>
    %33 = vector.extract_strided_slice %32 {offsets = [0, 0], sizes = [64, 64], strides = [1, 1]} : vector<80x64xbf16> to vector<64x64xbf16>
    %c1 = arith.constant 1 : index
    %c0_24 = arith.constant 0 : index
    %c0_25 = arith.constant 0 : index
    %34 = vector.load %arg5[%c1, %c0_24, %c0_25] : memref<9x64x32xbf16, #tpu.memory_space<vmem>>, vector<1x64x32xbf16>
    %35 = vector.shape_cast %34 : vector<1x64x32xbf16> to vector<64x32xbf16>
    %cst_26 = arith.constant dense<0.000000e+00> : vector<64x32xf32>
    %36 = tpu.matmul %33, %35, %cst_26 {dimension_numbers = #tpu.dot_dimension_numbers<[1], [0], [0], [1], [0, 0, 1, 1], [], []>} : vector<64x64xbf16>, vector<64x32xbf16>, vector<64x32xf32> -> vector<64x32xf32>
    %37 = arith.addf %31, %36 : vector<64x32xf32>
    %38 = vector.extract_strided_slice %32 {offsets = [8, 0], sizes = [64, 64], strides = [1, 1]} : vector<80x64xbf16> to vector<64x64xbf16>
    %c4 = arith.constant 4 : index
    %c0_27 = arith.constant 0 : index
    %c0_28 = arith.constant 0 : index
    %39 = vector.load %arg5[%c4, %c0_27, %c0_28] : memref<9x64x32xbf16, #tpu.memory_space<vmem>>, vector<1x64x32xbf16>
    %40 = vector.shape_cast %39 : vector<1x64x32xbf16> to vector<64x32xbf16>
    %cst_29 = arith.constant dense<0.000000e+00> : vector<64x32xf32>
    %41 = tpu.matmul %38, %40, %cst_29 {dimension_numbers = #tpu.dot_dimension_numbers<[1], [0], [0], [1], [0, 0, 1, 1], [], []>} : vector<64x64xbf16>, vector<64x32xbf16>, vector<64x32xf32> -> vector<64x32xf32>
    %42 = arith.addf %37, %41 : vector<64x32xf32>
    %43 = vector.extract_strided_slice %32 {offsets = [16, 0], sizes = [64, 64], strides = [1, 1]} : vector<80x64xbf16> to vector<64x64xbf16>
    %c7 = arith.constant 7 : index
    %c0_30 = arith.constant 0 : index
    %c0_31 = arith.constant 0 : index
    %44 = vector.load %arg5[%c7, %c0_30, %c0_31] : memref<9x64x32xbf16, #tpu.memory_space<vmem>>, vector<1x64x32xbf16>
    %45 = vector.shape_cast %44 : vector<1x64x32xbf16> to vector<64x32xbf16>
    %cst_32 = arith.constant dense<0.000000e+00> : vector<64x32xf32>
    %46 = tpu.matmul %43, %45, %cst_32 {dimension_numbers = #tpu.dot_dimension_numbers<[1], [0], [0], [1], [0, 0, 1, 1], [], []>} : vector<64x64xbf16>, vector<64x32xbf16>, vector<64x32xf32> -> vector<64x32xf32>
    %47 = arith.addf %42, %46 : vector<64x32xf32>
    %48 = vector.extract_strided_slice %11 {offsets = [0, 1, 0], sizes = [10, 7, 64], strides = [1, 1, 1]} : vector<10x8x64xbf16> to vector<10x7x64xbf16>
    %49 = tpu.concatenate %48, %12 in 1 : vector<10x7x64xbf16>, vector<10x1x64xbf16> -> vector<10x8x64xbf16>
    %50 = vector.shape_cast %49 : vector<10x8x64xbf16> to vector<80x64xbf16>
    %51 = vector.extract_strided_slice %50 {offsets = [0, 0], sizes = [64, 64], strides = [1, 1]} : vector<80x64xbf16> to vector<64x64xbf16>
    %c2 = arith.constant 2 : index
    %c0_33 = arith.constant 0 : index
    %c0_34 = arith.constant 0 : index
    %52 = vector.load %arg5[%c2, %c0_33, %c0_34] : memref<9x64x32xbf16, #tpu.memory_space<vmem>>, vector<1x64x32xbf16>
    %53 = vector.shape_cast %52 : vector<1x64x32xbf16> to vector<64x32xbf16>
    %cst_35 = arith.constant dense<0.000000e+00> : vector<64x32xf32>
    %54 = tpu.matmul %51, %53, %cst_35 {dimension_numbers = #tpu.dot_dimension_numbers<[1], [0], [0], [1], [0, 0, 1, 1], [], []>} : vector<64x64xbf16>, vector<64x32xbf16>, vector<64x32xf32> -> vector<64x32xf32>
    %55 = arith.addf %47, %54 : vector<64x32xf32>
    %56 = vector.extract_strided_slice %50 {offsets = [8, 0], sizes = [64, 64], strides = [1, 1]} : vector<80x64xbf16> to vector<64x64xbf16>
    %c5 = arith.constant 5 : index
    %c0_36 = arith.constant 0 : index
    %c0_37 = arith.constant 0 : index
    %57 = vector.load %arg5[%c5, %c0_36, %c0_37] : memref<9x64x32xbf16, #tpu.memory_space<vmem>>, vector<1x64x32xbf16>
    %58 = vector.shape_cast %57 : vector<1x64x32xbf16> to vector<64x32xbf16>
    %cst_38 = arith.constant dense<0.000000e+00> : vector<64x32xf32>
    %59 = tpu.matmul %56, %58, %cst_38 {dimension_numbers = #tpu.dot_dimension_numbers<[1], [0], [0], [1], [0, 0, 1, 1], [], []>} : vector<64x64xbf16>, vector<64x32xbf16>, vector<64x32xf32> -> vector<64x32xf32>
    %60 = arith.addf %55, %59 : vector<64x32xf32>
    %61 = vector.extract_strided_slice %50 {offsets = [16, 0], sizes = [64, 64], strides = [1, 1]} : vector<80x64xbf16> to vector<64x64xbf16>
    %c8 = arith.constant 8 : index
    %c0_39 = arith.constant 0 : index
    %c0_40 = arith.constant 0 : index
    %62 = vector.load %arg5[%c8, %c0_39, %c0_40] : memref<9x64x32xbf16, #tpu.memory_space<vmem>>, vector<1x64x32xbf16>
    %63 = vector.shape_cast %62 : vector<1x64x32xbf16> to vector<64x32xbf16>
    %cst_41 = arith.constant dense<0.000000e+00> : vector<64x32xf32>
    %64 = tpu.matmul %61, %63, %cst_41 {dimension_numbers = #tpu.dot_dimension_numbers<[1], [0], [0], [1], [0, 0, 1, 1], [], []>} : vector<64x64xbf16>, vector<64x32xbf16>, vector<64x32xf32> -> vector<64x32xf32>
    %65 = arith.addf %60, %64 : vector<64x32xf32>
    %c0_42 = arith.constant 0 : index
    %c0_43 = arith.constant 0 : index
    %66 = vector.load %arg6[%c0_42, %c0_43] : memref<1x32xf32, #tpu.memory_space<vmem>>, vector<1x32xf32>
    %67 = vector.broadcast %66 : vector<1x32xf32> to vector<64x32xf32>
    %68 = arith.addf %65, %67 : vector<64x32xf32>
    %69 = vector.shape_cast %68 : vector<64x32xf32> to vector<8x8x32xf32>
    %70 = arith.truncf %69 : vector<8x8x32xf32> to vector<8x8x32xbf16>
    %c0_44 = arith.constant 0 : index
    %c0_45 = arith.constant 0 : index
    %c0_46 = arith.constant 0 : index
    %c0_47 = arith.constant 0 : index
    %71 = vector.load %arg7[%c0_44, %c0_45, %c0_46, %c0_47] : memref<1x8x8x32xbf16, #tpu.memory_space<vmem>>, vector<1x8x8x32xbf16>
    %72 = vector.shape_cast %71 : vector<1x8x8x32xbf16> to vector<8x8x32xbf16>
    %73 = vector.shape_cast %70 : vector<8x8x32xbf16> to vector<1x8x8x32xbf16>
    tpu.vector_store %arg7[%c0_44, %c0_45, %c0_46, %c0_47], %73 {strides = array<i32>} : memref<1x8x8x32xbf16, #tpu.memory_space<vmem>>, vector<1x8x8x32xbf16>,
    return
  }
  func.func @transform_0(%arg0: i32, %arg1: i32) -> (i32, i32, i32, i32) {
    %c8_i32 = arith.constant 8 : i32
    %0 = arith.muli %arg1, %c8_i32 : i32
    %c1_i32 = arith.constant 1 : i32
    %1 = arith.subi %0, %c1_i32 : i32
    %c0_i32 = arith.constant 0 : i32
    %2 = arith.maxsi %1, %c0_i32 : i32
    %c0_i32_0 = arith.constant 0 : i32
    %c0_i32_1 = arith.constant 0 : i32
    %c0_i32_2 = arith.constant 0 : i32
    return %arg0, %2, %c0_i32_0, %c0_i32_1 : i32, i32, i32, i32
  }
  func.func @transform_1(%arg0: i32, %arg1: i32) -> (i32, i32, i32, i32) {
    %c0_i32 = arith.constant 0 : i32
    %c0_i32_0 = arith.constant 0 : i32
    %c0_i32_1 = arith.constant 0 : i32
    return %arg0, %arg1, %c0_i32, %c0_i32_0 : i32, i32, i32, i32
  }
  func.func @transform_2(%arg0: i32, %arg1: i32) -> (i32, i32, i32, i32) {
    %c1_i32 = arith.constant 1 : i32
    %0 = arith.addi %arg1, %c1_i32 : i32
    %c8_i32 = arith.constant 8 : i32
    %1 = arith.muli %0, %c8_i32 : i32
    %c7_i32 = arith.constant 7 : i32
    %2 = arith.minsi %1, %c7_i32 : i32
    %c0_i32 = arith.constant 0 : i32
    %c0_i32_0 = arith.constant 0 : i32
    %c0_i32_1 = arith.constant 0 : i32
    return %arg0, %2, %c0_i32, %c0_i32_0 : i32, i32, i32, i32
  }
  func.func @transform_3(%arg0: i32, %arg1: i32) -> (i32, i32, i32) {
    %c0_i32 = arith.constant 0 : i32
    %c0_i32_0 = arith.constant 0 : i32
    %c0_i32_1 = arith.constant 0 : i32
    %c0_i32_2 = arith.constant 0 : i32
    return %c0_i32, %c0_i32_0, %c0_i32_1 : i32, i32, i32
  }
  func.func @transform_4(%arg0: i32, %arg1: i32) -> (i32, i32) {
    %c0_i32 = arith.constant 0 : i32
    %c0_i32_0 = arith.constant 0 : i32
    %c0_i32_1 = arith.constant 0 : i32
    return %c0_i32, %c0_i32_0 : i32, i32
  }
  func.func @transform_5(%arg0: i32, %arg1: i32) -> (i32, i32, i32, i32) {
    %c0_i32 = arith.constant 0 : i32
    %c0_i32_0 = arith.constant 0 : i32
    %c0_i32_1 = arith.constant 0 : i32
    return %arg0, %arg1, %c0_i32, %c0_i32_0 : i32, i32, i32, i32
  }
}

module attributes {stable_mosaic.version = 11 : i64} {
  func.func @_gn_kernel(%arg0: i32, %arg1: memref<1x8x8x32xbf16, #tpu.memory_space<vmem>>, %arg2: memref<1x32xf32, #tpu.memory_space<vmem>>, %arg3: memref<1x32xf32, #tpu.memory_space<vmem>>, %arg4: memref<32x32xf32, #tpu.memory_space<vmem>>, %arg5: memref<1x8x8x32xbf16, #tpu.memory_space<vmem>>) attributes {dimension_semantics = [#tpu.dimension_semantics<parallel>], iteration_bounds = array<i64: 2>, scalar_prefetch = 0 : i64, scratch_operands = 0 : i64, tpu.core_type = #tpu.core_type<tc>, window_params = [{transform_indices = @transform_0, window_bounds = array<i64: 1, 8, 8, 32>}, {pipeline_mode = #tpu.pipeline_mode<synchronous>, transform_indices = @transform_1, window_bounds = array<i64: 1, 32>}, {pipeline_mode = #tpu.pipeline_mode<synchronous>, transform_indices = @transform_2, window_bounds = array<i64: 1, 32>}, {pipeline_mode = #tpu.pipeline_mode<synchronous>, transform_indices = @transform_3, window_bounds = array<i64: 32, 32>}, {transform_indices = @transform_4, window_bounds = array<i64: 1, 8, 8, 32>}]} {
    %c0 = arith.constant 0 : index
    %c0_0 = arith.constant 0 : index
    %c0_1 = arith.constant 0 : index
    %c0_2 = arith.constant 0 : index
    %0 = vector.load %arg1[%c0, %c0_0, %c0_1, %c0_2] : memref<1x8x8x32xbf16, #tpu.memory_space<vmem>>, vector<1x8x8x32xbf16>
    %1 = vector.shape_cast %0 : vector<1x8x8x32xbf16> to vector<8x8x32xbf16>
    %2 = arith.extf %1 : vector<8x8x32xbf16> to vector<8x8x32xf32>
    %3 = vector.shape_cast %2 : vector<8x8x32xf32> to vector<64x32xf32>
    %cst = arith.constant dense<0.000000e+00> : vector<32xf32>
    %4 = vector.multi_reduction <add>, %3, %cst [0] : vector<64x32xf32> to vector<32xf32>
    %5 = vector.shape_cast %4 : vector<32xf32> to vector<1x32xf32>
    %6 = arith.mulf %3, %3 : vector<64x32xf32>
    %cst_3 = arith.constant dense<0.000000e+00> : vector<32xf32>
    %7 = vector.multi_reduction <add>, %6, %cst_3 [0] : vector<64x32xf32> to vector<32xf32>
    %8 = vector.shape_cast %7 : vector<32xf32> to vector<1x32xf32>
    %c0_4 = arith.constant 0 : index
    %c0_5 = arith.constant 0 : index
    %9 = vector.load %arg4[%c0_4, %c0_5] : memref<32x32xf32, #tpu.memory_space<vmem>>, vector<32x32xf32>
    %cst_6 = arith.constant dense<0.000000e+00> : vector<1x32xf32>
    %10 = tpu.matmul %5, %9, %cst_6 {dimension_numbers = #tpu.dot_dimension_numbers<[1], [0], [0], [1], [0, 0, 1, 1], [], []>} : vector<1x32xf32>, vector<32x32xf32>, vector<1x32xf32> -> vector<1x32xf32>
    %c0_7 = arith.constant 0 : index
    %c0_8 = arith.constant 0 : index
    %11 = vector.load %arg4[%c0_7, %c0_8] : memref<32x32xf32, #tpu.memory_space<vmem>>, vector<32x32xf32>
    %cst_9 = arith.constant dense<0.000000e+00> : vector<1x32xf32>
    %12 = tpu.matmul %8, %11, %cst_9 {dimension_numbers = #tpu.dot_dimension_numbers<[1], [0], [0], [1], [0, 0, 1, 1], [], []>} : vector<1x32xf32>, vector<32x32xf32>, vector<1x32xf32> -> vector<1x32xf32>
    %13 = arith.mulf %10, %10 : vector<1x32xf32>
    %14 = arith.subf %12, %13 : vector<1x32xf32>
    %cst_10 = arith.constant 9.99999997E-7 : f32
    %15 = vector.broadcast %cst_10 : f32 to vector<1x32xf32>
    %16 = arith.addf %14, %15 : vector<1x32xf32>
    %17 = math.rsqrt %16 : vector<1x32xf32>
    %18 = vector.broadcast %10 : vector<1x32xf32> to vector<64x32xf32>
    %19 = arith.subf %3, %18 : vector<64x32xf32>
    %c0_11 = arith.constant 0 : index
    %c0_12 = arith.constant 0 : index
    %20 = vector.load %arg2[%c0_11, %c0_12] : memref<1x32xf32, #tpu.memory_space<vmem>>, vector<1x32xf32>
    %21 = arith.mulf %17, %20 : vector<1x32xf32>
    %22 = vector.broadcast %21 : vector<1x32xf32> to vector<64x32xf32>
    %23 = arith.mulf %19, %22 : vector<64x32xf32>
    %c0_13 = arith.constant 0 : index
    %c0_14 = arith.constant 0 : index
    %24 = vector.load %arg3[%c0_13, %c0_14] : memref<1x32xf32, #tpu.memory_space<vmem>>, vector<1x32xf32>
    %25 = vector.broadcast %24 : vector<1x32xf32> to vector<64x32xf32>
    %26 = arith.addf %23, %25 : vector<64x32xf32>
    %cst_15 = arith.constant 0.000000e+00 : f32
    %27 = vector.broadcast %cst_15 : f32 to vector<64x32xf32>
    %28 = arith.subf %27, %26 : vector<64x32xf32>
    %29 = math.exp %28 : vector<64x32xf32>
    %cst_16 = arith.constant 1.000000e+00 : f32
    %30 = vector.broadcast %cst_16 : f32 to vector<64x32xf32>
    %31 = arith.addf %30, %29 : vector<64x32xf32>
    %32 = arith.divf %26, %31 : vector<64x32xf32>
    %33 = vector.shape_cast %32 : vector<64x32xf32> to vector<8x8x32xf32>
    %34 = arith.truncf %33 : vector<8x8x32xf32> to vector<8x8x32xbf16>
    %c0_17 = arith.constant 0 : index
    %c0_18 = arith.constant 0 : index
    %c0_19 = arith.constant 0 : index
    %c0_20 = arith.constant 0 : index
    %35 = vector.load %arg5[%c0_17, %c0_18, %c0_19, %c0_20] : memref<1x8x8x32xbf16, #tpu.memory_space<vmem>>, vector<1x8x8x32xbf16>
    %36 = vector.shape_cast %35 : vector<1x8x8x32xbf16> to vector<8x8x32xbf16>
    %37 = vector.shape_cast %34 : vector<8x8x32xbf16> to vector<1x8x8x32xbf16>
    tpu.vector_store %arg5[%c0_17, %c0_18, %c0_19, %c0_20], %37 {strides = array<i32>} : memref<1x8x8x32xbf16, #tpu.memory_space<vmem>>, vector<1x8x8x32xbf16>,
    return
  }
  func.func @transform_0(%arg0: i32) -> (i32, i32, i32, i32) {
    %c0_i32 = arith.constant 0 : i32
    %c0_i32_0 = arith.constant 0 : i32
    %c0_i32_1 = arith.constant 0 : i32
    %c0_i32_2 = arith.constant 0 : i32
    return %arg0, %c0_i32, %c0_i32_0, %c0_i32_1 : i32, i32, i32, i32
  }
  func.func @transform_1(%arg0: i32) -> (i32, i32) {
    %c0_i32 = arith.constant 0 : i32
    %c0_i32_0 = arith.constant 0 : i32
    %c0_i32_1 = arith.constant 0 : i32
    return %c0_i32, %c0_i32_0 : i32, i32
  }
  func.func @transform_2(%arg0: i32) -> (i32, i32) {
    %c0_i32 = arith.constant 0 : i32
    %c0_i32_0 = arith.constant 0 : i32
    %c0_i32_1 = arith.constant 0 : i32
    return %c0_i32, %c0_i32_0 : i32, i32
  }
  func.func @transform_3(%arg0: i32) -> (i32, i32) {
    %c0_i32 = arith.constant 0 : i32
    %c0_i32_0 = arith.constant 0 : i32
    %c0_i32_1 = arith.constant 0 : i32
    return %c0_i32, %c0_i32_0 : i32, i32
  }
  func.func @transform_4(%arg0: i32) -> (i32, i32, i32, i32) {
    %c0_i32 = arith.constant 0 : i32
    %c0_i32_0 = arith.constant 0 : i32
    %c0_i32_1 = arith.constant 0 : i32
    %c0_i32_2 = arith.constant 0 : i32
    return %arg0, %c0_i32, %c0_i32_0, %c0_i32_1 : i32, i32, i32, i32
  }
}

module attributes {stable_mosaic.version = 11 : i64} {
  func.func @_conv1x1_kernel(%arg0: i32, %arg1: memref<128x64xbf16, #tpu.memory_space<vmem>>, %arg2: memref<64x32xbf16, #tpu.memory_space<vmem>>, %arg3: memref<1x32xf32, #tpu.memory_space<vmem>>, %arg4: memref<128x32xbf16, #tpu.memory_space<vmem>>) attributes {dimension_semantics = [#tpu.dimension_semantics<parallel>], iteration_bounds = array<i64: 1>, scalar_prefetch = 0 : i64, scratch_operands = 0 : i64, tpu.core_type = #tpu.core_type<tc>, window_params = [{transform_indices = @transform_0, window_bounds = array<i64: 128, 64>}, {pipeline_mode = #tpu.pipeline_mode<synchronous>, transform_indices = @transform_1, window_bounds = array<i64: 64, 32>}, {pipeline_mode = #tpu.pipeline_mode<synchronous>, transform_indices = @transform_2, window_bounds = array<i64: 1, 32>}, {transform_indices = @transform_3, window_bounds = array<i64: 128, 32>}]} {
    %c0 = arith.constant 0 : index
    %c0_0 = arith.constant 0 : index
    %0 = vector.load %arg1[%c0, %c0_0] : memref<128x64xbf16, #tpu.memory_space<vmem>>, vector<128x64xbf16>
    %c0_1 = arith.constant 0 : index
    %c0_2 = arith.constant 0 : index
    %1 = vector.load %arg2[%c0_1, %c0_2] : memref<64x32xbf16, #tpu.memory_space<vmem>>, vector<64x32xbf16>
    %cst = arith.constant dense<0.000000e+00> : vector<128x32xf32>
    %2 = tpu.matmul %0, %1, %cst {dimension_numbers = #tpu.dot_dimension_numbers<[1], [0], [0], [1], [0, 0, 1, 1], [], []>} : vector<128x64xbf16>, vector<64x32xbf16>, vector<128x32xf32> -> vector<128x32xf32>
    %c0_3 = arith.constant 0 : index
    %c0_4 = arith.constant 0 : index
    %3 = vector.load %arg3[%c0_3, %c0_4] : memref<1x32xf32, #tpu.memory_space<vmem>>, vector<1x32xf32>
    %4 = vector.broadcast %3 : vector<1x32xf32> to vector<128x32xf32>
    %5 = arith.addf %2, %4 : vector<128x32xf32>
    %6 = arith.truncf %5 : vector<128x32xf32> to vector<128x32xbf16>
    %c0_5 = arith.constant 0 : index
    %c0_6 = arith.constant 0 : index
    %7 = vector.load %arg4[%c0_5, %c0_6] : memref<128x32xbf16, #tpu.memory_space<vmem>>, vector<128x32xbf16>
    tpu.vector_store %arg4[%c0_5, %c0_6], %6 {strides = array<i32>} : memref<128x32xbf16, #tpu.memory_space<vmem>>, vector<128x32xbf16>,
    return
  }
  func.func @transform_0(%arg0: i32) -> (i32, i32) {
    %c0_i32 = arith.constant 0 : i32
    %c0_i32_0 = arith.constant 0 : i32
    return %arg0, %c0_i32 : i32, i32
  }
  func.func @transform_1(%arg0: i32) -> (i32, i32) {
    %c0_i32 = arith.constant 0 : i32
    %c0_i32_0 = arith.constant 0 : i32
    %c0_i32_1 = arith.constant 0 : i32
    return %c0_i32, %c0_i32_0 : i32, i32
  }
  func.func @transform_2(%arg0: i32) -> (i32, i32) {
    %c0_i32 = arith.constant 0 : i32
    %c0_i32_0 = arith.constant 0 : i32
    %c0_i32_1 = arith.constant 0 : i32
    return %c0_i32, %c0_i32_0 : i32, i32
  }
  func.func @transform_3(%arg0: i32) -> (i32, i32) {
    %c0_i32 = arith.constant 0 : i32
    %c0_i32_0 = arith.constant 0 : i32
    return %arg0, %c0_i32 : i32, i32
  }
}

module attributes {stable_mosaic.version = 11 : i64} {
  func.func @_conv3x3_kernel(%arg0: i32, %arg1: i32, %arg2: memref<1x1x8x32xbf16, #tpu.memory_space<vmem>>, %arg3: memref<1x8x8x32xbf16, #tpu.memory_space<vmem>>, %arg4: memref<1x1x8x32xbf16, #tpu.memory_space<vmem>>, %arg5: memref<9x32x32xbf16, #tpu.memory_space<vmem>>, %arg6: memref<1x32xf32, #tpu.memory_space<vmem>>, %arg7: memref<1x8x8x32xbf16, #tpu.memory_space<vmem>>) attributes {dimension_semantics = [#tpu.dimension_semantics<parallel>, #tpu.dimension_semantics<parallel>], iteration_bounds = array<i64: 2, 1>, scalar_prefetch = 0 : i64, scratch_operands = 0 : i64, tpu.core_type = #tpu.core_type<tc>, window_params = [{transform_indices = @transform_0, window_bounds = array<i64: 1, 1, 8, 32>}, {transform_indices = @transform_1, window_bounds = array<i64: 1, 8, 8, 32>}, {transform_indices = @transform_2, window_bounds = array<i64: 1, 1, 8, 32>}, {pipeline_mode = #tpu.pipeline_mode<synchronous>, transform_indices = @transform_3, window_bounds = array<i64: 9, 32, 32>}, {pipeline_mode = #tpu.pipeline_mode<synchronous>, transform_indices = @transform_4, window_bounds = array<i64: 1, 32>}, {transform_indices = @transform_5, window_bounds = array<i64: 1, 8, 8, 32>}]} {
    %cst = arith.constant 0.000000e+00 : bf16
    %0 = vector.broadcast %cst : bf16 to vector<1x8x32xbf16>
    %c0_i32 = arith.constant 0 : i32
    %1 = arith.cmpi sgt, %arg1, %c0_i32 : i32
    %c0 = arith.constant 0 : index
    %c0_0 = arith.constant 0 : index
    %c0_1 = arith.constant 0 : index
    %c0_2 = arith.constant 0 : index
    %2 = vector.load %arg2[%c0, %c0_0, %c0_1, %c0_2] : memref<1x1x8x32xbf16, #tpu.memory_space<vmem>>, vector<1x1x8x32xbf16>
    %3 = vector.shape_cast %2 : vector<1x1x8x32xbf16> to vector<1x8x32xbf16>
    %4 = arith.select %1, %3, %0 : vector<1x8x32xbf16>
    %c0_i32_3 = arith.constant 0 : i32
    %5 = arith.cmpi slt, %arg1, %c0_i32_3 : i32
    %c0_4 = arith.constant 0 : index
    %c0_5 = arith.constant 0 : index
    %c0_6 = arith.constant 0 : index
    %c0_7 = arith.constant 0 : index
    %6 = vector.load %arg4[%c0_4, %c0_5, %c0_6, %c0_7] : memref<1x1x8x32xbf16, #tpu.memory_space<vmem>>, vector<1x1x8x32xbf16>
    %7 = vector.shape_cast %6 : vector<1x1x8x32xbf16> to vector<1x8x32xbf16>
    %8 = arith.select %5, %7, %0 : vector<1x8x32xbf16>
    %c0_8 = arith.constant 0 : index
    %c0_9 = arith.constant 0 : index
    %c0_10 = arith.constant 0 : index
    %c0_11 = arith.constant 0 : index
    %9 = vector.load %arg3[%c0_8, %c0_9, %c0_10, %c0_11] : memref<1x8x8x32xbf16, #tpu.memory_space<vmem>>, vector<1x8x8x32xbf16>
    %10 = vector.shape_cast %9 : vector<1x8x8x32xbf16> to vector<8x8x32xbf16>
    %11 = tpu.concatenate %4, %10, %8 in 0 : vector<1x8x32xbf16>, vector<8x8x32xbf16>, vector<1x8x32xbf16> -> vector<10x8x32xbf16>
    %cst_12 = arith.constant 0.000000e+00 : bf16
    %12 = vector.broadcast %cst_12 : bf16 to vector<10x1x32xbf16>
    %cst_13 = arith.constant 0.000000e+00 : f32
    %13 = vector.broadcast %cst_13 : f32 to vector<64x32xf32>
    %14 = vector.extract_strided_slice %11 {offsets = [0, 0, 0], sizes = [10, 7, 32], strides = [1, 1, 1]} : vector<10x8x32xbf16> to vector<10x7x32xbf16>
    %15 = tpu.concatenate %12, %14 in 1 : vector<10x1x32xbf16>, vector<10x7x32xbf16> -> vector<10x8x32xbf16>
    %16 = vector.shape_cast %15 : vector<10x8x32xbf16> to vector<80x32xbf16>
    %17 = vector.extract_strided_slice %16 {offsets = [0, 0], sizes = [64, 32], strides = [1, 1]} : vector<80x32xbf16> to vector<64x32xbf16>
    %c0_14 = arith.constant 0 : index
    %c0_15 = arith.constant 0 : index
    %c0_16 = arith.constant 0 : index
    %18 = vector.load %arg5[%c0_14, %c0_15, %c0_16] : memref<9x32x32xbf16, #tpu.memory_space<vmem>>, vector<1x32x32xbf16>
    %19 = vector.shape_cast %18 : vector<1x32x32xbf16> to vector<32x32xbf16>
    %cst_17 = arith.constant dense<0.000000e+00> : vector<64x32xf32>
    %20 = tpu.matmul %17, %19, %cst_17 {dimension_numbers = #tpu.dot_dimension_numbers<[1], [0], [0], [1], [0, 0, 1, 1], [], []>} : vector<64x32xbf16>, vector<32x32xbf16>, vector<64x32xf32> -> vector<64x32xf32>
    %21 = arith.addf %13, %20 : vector<64x32xf32>
    %22 = vector.extract_strided_slice %16 {offsets = [8, 0], sizes = [64, 32], strides = [1, 1]} : vector<80x32xbf16> to vector<64x32xbf16>
    %c3 = arith.constant 3 : index
    %c0_18 = arith.constant 0 : index
    %c0_19 = arith.constant 0 : index
    %23 = vector.load %arg5[%c3, %c0_18, %c0_19] : memref<9x32x32xbf16, #tpu.memory_space<vmem>>, vector<1x32x32xbf16>
    %24 = vector.shape_cast %23 : vector<1x32x32xbf16> to vector<32x32xbf16>
    %cst_20 = arith.constant dense<0.000000e+00> : vector<64x32xf32>
    %25 = tpu.matmul %22, %24, %cst_20 {dimension_numbers = #tpu.dot_dimension_numbers<[1], [0], [0], [1], [0, 0, 1, 1], [], []>} : vector<64x32xbf16>, vector<32x32xbf16>, vector<64x32xf32> -> vector<64x32xf32>
    %26 = arith.addf %21, %25 : vector<64x32xf32>
    %27 = vector.extract_strided_slice %16 {offsets = [16, 0], sizes = [64, 32], strides = [1, 1]} : vector<80x32xbf16> to vector<64x32xbf16>
    %c6 = arith.constant 6 : index
    %c0_21 = arith.constant 0 : index
    %c0_22 = arith.constant 0 : index
    %28 = vector.load %arg5[%c6, %c0_21, %c0_22] : memref<9x32x32xbf16, #tpu.memory_space<vmem>>, vector<1x32x32xbf16>
    %29 = vector.shape_cast %28 : vector<1x32x32xbf16> to vector<32x32xbf16>
    %cst_23 = arith.constant dense<0.000000e+00> : vector<64x32xf32>
    %30 = tpu.matmul %27, %29, %cst_23 {dimension_numbers = #tpu.dot_dimension_numbers<[1], [0], [0], [1], [0, 0, 1, 1], [], []>} : vector<64x32xbf16>, vector<32x32xbf16>, vector<64x32xf32> -> vector<64x32xf32>
    %31 = arith.addf %26, %30 : vector<64x32xf32>
    %32 = vector.shape_cast %11 : vector<10x8x32xbf16> to vector<80x32xbf16>
    %33 = vector.extract_strided_slice %32 {offsets = [0, 0], sizes = [64, 32], strides = [1, 1]} : vector<80x32xbf16> to vector<64x32xbf16>
    %c1 = arith.constant 1 : index
    %c0_24 = arith.constant 0 : index
    %c0_25 = arith.constant 0 : index
    %34 = vector.load %arg5[%c1, %c0_24, %c0_25] : memref<9x32x32xbf16, #tpu.memory_space<vmem>>, vector<1x32x32xbf16>
    %35 = vector.shape_cast %34 : vector<1x32x32xbf16> to vector<32x32xbf16>
    %cst_26 = arith.constant dense<0.000000e+00> : vector<64x32xf32>
    %36 = tpu.matmul %33, %35, %cst_26 {dimension_numbers = #tpu.dot_dimension_numbers<[1], [0], [0], [1], [0, 0, 1, 1], [], []>} : vector<64x32xbf16>, vector<32x32xbf16>, vector<64x32xf32> -> vector<64x32xf32>
    %37 = arith.addf %31, %36 : vector<64x32xf32>
    %38 = vector.extract_strided_slice %32 {offsets = [8, 0], sizes = [64, 32], strides = [1, 1]} : vector<80x32xbf16> to vector<64x32xbf16>
    %c4 = arith.constant 4 : index
    %c0_27 = arith.constant 0 : index
    %c0_28 = arith.constant 0 : index
    %39 = vector.load %arg5[%c4, %c0_27, %c0_28] : memref<9x32x32xbf16, #tpu.memory_space<vmem>>, vector<1x32x32xbf16>
    %40 = vector.shape_cast %39 : vector<1x32x32xbf16> to vector<32x32xbf16>
    %cst_29 = arith.constant dense<0.000000e+00> : vector<64x32xf32>
    %41 = tpu.matmul %38, %40, %cst_29 {dimension_numbers = #tpu.dot_dimension_numbers<[1], [0], [0], [1], [0, 0, 1, 1], [], []>} : vector<64x32xbf16>, vector<32x32xbf16>, vector<64x32xf32> -> vector<64x32xf32>
    %42 = arith.addf %37, %41 : vector<64x32xf32>
    %43 = vector.extract_strided_slice %32 {offsets = [16, 0], sizes = [64, 32], strides = [1, 1]} : vector<80x32xbf16> to vector<64x32xbf16>
    %c7 = arith.constant 7 : index
    %c0_30 = arith.constant 0 : index
    %c0_31 = arith.constant 0 : index
    %44 = vector.load %arg5[%c7, %c0_30, %c0_31] : memref<9x32x32xbf16, #tpu.memory_space<vmem>>, vector<1x32x32xbf16>
    %45 = vector.shape_cast %44 : vector<1x32x32xbf16> to vector<32x32xbf16>
    %cst_32 = arith.constant dense<0.000000e+00> : vector<64x32xf32>
    %46 = tpu.matmul %43, %45, %cst_32 {dimension_numbers = #tpu.dot_dimension_numbers<[1], [0], [0], [1], [0, 0, 1, 1], [], []>} : vector<64x32xbf16>, vector<32x32xbf16>, vector<64x32xf32> -> vector<64x32xf32>
    %47 = arith.addf %42, %46 : vector<64x32xf32>
    %48 = vector.extract_strided_slice %11 {offsets = [0, 1, 0], sizes = [10, 7, 32], strides = [1, 1, 1]} : vector<10x8x32xbf16> to vector<10x7x32xbf16>
    %49 = tpu.concatenate %48, %12 in 1 : vector<10x7x32xbf16>, vector<10x1x32xbf16> -> vector<10x8x32xbf16>
    %50 = vector.shape_cast %49 : vector<10x8x32xbf16> to vector<80x32xbf16>
    %51 = vector.extract_strided_slice %50 {offsets = [0, 0], sizes = [64, 32], strides = [1, 1]} : vector<80x32xbf16> to vector<64x32xbf16>
    %c2 = arith.constant 2 : index
    %c0_33 = arith.constant 0 : index
    %c0_34 = arith.constant 0 : index
    %52 = vector.load %arg5[%c2, %c0_33, %c0_34] : memref<9x32x32xbf16, #tpu.memory_space<vmem>>, vector<1x32x32xbf16>
    %53 = vector.shape_cast %52 : vector<1x32x32xbf16> to vector<32x32xbf16>
    %cst_35 = arith.constant dense<0.000000e+00> : vector<64x32xf32>
    %54 = tpu.matmul %51, %53, %cst_35 {dimension_numbers = #tpu.dot_dimension_numbers<[1], [0], [0], [1], [0, 0, 1, 1], [], []>} : vector<64x32xbf16>, vector<32x32xbf16>, vector<64x32xf32> -> vector<64x32xf32>
    %55 = arith.addf %47, %54 : vector<64x32xf32>
    %56 = vector.extract_strided_slice %50 {offsets = [8, 0], sizes = [64, 32], strides = [1, 1]} : vector<80x32xbf16> to vector<64x32xbf16>
    %c5 = arith.constant 5 : index
    %c0_36 = arith.constant 0 : index
    %c0_37 = arith.constant 0 : index
    %57 = vector.load %arg5[%c5, %c0_36, %c0_37] : memref<9x32x32xbf16, #tpu.memory_space<vmem>>, vector<1x32x32xbf16>
    %58 = vector.shape_cast %57 : vector<1x32x32xbf16> to vector<32x32xbf16>
    %cst_38 = arith.constant dense<0.000000e+00> : vector<64x32xf32>
    %59 = tpu.matmul %56, %58, %cst_38 {dimension_numbers = #tpu.dot_dimension_numbers<[1], [0], [0], [1], [0, 0, 1, 1], [], []>} : vector<64x32xbf16>, vector<32x32xbf16>, vector<64x32xf32> -> vector<64x32xf32>
    %60 = arith.addf %55, %59 : vector<64x32xf32>
    %61 = vector.extract_strided_slice %50 {offsets = [16, 0], sizes = [64, 32], strides = [1, 1]} : vector<80x32xbf16> to vector<64x32xbf16>
    %c8 = arith.constant 8 : index
    %c0_39 = arith.constant 0 : index
    %c0_40 = arith.constant 0 : index
    %62 = vector.load %arg5[%c8, %c0_39, %c0_40] : memref<9x32x32xbf16, #tpu.memory_space<vmem>>, vector<1x32x32xbf16>
    %63 = vector.shape_cast %62 : vector<1x32x32xbf16> to vector<32x32xbf16>
    %cst_41 = arith.constant dense<0.000000e+00> : vector<64x32xf32>
    %64 = tpu.matmul %61, %63, %cst_41 {dimension_numbers = #tpu.dot_dimension_numbers<[1], [0], [0], [1], [0, 0, 1, 1], [], []>} : vector<64x32xbf16>, vector<32x32xbf16>, vector<64x32xf32> -> vector<64x32xf32>
    %65 = arith.addf %60, %64 : vector<64x32xf32>
    %c0_42 = arith.constant 0 : index
    %c0_43 = arith.constant 0 : index
    %66 = vector.load %arg6[%c0_42, %c0_43] : memref<1x32xf32, #tpu.memory_space<vmem>>, vector<1x32xf32>
    %67 = vector.broadcast %66 : vector<1x32xf32> to vector<64x32xf32>
    %68 = arith.addf %65, %67 : vector<64x32xf32>
    %69 = vector.shape_cast %68 : vector<64x32xf32> to vector<8x8x32xf32>
    %70 = arith.truncf %69 : vector<8x8x32xf32> to vector<8x8x32xbf16>
    %c0_44 = arith.constant 0 : index
    %c0_45 = arith.constant 0 : index
    %c0_46 = arith.constant 0 : index
    %c0_47 = arith.constant 0 : index
    %71 = vector.load %arg7[%c0_44, %c0_45, %c0_46, %c0_47] : memref<1x8x8x32xbf16, #tpu.memory_space<vmem>>, vector<1x8x8x32xbf16>
    %72 = vector.shape_cast %71 : vector<1x8x8x32xbf16> to vector<8x8x32xbf16>
    %73 = vector.shape_cast %70 : vector<8x8x32xbf16> to vector<1x8x8x32xbf16>
    tpu.vector_store %arg7[%c0_44, %c0_45, %c0_46, %c0_47], %73 {strides = array<i32>} : memref<1x8x8x32xbf16, #tpu.memory_space<vmem>>, vector<1x8x8x32xbf16>,
    return
  }
  func.func @transform_0(%arg0: i32, %arg1: i32) -> (i32, i32, i32, i32) {
    %c8_i32 = arith.constant 8 : i32
    %0 = arith.muli %arg1, %c8_i32 : i32
    %c1_i32 = arith.constant 1 : i32
    %1 = arith.subi %0, %c1_i32 : i32
    %c0_i32 = arith.constant 0 : i32
    %2 = arith.maxsi %1, %c0_i32 : i32
    %c0_i32_0 = arith.constant 0 : i32
    %c0_i32_1 = arith.constant 0 : i32
    %c0_i32_2 = arith.constant 0 : i32
    return %arg0, %2, %c0_i32_0, %c0_i32_1 : i32, i32, i32, i32
  }
  func.func @transform_1(%arg0: i32, %arg1: i32) -> (i32, i32, i32, i32) {
    %c0_i32 = arith.constant 0 : i32
    %c0_i32_0 = arith.constant 0 : i32
    %c0_i32_1 = arith.constant 0 : i32
    return %arg0, %arg1, %c0_i32, %c0_i32_0 : i32, i32, i32, i32
  }
  func.func @transform_2(%arg0: i32, %arg1: i32) -> (i32, i32, i32, i32) {
    %c1_i32 = arith.constant 1 : i32
    %0 = arith.addi %arg1, %c1_i32 : i32
    %c8_i32 = arith.constant 8 : i32
    %1 = arith.muli %0, %c8_i32 : i32
    %c7_i32 = arith.constant 7 : i32
    %2 = arith.minsi %1, %c7_i32 : i32
    %c0_i32 = arith.constant 0 : i32
    %c0_i32_0 = arith.constant 0 : i32
    %c0_i32_1 = arith.constant 0 : i32
    return %arg0, %2, %c0_i32, %c0_i32_0 : i32, i32, i32, i32
  }
  func.func @transform_3(%arg0: i32, %arg1: i32) -> (i32, i32, i32) {
    %c0_i32 = arith.constant 0 : i32
    %c0_i32_0 = arith.constant 0 : i32
    %c0_i32_1 = arith.constant 0 : i32
    %c0_i32_2 = arith.constant 0 : i32
    return %c0_i32, %c0_i32_0, %c0_i32_1 : i32, i32, i32
  }
  func.func @transform_4(%arg0: i32, %arg1: i32) -> (i32, i32) {
    %c0_i32 = arith.constant 0 : i32
    %c0_i32_0 = arith.constant 0 : i32
    %c0_i32_1 = arith.constant 0 : i32
    return %c0_i32, %c0_i32_0 : i32, i32
  }
  func.func @transform_5(%arg0: i32, %arg1: i32) -> (i32, i32, i32, i32) {
    %c0_i32 = arith.constant 0 : i32
    %c0_i32_0 = arith.constant 0 : i32
    %c0_i32_1 = arith.constant 0 : i32
    return %arg0, %arg1, %c0_i32, %c0_i32_0 : i32, i32, i32, i32
  }
}

module attributes {stable_mosaic.version = 11 : i64} {
  func.func @_conv3x3_kernel(%arg0: i32, %arg1: i32, %arg2: memref<1x1x8x32xbf16, #tpu.memory_space<vmem>>, %arg3: memref<1x8x8x32xbf16, #tpu.memory_space<vmem>>, %arg4: memref<1x1x8x32xbf16, #tpu.memory_space<vmem>>, %arg5: memref<9x32x32xbf16, #tpu.memory_space<vmem>>, %arg6: memref<1x32xf32, #tpu.memory_space<vmem>>, %arg7: memref<1x8x8x32xbf16, #tpu.memory_space<vmem>>, %arg8: memref<1x8x8x32xbf16, #tpu.memory_space<vmem>>) attributes {dimension_semantics = [#tpu.dimension_semantics<parallel>, #tpu.dimension_semantics<parallel>], iteration_bounds = array<i64: 2, 1>, scalar_prefetch = 0 : i64, scratch_operands = 0 : i64, tpu.core_type = #tpu.core_type<tc>, window_params = [{transform_indices = @transform_0, window_bounds = array<i64: 1, 1, 8, 32>}, {transform_indices = @transform_1, window_bounds = array<i64: 1, 8, 8, 32>}, {transform_indices = @transform_2, window_bounds = array<i64: 1, 1, 8, 32>}, {pipeline_mode = #tpu.pipeline_mode<synchronous>, transform_indices = @transform_3, window_bounds = array<i64: 9, 32, 32>}, {pipeline_mode = #tpu.pipeline_mode<synchronous>, transform_indices = @transform_4, window_bounds = array<i64: 1, 32>}, {transform_indices = @transform_5, window_bounds = array<i64: 1, 8, 8, 32>}, {transform_indices = @transform_6, window_bounds = array<i64: 1, 8, 8, 32>}]} {
    %cst = arith.constant 0.000000e+00 : bf16
    %0 = vector.broadcast %cst : bf16 to vector<1x8x32xbf16>
    %c0_i32 = arith.constant 0 : i32
    %1 = arith.cmpi sgt, %arg1, %c0_i32 : i32
    %c0 = arith.constant 0 : index
    %c0_0 = arith.constant 0 : index
    %c0_1 = arith.constant 0 : index
    %c0_2 = arith.constant 0 : index
    %2 = vector.load %arg2[%c0, %c0_0, %c0_1, %c0_2] : memref<1x1x8x32xbf16, #tpu.memory_space<vmem>>, vector<1x1x8x32xbf16>
    %3 = vector.shape_cast %2 : vector<1x1x8x32xbf16> to vector<1x8x32xbf16>
    %4 = arith.select %1, %3, %0 : vector<1x8x32xbf16>
    %c0_i32_3 = arith.constant 0 : i32
    %5 = arith.cmpi slt, %arg1, %c0_i32_3 : i32
    %c0_4 = arith.constant 0 : index
    %c0_5 = arith.constant 0 : index
    %c0_6 = arith.constant 0 : index
    %c0_7 = arith.constant 0 : index
    %6 = vector.load %arg4[%c0_4, %c0_5, %c0_6, %c0_7] : memref<1x1x8x32xbf16, #tpu.memory_space<vmem>>, vector<1x1x8x32xbf16>
    %7 = vector.shape_cast %6 : vector<1x1x8x32xbf16> to vector<1x8x32xbf16>
    %8 = arith.select %5, %7, %0 : vector<1x8x32xbf16>
    %c0_8 = arith.constant 0 : index
    %c0_9 = arith.constant 0 : index
    %c0_10 = arith.constant 0 : index
    %c0_11 = arith.constant 0 : index
    %9 = vector.load %arg3[%c0_8, %c0_9, %c0_10, %c0_11] : memref<1x8x8x32xbf16, #tpu.memory_space<vmem>>, vector<1x8x8x32xbf16>
    %10 = vector.shape_cast %9 : vector<1x8x8x32xbf16> to vector<8x8x32xbf16>
    %11 = tpu.concatenate %4, %10, %8 in 0 : vector<1x8x32xbf16>, vector<8x8x32xbf16>, vector<1x8x32xbf16> -> vector<10x8x32xbf16>
    %cst_12 = arith.constant 0.000000e+00 : bf16
    %12 = vector.broadcast %cst_12 : bf16 to vector<10x1x32xbf16>
    %cst_13 = arith.constant 0.000000e+00 : f32
    %13 = vector.broadcast %cst_13 : f32 to vector<64x32xf32>
    %14 = vector.extract_strided_slice %11 {offsets = [0, 0, 0], sizes = [10, 7, 32], strides = [1, 1, 1]} : vector<10x8x32xbf16> to vector<10x7x32xbf16>
    %15 = tpu.concatenate %12, %14 in 1 : vector<10x1x32xbf16>, vector<10x7x32xbf16> -> vector<10x8x32xbf16>
    %16 = vector.shape_cast %15 : vector<10x8x32xbf16> to vector<80x32xbf16>
    %17 = vector.extract_strided_slice %16 {offsets = [0, 0], sizes = [64, 32], strides = [1, 1]} : vector<80x32xbf16> to vector<64x32xbf16>
    %c0_14 = arith.constant 0 : index
    %c0_15 = arith.constant 0 : index
    %c0_16 = arith.constant 0 : index
    %18 = vector.load %arg5[%c0_14, %c0_15, %c0_16] : memref<9x32x32xbf16, #tpu.memory_space<vmem>>, vector<1x32x32xbf16>
    %19 = vector.shape_cast %18 : vector<1x32x32xbf16> to vector<32x32xbf16>
    %cst_17 = arith.constant dense<0.000000e+00> : vector<64x32xf32>
    %20 = tpu.matmul %17, %19, %cst_17 {dimension_numbers = #tpu.dot_dimension_numbers<[1], [0], [0], [1], [0, 0, 1, 1], [], []>} : vector<64x32xbf16>, vector<32x32xbf16>, vector<64x32xf32> -> vector<64x32xf32>
    %21 = arith.addf %13, %20 : vector<64x32xf32>
    %22 = vector.extract_strided_slice %16 {offsets = [8, 0], sizes = [64, 32], strides = [1, 1]} : vector<80x32xbf16> to vector<64x32xbf16>
    %c3 = arith.constant 3 : index
    %c0_18 = arith.constant 0 : index
    %c0_19 = arith.constant 0 : index
    %23 = vector.load %arg5[%c3, %c0_18, %c0_19] : memref<9x32x32xbf16, #tpu.memory_space<vmem>>, vector<1x32x32xbf16>
    %24 = vector.shape_cast %23 : vector<1x32x32xbf16> to vector<32x32xbf16>
    %cst_20 = arith.constant dense<0.000000e+00> : vector<64x32xf32>
    %25 = tpu.matmul %22, %24, %cst_20 {dimension_numbers = #tpu.dot_dimension_numbers<[1], [0], [0], [1], [0, 0, 1, 1], [], []>} : vector<64x32xbf16>, vector<32x32xbf16>, vector<64x32xf32> -> vector<64x32xf32>
    %26 = arith.addf %21, %25 : vector<64x32xf32>
    %27 = vector.extract_strided_slice %16 {offsets = [16, 0], sizes = [64, 32], strides = [1, 1]} : vector<80x32xbf16> to vector<64x32xbf16>
    %c6 = arith.constant 6 : index
    %c0_21 = arith.constant 0 : index
    %c0_22 = arith.constant 0 : index
    %28 = vector.load %arg5[%c6, %c0_21, %c0_22] : memref<9x32x32xbf16, #tpu.memory_space<vmem>>, vector<1x32x32xbf16>
    %29 = vector.shape_cast %28 : vector<1x32x32xbf16> to vector<32x32xbf16>
    %cst_23 = arith.constant dense<0.000000e+00> : vector<64x32xf32>
    %30 = tpu.matmul %27, %29, %cst_23 {dimension_numbers = #tpu.dot_dimension_numbers<[1], [0], [0], [1], [0, 0, 1, 1], [], []>} : vector<64x32xbf16>, vector<32x32xbf16>, vector<64x32xf32> -> vector<64x32xf32>
    %31 = arith.addf %26, %30 : vector<64x32xf32>
    %32 = vector.shape_cast %11 : vector<10x8x32xbf16> to vector<80x32xbf16>
    %33 = vector.extract_strided_slice %32 {offsets = [0, 0], sizes = [64, 32], strides = [1, 1]} : vector<80x32xbf16> to vector<64x32xbf16>
    %c1 = arith.constant 1 : index
    %c0_24 = arith.constant 0 : index
    %c0_25 = arith.constant 0 : index
    %34 = vector.load %arg5[%c1, %c0_24, %c0_25] : memref<9x32x32xbf16, #tpu.memory_space<vmem>>, vector<1x32x32xbf16>
    %35 = vector.shape_cast %34 : vector<1x32x32xbf16> to vector<32x32xbf16>
    %cst_26 = arith.constant dense<0.000000e+00> : vector<64x32xf32>
    %36 = tpu.matmul %33, %35, %cst_26 {dimension_numbers = #tpu.dot_dimension_numbers<[1], [0], [0], [1], [0, 0, 1, 1], [], []>} : vector<64x32xbf16>, vector<32x32xbf16>, vector<64x32xf32> -> vector<64x32xf32>
    %37 = arith.addf %31, %36 : vector<64x32xf32>
    %38 = vector.extract_strided_slice %32 {offsets = [8, 0], sizes = [64, 32], strides = [1, 1]} : vector<80x32xbf16> to vector<64x32xbf16>
    %c4 = arith.constant 4 : index
    %c0_27 = arith.constant 0 : index
    %c0_28 = arith.constant 0 : index
    %39 = vector.load %arg5[%c4, %c0_27, %c0_28] : memref<9x32x32xbf16, #tpu.memory_space<vmem>>, vector<1x32x32xbf16>
    %40 = vector.shape_cast %39 : vector<1x32x32xbf16> to vector<32x32xbf16>
    %cst_29 = arith.constant dense<0.000000e+00> : vector<64x32xf32>
    %41 = tpu.matmul %38, %40, %cst_29 {dimension_numbers = #tpu.dot_dimension_numbers<[1], [0], [0], [1], [0, 0, 1, 1], [], []>} : vector<64x32xbf16>, vector<32x32xbf16>, vector<64x32xf32> -> vector<64x32xf32>
    %42 = arith.addf %37, %41 : vector<64x32xf32>
    %43 = vector.extract_strided_slice %32 {offsets = [16, 0], sizes = [64, 32], strides = [1, 1]} : vector<80x32xbf16> to vector<64x32xbf16>
    %c7 = arith.constant 7 : index
    %c0_30 = arith.constant 0 : index
    %c0_31 = arith.constant 0 : index
    %44 = vector.load %arg5[%c7, %c0_30, %c0_31] : memref<9x32x32xbf16, #tpu.memory_space<vmem>>, vector<1x32x32xbf16>
    %45 = vector.shape_cast %44 : vector<1x32x32xbf16> to vector<32x32xbf16>
    %cst_32 = arith.constant dense<0.000000e+00> : vector<64x32xf32>
    %46 = tpu.matmul %43, %45, %cst_32 {dimension_numbers = #tpu.dot_dimension_numbers<[1], [0], [0], [1], [0, 0, 1, 1], [], []>} : vector<64x32xbf16>, vector<32x32xbf16>, vector<64x32xf32> -> vector<64x32xf32>
    %47 = arith.addf %42, %46 : vector<64x32xf32>
    %48 = vector.extract_strided_slice %11 {offsets = [0, 1, 0], sizes = [10, 7, 32], strides = [1, 1, 1]} : vector<10x8x32xbf16> to vector<10x7x32xbf16>
    %49 = tpu.concatenate %48, %12 in 1 : vector<10x7x32xbf16>, vector<10x1x32xbf16> -> vector<10x8x32xbf16>
    %50 = vector.shape_cast %49 : vector<10x8x32xbf16> to vector<80x32xbf16>
    %51 = vector.extract_strided_slice %50 {offsets = [0, 0], sizes = [64, 32], strides = [1, 1]} : vector<80x32xbf16> to vector<64x32xbf16>
    %c2 = arith.constant 2 : index
    %c0_33 = arith.constant 0 : index
    %c0_34 = arith.constant 0 : index
    %52 = vector.load %arg5[%c2, %c0_33, %c0_34] : memref<9x32x32xbf16, #tpu.memory_space<vmem>>, vector<1x32x32xbf16>
    %53 = vector.shape_cast %52 : vector<1x32x32xbf16> to vector<32x32xbf16>
    %cst_35 = arith.constant dense<0.000000e+00> : vector<64x32xf32>
    %54 = tpu.matmul %51, %53, %cst_35 {dimension_numbers = #tpu.dot_dimension_numbers<[1], [0], [0], [1], [0, 0, 1, 1], [], []>} : vector<64x32xbf16>, vector<32x32xbf16>, vector<64x32xf32> -> vector<64x32xf32>
    %55 = arith.addf %47, %54 : vector<64x32xf32>
    %56 = vector.extract_strided_slice %50 {offsets = [8, 0], sizes = [64, 32], strides = [1, 1]} : vector<80x32xbf16> to vector<64x32xbf16>
    %c5 = arith.constant 5 : index
    %c0_36 = arith.constant 0 : index
    %c0_37 = arith.constant 0 : index
    %57 = vector.load %arg5[%c5, %c0_36, %c0_37] : memref<9x32x32xbf16, #tpu.memory_space<vmem>>, vector<1x32x32xbf16>
    %58 = vector.shape_cast %57 : vector<1x32x32xbf16> to vector<32x32xbf16>
    %cst_38 = arith.constant dense<0.000000e+00> : vector<64x32xf32>
    %59 = tpu.matmul %56, %58, %cst_38 {dimension_numbers = #tpu.dot_dimension_numbers<[1], [0], [0], [1], [0, 0, 1, 1], [], []>} : vector<64x32xbf16>, vector<32x32xbf16>, vector<64x32xf32> -> vector<64x32xf32>
    %60 = arith.addf %55, %59 : vector<64x32xf32>
    %61 = vector.extract_strided_slice %50 {offsets = [16, 0], sizes = [64, 32], strides = [1, 1]} : vector<80x32xbf16> to vector<64x32xbf16>
    %c8 = arith.constant 8 : index
    %c0_39 = arith.constant 0 : index
    %c0_40 = arith.constant 0 : index
    %62 = vector.load %arg5[%c8, %c0_39, %c0_40] : memref<9x32x32xbf16, #tpu.memory_space<vmem>>, vector<1x32x32xbf16>
    %63 = vector.shape_cast %62 : vector<1x32x32xbf16> to vector<32x32xbf16>
    %cst_41 = arith.constant dense<0.000000e+00> : vector<64x32xf32>
    %64 = tpu.matmul %61, %63, %cst_41 {dimension_numbers = #tpu.dot_dimension_numbers<[1], [0], [0], [1], [0, 0, 1, 1], [], []>} : vector<64x32xbf16>, vector<32x32xbf16>, vector<64x32xf32> -> vector<64x32xf32>
    %65 = arith.addf %60, %64 : vector<64x32xf32>
    %c0_42 = arith.constant 0 : index
    %c0_43 = arith.constant 0 : index
    %66 = vector.load %arg6[%c0_42, %c0_43] : memref<1x32xf32, #tpu.memory_space<vmem>>, vector<1x32xf32>
    %67 = vector.broadcast %66 : vector<1x32xf32> to vector<64x32xf32>
    %68 = arith.addf %65, %67 : vector<64x32xf32>
    %69 = vector.shape_cast %68 : vector<64x32xf32> to vector<8x8x32xf32>
    %c0_44 = arith.constant 0 : index
    %c0_45 = arith.constant 0 : index
    %c0_46 = arith.constant 0 : index
    %c0_47 = arith.constant 0 : index
    %70 = vector.load %arg7[%c0_44, %c0_45, %c0_46, %c0_47] : memref<1x8x8x32xbf16, #tpu.memory_space<vmem>>, vector<1x8x8x32xbf16>
    %71 = vector.shape_cast %70 : vector<1x8x8x32xbf16> to vector<8x8x32xbf16>
    %72 = arith.extf %71 : vector<8x8x32xbf16> to vector<8x8x32xf32>
    %73 = arith.addf %69, %72 : vector<8x8x32xf32>
    %74 = arith.truncf %73 : vector<8x8x32xf32> to vector<8x8x32xbf16>
    %c0_48 = arith.constant 0 : index
    %c0_49 = arith.constant 0 : index
    %c0_50 = arith.constant 0 : index
    %c0_51 = arith.constant 0 : index
    %75 = vector.load %arg8[%c0_48, %c0_49, %c0_50, %c0_51] : memref<1x8x8x32xbf16, #tpu.memory_space<vmem>>, vector<1x8x8x32xbf16>
    %76 = vector.shape_cast %75 : vector<1x8x8x32xbf16> to vector<8x8x32xbf16>
    %77 = vector.shape_cast %74 : vector<8x8x32xbf16> to vector<1x8x8x32xbf16>
    tpu.vector_store %arg8[%c0_48, %c0_49, %c0_50, %c0_51], %77 {strides = array<i32>} : memref<1x8x8x32xbf16, #tpu.memory_space<vmem>>, vector<1x8x8x32xbf16>,
    return
  }
  func.func @transform_0(%arg0: i32, %arg1: i32) -> (i32, i32, i32, i32) {
    %c8_i32 = arith.constant 8 : i32
    %0 = arith.muli %arg1, %c8_i32 : i32
    %c1_i32 = arith.constant 1 : i32
    %1 = arith.subi %0, %c1_i32 : i32
    %c0_i32 = arith.constant 0 : i32
    %2 = arith.maxsi %1, %c0_i32 : i32
    %c0_i32_0 = arith.constant 0 : i32
    %c0_i32_1 = arith.constant 0 : i32
    %c0_i32_2 = arith.constant 0 : i32
    return %arg0, %2, %c0_i32_0, %c0_i32_1 : i32, i32, i32, i32
  }
  func.func @transform_1(%arg0: i32, %arg1: i32) -> (i32, i32, i32, i32) {
    %c0_i32 = arith.constant 0 : i32
    %c0_i32_0 = arith.constant 0 : i32
    %c0_i32_1 = arith.constant 0 : i32
    return %arg0, %arg1, %c0_i32, %c0_i32_0 : i32, i32, i32, i32
  }
  func.func @transform_2(%arg0: i32, %arg1: i32) -> (i32, i32, i32, i32) {
    %c1_i32 = arith.constant 1 : i32
    %0 = arith.addi %arg1, %c1_i32 : i32
    %c8_i32 = arith.constant 8 : i32
    %1 = arith.muli %0, %c8_i32 : i32
    %c7_i32 = arith.constant 7 : i32
    %2 = arith.minsi %1, %c7_i32 : i32
    %c0_i32 = arith.constant 0 : i32
    %c0_i32_0 = arith.constant 0 : i32
    %c0_i32_1 = arith.constant 0 : i32
    return %arg0, %2, %c0_i32, %c0_i32_0 : i32, i32, i32, i32
  }
  func.func @transform_3(%arg0: i32, %arg1: i32) -> (i32, i32, i32) {
    %c0_i32 = arith.constant 0 : i32
    %c0_i32_0 = arith.constant 0 : i32
    %c0_i32_1 = arith.constant 0 : i32
    %c0_i32_2 = arith.constant 0 : i32
    return %c0_i32, %c0_i32_0, %c0_i32_1 : i32, i32, i32
  }
  func.func @transform_4(%arg0: i32, %arg1: i32) -> (i32, i32) {
    %c0_i32 = arith.constant 0 : i32
    %c0_i32_0 = arith.constant 0 : i32
    %c0_i32_1 = arith.constant 0 : i32
    return %c0_i32, %c0_i32_0 : i32, i32
  }
  func.func @transform_5(%arg0: i32, %arg1: i32) -> (i32, i32, i32, i32) {
    %c0_i32 = arith.constant 0 : i32
    %c0_i32_0 = arith.constant 0 : i32
    %c0_i32_1 = arith.constant 0 : i32
    return %arg0, %arg1, %c0_i32, %c0_i32_0 : i32, i32, i32, i32
  }
  func.func @transform_6(%arg0: i32, %arg1: i32) -> (i32, i32, i32, i32) {
    %c0_i32 = arith.constant 0 : i32
    %c0_i32_0 = arith.constant 0 : i32
    %c0_i32_1 = arith.constant 0 : i32
    return %arg0, %arg1, %c0_i32, %c0_i32_0 : i32, i32, i32, i32
  }
}

module attributes {stable_mosaic.version = 11 : i64} {
  func.func @_conv3x3_kernel(%arg0: i32, %arg1: i32, %arg2: memref<1x1x8x32xbf16, #tpu.memory_space<vmem>>, %arg3: memref<1x8x8x32xbf16, #tpu.memory_space<vmem>>, %arg4: memref<1x1x8x32xbf16, #tpu.memory_space<vmem>>, %arg5: memref<9x32x3xbf16, #tpu.memory_space<vmem>>, %arg6: memref<1x3xf32, #tpu.memory_space<vmem>>, %arg7: memref<1x8x8x3xf32, #tpu.memory_space<vmem>>) attributes {dimension_semantics = [#tpu.dimension_semantics<parallel>, #tpu.dimension_semantics<parallel>], iteration_bounds = array<i64: 2, 1>, scalar_prefetch = 0 : i64, scratch_operands = 0 : i64, tpu.core_type = #tpu.core_type<tc>, window_params = [{transform_indices = @transform_0, window_bounds = array<i64: 1, 1, 8, 32>}, {transform_indices = @transform_1, window_bounds = array<i64: 1, 8, 8, 32>}, {transform_indices = @transform_2, window_bounds = array<i64: 1, 1, 8, 32>}, {pipeline_mode = #tpu.pipeline_mode<synchronous>, transform_indices = @transform_3, window_bounds = array<i64: 9, 32, 3>}, {pipeline_mode = #tpu.pipeline_mode<synchronous>, transform_indices = @transform_4, window_bounds = array<i64: 1, 3>}, {transform_indices = @transform_5, window_bounds = array<i64: 1, 8, 8, 3>}]} {
    %cst = arith.constant 0.000000e+00 : bf16
    %0 = vector.broadcast %cst : bf16 to vector<1x8x32xbf16>
    %c0_i32 = arith.constant 0 : i32
    %1 = arith.cmpi sgt, %arg1, %c0_i32 : i32
    %c0 = arith.constant 0 : index
    %c0_0 = arith.constant 0 : index
    %c0_1 = arith.constant 0 : index
    %c0_2 = arith.constant 0 : index
    %2 = vector.load %arg2[%c0, %c0_0, %c0_1, %c0_2] : memref<1x1x8x32xbf16, #tpu.memory_space<vmem>>, vector<1x1x8x32xbf16>
    %3 = vector.shape_cast %2 : vector<1x1x8x32xbf16> to vector<1x8x32xbf16>
    %4 = arith.select %1, %3, %0 : vector<1x8x32xbf16>
    %c0_i32_3 = arith.constant 0 : i32
    %5 = arith.cmpi slt, %arg1, %c0_i32_3 : i32
    %c0_4 = arith.constant 0 : index
    %c0_5 = arith.constant 0 : index
    %c0_6 = arith.constant 0 : index
    %c0_7 = arith.constant 0 : index
    %6 = vector.load %arg4[%c0_4, %c0_5, %c0_6, %c0_7] : memref<1x1x8x32xbf16, #tpu.memory_space<vmem>>, vector<1x1x8x32xbf16>
    %7 = vector.shape_cast %6 : vector<1x1x8x32xbf16> to vector<1x8x32xbf16>
    %8 = arith.select %5, %7, %0 : vector<1x8x32xbf16>
    %c0_8 = arith.constant 0 : index
    %c0_9 = arith.constant 0 : index
    %c0_10 = arith.constant 0 : index
    %c0_11 = arith.constant 0 : index
    %9 = vector.load %arg3[%c0_8, %c0_9, %c0_10, %c0_11] : memref<1x8x8x32xbf16, #tpu.memory_space<vmem>>, vector<1x8x8x32xbf16>
    %10 = vector.shape_cast %9 : vector<1x8x8x32xbf16> to vector<8x8x32xbf16>
    %11 = tpu.concatenate %4, %10, %8 in 0 : vector<1x8x32xbf16>, vector<8x8x32xbf16>, vector<1x8x32xbf16> -> vector<10x8x32xbf16>
    %cst_12 = arith.constant 0.000000e+00 : bf16
    %12 = vector.broadcast %cst_12 : bf16 to vector<10x1x32xbf16>
    %cst_13 = arith.constant 0.000000e+00 : f32
    %13 = vector.broadcast %cst_13 : f32 to vector<64x3xf32>
    %14 = vector.extract_strided_slice %11 {offsets = [0, 0, 0], sizes = [10, 7, 32], strides = [1, 1, 1]} : vector<10x8x32xbf16> to vector<10x7x32xbf16>
    %15 = tpu.concatenate %12, %14 in 1 : vector<10x1x32xbf16>, vector<10x7x32xbf16> -> vector<10x8x32xbf16>
    %16 = vector.shape_cast %15 : vector<10x8x32xbf16> to vector<80x32xbf16>
    %17 = vector.extract_strided_slice %16 {offsets = [0, 0], sizes = [64, 32], strides = [1, 1]} : vector<80x32xbf16> to vector<64x32xbf16>
    %c0_14 = arith.constant 0 : index
    %c0_15 = arith.constant 0 : index
    %c0_16 = arith.constant 0 : index
    %18 = vector.load %arg5[%c0_14, %c0_15, %c0_16] : memref<9x32x3xbf16, #tpu.memory_space<vmem>>, vector<1x32x3xbf16>
    %19 = vector.shape_cast %18 : vector<1x32x3xbf16> to vector<32x3xbf16>
    %cst_17 = arith.constant dense<0.000000e+00> : vector<64x3xf32>
    %20 = tpu.matmul %17, %19, %cst_17 {dimension_numbers = #tpu.dot_dimension_numbers<[1], [0], [0], [1], [0, 0, 1, 1], [], []>} : vector<64x32xbf16>, vector<32x3xbf16>, vector<64x3xf32> -> vector<64x3xf32>
    %21 = arith.addf %13, %20 : vector<64x3xf32>
    %22 = vector.extract_strided_slice %16 {offsets = [8, 0], sizes = [64, 32], strides = [1, 1]} : vector<80x32xbf16> to vector<64x32xbf16>
    %c3 = arith.constant 3 : index
    %c0_18 = arith.constant 0 : index
    %c0_19 = arith.constant 0 : index
    %23 = vector.load %arg5[%c3, %c0_18, %c0_19] : memref<9x32x3xbf16, #tpu.memory_space<vmem>>, vector<1x32x3xbf16>
    %24 = vector.shape_cast %23 : vector<1x32x3xbf16> to vector<32x3xbf16>
    %cst_20 = arith.constant dense<0.000000e+00> : vector<64x3xf32>
    %25 = tpu.matmul %22, %24, %cst_20 {dimension_numbers = #tpu.dot_dimension_numbers<[1], [0], [0], [1], [0, 0, 1, 1], [], []>} : vector<64x32xbf16>, vector<32x3xbf16>, vector<64x3xf32> -> vector<64x3xf32>
    %26 = arith.addf %21, %25 : vector<64x3xf32>
    %27 = vector.extract_strided_slice %16 {offsets = [16, 0], sizes = [64, 32], strides = [1, 1]} : vector<80x32xbf16> to vector<64x32xbf16>
    %c6 = arith.constant 6 : index
    %c0_21 = arith.constant 0 : index
    %c0_22 = arith.constant 0 : index
    %28 = vector.load %arg5[%c6, %c0_21, %c0_22] : memref<9x32x3xbf16, #tpu.memory_space<vmem>>, vector<1x32x3xbf16>
    %29 = vector.shape_cast %28 : vector<1x32x3xbf16> to vector<32x3xbf16>
    %cst_23 = arith.constant dense<0.000000e+00> : vector<64x3xf32>
    %30 = tpu.matmul %27, %29, %cst_23 {dimension_numbers = #tpu.dot_dimension_numbers<[1], [0], [0], [1], [0, 0, 1, 1], [], []>} : vector<64x32xbf16>, vector<32x3xbf16>, vector<64x3xf32> -> vector<64x3xf32>
    %31 = arith.addf %26, %30 : vector<64x3xf32>
    %32 = vector.shape_cast %11 : vector<10x8x32xbf16> to vector<80x32xbf16>
    %33 = vector.extract_strided_slice %32 {offsets = [0, 0], sizes = [64, 32], strides = [1, 1]} : vector<80x32xbf16> to vector<64x32xbf16>
    %c1 = arith.constant 1 : index
    %c0_24 = arith.constant 0 : index
    %c0_25 = arith.constant 0 : index
    %34 = vector.load %arg5[%c1, %c0_24, %c0_25] : memref<9x32x3xbf16, #tpu.memory_space<vmem>>, vector<1x32x3xbf16>
    %35 = vector.shape_cast %34 : vector<1x32x3xbf16> to vector<32x3xbf16>
    %cst_26 = arith.constant dense<0.000000e+00> : vector<64x3xf32>
    %36 = tpu.matmul %33, %35, %cst_26 {dimension_numbers = #tpu.dot_dimension_numbers<[1], [0], [0], [1], [0, 0, 1, 1], [], []>} : vector<64x32xbf16>, vector<32x3xbf16>, vector<64x3xf32> -> vector<64x3xf32>
    %37 = arith.addf %31, %36 : vector<64x3xf32>
    %38 = vector.extract_strided_slice %32 {offsets = [8, 0], sizes = [64, 32], strides = [1, 1]} : vector<80x32xbf16> to vector<64x32xbf16>
    %c4 = arith.constant 4 : index
    %c0_27 = arith.constant 0 : index
    %c0_28 = arith.constant 0 : index
    %39 = vector.load %arg5[%c4, %c0_27, %c0_28] : memref<9x32x3xbf16, #tpu.memory_space<vmem>>, vector<1x32x3xbf16>
    %40 = vector.shape_cast %39 : vector<1x32x3xbf16> to vector<32x3xbf16>
    %cst_29 = arith.constant dense<0.000000e+00> : vector<64x3xf32>
    %41 = tpu.matmul %38, %40, %cst_29 {dimension_numbers = #tpu.dot_dimension_numbers<[1], [0], [0], [1], [0, 0, 1, 1], [], []>} : vector<64x32xbf16>, vector<32x3xbf16>, vector<64x3xf32> -> vector<64x3xf32>
    %42 = arith.addf %37, %41 : vector<64x3xf32>
    %43 = vector.extract_strided_slice %32 {offsets = [16, 0], sizes = [64, 32], strides = [1, 1]} : vector<80x32xbf16> to vector<64x32xbf16>
    %c7 = arith.constant 7 : index
    %c0_30 = arith.constant 0 : index
    %c0_31 = arith.constant 0 : index
    %44 = vector.load %arg5[%c7, %c0_30, %c0_31] : memref<9x32x3xbf16, #tpu.memory_space<vmem>>, vector<1x32x3xbf16>
    %45 = vector.shape_cast %44 : vector<1x32x3xbf16> to vector<32x3xbf16>
    %cst_32 = arith.constant dense<0.000000e+00> : vector<64x3xf32>
    %46 = tpu.matmul %43, %45, %cst_32 {dimension_numbers = #tpu.dot_dimension_numbers<[1], [0], [0], [1], [0, 0, 1, 1], [], []>} : vector<64x32xbf16>, vector<32x3xbf16>, vector<64x3xf32> -> vector<64x3xf32>
    %47 = arith.addf %42, %46 : vector<64x3xf32>
    %48 = vector.extract_strided_slice %11 {offsets = [0, 1, 0], sizes = [10, 7, 32], strides = [1, 1, 1]} : vector<10x8x32xbf16> to vector<10x7x32xbf16>
    %49 = tpu.concatenate %48, %12 in 1 : vector<10x7x32xbf16>, vector<10x1x32xbf16> -> vector<10x8x32xbf16>
    %50 = vector.shape_cast %49 : vector<10x8x32xbf16> to vector<80x32xbf16>
    %51 = vector.extract_strided_slice %50 {offsets = [0, 0], sizes = [64, 32], strides = [1, 1]} : vector<80x32xbf16> to vector<64x32xbf16>
    %c2 = arith.constant 2 : index
    %c0_33 = arith.constant 0 : index
    %c0_34 = arith.constant 0 : index
    %52 = vector.load %arg5[%c2, %c0_33, %c0_34] : memref<9x32x3xbf16, #tpu.memory_space<vmem>>, vector<1x32x3xbf16>
    %53 = vector.shape_cast %52 : vector<1x32x3xbf16> to vector<32x3xbf16>
    %cst_35 = arith.constant dense<0.000000e+00> : vector<64x3xf32>
    %54 = tpu.matmul %51, %53, %cst_35 {dimension_numbers = #tpu.dot_dimension_numbers<[1], [0], [0], [1], [0, 0, 1, 1], [], []>} : vector<64x32xbf16>, vector<32x3xbf16>, vector<64x3xf32> -> vector<64x3xf32>
    %55 = arith.addf %47, %54 : vector<64x3xf32>
    %56 = vector.extract_strided_slice %50 {offsets = [8, 0], sizes = [64, 32], strides = [1, 1]} : vector<80x32xbf16> to vector<64x32xbf16>
    %c5 = arith.constant 5 : index
    %c0_36 = arith.constant 0 : index
    %c0_37 = arith.constant 0 : index
    %57 = vector.load %arg5[%c5, %c0_36, %c0_37] : memref<9x32x3xbf16, #tpu.memory_space<vmem>>, vector<1x32x3xbf16>
    %58 = vector.shape_cast %57 : vector<1x32x3xbf16> to vector<32x3xbf16>
    %cst_38 = arith.constant dense<0.000000e+00> : vector<64x3xf32>
    %59 = tpu.matmul %56, %58, %cst_38 {dimension_numbers = #tpu.dot_dimension_numbers<[1], [0], [0], [1], [0, 0, 1, 1], [], []>} : vector<64x32xbf16>, vector<32x3xbf16>, vector<64x3xf32> -> vector<64x3xf32>
    %60 = arith.addf %55, %59 : vector<64x3xf32>
    %61 = vector.extract_strided_slice %50 {offsets = [16, 0], sizes = [64, 32], strides = [1, 1]} : vector<80x32xbf16> to vector<64x32xbf16>
    %c8 = arith.constant 8 : index
    %c0_39 = arith.constant 0 : index
    %c0_40 = arith.constant 0 : index
    %62 = vector.load %arg5[%c8, %c0_39, %c0_40] : memref<9x32x3xbf16, #tpu.memory_space<vmem>>, vector<1x32x3xbf16>
    %63 = vector.shape_cast %62 : vector<1x32x3xbf16> to vector<32x3xbf16>
    %cst_41 = arith.constant dense<0.000000e+00> : vector<64x3xf32>
    %64 = tpu.matmul %61, %63, %cst_41 {dimension_numbers = #tpu.dot_dimension_numbers<[1], [0], [0], [1], [0, 0, 1, 1], [], []>} : vector<64x32xbf16>, vector<32x3xbf16>, vector<64x3xf32> -> vector<64x3xf32>
    %65 = arith.addf %60, %64 : vector<64x3xf32>
    %c0_42 = arith.constant 0 : index
    %c0_43 = arith.constant 0 : index
    %66 = vector.load %arg6[%c0_42, %c0_43] : memref<1x3xf32, #tpu.memory_space<vmem>>, vector<1x3xf32>
    %67 = vector.broadcast %66 : vector<1x3xf32> to vector<64x3xf32>
    %68 = arith.addf %65, %67 : vector<64x3xf32>
    %69 = vector.shape_cast %68 : vector<64x3xf32> to vector<8x8x3xf32>
    %c0_44 = arith.constant 0 : index
    %c0_45 = arith.constant 0 : index
    %c0_46 = arith.constant 0 : index
    %c0_47 = arith.constant 0 : index
    %70 = vector.load %arg7[%c0_44, %c0_45, %c0_46, %c0_47] : memref<1x8x8x3xf32, #tpu.memory_space<vmem>>, vector<1x8x8x3xf32>
    %71 = vector.shape_cast %70 : vector<1x8x8x3xf32> to vector<8x8x3xf32>
    %72 = vector.shape_cast %69 : vector<8x8x3xf32> to vector<1x8x8x3xf32>
    tpu.vector_store %arg7[%c0_44, %c0_45, %c0_46, %c0_47], %72 {strides = array<i32>} : memref<1x8x8x3xf32, #tpu.memory_space<vmem>>, vector<1x8x8x3xf32>,
    return
  }
  func.func @transform_0(%arg0: i32, %arg1: i32) -> (i32, i32, i32, i32) {
    %c8_i32 = arith.constant 8 : i32
    %0 = arith.muli %arg1, %c8_i32 : i32
    %c1_i32 = arith.constant 1 : i32
    %1 = arith.subi %0, %c1_i32 : i32
    %c0_i32 = arith.constant 0 : i32
    %2 = arith.maxsi %1, %c0_i32 : i32
    %c0_i32_0 = arith.constant 0 : i32
    %c0_i32_1 = arith.constant 0 : i32
    %c0_i32_2 = arith.constant 0 : i32
    return %arg0, %2, %c0_i32_0, %c0_i32_1 : i32, i32, i32, i32
  }
  func.func @transform_1(%arg0: i32, %arg1: i32) -> (i32, i32, i32, i32) {
    %c0_i32 = arith.constant 0 : i32
    %c0_i32_0 = arith.constant 0 : i32
    %c0_i32_1 = arith.constant 0 : i32
    return %arg0, %arg1, %c0_i32, %c0_i32_0 : i32, i32, i32, i32
  }
  func.func @transform_2(%arg0: i32, %arg1: i32) -> (i32, i32, i32, i32) {
    %c1_i32 = arith.constant 1 : i32
    %0 = arith.addi %arg1, %c1_i32 : i32
    %c8_i32 = arith.constant 8 : i32
    %1 = arith.muli %0, %c8_i32 : i32
    %c7_i32 = arith.constant 7 : i32
    %2 = arith.minsi %1, %c7_i32 : i32
    %c0_i32 = arith.constant 0 : i32
    %c0_i32_0 = arith.constant 0 : i32
    %c0_i32_1 = arith.constant 0 : i32
    return %arg0, %2, %c0_i32, %c0_i32_0 : i32, i32, i32, i32
  }
  func.func @transform_3(%arg0: i32, %arg1: i32) -> (i32, i32, i32) {
    %c0_i32 = arith.constant 0 : i32
    %c0_i32_0 = arith.constant 0 : i32
    %c0_i32_1 = arith.constant 0 : i32
    %c0_i32_2 = arith.constant 0 : i32
    return %c0_i32, %c0_i32_0, %c0_i32_1 : i32, i32, i32
  }
  func.func @transform_4(%arg0: i32, %arg1: i32) -> (i32, i32) {
    %c0_i32 = arith.constant 0 : i32
    %c0_i32_0 = arith.constant 0 : i32
    %c0_i32_1 = arith.constant 0 : i32
    return %c0_i32, %c0_i32_0 : i32, i32
  }
  func.func @transform_5(%arg0: i32, %arg1: i32) -> (i32, i32, i32, i32) {
    %c0_i32 = arith.constant 0 : i32
    %c0_i32_0 = arith.constant 0 : i32
    %c0_i32_1 = arith.constant 0 : i32
    return %arg0, %arg1, %c0_i32, %c0_i32_0 : i32, i32, i32, i32
  }
}

</mosaic_0001>

<bundles_post_ra>
// kernel: decoder_forward.48
= control target key start
LH: loop header
LB: loop body
LE: loop exit
PB: predicated region body
PF: predicated region fallthrough
CT: control target
= control target key end

     0   :  { %s663_s15 = smov 0   ;;  %s765_s0 = inlined_call_operand.vmem [shape: bf16[2,4,4,64], index: 0, kind: input, shape index: {}]   ;;  %s766_s1 = inlined_call_operand.vmem [shape: f32[1,64], index: 1, kind: input, shape index: {}]   ;;  %s767_s2 = inlined_call_operand.vmem [shape: f32[1,64], index: 2, kind: input, shape index: {}]   ;;  %s768_s3 = inlined_call_operand.vmem [shape: f32[64,64], index: 3, kind: input, shape index: {}]   ;;  %s769_s4 = inlined_call_operand.vmem [shape: bf16[2,4,4,64], index: 4, kind: output, shape index: {}]  }
   0x1 LB: > { %s528_s16 = sadd.s32 4294967295, %s634_s15   ;;  %p532_p0 = scmp.ge.s32.totalorder %s634_s15, 1  ;;  %s634_s15 = sphi %s663_s15, %s14_s15  }
   0x2   : > { %p162_p1 = scmp.lt.s32.totalorder %s634_s15, 3 }
   0x4   : > { %p163_p2 = pnand %p532_p0, %p162_p1 }
   0x5   : > { %p188_p3 = scmp.lt.s32.totalorder (!%p163_p2), %s528_s16, 1 }
   0x6   : > { %166 = sbr.rel (%p163_p2) target bundleno = 298 (0x12a), region = 36 }
   0xb   : > { %v252_v0 = vld [vmem:[%s768_s3 + $0x38] sm:$0xff]  ;;  %v636_v1 = vmov 0.0   ;;  %v251_v2 = vld [vmem:[%s768_s3 + $0x30] sm:$0xff]  ;;  %s771_s16 = smov (!%p188_p3, %s528_s16), 1  ;;  %v250_v3 = vld [vmem:[%s768_s3 + $0x28] sm:$0xff]  ;;  %vm214_vm0 = vcmask 523264   ;;  %v403_v48 = vlaneseq }
   0xc   : > { %562 = vmatprep.subr.mxu0 %v636_v1  ;;  %581 = vmatprep.subr.mxu1 %v636_v1  ;;  %s542_s23 = sshll.u32 %s771_s16, 3  ;;  %v249_v4 = vld [vmem:[%s768_s3 + $0x20] sm:$0xff]  ;;  %v248_v8 = vld [vmem:[%s768_s3 + $0x18] sm:$0xff]  ;;  %v247_v14 = vld [vmem:[%s768_s3 + $0x10] sm:$0xff]  ;;  %vm637_vm1 = vmmov 0   ;;  %vm468_vm2 = vcmask 517120  }
   0xd   : > { %563 = vmatpush3.msra.mxu0 %v252_v0  ;;  %582 = vmatpush3.msra.mxu1 %v252_v0  ;;  %s192_s28 = scalar_lea.vmem %s765_s0, %s542_s23  ;;  %v246_v21 = vld [vmem:[%s768_s3 + $0x8] sm:$0xff]  ;;  %v245_v26 = vld [vmem:[%s768_s3] sm:$0xff]  ;;  %v404_v51 = vshrl.u32 %v403_v48, 7  ;;  %s197_s19 = scalar_lea.vmem %s769_s4, %s542_s23 }
   0xe   : > { %564 = vmatprep.subr.mxu0 %v636_v1  ;;  %583 = vmatprep.subr.mxu1 %v636_v1  ;;  %v198_v5 = vld [vmem:[%s192_s28] sm:$0x3]  ;;  %v199_v6 = vld [vmem:[%s192_s28 + $0x2] sm:$0x3]  ;;  %v200_v7 = vld [vmem:[%s192_s28 + $0x4] sm:$0x3] }
   0xf   : > { %565 = vmatpush3.msra.mxu0 %v251_v2  ;;  %584 = vmatpush3.msra.mxu1 %v251_v2  ;;  %v201_v9 = vld [vmem:[%s192_s28 + $0x6] sm:$0x3]  ;;  %v702_v10 = vunpack.c.l.bf16 %v198_v5  ;;  %v704_v11 = vunpack.c.l.bf16 %v199_v6  ;;  %v706_v12 = vunpack.c.l.bf16 %v200_v7  ;;  %v405_v52 = vsub.s32 0, %v404_v51  ;;  %v414_v54 = vld [vmem:[%s766_s1] sm:$0x1] }
  0x10   : > { %566 = vmatprep.subr.mxu0 %v636_v1  ;;  %585 = vmatprep.subr.mxu1 %v636_v1  ;;  %v708_v13 = vunpack.c.l.bf16 %v201_v9  ;;  %v539_v58 = vld [vmem:[%s767_s2] ss:$0 sm:$0xff] }
  0x11   : > { %567 = vmatpush3.msra.mxu0 %v250_v3  ;;  %586 = vmatpush3.msra.mxu1 %v250_v3  ;;  %v210_v15 = vcombine.low %v702_v10, %v704_v11  ;;  %v224_v16 = vmul.f32 %v702_v10, %v702_v10  ;;  %v225_v17 = vmul.f32 %v704_v11, %v704_v11 }
  0x12   : > { %568 = vmatprep.subr.mxu0 %v636_v1  ;;  %587 = vmatprep.subr.mxu1 %v636_v1  ;;  %v211_v18 = vcombine.low %v706_v12, %v708_v13  ;;  %v226_v19 = vmul.f32 %v706_v12, %v706_v12  ;;  %v227_v20 = vmul.f32 %v708_v13, %v708_v13 }
  0x13   : > { %569 = vmatpush3.msra.mxu0 %v249_v4  ;;  %588 = vmatpush3.msra.mxu1 %v249_v4  ;;  %v215_v22 = vsel %vm214_vm0, %v210_v15, 0.0  ;;  %v232_v23 = vcombine.low %v224_v16, %v225_v17  ;;  %v434_v63 = vcombine.high %v539_v58, %v539_v58 }
  0x14   : > { %570 = vmatprep.subr.mxu0 %v636_v1  ;;  %589 = vmatprep.subr.mxu1 %v636_v1  ;;  %v216_v24 = vsel %vm214_vm0, %v211_v18, 0.0  ;;  %v233_v25 = vcombine.low %v226_v19, %v227_v20 }
  0x15   : > { %571 = vmatpush3.msra.mxu0 %v248_v8  ;;  %590 = vmatpush3.msra.mxu1 %v248_v8  ;;  %v217_v27 = vadd.f32 %v216_v24, %v215_v22  ;;  %v236_v28 = vsel %vm214_vm0, %v232_v23, 0.0 }
  0x16   : > { %572 = vmatprep.subr.mxu0 %v636_v1  ;;  %591 = vmatprep.subr.mxu1 %v636_v1  ;;  %v237_v29 = vsel %vm214_vm0, %v233_v25, 0.0 }
  0x17   : > { %573 = vmatpush3.msra.mxu0 %v247_v14  ;;  %592 = vmatpush3.msra.mxu1 %v247_v14  ;;  %v218_v30 = vrot.slane %v217_v27, 4  ;;  %v238_v31 = vadd.f32 %v237_v29, %v236_v28 }
  0x18   : > { %574 = vmatprep.subr.mxu0 %v636_v1  ;;  %593 = vmatprep.subr.mxu1 %v636_v1 }
  0x19   : > { %575 = vmatpush3.msra.mxu0 %v246_v21  ;;  %578 = vmatprep.mubr.msk.f32.mxu0 %vm637_vm1, %v636_v1  ;;  %v219_v32 = vadd.f32 %v218_v30, %v217_v27  ;;  %v239_v33 = vrot.slane %v238_v31, 4 }
  0x1a   : > { %576 = vmatprep.subr.mxu0 %v636_v1  ;;  %594 = vmatpush3.msra.mxu1 %v246_v21 }
  0x1b   : > { %577 = vmatpush3.msra.mxu0 %v245_v26  ;;  %595 = vmatprep.subr.mxu1 %v636_v1  ;;  %v220_v34 = vrot.slane %v219_v32, 2  ;;  %v240_v35 = vadd.f32 %v239_v33, %v238_v31 }
  0x1c   : > { %596 = vmatpush3.msra.mxu1 %v245_v26  ;;  %597 = vmatprep.mubr.msk.f32.mxu1 %vm637_vm1, %v636_v1 }
  0x1d   : > { %v221_v36 = vadd.f32 %v220_v34, %v219_v32  ;;  %v241_v37 = vrot.slane %v240_v35, 2 }
  0x1f   : > { %v222_v38 = vrot.slane %v221_v36, 1  ;;  %v242_v39 = vadd.f32 %v241_v37, %v240_v35 }
  0x21   : > { %v223_v40 = vadd.f32 %v222_v38, %v221_v36  ;;  %v243_v41 = vrot.slane %v242_v39, 1 }
  0x23   : > { %579 = vmatmul.mubr.msk.f32.vlgmr.msra.gmra.mxu0 %vm214_vm0, %v223_v40  ;;  %v244_v42 = vadd.f32 %v243_v41, %v242_v39 }
  0x25   : > { %598 = vmatmul.mubr.msk.f32.vlgmr.msra.gmra.mxu1 %vm214_vm0, %v244_v42 }
  0xe3   : > { %v322_v43 = vpop.f32.mrf.mxu0 }
  0xe4   : > { %v399_v44 = vmul.f32 %v322_v43, %v322_v43  ;;  %v406_v53 = vrot.slane %v322_v43, %v405_v52 }
  0xe5   : > { %v580_v45 = vpop.f32.mrf.mxu0  ;;  %v395_v46 = vpop.f32.mrf.mxu1 }
  0xe6   : > { %v400_v47 = vsub.f32 %v395_v46, %v399_v44  ;;  %v408_v56 = vcombine.high %v406_v53, %v406_v53  ;;  %v410_v59 = vsub.f32 %v702_v10, %v406_v53  ;;  %v412_v60 = vsub.f32 %v706_v12, %v406_v53 }
  0xe7   : > { %v599_v49 = vpop.f32.mrf.mxu1 }
  0xe8   : > { %v401_v50 = vadd.f32 1e-06, %v400_v47  ;;  %v411_v62 = vsub.f32 %v704_v11, %v408_v56  ;;  %v413_v0 = vsub.f32 %v708_v13, %v408_v56 }
  0xea   : > { %610 = vrsqrt.f32 %v401_v50 }
  0xf7   : > { %v611_v55 = vpop.eup %610 }
  0xf8   : > { %v415_v57 = vmul.f32 %v611_v55, %v414_v54 }
  0xfa   : > { %v419_v61 = vrot.slane %v415_v57, %v405_v52 }
  0xfc   : > { %v421_v1 = vcombine.high %v419_v61, %v419_v61  ;;  %v423_v2 = vmul.f32 %v419_v61, %v410_v59  ;;  %v425_v3 = vmul.f32 %v419_v61, %v412_v60 }
  0xfe   : > { %v424_v4 = vmul.f32 %v421_v1, %v411_v62  ;;  %v426_v5 = vmul.f32 %v421_v1, %v413_v0  ;;  %v436_v6 = vadd.f32 %v539_v58, %v423_v2  ;;  %v438_v7 = vadd.f32 %v539_v58, %v425_v3 }
 0x100   : > { %v437_v8 = vadd.f32 %v434_v63, %v424_v4  ;;  %v439_v9 = vadd.f32 %v434_v63, %v426_v5  ;;  %v440_v14 = vsub.f32 0.0, %v436_v6  ;;  %v442_v15 = vsub.f32 0.0, %v438_v7 }
 0x102   : > { %v441_v10 = vsub.f32 0.0, %v437_v8  ;;  %v443_v16 = vsub.f32 0.0, %v439_v9  ;;  %v444_v12 = vmul.f32 1.442695, %v440_v14  ;;  %v448_v17 = vmul.f32 1.442695, %v442_v15 }
 0x104   : > { %612 = vpow2.f32 %v444_v12  ;;  %v446_v11 = vmul.f32 1.442695, %v441_v10  ;;  %v450_v18 = vmul.f32 1.442695, %v443_v16 }
 0x105   : > { %614 = vpow2.f32 %v448_v17 }
 0x106   : > { %616 = vpow2.f32 %v446_v11 }
 0x107   : > { %618 = vpow2.f32 %v450_v18 }
 0x111   : > { %v613_v13 = vpop.eup %612 }
 0x112   : > { %v615_v19 = vpop.eup %614  ;;  %v452_v20 = vadd.f32 1.0, %v613_v13 }
 0x113   : > { %v617_v21 = vpop.eup %616  ;;  %v454_v22 = vadd.f32 1.0, %v615_v19 }
 0x114   : > { %v619_v23 = vpop.eup %618  ;;  %v453_v24 = vadd.f32 1.0, %v617_v21  ;;  %620 = vrcp.f32 %v452_v20 }
 0x115   : > { %v455_v25 = vadd.f32 1.0, %v619_v23  ;;  %622 = vrcp.f32 %v454_v22 }
 0x116   : > { %624 = vrcp.f32 %v453_v24 }
 0x117   : > { %626 = vrcp.f32 %v455_v25 }
 0x121   : > { %v621_v26 = vpop.eup %620 }
 0x122   : > { %v623_v27 = vpop.eup %622  ;;  %v457_v28 = vmul.f32 %v621_v26, %v436_v6 }
 0x123   : > { %v625_v29 = vpop.eup %624  ;;  %v461_v30 = vmul.f32 %v623_v27, %v438_v7 }
 0x124   : > { %v627_v31 = vpop.eup %626  ;;  %v459_v32 = vmul.f32 %v625_v29, %v437_v8  ;;  %v464_v33 = vpack.c.bf16 %v457_v28, %v457_v28 }
 0x125   : > { %v463_v34 = vmul.f32 %v627_v31, %v439_v9  ;;  %v466_v35 = vpack.c.bf16 %v461_v30, %v461_v30 }
 0x126   : > { %v465_v36 = vpack.c.bf16 %v459_v32, %v459_v32  ;;  %469 = vst.msk [vmem:[%s197_s19] sm:$0x3] %vm468_vm2, %v464_v33 }
 0x127   : > { %v467_v37 = vpack.c.bf16 %v463_v34, %v463_v34  ;;  %471 = vst.msk [vmem:[%s197_s19 + $0x4] sm:$0x3] %vm468_vm2, %v466_v35 }
 0x128   : > { %470 = vst.msk [vmem:[%s197_s19 + $0x2] sm:$0x3] %vm468_vm2, %v465_v36 }
 0x129   : > { %472 = vst.msk [vmem:[%s197_s19 + $0x6] sm:$0x3] %vm468_vm2, %v467_v37 }
 0x12a PF: > { %s14_s15 = sadd.s32 1, %s634_s15  }
 0x12b   : > { %p11_p4 = scmp.ge.s32.totalorder %s14_s15, 4  }
 0x12d   :  { %13 = sbr.rel (!%p11_p4) target bundleno = 1 (0x1), region = 66 }

// kernel: decoder_forward.47
= control target key start
LH: loop header
LB: loop body
LE: loop exit
PB: predicated region body
PF: predicated region fallthrough
CT: control target
= control target key end

     0   :  { %s1539_s18 = smov 0   ;;  %s1541_s19 = smov 0   ;;  %s1756_s0 = inlined_call_operand.vmem [shape: bf16[2,4,4,16], index: 0, kind: input, shape index: {}, may-alias: {0,1,2}]   ;;  %s1757_s1 = inlined_call_operand.vmem [shape: bf16[2,4,4,16], index: 1, kind: input, shape index: {}, may-alias: {0,1,2}]   ;;  %s1758_s2 = inlined_call_operand.vmem [shape: bf16[2,4,4,16], index: 2, kind: input, shape index: {}, may-alias: {0,1,2}]   ;;  %s1759_s3 = inlined_call_operand.vmem [shape: bf16[9,16,64], index: 3, kind: input, shape index: {}]   ;;  %s1760_s4 = inlined_call_operand.vmem [shape: f32[1,64], index: 4, kind: input, shape index: {}]   ;;  %s1761_s5 = inlined_call_operand.vmem [shape: bf16[2,4,4,64], index: 5, kind: output, shape index: {}]  }
   0x1   :  { %s1543_s0 = smov 0  }
   0x2 LB: > { %s27_s2 = sadd.s32 1, %s1499_s19  ;;  %p1321_p0 = scmp.ge.s32.totalorder %s1503_s0, 1  ;;  %s1503_s0 = sphi %s1543_s0, %s15_s0   ;;  %s1499_s19 = sphi %s1541_s19, %s1767_s19   ;;  %s1495_s18 = sphi %s1539_s18, %s1766_s18  }
   0x3   : > { %p29_p1 = scmp.ge.s32.totalorder %s27_s2, 2  ;;  %p270_p2 = scmp.lt.s32.totalorder %s1503_s0, 3 }
   0x5   : > { %s1769_s2 = smov (%p29_p1, %s27_s2), 0  ;;  %p271_p3 = pnand %p1321_p0, %p270_p2 }
   0x6   : > { %p347_p4 = scmp.lt.s32.totalorder (!%p271_p3), %s1495_s18, 1 }
   0x7   : > { %274 = sbr.rel (%p271_p3) target bundleno = 273 (0x111), region = 40 }
   0xc   : > { %v1472_v0 = vld [vmem:[%s1759_s3 + $0x18] sm:$0xff]   ;;  %v415_v1 = vlaneseq  ;;  %v1505_v2 = vmov 0.0   ;;  %v1473_v3 = vld [vmem:[%s1759_s3] sm:$0xff]   ;;  %vm1506_vm0 = vmmov 0   ;;  %v1507_v4 = vmov 1983009808  }
   0xd   : > { %1390 = vmatprep.subr.bf16.mxu0 %v1505_v2  ;;  %1396 = vmatprep.subr.bf16.mxu1 %v1505_v2  ;;  %v413_v5 = vunpack.c.l.s4 %v1507_v4  ;;  %s1771_s18 = smov (!%p347_p4, %s1495_s18), 1  ;;  %vm502_vm1 = vcmask 1040384   ;;  %vm503_vm2 = vsmask.f32 256  ;;  %v1508_v17 = vmov 0   ;;  %v1474_v53 = vld [vmem:[%s1759_s3 + $0x30] sm:$0xff]  }
   0xe   : > { %1391 = vmatpush3.bf16.msra.mxu0 %v1472_v0  ;;  %1392 = vmatprep.mubr.msk.bf16.mxu0 %vm1506_vm0, %v1505_v2  ;;  %v416_v6 = vshrl.u32 %v415_v1, 7  ;;  %s1368_s24 = sshll.u32 %s1771_s18, 3  ;;  %vm1627_vm3 = vmand %vm502_vm1, %vm503_vm2  ;;  %vm543_vm4 = vcmask 130048   ;;  %v1475_v60 = vld [vmem:[%s1759_s3 + $0x8] sm:$0xff]   ;;  %vm947_vm5 = vcmask 1041408   ;;  %vm1189_vm8 = vcmask 517120  }
   0xf   : > { %1397 = vmatpush3.bf16.msra.mxu1 %v1473_v3  ;;  %1398 = vmatprep.mubr.msk.bf16.mxu1 %vm1506_vm0, %v1505_v2  ;;  %v414_v7 = vunpack.c.0.s8 %v413_v5  ;;  %s354_s27 = scalar_lea.vmem %s1757_s1, %s1368_s24  ;;  %vm948_vm6 = vsmask.f32 1280  ;;  %s380_s23 = scalar_lea.vmem %s1761_s5, %s1368_s24 }
  0x10   : > { %1402 = vmatprep.subr.bf16.mxu0 %v1505_v2  ;;  %1408 = vmatprep.subr.bf16.mxu1 %v1505_v2  ;;  %v1581_v9 = vld [vmem:[%s354_s27] sm:$0x3]  ;;  %v1583_v10 = vld [vmem:[%s354_s27 + $0x2] sm:$0x3]  ;;  %v1585_v11 = vld [vmem:[%s354_s27 + $0x4] sm:$0x3] }
  0x11   : > { %v1579_v8 = vsub.s32 %v414_v7, %v416_v6  ;;  %v1587_v12 = vld [vmem:[%s354_s27 + $0x6] sm:$0x3]  ;;  %v724_v56 = vcombine.low %v1508_v17, %v1581_v9  ;;  %v725_v57 = vcombine.low %v1583_v10, %v1585_v11  ;;  %v796_v6 = vcombine.low %v1581_v9, %v1583_v10  ;;  %vm1681_vm7 = vmand %vm947_vm5, %vm948_vm6 }
  0x12   : > { %v797_v7 = vcombine.low %v1585_v11, %v1587_v12 }
  0x13   : > { %v1591_v13 = vrot.slane %v1581_v9, %v1579_v8  ;;  %v1595_v14 = vrot.slane %v1583_v10, %v1579_v8  ;;  %v1599_v15 = vrot.slane %v1585_v11, %v1579_v8  ;;  %v1603_v16 = vrot.slane %v1587_v12, %v1579_v8 }
  0x14   : > { %v1607_v18 = vrot.slane %v1508_v17, %v1579_v8  ;;  %v732_v1 = vrot.slane %v724_v56, %v1579_v8  ;;  %v739_v3 = vrot.slane %v725_v57, %v1579_v8  ;;  %v868_v11 = vcombine.low %v1587_v12, %v1508_v17 }
  0x15   : > { %v462_v19 = vshrl.u32 %v1591_v13, 16  ;;  %v465_v20 = vshll.u32 %v1591_v13, 16  ;;  %v469_v21 = vshrl.u32 %v1595_v14, 16  ;;  %v472_v22 = vshll.u32 %v1595_v14, 16  ;;  %v1477_v13 = vld [vmem:[%s1759_s3 + $0x38] sm:$0xff]  }
  0x16   : > { %v476_v23 = vshrl.u32 %v1599_v15, 16  ;;  %v479_v24 = vshll.u32 %v1599_v15, 16  ;;  %v483_v25 = vshrl.u32 %v1603_v16, 16  ;;  %v486_v26 = vshll.u32 %v1603_v16, 16 }
  0x17   : > { %v464_v27 = vrot.slane %v462_v19, 7  ;;  %v471_v28 = vrot.slane %v469_v21, 7  ;;  %v455_v34 = vshrl.u32 %v1607_v18, 16  ;;  %v458_v35 = vshll.u32 %v1607_v18, 16  ;;  %v1476_v18 = vld [vmem:[%s1759_s3 + $0x20] sm:$0xff]  }
  0x18   : > { %v478_v29 = vrot.slane %v476_v23, 7  ;;  %v485_v30 = vrot.slane %v483_v25, 7  ;;  %v931_v58 = vrot.slane %v465_v20, 1  ;;  %v933_v61 = vrot.slane %v472_v22, 1 }
  0x19   : > { %v467_v32 = vor.u32 %v465_v20, %v464_v27  ;;  %v474_v33 = vor.u32 %v472_v22, %v471_v28  ;;  %v457_v40 = vrot.slane %v455_v34, 7  ;;  %v935_v62 = vrot.slane %v479_v24, 1 }
  0x1a   : > { %v481_v36 = vor.u32 %v479_v24, %v478_v29  ;;  %v488_v37 = vor.u32 %v486_v26, %v485_v30  ;;  %v929_v0 = vrot.slane %v458_v35, 1  ;;  %v937_v4 = vrot.slane %v486_v26, 1  ;;  %v1478_v30 = vld [vmem:[%s1759_s3 + $0x10] sm:$0xff]  }
  0x1b   : > { %v506_v38 = vsel %vm1627_vm3, 0, %v467_v32  ;;  %v507_v39 = vsel %vm1627_vm3, 0, %v474_v33  ;;  %v460_v45 = vor.u32 %v458_v35, %v457_v40  ;;  %v932_v22 = vor.u32 %v931_v58, %v462_v19 }
  0x1c   : > { %v508_v41 = vsel %vm1627_vm3, 0, %v481_v36  ;;  %v509_v42 = vsel %vm1627_vm3, 0, %v488_v37  ;;  %v520_v43 = vcombine.low %v506_v38, %v507_v39  ;;  %v930_v20 = vor.u32 %v929_v0, %v455_v34  ;;  %v1479_v34 = vld [vmem:[%s1759_s3 + $0x28] sm:$0xff]  }
  0x1d   : > { %v521_v44 = vcombine.low %v508_v41, %v509_v42  ;;  %v590_v46 = vcombine.low %v507_v39, %v508_v41  ;;  %v505_v49 = vsel %vm1627_vm3, 0, %v460_v45  ;;  %v934_v24 = vor.u32 %v933_v61, %v469_v21  ;;  %v1480_v41 = vld [vmem:[%s1759_s3 + $0x40] sm:$0xff]  }
  0x1e   : > { %v528_v47 = vrot.slane %v520_v43, %v1579_v8  ;;  %v589_v50 = vcombine.low %v505_v49, %v506_v38  ;;  %v660_v52 = vcombine.low %v509_v42, %v505_v49  ;;  %v936_v26 = vor.u32 %v935_v62, %v476_v23 }
  0x1f   : > { %v535_v48 = vrot.slane %v521_v44, %v1579_v8  ;;  %v604_v51 = vrot.slane %v590_v46, %v1579_v8  ;;  %v740_v10 = vcombine.low %v732_v1, %v739_v3  ;;  %v804_v14 = vrot.slane %v796_v6, %v1579_v8 }
  0x20   : > { %v597_v55 = vrot.slane %v589_v50, %v1579_v8  ;;  %v667_v59 = vrot.slane %v660_v52, %v1579_v8  ;;  %v811_v19 = vrot.slane %v797_v7, %v1579_v8  ;;  %v938_v15 = vor.u32 %v937_v4, %v483_v25 }
  0x21   : > { %v536_v54 = vcombine.low %v528_v47, %v535_v48  ;;  %v950_v12 = vsel %vm1681_vm7, %v930_v20, 0  ;;  %v951_v17 = vsel %vm1681_vm7, %v932_v22, 0  ;;  %v952_v21 = vsel %vm1681_vm7, %v934_v24, 0 }
  0x22   : > { %v605_v63 = vcombine.low %v597_v55, %v604_v51  ;;  %v668_v5 = vcombine.low %v604_v51, %v667_v59  ;;  %v953_v23 = vsel %vm1681_vm7, %v936_v26, 0  ;;  %v875_v16 = vrot.slane %v868_v11, %v1579_v8 }
  0x23   : > { %1393 = vmatmul.mubr.msk.bf16.vlgmr.msra.gmra.mxu0 %vm543_vm4, %v536_v54  ;;  %v812_v25 = vcombine.low %v804_v14, %v811_v19  ;;  %v963_v27 = vcombine.low %v950_v12, %v951_v17  ;;  %v964_v28 = vcombine.low %v952_v21, %v953_v23  ;;  %v954_v29 = vsel %vm1681_vm7, %v938_v15, 0 }
  0x24   : > { %1403 = vmatpush3.bf16.msra.mxu0 %v1474_v53  ;;  %1404 = vmatprep.mubr.msk.bf16.mxu0 %vm1506_vm0, %v1505_v2  ;;  %v876_v31 = vcombine.low %v739_v3, %v875_v16  ;;  %v1036_v32 = vcombine.low %v951_v17, %v952_v21  ;;  %v1037_v33 = vcombine.low %v953_v23, %v954_v29 }
  0x25   : > { %1414 = vmatprep.subr.bf16.mxu0 %v1505_v2  ;;  %1399 = vmatmul.mubr.msk.bf16.vlgmr.msra.gmra.mxu1 %vm543_vm4, %v605_v63  ;;  %v971_v35 = vrot.slane %v963_v27, %v1579_v8  ;;  %v978_v36 = vrot.slane %v964_v28, %v1579_v8  ;;  %v1109_v40 = vcombine.low %v954_v29, %v950_v12 }
  0x26   : > { %1409 = vmatpush3.bf16.msra.mxu1 %v1475_v60  ;;  %1410 = vmatprep.mubr.msk.bf16.mxu1 %vm1506_vm0, %v1505_v2  ;;  %v1044_v37 = vrot.slane %v1036_v32, %v1579_v8  ;;  %v1051_v38 = vrot.slane %v1037_v33, %v1579_v8 }
  0x27   : > { %1420 = vmatprep.subr.bf16.mxu1 %v1505_v2  ;;  %v979_v39 = vcombine.low %v971_v35, %v978_v36  ;;  %v1116_v43 = vrot.slane %v1109_v40, %v1579_v8 }
  0x28   : > { %v1052_v42 = vcombine.low %v1044_v37, %v1051_v38 }
  0x29   : > { %v1117_v44 = vcombine.low %v978_v36, %v1116_v43 }
  0x2b   : > { %1405 = vmatmul.mubr.msk.bf16.vlgmr.msra.gmra.mxu0 %vm543_vm4, %v668_v5 }
  0x2c   : > { %1415 = vmatpush3.bf16.msra.mxu0 %v1476_v18  ;;  %1416 = vmatprep.mubr.msk.bf16.mxu0 %vm1506_vm0, %v1505_v2 }
  0x2d   : > { %1426 = vmatprep.subr.bf16.mxu0 %v1505_v2  ;;  %1411 = vmatmul.mubr.msk.bf16.vlgmr.msra.gmra.mxu1 %vm543_vm4, %v740_v10 }
  0x2e   : > { %1421 = vmatpush3.bf16.msra.mxu1 %v1477_v13  ;;  %1422 = vmatprep.mubr.msk.bf16.mxu1 %vm1506_vm0, %v1505_v2 }
  0x2f   : > { %1432 = vmatprep.subr.bf16.mxu1 %v1505_v2 }
  0x33   : > { %1417 = vmatmul.mubr.msk.bf16.vlgmr.msra.gmra.mxu0 %vm543_vm4, %v812_v25  ;;  %v1364_v25 = vld [vmem:[%s1760_s4] ss:$0 sm:$0xff] }
  0x34   : > { %1427 = vmatpush3.bf16.msra.mxu0 %v1478_v30  ;;  %1428 = vmatprep.mubr.msk.bf16.mxu0 %vm1506_vm0, %v1505_v2 }
  0x35   : > { %1438 = vmatprep.subr.bf16.mxu0 %v1505_v2  ;;  %1423 = vmatmul.mubr.msk.bf16.vlgmr.msra.gmra.mxu1 %vm543_vm4, %v876_v31 }
  0x36   : > { %1433 = vmatpush3.bf16.msra.mxu1 %v1479_v34  ;;  %1434 = vmatprep.mubr.msk.bf16.mxu1 %vm1506_vm0, %v1505_v2 }
  0x3b   : > { %1429 = vmatmul.mubr.msk.bf16.vlgmr.msra.gmra.mxu0 %vm543_vm4, %v979_v39 }
  0x3c   : > { %1439 = vmatpush3.bf16.msra.mxu0 %v1480_v41  ;;  %1440 = vmatprep.mubr.msk.bf16.mxu0 %vm1506_vm0, %v1505_v2 }
  0x3d   : > { %1435 = vmatmul.mubr.msk.bf16.vlgmr.msra.gmra.mxu1 %vm543_vm4, %v1052_v42 }
  0x43   : > { %1441 = vmatmul.mubr.msk.bf16.vlgmr.msra.gmra.mxu0 %vm543_vm4, %v1117_v44 }
  0xe3   : > { %v581_v45 = vpop.f32.mrf.mxu0 }
  0xe5   : > { %v1394_v46 = vpop.f32.mrf.mxu0  ;;  %v649_v47 = vpop.f32.mrf.mxu1 }
  0xe6   : > { %v650_v56 = vadd.f32 %v649_v47, %v581_v45 }
  0xe7   : > { %v584_v48 = vpop.f32.mrf.mxu0  ;;  %v1400_v49 = vpop.f32.mrf.mxu1 }
  0xe9   : > { %v1395_v50 = vpop.f32.mrf.mxu0  ;;  %v652_v51 = vpop.f32.mrf.mxu1 }
  0xea   : > { %v653_v61 = vadd.f32 %v652_v51, %v584_v48 }
  0xeb   : > { %v712_v52 = vpop.f32.mrf.mxu0  ;;  %v1401_v53 = vpop.f32.mrf.mxu1 }
  0xec   : > { %v719_v58 = vadd.f32 %v712_v52, %v650_v56 }
  0xed   : > { %v1406_v54 = vpop.f32.mrf.mxu0  ;;  %v784_v8 = vpop.f32.mrf.mxu1 }
  0xee   : > { %v791_v0 = vadd.f32 %v784_v8, %v719_v58 }
  0xef   : > { %v715_v55 = vpop.f32.mrf.mxu0  ;;  %v1412_v57 = vpop.f32.mrf.mxu1 }
  0xf0   : > { %v720_v1 = vadd.f32 %v715_v55, %v653_v61 }
  0xf1   : > { %v1407_v2 = vpop.f32.mrf.mxu0  ;;  %v787_v59 = vpop.f32.mrf.mxu1 }
  0xf2   : > { %v792_v18 = vadd.f32 %v787_v59, %v720_v1 }
  0xf3   : > { %v856_v60 = vpop.f32.mrf.mxu0  ;;  %v1413_v62 = vpop.f32.mrf.mxu1 }
  0xf4   : > { %v863_v5 = vadd.f32 %v856_v60, %v791_v0 }
  0xf5   : > { %v1418_v63 = vpop.f32.mrf.mxu0  ;;  %v920_v3 = vpop.f32.mrf.mxu1 }
  0xf6   : > { %v927_v24 = vadd.f32 %v920_v3, %v863_v5 }
  0xf7   : > { %v859_v4 = vpop.f32.mrf.mxu0  ;;  %v1424_v6 = vpop.f32.mrf.mxu1 }
  0xf8   : > { %v864_v26 = vadd.f32 %v859_v4, %v792_v18 }
  0xf9   : > { %v1419_v7 = vpop.f32.mrf.mxu0  ;;  %v923_v20 = vpop.f32.mrf.mxu1 }
  0xfa   : > { %v928_v19 = vadd.f32 %v923_v20, %v864_v26 }
  0xfb   : > { %v1023_v22 = vpop.f32.mrf.mxu0  ;;  %v1425_v9 = vpop.f32.mrf.mxu1 }
  0xfc   : > { %v1030_v11 = vadd.f32 %v1023_v22, %v927_v24 }
  0xfd   : > { %v1430_v10 = vpop.f32.mrf.mxu0  ;;  %v1096_v13 = vpop.f32.mrf.mxu1 }
  0xfe   : > { %v1103_v17 = vadd.f32 %v1096_v13, %v1030_v11 }
  0xff   : > { %v1026_v14 = vpop.f32.mrf.mxu0  ;;  %v1436_v15 = vpop.f32.mrf.mxu1 }
 0x100   : > { %v1031_v21 = vadd.f32 %v1026_v14, %v928_v19 }
 0x101   : > { %v1431_v12 = vpop.f32.mrf.mxu0  ;;  %v1099_v23 = vpop.f32.mrf.mxu1 }
 0x102   : > { %v1104_v30 = vadd.f32 %v1099_v23, %v1031_v21 }
 0x103   : > { %v1161_v16 = vpop.f32.mrf.mxu0  ;;  %v1437_v27 = vpop.f32.mrf.mxu1 }
 0x104   : > { %v1168_v28 = vadd.f32 %v1161_v16, %v1103_v17 }
 0x105   : > { %v1442_v29 = vpop.f32.mrf.mxu0 }
 0x106   : > { %v1177_v31 = vadd.f32 %v1364_v25, %v1168_v28 }
 0x107   : > { %v1164_v32 = vpop.f32.mrf.mxu0 }
 0x108   : > { %v1181_v33 = vcombine.high %v1177_v31, %v1177_v31  ;;  %v1185_v34 = vpack.c.bf16 %v1177_v31, %v1177_v31  ;;  %v1169_v35 = vadd.f32 %v1164_v32, %v1104_v30 }
 0x109   : > { %v1443_v36 = vpop.f32.mrf.mxu0 }
 0x10a   : > { %v1186_v37 = vpack.c.bf16 %v1181_v33, %v1181_v33  ;;  %1190 = vst.msk [vmem:[%s380_s23] sm:$0x3] %vm1189_vm8, %v1185_v34  ;;  %v1178_v38 = vadd.f32 %v1364_v25, %v1169_v35 }
 0x10c   : > { %1191 = vst.msk [vmem:[%s380_s23 + $0x2] sm:$0x3] %vm1189_vm8, %v1186_v37  ;;  %v1182_v39 = vcombine.high %v1178_v38, %v1178_v38  ;;  %v1187_v40 = vpack.c.bf16 %v1178_v38, %v1178_v38 }
 0x10e   : > { %v1188_v41 = vpack.c.bf16 %v1182_v39, %v1182_v39  ;;  %1192 = vst.msk [vmem:[%s380_s23 + $0x4] sm:$0x3] %vm1189_vm8, %v1187_v40 }
 0x110   : > { %1193 = vst.msk [vmem:[%s380_s23 + $0x6] sm:$0x3] %vm1189_vm8, %v1188_v41 }
 0x111 PF: > { %s15_s0 = sadd.s32 1, %s1503_s0   ;;  %s1766_s18 = smov %s1499_s19 }
 0x112   : > { %p12_p5 = scmp.ge.s32.totalorder %s15_s0, 4   ;;  %s1767_s19 = smov %s1769_s2 }
 0x114   :  { %14 = sbr.rel (!%p12_p5) target bundleno = 2 (0x2), region = 84 }

// kernel: decoder_forward.52
= control target key start
LH: loop header
LB: loop body
LE: loop exit
PB: predicated region body
PF: predicated region fallthrough
CT: control target
= control target key end

     0   :  { %s623_s15 = smov 0   ;;  %s725_s0 = inlined_call_operand.vmem [shape: bf16[2,4,4,64], index: 0, kind: input, shape index: {}]   ;;  %s726_s1 = inlined_call_operand.vmem [shape: f32[1,64], index: 1, kind: input, shape index: {}]   ;;  %s727_s2 = inlined_call_operand.vmem [shape: f32[1,64], index: 2, kind: input, shape index: {}]   ;;  %s728_s3 = inlined_call_operand.vmem [shape: f32[64,64], index: 3, kind: input, shape index: {}]   ;;  %s729_s4 = inlined_call_operand.vmem [shape: bf16[2,4,4,64], index: 4, kind: output, shape index: {}]  }
   0x1 LB: > { %s504_s16 = sadd.s32 4294967295, %s594_s15   ;;  %p508_p0 = scmp.ge.s32.totalorder %s594_s15, 1  ;;  %s594_s15 = sphi %s623_s15, %s14_s15  }
   0x2   : > { %p162_p1 = scmp.lt.s32.totalorder %s594_s15, 3 }
   0x4   : > { %p163_p2 = pnand %p508_p0, %p162_p1 }
   0x5   : > { %p188_p3 = scmp.lt.s32.totalorder (!%p163_p2), %s504_s16, 1 }
   0x6   : > { %166 = sbr.rel (%p163_p2) target bundleno = 261 (0x105), region = 36 }
   0xb   : > { %v252_v0 = vld [vmem:[%s728_s3 + $0x38] sm:$0xff]  ;;  %v596_v1 = vmov 0.0   ;;  %v251_v2 = vld [vmem:[%s728_s3 + $0x30] sm:$0xff]  ;;  %s731_s16 = smov (!%p188_p3, %s504_s16), 1  ;;  %v250_v3 = vld [vmem:[%s728_s3 + $0x28] sm:$0xff]  ;;  %vm214_vm0 = vcmask 523264   ;;  %v403_v48 = vlaneseq }
   0xc   : > { %538 = vmatprep.subr.mxu0 %v596_v1  ;;  %557 = vmatprep.subr.mxu1 %v596_v1  ;;  %s518_s23 = sshll.u32 %s731_s16, 3  ;;  %v249_v4 = vld [vmem:[%s728_s3 + $0x20] sm:$0xff]  ;;  %v248_v8 = vld [vmem:[%s728_s3 + $0x18] sm:$0xff]  ;;  %v247_v14 = vld [vmem:[%s728_s3 + $0x10] sm:$0xff]  ;;  %vm597_vm1 = vmmov 0   ;;  %vm444_vm2 = vcmask 517120  }
   0xd   : > { %539 = vmatpush3.msra.mxu0 %v252_v0  ;;  %558 = vmatpush3.msra.mxu1 %v252_v0  ;;  %s192_s28 = scalar_lea.vmem %s725_s0, %s518_s23  ;;  %v246_v21 = vld [vmem:[%s728_s3 + $0x8] sm:$0xff]  ;;  %v245_v26 = vld [vmem:[%s728_s3] sm:$0xff]  ;;  %v404_v51 = vshrl.u32 %v403_v48, 7  ;;  %s197_s19 = scalar_lea.vmem %s729_s4, %s518_s23 }
   0xe   : > { %540 = vmatprep.subr.mxu0 %v596_v1  ;;  %559 = vmatprep.subr.mxu1 %v596_v1  ;;  %v198_v5 = vld [vmem:[%s192_s28] sm:$0x3]  ;;  %v199_v6 = vld [vmem:[%s192_s28 + $0x2] sm:$0x3]  ;;  %v200_v7 = vld [vmem:[%s192_s28 + $0x4] sm:$0x3] }
   0xf   : > { %541 = vmatpush3.msra.mxu0 %v251_v2  ;;  %560 = vmatpush3.msra.mxu1 %v251_v2  ;;  %v201_v9 = vld [vmem:[%s192_s28 + $0x6] sm:$0x3]  ;;  %v662_v10 = vunpack.c.l.bf16 %v198_v5  ;;  %v664_v11 = vunpack.c.l.bf16 %v199_v6  ;;  %v666_v12 = vunpack.c.l.bf16 %v200_v7  ;;  %v405_v52 = vsub.s32 0, %v404_v51  ;;  %v414_v54 = vld [vmem:[%s726_s1] sm:$0x1] }
  0x10   : > { %542 = vmatprep.subr.mxu0 %v596_v1  ;;  %561 = vmatprep.subr.mxu1 %v596_v1  ;;  %v668_v13 = vunpack.c.l.bf16 %v201_v9  ;;  %v515_v58 = vld [vmem:[%s727_s2] ss:$0 sm:$0xff] }
  0x11   : > { %543 = vmatpush3.msra.mxu0 %v250_v3  ;;  %562 = vmatpush3.msra.mxu1 %v250_v3  ;;  %v210_v15 = vcombine.low %v662_v10, %v664_v11  ;;  %v224_v16 = vmul.f32 %v662_v10, %v662_v10  ;;  %v225_v17 = vmul.f32 %v664_v11, %v664_v11 }
  0x12   : > { %544 = vmatprep.subr.mxu0 %v596_v1  ;;  %563 = vmatprep.subr.mxu1 %v596_v1  ;;  %v211_v18 = vcombine.low %v666_v12, %v668_v13  ;;  %v226_v19 = vmul.f32 %v666_v12, %v666_v12  ;;  %v227_v20 = vmul.f32 %v668_v13, %v668_v13 }
  0x13   : > { %545 = vmatpush3.msra.mxu0 %v249_v4  ;;  %564 = vmatpush3.msra.mxu1 %v249_v4  ;;  %v215_v22 = vsel %vm214_vm0, %v210_v15, 0.0  ;;  %v232_v23 = vcombine.low %v224_v16, %v225_v17  ;;  %v434_v63 = vcombine.high %v515_v58, %v515_v58 }
  0x14   : > { %546 = vmatprep.subr.mxu0 %v596_v1  ;;  %565 = vmatprep.subr.mxu1 %v596_v1  ;;  %v216_v24 = vsel %vm214_vm0, %v211_v18, 0.0  ;;  %v233_v25 = vcombine.low %v226_v19, %v227_v20 }
  0x15   : > { %547 = vmatpush3.msra.mxu0 %v248_v8  ;;  %566 = vmatpush3.msra.mxu1 %v248_v8  ;;  %v217_v27 = vadd.f32 %v216_v24, %v215_v22  ;;  %v236_v28 = vsel %vm214_vm0, %v232_v23, 0.0 }
  0x16   : > { %548 = vmatprep.subr.mxu0 %v596_v1  ;;  %567 = vmatprep.subr.mxu1 %v596_v1  ;;  %v237_v29 = vsel %vm214_vm0, %v233_v25, 0.0 }
  0x17   : > { %549 = vmatpush3.msra.mxu0 %v247_v14  ;;  %568 = vmatpush3.msra.mxu1 %v247_v14  ;;  %v218_v30 = vrot.slane %v217_v27, 4  ;;  %v238_v31 = vadd.f32 %v237_v29, %v236_v28 }
  0x18   : > { %550 = vmatprep.subr.mxu0 %v596_v1  ;;  %569 = vmatprep.subr.mxu1 %v596_v1 }
  0x19   : > { %551 = vmatpush3.msra.mxu0 %v246_v21  ;;  %554 = vmatprep.mubr.msk.f32.mxu0 %vm597_vm1, %v596_v1  ;;  %v219_v32 = vadd.f32 %v218_v30, %v217_v27  ;;  %v239_v33 = vrot.slane %v238_v31, 4 }
  0x1a   : > { %552 = vmatprep.subr.mxu0 %v596_v1  ;;  %570 = vmatpush3.msra.mxu1 %v246_v21 }
  0x1b   : > { %553 = vmatpush3.msra.mxu0 %v245_v26  ;;  %571 = vmatprep.subr.mxu1 %v596_v1  ;;  %v220_v34 = vrot.slane %v219_v32, 2  ;;  %v240_v35 = vadd.f32 %v239_v33, %v238_v31 }
  0x1c   : > { %572 = vmatpush3.msra.mxu1 %v245_v26  ;;  %573 = vmatprep.mubr.msk.f32.mxu1 %vm597_vm1, %v596_v1 }
  0x1d   : > { %v221_v36 = vadd.f32 %v220_v34, %v219_v32  ;;  %v241_v37 = vrot.slane %v240_v35, 2 }
  0x1f   : > { %v222_v38 = vrot.slane %v221_v36, 1  ;;  %v242_v39 = vadd.f32 %v241_v37, %v240_v35 }
  0x21   : > { %v223_v40 = vadd.f32 %v222_v38, %v221_v36  ;;  %v243_v41 = vrot.slane %v242_v39, 1 }
  0x23   : > { %555 = vmatmul.mubr.msk.f32.vlgmr.msra.gmra.mxu0 %vm214_vm0, %v223_v40  ;;  %v244_v42 = vadd.f32 %v243_v41, %v242_v39 }
  0x25   : > { %574 = vmatmul.mubr.msk.f32.vlgmr.msra.gmra.mxu1 %vm214_vm0, %v244_v42 }
  0xe3   : > { %v322_v43 = vpop.f32.mrf.mxu0 }
  0xe4   : > { %v399_v44 = vmul.f32 %v322_v43, %v322_v43  ;;  %v406_v53 = vrot.slane %v322_v43, %v405_v52 }
  0xe5   : > { %v556_v45 = vpop.f32.mrf.mxu0  ;;  %v395_v46 = vpop.f32.mrf.mxu1 }
  0xe6   : > { %v400_v47 = vsub.f32 %v395_v46, %v399_v44  ;;  %v408_v56 = vcombine.high %v406_v53, %v406_v53  ;;  %v410_v59 = vsub.f32 %v662_v10, %v406_v53  ;;  %v412_v60 = vsub.f32 %v666_v12, %v406_v53 }
  0xe7   : > { %v575_v49 = vpop.f32.mrf.mxu1 }
  0xe8   : > { %v401_v50 = vadd.f32 1e-06, %v400_v47  ;;  %v411_v62 = vsub.f32 %v664_v11, %v408_v56  ;;  %v413_v0 = vsub.f32 %v668_v13, %v408_v56 }
  0xea   : > { %586 = vrsqrt.f32 %v401_v50 }
  0xf7   : > { %v587_v55 = vpop.eup %586 }
  0xf8   : > { %v415_v57 = vmul.f32 %v587_v55, %v414_v54 }
  0xfa   : > { %v419_v61 = vrot.slane %v415_v57, %v405_v52 }
  0xfc   : > { %v421_v1 = vcombine.high %v419_v61, %v419_v61  ;;  %v423_v2 = vmul.f32 %v419_v61, %v410_v59  ;;  %v425_v3 = vmul.f32 %v419_v61, %v412_v60 }
  0xfe   : > { %v424_v4 = vmul.f32 %v421_v1, %v411_v62  ;;  %v426_v5 = vmul.f32 %v421_v1, %v413_v0  ;;  %v436_v6 = vadd.f32 %v515_v58, %v423_v2  ;;  %v438_v7 = vadd.f32 %v515_v58, %v425_v3 }
 0x100   : > { %v437_v8 = vadd.f32 %v434_v63, %v424_v4  ;;  %v439_v9 = vadd.f32 %v434_v63, %v426_v5  ;;  %v440_v10 = vpack.c.bf16 %v436_v6, %v436_v6  ;;  %v442_v11 = vpack.c.bf16 %v438_v7, %v438_v7 }
 0x102   : > { %v441_v12 = vpack.c.bf16 %v437_v8, %v437_v8  ;;  %v443_v14 = vpack.c.bf16 %v439_v9, %v439_v9  ;;  %445 = vst.msk [vmem:[%s197_s19] sm:$0x3] %vm444_vm2, %v440_v10  ;;  %447 = vst.msk [vmem:[%s197_s19 + $0x4] sm:$0x3] %vm444_vm2, %v442_v11 }
 0x104   : > { %446 = vst.msk [vmem:[%s197_s19 + $0x2] sm:$0x3] %vm444_vm2, %v441_v12  ;;  %448 = vst.msk [vmem:[%s197_s19 + $0x6] sm:$0x3] %vm444_vm2, %v443_v14 }
 0x105 PF: > { %s14_s15 = sadd.s32 1, %s594_s15  }
 0x106   : > { %p11_p4 = scmp.ge.s32.totalorder %s14_s15, 4  }
 0x108   :  { %13 = sbr.rel (!%p11_p4) target bundleno = 1 (0x1), region = 66 }

// kernel: decoder_forward.49
= control target key start
LH: loop header
LB: loop body
LE: loop exit
PB: predicated region body
PF: predicated region fallthrough
CT: control target
= control target key end

     0   :  { %s1938_s18 = smov 0   ;;  %s1940_s19 = smov 0   ;;  %s2287_s0 = inlined_call_operand.vmem [shape: bf16[2,4,4,64], index: 0, kind: input, shape index: {}, may-alias: {0,1,2}]   ;;  %s2288_s1 = inlined_call_operand.vmem [shape: bf16[2,4,4,64], index: 1, kind: input, shape index: {}, may-alias: {0,1,2}]   ;;  %s2289_s2 = inlined_call_operand.vmem [shape: bf16[2,4,4,64], index: 2, kind: input, shape index: {}, may-alias: {0,1,2}]   ;;  %s2290_s3 = inlined_call_operand.vmem [shape: bf16[9,64,64], index: 3, kind: input, shape index: {}]   ;;  %s2291_s4 = inlined_call_operand.vmem [shape: f32[1,64], index: 4, kind: input, shape index: {}]   ;;  %s2292_s5 = inlined_call_operand.vmem [shape: bf16[2,4,4,64], index: 5, kind: output, shape index: {}]  }
   0x1   :  { %s1942_s0 = smov 0  }
   0x2 LB: > { %s27_s2 = sadd.s32 1, %s1898_s19  ;;  %p1537_p0 = scmp.ge.s32.totalorder %s1902_s0, 1  ;;  %s1902_s0 = sphi %s1942_s0, %s15_s0   ;;  %s1898_s19 = sphi %s1940_s19, %s2298_s19   ;;  %s1894_s18 = sphi %s1938_s18, %s2297_s18  }
   0x3   : > { %p29_p1 = scmp.ge.s32.totalorder %s27_s2, 2  ;;  %p270_p2 = scmp.lt.s32.totalorder %s1902_s0, 3 }
   0x5   : > { %s2300_s2 = smov (%p29_p1, %s27_s2), 0  ;;  %p271_p3 = pnand %p1537_p0, %p270_p2 }
   0x6   : > { %p347_p4 = scmp.lt.s32.totalorder (!%p271_p3), %s1894_s18, 1 }
   0x7   : > { %274 = sbr.rel (%p271_p3) target bundleno = 306 (0x132), region = 40 }
   0xc   : > { %v1844_v0 = vld [vmem:[%s2290_s3 + $0x78] sm:$0xff]   ;;  %v1904_v1 = vmov 0.0   ;;  %v1846_v3 = vld [vmem:[%s2290_s3 + $0x70] sm:$0xff]   ;;  %vm1905_vm0 = vmmov 0   ;;  %s2302_s18 = smov (!%p347_p4, %s1894_s18), 1  ;;  %v1848_v5 = vld [vmem:[%s2290_s3 + $0x68] sm:$0xff]   ;;  %v415_v6 = vlaneseq }
   0xd   : > { %1708 = vmatprep.subr.bf16.mxu0 %v1904_v1  ;;  %1720 = vmatprep.subr.bf16.mxu1 %v1904_v1  ;;  %v1845_v2 = vld [vmem:[%s2290_s3 + $0x18] sm:$0xff]   ;;  %v1847_v4 = vld [vmem:[%s2290_s3 + $0x10] sm:$0xff]   ;;  %s1659_s30 = sshll.u32 %s2302_s18, 3  ;;  %v1849_v7 = vld [vmem:[%s2290_s3 + $0x8] sm:$0xff]   ;;  %v1906_v10 = vmov 1983009808  }
   0xe   : > { %1709 = vmatpush3.bf16.msra.mxu0 %v1844_v0  ;;  %1716 = vmatprep.mubr.msk.bf16.mxu0 %vm1905_vm0, %v1904_v1  ;;  %s354_s10 = scalar_lea.vmem %s2288_s1, %s1659_s30  ;;  %v1850_v8 = vld [vmem:[%s2290_s3 + $0x60] sm:$0xff]   ;;  %v413_v11 = vunpack.c.l.s4 %v1906_v10  ;;  %v416_v12 = vshrl.u32 %v415_v6, 7  ;;  %vm502_vm1 = vcmask 1040384   ;;  %vm503_vm2 = vsmask.f32 256  ;;  %v1852_v58 = vld [vmem:[%s2290_s3 + $0xd8] sm:$0xff]   ;;  %s380_s9 = scalar_lea.vmem %s2292_s5, %s1659_s30 }
   0xf   : > { %1721 = vmatpush3.bf16.msra.mxu1 %v1845_v2  ;;  %1710 = vmatprep.subr.bf16.mxu0 %v1904_v1  ;;  %v1851_v9 = vld [vmem:[%s2290_s3] sm:$0xff]   ;;  %v1907_v23 = vmov 0   ;;  %vm2050_vm3 = vmand %vm502_vm1, %vm503_vm2  ;;  %vm573_vm4 = vcmask 523264   ;;  %v1853_v61 = vld [vmem:[%s2290_s3 + $0x38] sm:$0xff]   ;;  %vm1091_vm5 = vcmask 1041408   ;;  %vm1405_vm8 = vcmask 517120  }
  0x10   : > { %1722 = vmatprep.subr.bf16.mxu1 %v1904_v1  ;;  %1728 = vmatprep.mubr.msk.bf16.mxu1 %vm1905_vm0, %v1904_v1  ;;  %v1999_v13 = vld [vmem:[%s354_s10] sm:$0x3]  ;;  %v2001_v14 = vld [vmem:[%s354_s10 + $0x2] sm:$0x3]  ;;  %v2004_v15 = vld [vmem:[%s354_s10 + $0x4] sm:$0x3]  ;;  %v414_v16 = vunpack.c.0.s8 %v413_v11 }
  0x11   : > { %v2006_v17 = vld [vmem:[%s354_s10 + $0x6] sm:$0x3]  ;;  %v1854_v63 = vld [vmem:[%s2290_s3 + $0xd0] sm:$0xff]   ;;  %v898_v37 = vcombine.low %v1999_v13, %v2001_v14  ;;  %vm1092_vm6 = vsmask.f32 1280 }
  0x12   : > { %1711 = vmatpush3.bf16.msra.mxu0 %v1846_v3  ;;  %v2008_v18 = vsub.s32 %v414_v16, %v416_v12  ;;  %v1855_v2 = vld [vmem:[%s2290_s3 + $0x30] sm:$0xff]   ;;  %v1856_v3 = vld [vmem:[%s2290_s3 + $0xc8] sm:$0xff]   ;;  %v1859_v12 = vld [vmem:[%s2290_s3 + $0x20] sm:$0xff]  }
  0x13   : > { %1723 = vmatpush3.bf16.msra.mxu1 %v1847_v4  ;;  %1712 = vmatprep.subr.bf16.mxu0 %v1904_v1  ;;  %v802_v4 = vcombine.low %v1907_v23, %v1999_v13  ;;  %v1860_v16 = vld [vmem:[%s2290_s3 + $0x98] sm:$0xff]   ;;  %vm2194_vm7 = vmand %vm1091_vm5, %vm1092_vm6 }
  0x14   : > { %1724 = vmatprep.subr.bf16.mxu1 %v1904_v1  ;;  %v2013_v19 = vrot.slane %v1999_v13, %v2008_v18  ;;  %v2017_v20 = vrot.slane %v2001_v14, %v2008_v18  ;;  %v2021_v21 = vrot.slane %v2004_v15, %v2008_v18  ;;  %v2025_v22 = vrot.slane %v2006_v17, %v2008_v18 }
  0x15   : > { %v2030_v24 = vrot.slane %v1907_v23, %v2008_v18 }
  0x16   : > { %1713 = vmatpush3.bf16.msra.mxu0 %v1848_v5  ;;  %v462_v25 = vshrl.u32 %v2013_v19, 16  ;;  %v465_v26 = vshll.u32 %v2013_v19, 16  ;;  %v469_v27 = vshrl.u32 %v2017_v20, 16  ;;  %v472_v28 = vshll.u32 %v2017_v20, 16  ;;  %v1869_v19 = vld [vmem:[%s2290_s3 + $0xb8] sm:$0xff]  }
  0x17   : > { %1725 = vmatpush3.bf16.msra.mxu1 %v1849_v7  ;;  %1714 = vmatprep.subr.bf16.mxu0 %v1904_v1  ;;  %v476_v29 = vshrl.u32 %v2021_v21, 16  ;;  %v479_v30 = vshll.u32 %v2021_v21, 16  ;;  %v483_v31 = vshrl.u32 %v2025_v22, 16  ;;  %v486_v32 = vshll.u32 %v2025_v22, 16  ;;  %v1857_v7 = vld [vmem:[%s2290_s3 + $0x28] sm:$0xff]   ;;  %v1870_v21 = vld [vmem:[%s2290_s3 + $0x50] sm:$0xff]  }
  0x18   : > { %1726 = vmatprep.subr.bf16.mxu1 %v1904_v1  ;;  %v464_v33 = vrot.slane %v462_v25, 7  ;;  %v471_v34 = vrot.slane %v469_v27, 7  ;;  %v455_v40 = vshrl.u32 %v2030_v24, 16  ;;  %v458_v41 = vshll.u32 %v2030_v24, 16 }
  0x19   : > { %v478_v35 = vrot.slane %v476_v29, 7  ;;  %v485_v36 = vrot.slane %v483_v31, 7  ;;  %v803_v5 = vcombine.low %v2001_v14, %v2004_v15  ;;  %v1865_v14 = vld [vmem:[%s2290_s3 + $0xe8] sm:$0xff]  }
  0x1a   : > { %1715 = vmatpush3.bf16.msra.mxu0 %v1850_v8  ;;  %v467_v38 = vor.u32 %v465_v26, %v464_v33  ;;  %v474_v39 = vor.u32 %v472_v28, %v471_v34  ;;  %v457_v46 = vrot.slane %v455_v40, 7  ;;  %v1858_v8 = vld [vmem:[%s2290_s3 + $0xc0] sm:$0xff]   ;;  %v1861_v34 = vld [vmem:[%s2290_s3 + $0xf8] sm:$0xff]   ;;  %v1073_v13 = vrot.slane %v458_v41, 1 }
  0x1b   : > { %1727 = vmatpush3.bf16.msra.mxu1 %v1851_v9  ;;  %1732 = vmatprep.subr.bf16.mxu0 %v1904_v1  ;;  %v481_v42 = vor.u32 %v479_v30, %v478_v35  ;;  %v488_v43 = vor.u32 %v486_v32, %v485_v36  ;;  %v810_v9 = vrot.slane %v802_v4, %v2008_v18  ;;  %v1862_v35 = vld [vmem:[%s2290_s3 + $0x90] sm:$0xff]  }
  0x1c   : > { %1744 = vmatprep.subr.bf16.mxu1 %v1904_v1  ;;  %v506_v44 = vsel %vm2050_vm3, 0, %v467_v38  ;;  %v507_v45 = vsel %vm2050_vm3, 0, %v474_v39  ;;  %v460_v51 = vor.u32 %v458_v41, %v457_v46  ;;  %v817_v10 = vrot.slane %v803_v5, %v2008_v18  ;;  %v1863_v36 = vld [vmem:[%s2290_s3 + $0xf0] sm:$0xff]   ;;  %v1864_v39 = vld [vmem:[%s2290_s3 + $0x88] sm:$0xff]  }
  0x1d   : > { %v508_v47 = vsel %vm2050_vm3, 0, %v481_v42  ;;  %v509_v48 = vsel %vm2050_vm3, 0, %v488_v43  ;;  %v532_v49 = vcombine.low %v506_v44, %v507_v45  ;;  %v899_v38 = vcombine.low %v2004_v15, %v2006_v17  ;;  %v1878_v5 = vld [vmem:[%s2290_s3 + $0x108] sm:$0xff]  }
  0x1e   : > { %v533_v50 = vcombine.low %v508_v47, %v509_v48  ;;  %v620_v52 = vcombine.low %v507_v45, %v508_v47  ;;  %v505_v55 = vsel %vm2050_vm3, 0, %v460_v51  ;;  %v818_v33 = vcombine.low %v810_v9, %v817_v10  ;;  %v1868_v47 = vld [vmem:[%s2290_s3 + $0x58] sm:$0xff]  }
  0x1f   : > { %v540_v53 = vrot.slane %v532_v49, %v2008_v18  ;;  %v619_v56 = vcombine.low %v505_v55, %v506_v44  ;;  %v714_v0 = vcombine.low %v509_v48, %v505_v55  ;;  %v994_v42 = vcombine.low %v2006_v17, %v1907_v23  ;;  %v1866_v23 = vld [vmem:[%s2290_s3 + $0x80] sm:$0xff]  }
  0x20   : > { %v547_v54 = vrot.slane %v533_v50, %v2008_v18  ;;  %v634_v57 = vrot.slane %v620_v52, %v2008_v18  ;;  %v906_v15 = vrot.slane %v898_v37, %v2008_v18  ;;  %v913_v43 = vrot.slane %v899_v38, %v2008_v18 }
  0x21   : > { %v627_v60 = vrot.slane %v619_v56, %v2008_v18  ;;  %v721_v6 = vrot.slane %v714_v0, %v2008_v18  ;;  %v1075_v44 = vrot.slane %v465_v26, 1  ;;  %v1077_v45 = vrot.slane %v472_v28, 1  ;;  %v1867_v28 = vld [vmem:[%s2290_s3 + $0xe0] sm:$0xff]   ;;  %v1873_v56 = vld [vmem:[%s2290_s3 + $0xa8] sm:$0xff]   ;;  %v1876_v0 = vld [vmem:[%s2290_s3 + $0x118] sm:$0xff]  }
  0x22   : > { %v548_v59 = vcombine.low %v540_v53, %v547_v54  ;;  %v1079_v17 = vrot.slane %v479_v30, 1  ;;  %v1001_v41 = vrot.slane %v994_v42, %v2008_v18  ;;  %v1081_v26 = vrot.slane %v486_v32, 1  ;;  %v1872_v53 = vld [vmem:[%s2290_s3 + $0x48] sm:$0xff]  }
  0x23   : > { %v635_v62 = vcombine.low %v627_v60, %v634_v57  ;;  %v722_v11 = vcombine.low %v634_v57, %v721_v6  ;;  %v914_v30 = vcombine.low %v906_v15, %v913_v43  ;;  %v1074_v46 = vor.u32 %v1073_v13, %v455_v40 }
  0x24   : > { %1717 = vmatmul.mubr.msk.bf16.vlgmr.msra.gmra.mxu0 %vm573_vm4, %v548_v59  ;;  %v1076_v48 = vor.u32 %v1075_v44, %v462_v25  ;;  %v1078_v32 = vor.u32 %v1077_v45, %v469_v27  ;;  %v1080_v49 = vor.u32 %v1079_v17, %v476_v29  ;;  %v1002_v40 = vcombine.low %v817_v10, %v1001_v41  ;;  %v1874_v59 = vld [vmem:[%s2290_s3 + $0x40] sm:$0xff]  }
  0x25   : > { %1733 = vmatpush3.bf16.msra.mxu0 %v1852_v58  ;;  %1740 = vmatprep.mubr.msk.bf16.mxu0 %vm1905_vm0, %v1904_v1  ;;  %v1082_v20 = vor.u32 %v1081_v26, %v483_v31  ;;  %v1094_v25 = vsel %vm2194_vm7, %v1074_v46, 0  ;;  %v1871_v31 = vld [vmem:[%s2290_s3 + $0xb0] sm:$0xff]  }
  0x26   : > { %1734 = vmatprep.subr.bf16.mxu0 %v1904_v1  ;;  %1729 = vmatmul.mubr.msk.bf16.vlgmr.msra.gmra.mxu1 %vm573_vm4, %v635_v62  ;;  %v1095_v27 = vsel %vm2194_vm7, %v1076_v48, 0  ;;  %v1096_v29 = vsel %vm2194_vm7, %v1078_v32, 0  ;;  %v1097_v22 = vsel %vm2194_vm7, %v1080_v49, 0  ;;  %v1875_v62 = vld [vmem:[%s2290_s3 + $0xa0] sm:$0xff]  }
  0x27   : > { %1745 = vmatpush3.bf16.msra.mxu1 %v1853_v61  ;;  %1752 = vmatprep.mubr.msk.bf16.mxu1 %vm1905_vm0, %v1904_v1  ;;  %v1113_v50 = vcombine.low %v1094_v25, %v1095_v27  ;;  %v1114_v51 = vcombine.low %v1096_v29, %v1097_v22  ;;  %v1098_v52 = vsel %vm2194_vm7, %v1082_v20, 0  ;;  %v1210_v54 = vcombine.low %v1095_v27, %v1096_v29 }
  0x28   : > { %1746 = vmatprep.subr.bf16.mxu1 %v1904_v1  ;;  %v1211_v55 = vcombine.low %v1097_v22, %v1098_v52  ;;  %v1307_v4 = vcombine.low %v1098_v52, %v1094_v25 }
  0x29   : > { %1735 = vmatpush3.bf16.msra.mxu0 %v1854_v63  ;;  %v1121_v57 = vrot.slane %v1113_v50, %v2008_v18  ;;  %v1128_v58 = vrot.slane %v1114_v51, %v2008_v18  ;;  %v1218_v60 = vrot.slane %v1210_v54, %v2008_v18  ;;  %v1655_v54 = vld [vmem:[%s2291_s4] ss:$0 sm:$0xff] }
  0x2a   : > { %1736 = vmatprep.subr.bf16.mxu0 %v1904_v1  ;;  %v1225_v61 = vrot.slane %v1211_v55, %v2008_v18  ;;  %v1314_v6 = vrot.slane %v1307_v4, %v2008_v18 }
  0x2b   : > { %1747 = vmatpush3.bf16.msra.mxu1 %v1855_v2  ;;  %v1129_v63 = vcombine.low %v1121_v57, %v1128_v58 }
  0x2c   : > { %1748 = vmatprep.subr.bf16.mxu1 %v1904_v1  ;;  %v1226_v2 = vcombine.low %v1218_v60, %v1225_v61 }
  0x2d   : > { %1737 = vmatpush3.bf16.msra.mxu0 %v1856_v3  ;;  %v1877_v3 = vld [vmem:[%s2290_s3 + $0x110] sm:$0xff]  }
  0x2e   : > { %1738 = vmatprep.subr.bf16.mxu0 %v1904_v1 }
  0x2f   : > { %1749 = vmatpush3.bf16.msra.mxu1 %v1857_v7  ;;  %v1879_v7 = vld [vmem:[%s2290_s3 + $0x100] sm:$0xff]  }
  0x30   : > { %1750 = vmatprep.subr.bf16.mxu1 %v1904_v1 }
  0x31   : > { %1739 = vmatpush3.bf16.msra.mxu0 %v1858_v8  ;;  %v1315_v8 = vcombine.low %v1128_v58, %v1314_v6 }
  0x32   : > { %1756 = vmatprep.subr.bf16.mxu0 %v1904_v1 }
  0x33   : > { %1751 = vmatpush3.bf16.msra.mxu1 %v1859_v12 }
  0x34   : > { %1741 = vmatmul.mubr.msk.bf16.vlgmr.msra.gmra.mxu0 %vm573_vm4, %v722_v11  ;;  %1768 = vmatprep.subr.bf16.mxu1 %v1904_v1 }
  0x35   : > { %1757 = vmatpush3.bf16.msra.mxu0 %v1860_v16  ;;  %1764 = vmatprep.mubr.msk.bf16.mxu0 %vm1905_vm0, %v1904_v1 }
  0x36   : > { %1758 = vmatprep.subr.bf16.mxu0 %v1904_v1  ;;  %1753 = vmatmul.mubr.msk.bf16.vlgmr.msra.gmra.mxu1 %vm573_vm4, %v818_v33 }
  0x37   : > { %1769 = vmatpush3.bf16.msra.mxu1 %v1861_v34  ;;  %1776 = vmatprep.mubr.msk.bf16.mxu1 %vm1905_vm0, %v1904_v1 }
  0x38   : > { %1770 = vmatprep.subr.bf16.mxu1 %v1904_v1 }
  0x39   : > { %1759 = vmatpush3.bf16.msra.mxu0 %v1862_v35 }
  0x3a   : > { %1760 = vmatprep.subr.bf16.mxu0 %v1904_v1 }
  0x3b   : > { %1771 = vmatpush3.bf16.msra.mxu1 %v1863_v36 }
  0x3c   : > { %1772 = vmatprep.subr.bf16.mxu1 %v1904_v1 }
  0x3d   : > { %1761 = vmatpush3.bf16.msra.mxu0 %v1864_v39 }
  0x3e   : > { %1762 = vmatprep.subr.bf16.mxu0 %v1904_v1 }
  0x3f   : > { %1773 = vmatpush3.bf16.msra.mxu1 %v1865_v14 }
  0x40   : > { %1774 = vmatprep.subr.bf16.mxu1 %v1904_v1 }
  0x41   : > { %1763 = vmatpush3.bf16.msra.mxu0 %v1866_v23 }
  0x42   : > { %1780 = vmatprep.subr.bf16.mxu0 %v1904_v1 }
  0x43   : > { %1775 = vmatpush3.bf16.msra.mxu1 %v1867_v28 }
  0x44   : > { %1765 = vmatmul.mubr.msk.bf16.vlgmr.msra.gmra.mxu0 %vm573_vm4, %v914_v30  ;;  %1792 = vmatprep.subr.bf16.mxu1 %v1904_v1 }
  0x45   : > { %1781 = vmatpush3.bf16.msra.mxu0 %v1868_v47  ;;  %1788 = vmatprep.mubr.msk.bf16.mxu0 %vm1905_vm0, %v1904_v1 }
  0x46   : > { %1782 = vmatprep.subr.bf16.mxu0 %v1904_v1  ;;  %1777 = vmatmul.mubr.msk.bf16.vlgmr.msra.gmra.mxu1 %vm573_vm4, %v1002_v40 }
  0x47   : > { %1793 = vmatpush3.bf16.msra.mxu1 %v1869_v19  ;;  %1800 = vmatprep.mubr.msk.bf16.mxu1 %vm1905_vm0, %v1904_v1 }
  0x48   : > { %1794 = vmatprep.subr.bf16.mxu1 %v1904_v1 }
  0x49   : > { %1783 = vmatpush3.bf16.msra.mxu0 %v1870_v21 }
  0x4a   : > { %1784 = vmatprep.subr.bf16.mxu0 %v1904_v1 }
  0x4b   : > { %1795 = vmatpush3.bf16.msra.mxu1 %v1871_v31 }
  0x4c   : > { %1796 = vmatprep.subr.bf16.mxu1 %v1904_v1 }
  0x4d   : > { %1785 = vmatpush3.bf16.msra.mxu0 %v1872_v53 }
  0x4e   : > { %1786 = vmatprep.subr.bf16.mxu0 %v1904_v1 }
  0x4f   : > { %1797 = vmatpush3.bf16.msra.mxu1 %v1873_v56 }
  0x50   : > { %1798 = vmatprep.subr.bf16.mxu1 %v1904_v1 }
  0x51   : > { %1787 = vmatpush3.bf16.msra.mxu0 %v1874_v59 }
  0x52   : > { %1804 = vmatprep.subr.bf16.mxu0 %v1904_v1 }
  0x53   : > { %1799 = vmatpush3.bf16.msra.mxu1 %v1875_v62 }
  0x54   : > { %1789 = vmatmul.mubr.msk.bf16.vlgmr.msra.gmra.mxu0 %vm573_vm4, %v1129_v63 }
  0x55   : > { %1805 = vmatpush3.bf16.msra.mxu0 %v1876_v0  ;;  %1812 = vmatprep.mubr.msk.bf16.mxu0 %vm1905_vm0, %v1904_v1 }
  0x56   : > { %1806 = vmatprep.subr.bf16.mxu0 %v1904_v1  ;;  %1801 = vmatmul.mubr.msk.bf16.vlgmr.msra.gmra.mxu1 %vm573_vm4, %v1226_v2 }
  0x59   : > { %1807 = vmatpush3.bf16.msra.mxu0 %v1877_v3 }
  0x5a   : > { %1808 = vmatprep.subr.bf16.mxu0 %v1904_v1 }
  0x5d   : > { %1809 = vmatpush3.bf16.msra.mxu0 %v1878_v5 }
  0x5e   : > { %1810 = vmatprep.subr.bf16.mxu0 %v1904_v1 }
  0x61   : > { %1811 = vmatpush3.bf16.msra.mxu0 %v1879_v7 }
  0x64   : > { %1813 = vmatmul.mubr.msk.bf16.vlgmr.msra.gmra.mxu0 %vm573_vm4, %v1315_v8 }
  0xe4   : > { %v611_v9 = vpop.f32.mrf.mxu0 }
  0xe6   : > { %v1718_v10 = vpop.f32.mrf.mxu0  ;;  %v697_v11 = vpop.f32.mrf.mxu1 }
  0xe7   : > { %v698_v26 = vadd.f32 %v697_v11, %v611_v9 }
  0xe8   : > { %v614_v12 = vpop.f32.mrf.mxu0  ;;  %v1730_v16 = vpop.f32.mrf.mxu1 }
  0xea   : > { %v1719_v33 = vpop.f32.mrf.mxu0  ;;  %v700_v34 = vpop.f32.mrf.mxu1 }
  0xeb   : > { %v701_v46 = vadd.f32 %v700_v34, %v614_v12 }
  0xec   : > { %v1731_v35 = vpop.f32.mrf.mxu1 }
  0xf4   : > { %v784_v18 = vpop.f32.mrf.mxu0 }
  0xf5   : > { %v791_v28 = vadd.f32 %v784_v18, %v698_v26 }
  0xf6   : > { %v1742_v36 = vpop.f32.mrf.mxu0  ;;  %v880_v37 = vpop.f32.mrf.mxu1 }
  0xf7   : > { %v887_v48 = vadd.f32 %v880_v37, %v791_v28 }
  0xf8   : > { %v787_v38 = vpop.f32.mrf.mxu0  ;;  %v1754_v39 = vpop.f32.mrf.mxu1 }
  0xf9   : > { %v792_v32 = vadd.f32 %v787_v38, %v701_v46 }
  0xfa   : > { %v1743_v42 = vpop.f32.mrf.mxu0  ;;  %v883_v13 = vpop.f32.mrf.mxu1 }
  0xfb   : > { %v888_v21 = vadd.f32 %v883_v13, %v792_v32 }
  0xfc   : > { %v1755_v1 = vpop.f32.mrf.mxu1 }
 0x104   : > { %v976_v14 = vpop.f32.mrf.mxu0 }
 0x105   : > { %v983_v40 = vadd.f32 %v976_v14, %v887_v48 }
 0x106   : > { %v1766_v15 = vpop.f32.mrf.mxu0  ;;  %v1064_v43 = vpop.f32.mrf.mxu1 }
 0x107   : > { %v1071_v27 = vadd.f32 %v1064_v43, %v983_v40 }
 0x108   : > { %v979_v44 = vpop.f32.mrf.mxu0  ;;  %v1778_v45 = vpop.f32.mrf.mxu1 }
 0x109   : > { %v984_v29 = vadd.f32 %v979_v44, %v888_v21 }
 0x10a   : > { %v1767_v17 = vpop.f32.mrf.mxu0  ;;  %v1067_v23 = vpop.f32.mrf.mxu1 }
 0x10b   : > { %v1072_v50 = vadd.f32 %v1067_v23, %v984_v29 }
 0x10c   : > { %v1779_v41 = vpop.f32.mrf.mxu1 }
 0x114   : > { %v1191_v30 = vpop.f32.mrf.mxu0 }
 0x115   : > { %v1198_v31 = vadd.f32 %v1191_v30, %v1071_v27 }
 0x116   : > { %v1790_v47 = vpop.f32.mrf.mxu0  ;;  %v1288_v49 = vpop.f32.mrf.mxu1 }
 0x117   : > { %v1295_v51 = vadd.f32 %v1288_v49, %v1198_v31 }
 0x118   : > { %v1194_v24 = vpop.f32.mrf.mxu0  ;;  %v1802_v19 = vpop.f32.mrf.mxu1 }
 0x119   : > { %v1199_v52 = vadd.f32 %v1194_v24, %v1072_v50 }
 0x11a   : > { %v1791_v20 = vpop.f32.mrf.mxu0  ;;  %v1291_v25 = vpop.f32.mrf.mxu1 }
 0x11b   : > { %v1296_v57 = vadd.f32 %v1291_v25, %v1199_v52 }
 0x11c   : > { %v1803_v22 = vpop.f32.mrf.mxu1 }
 0x124   : > { %v1377_v53 = vpop.f32.mrf.mxu0 }
 0x125   : > { %v1384_v55 = vadd.f32 %v1377_v53, %v1295_v51 }
 0x126   : > { %v1814_v56 = vpop.f32.mrf.mxu0 }
 0x127   : > { %v1393_v58 = vadd.f32 %v1655_v54, %v1384_v55 }
 0x128   : > { %v1380_v59 = vpop.f32.mrf.mxu0 }
 0x129   : > { %v1397_v60 = vcombine.high %v1393_v58, %v1393_v58  ;;  %v1401_v61 = vpack.c.bf16 %v1393_v58, %v1393_v58  ;;  %v1385_v62 = vadd.f32 %v1380_v59, %v1296_v57 }
 0x12a   : > { %v1815_v63 = vpop.f32.mrf.mxu0 }
 0x12b   : > { %v1402_v0 = vpack.c.bf16 %v1397_v60, %v1397_v60  ;;  %1406 = vst.msk [vmem:[%s380_s9] sm:$0x3] %vm1405_vm8, %v1401_v61  ;;  %v1394_v2 = vadd.f32 %v1655_v54, %v1385_v62 }
 0x12d   : > { %1407 = vst.msk [vmem:[%s380_s9 + $0x2] sm:$0x3] %vm1405_vm8, %v1402_v0  ;;  %v1398_v3 = vcombine.high %v1394_v2, %v1394_v2  ;;  %v1403_v4 = vpack.c.bf16 %v1394_v2, %v1394_v2 }
 0x12f   : > { %v1404_v5 = vpack.c.bf16 %v1398_v3, %v1398_v3  ;;  %1408 = vst.msk [vmem:[%s380_s9 + $0x4] sm:$0x3] %vm1405_vm8, %v1403_v4 }
 0x131   : > { %1409 = vst.msk [vmem:[%s380_s9 + $0x6] sm:$0x3] %vm1405_vm8, %v1404_v5 }
 0x132 PF: > { %s15_s0 = sadd.s32 1, %s1902_s0   ;;  %s2297_s18 = smov %s1898_s19 }
 0x133   : > { %p12_p5 = scmp.ge.s32.totalorder %s15_s0, 4   ;;  %s2298_s19 = smov %s2300_s2 }
 0x135   :  { %14 = sbr.rel (!%p12_p5) target bundleno = 2 (0x2), region = 84 }

// kernel: decoder_forward.51
= control target key start
LH: loop header
LB: loop body
LE: loop exit
PB: predicated region body
PF: predicated region fallthrough
CT: control target
= control target key end

     0   :  { %s2039_s21 = smov 0   ;;  %s2041_s0 = smov 0   ;;  %s2389_s0 = inlined_call_operand.vmem [shape: bf16[2,4,4,64], index: 0, kind: input, shape index: {}, may-alias: {0,1,2}]   ;;  %s2390_s1 = inlined_call_operand.vmem [shape: bf16[2,4,4,64], index: 1, kind: input, shape index: {}, may-alias: {0,1,2}]   ;;  %s2391_s2 = inlined_call_operand.vmem [shape: bf16[2,4,4,64], index: 2, kind: input, shape index: {}, may-alias: {0,1,2}]   ;;  %s2392_s3 = inlined_call_operand.vmem [shape: bf16[9,64,64], index: 3, kind: input, shape index: {}]   ;;  %s2393_s4 = inlined_call_operand.vmem [shape: f32[1,64], index: 4, kind: input, shape index: {}]   ;;  %s2394_s5 = inlined_call_operand.vmem [shape: bf16[2,4,4,64], index: 5, kind: input, shape index: {}]   ;;  %s2395_s6 = inlined_call_operand.vmem [shape: bf16[2,4,4,64], index: 6, kind: output, shape index: {}]  }
   0x1   :  { %s2043_s22 = smov 0  }
   0x2 LB: > { %s28_s2 = sadd.s32 1, %s1994_s0  ;;  %p1630_p0 = scmp.ge.s32.totalorder %s1998_s22, 1  ;;  %s1998_s22 = sphi %s2043_s22, %s16_s22   ;;  %s1994_s0 = sphi %s2041_s0, %s2401_s0   ;;  %s1990_s21 = sphi %s2039_s21, %s2400_s21  }
   0x3   : > { %p30_p1 = scmp.ge.s32.totalorder %s28_s2, 2  ;;  %p312_p2 = scmp.lt.s32.totalorder %s1998_s22, 3 }
   0x5   : > { %s2403_s2 = smov (%p30_p1, %s28_s2), 0  ;;  %p313_p3 = pnand %p1630_p0, %p312_p2 }
   0x6   : > { %p400_p4 = scmp.lt.s32.totalorder (!%p313_p3), %s1990_s21, 1 }
   0x7   : > { %316 = sbr.rel (%p313_p3) target bundleno = 308 (0x134), region = 44 }
   0xc   : > { %v1940_v0 = vld [vmem:[%s2392_s3 + $0x78] sm:$0xff]   ;;  %v2000_v1 = vmov 0.0   ;;  %v1942_v3 = vld [vmem:[%s2392_s3 + $0x70] sm:$0xff]   ;;  %vm2001_vm0 = vmmov 0   ;;  %s2405_s21 = smov (!%p400_p4, %s1990_s21), 1  ;;  %v1944_v5 = vld [vmem:[%s2392_s3 + $0x68] sm:$0xff]   ;;  %v478_v6 = vlaneseq }
   0xd   : > { %1804 = vmatprep.subr.bf16.mxu0 %v2000_v1  ;;  %1816 = vmatprep.subr.bf16.mxu1 %v2000_v1  ;;  %v1941_v2 = vld [vmem:[%s2392_s3 + $0x18] sm:$0xff]   ;;  %v1943_v4 = vld [vmem:[%s2392_s3 + $0x10] sm:$0xff]   ;;  %s2080_s9 = sshll.u32 %s2405_s21, 3  ;;  %v1945_v7 = vld [vmem:[%s2392_s3 + $0x8] sm:$0xff]   ;;  %v2002_v10 = vmov 1983009808  }
   0xe   : > { %1805 = vmatpush3.bf16.msra.mxu0 %v1940_v0  ;;  %1812 = vmatprep.mubr.msk.bf16.mxu0 %vm2001_vm0, %v2000_v1  ;;  %s407_s14 = scalar_lea.vmem %s2390_s1, %s2080_s9  ;;  %v1946_v8 = vld [vmem:[%s2392_s3 + $0x60] sm:$0xff]   ;;  %v476_v11 = vunpack.c.l.s4 %v2002_v10  ;;  %v479_v12 = vshrl.u32 %v478_v6, 7  ;;  %vm565_vm1 = vcmask 1040384   ;;  %vm566_vm2 = vsmask.f32 256  ;;  %v1948_v58 = vld [vmem:[%s2392_s3 + $0xd8] sm:$0xff]   ;;  %s433_s11 = scalar_lea.vmem %s2394_s5, %s2080_s9 }
   0xf   : > { %1817 = vmatpush3.bf16.msra.mxu1 %v1941_v2  ;;  %1806 = vmatprep.subr.bf16.mxu0 %v2000_v1  ;;  %v1947_v9 = vld [vmem:[%s2392_s3] sm:$0xff]   ;;  %v2003_v23 = vmov 0   ;;  %vm2149_vm3 = vmand %vm565_vm1, %vm566_vm2  ;;  %vm636_vm4 = vcmask 523264   ;;  %v1949_v61 = vld [vmem:[%s2392_s3 + $0x38] sm:$0xff]   ;;  %vm1154_vm5 = vcmask 1041408   ;;  %s443_s16 = scalar_lea.vmem %s2395_s6, %s2080_s9  ;;  %vm1480_vm8 = vcmask 517120  }
  0x10   : > { %1818 = vmatprep.subr.bf16.mxu1 %v2000_v1  ;;  %1824 = vmatprep.mubr.msk.bf16.mxu1 %vm2001_vm0, %v2000_v1  ;;  %v2098_v13 = vld [vmem:[%s407_s14] sm:$0x3]  ;;  %v2100_v14 = vld [vmem:[%s407_s14 + $0x2] sm:$0x3]  ;;  %v2103_v15 = vld [vmem:[%s407_s14 + $0x4] sm:$0x3]  ;;  %v477_v16 = vunpack.c.0.s8 %v476_v11 }
  0x11   : > { %v2105_v17 = vld [vmem:[%s407_s14 + $0x6] sm:$0x3]  ;;  %v1950_v63 = vld [vmem:[%s2392_s3 + $0xd0] sm:$0xff]   ;;  %v961_v37 = vcombine.low %v2098_v13, %v2100_v14  ;;  %vm1155_vm6 = vsmask.f32 1280 }
  0x12   : > { %1807 = vmatpush3.bf16.msra.mxu0 %v1942_v3  ;;  %v2107_v18 = vsub.s32 %v477_v16, %v479_v12  ;;  %v1951_v2 = vld [vmem:[%s2392_s3 + $0x30] sm:$0xff]   ;;  %v1952_v3 = vld [vmem:[%s2392_s3 + $0xc8] sm:$0xff]   ;;  %v1955_v12 = vld [vmem:[%s2392_s3 + $0x20] sm:$0xff]  }
  0x13   : > { %1819 = vmatpush3.bf16.msra.mxu1 %v1943_v4  ;;  %1808 = vmatprep.subr.bf16.mxu0 %v2000_v1  ;;  %v865_v4 = vcombine.low %v2003_v23, %v2098_v13  ;;  %v1956_v16 = vld [vmem:[%s2392_s3 + $0x98] sm:$0xff]   ;;  %vm2293_vm7 = vmand %vm1154_vm5, %vm1155_vm6 }
  0x14   : > { %1820 = vmatprep.subr.bf16.mxu1 %v2000_v1  ;;  %v2112_v19 = vrot.slane %v2098_v13, %v2107_v18  ;;  %v2116_v20 = vrot.slane %v2100_v14, %v2107_v18  ;;  %v2120_v21 = vrot.slane %v2103_v15, %v2107_v18  ;;  %v2124_v22 = vrot.slane %v2105_v17, %v2107_v18 }
  0x15   : > { %v2129_v24 = vrot.slane %v2003_v23, %v2107_v18 }
  0x16   : > { %1809 = vmatpush3.bf16.msra.mxu0 %v1944_v5  ;;  %v525_v25 = vshrl.u32 %v2112_v19, 16  ;;  %v528_v26 = vshll.u32 %v2112_v19, 16  ;;  %v532_v27 = vshrl.u32 %v2116_v20, 16  ;;  %v535_v28 = vshll.u32 %v2116_v20, 16  ;;  %v1965_v19 = vld [vmem:[%s2392_s3 + $0xb8] sm:$0xff]  }
  0x17   : > { %1821 = vmatpush3.bf16.msra.mxu1 %v1945_v7  ;;  %1810 = vmatprep.subr.bf16.mxu0 %v2000_v1  ;;  %v539_v29 = vshrl.u32 %v2120_v21, 16  ;;  %v542_v30 = vshll.u32 %v2120_v21, 16  ;;  %v546_v31 = vshrl.u32 %v2124_v22, 16  ;;  %v549_v32 = vshll.u32 %v2124_v22, 16  ;;  %v1953_v7 = vld [vmem:[%s2392_s3 + $0x28] sm:$0xff]   ;;  %v1966_v21 = vld [vmem:[%s2392_s3 + $0x50] sm:$0xff]  }
  0x18   : > { %1822 = vmatprep.subr.bf16.mxu1 %v2000_v1  ;;  %v527_v33 = vrot.slane %v525_v25, 7  ;;  %v534_v34 = vrot.slane %v532_v27, 7  ;;  %v518_v40 = vshrl.u32 %v2129_v24, 16  ;;  %v521_v41 = vshll.u32 %v2129_v24, 16 }
  0x19   : > { %v541_v35 = vrot.slane %v539_v29, 7  ;;  %v548_v36 = vrot.slane %v546_v31, 7  ;;  %v866_v5 = vcombine.low %v2100_v14, %v2103_v15  ;;  %v1961_v14 = vld [vmem:[%s2392_s3 + $0xe8] sm:$0xff]  }
  0x1a   : > { %1811 = vmatpush3.bf16.msra.mxu0 %v1946_v8  ;;  %v530_v38 = vor.u32 %v528_v26, %v527_v33  ;;  %v537_v39 = vor.u32 %v535_v28, %v534_v34  ;;  %v520_v46 = vrot.slane %v518_v40, 7  ;;  %v1954_v8 = vld [vmem:[%s2392_s3 + $0xc0] sm:$0xff]   ;;  %v1957_v34 = vld [vmem:[%s2392_s3 + $0xf8] sm:$0xff]   ;;  %v1136_v13 = vrot.slane %v521_v41, 1 }
  0x1b   : > { %1823 = vmatpush3.bf16.msra.mxu1 %v1947_v9  ;;  %1828 = vmatprep.subr.bf16.mxu0 %v2000_v1  ;;  %v544_v42 = vor.u32 %v542_v30, %v541_v35  ;;  %v551_v43 = vor.u32 %v549_v32, %v548_v36  ;;  %v873_v9 = vrot.slane %v865_v4, %v2107_v18  ;;  %v1958_v35 = vld [vmem:[%s2392_s3 + $0x90] sm:$0xff]  }
  0x1c   : > { %1840 = vmatprep.subr.bf16.mxu1 %v2000_v1  ;;  %v569_v44 = vsel %vm2149_vm3, 0, %v530_v38  ;;  %v570_v45 = vsel %vm2149_vm3, 0, %v537_v39  ;;  %v523_v51 = vor.u32 %v521_v41, %v520_v46  ;;  %v880_v10 = vrot.slane %v866_v5, %v2107_v18  ;;  %v1959_v36 = vld [vmem:[%s2392_s3 + $0xf0] sm:$0xff]   ;;  %v1960_v39 = vld [vmem:[%s2392_s3 + $0x88] sm:$0xff]  }
  0x1d   : > { %v571_v47 = vsel %vm2149_vm3, 0, %v544_v42  ;;  %v572_v48 = vsel %vm2149_vm3, 0, %v551_v43  ;;  %v595_v49 = vcombine.low %v569_v44, %v570_v45  ;;  %v962_v38 = vcombine.low %v2103_v15, %v2105_v17  ;;  %v1974_v5 = vld [vmem:[%s2392_s3 + $0x108] sm:$0xff]  }
  0x1e   : > { %v596_v50 = vcombine.low %v571_v47, %v572_v48  ;;  %v683_v52 = vcombine.low %v570_v45, %v571_v47  ;;  %v568_v55 = vsel %vm2149_vm3, 0, %v523_v51  ;;  %v881_v33 = vcombine.low %v873_v9, %v880_v10  ;;  %v1964_v47 = vld [vmem:[%s2392_s3 + $0x58] sm:$0xff]  }
  0x1f   : > { %v603_v53 = vrot.slane %v595_v49, %v2107_v18  ;;  %v682_v56 = vcombine.low %v568_v55, %v569_v44  ;;  %v777_v0 = vcombine.low %v572_v48, %v568_v55  ;;  %v1057_v42 = vcombine.low %v2105_v17, %v2003_v23  ;;  %v1962_v23 = vld [vmem:[%s2392_s3 + $0x80] sm:$0xff]  }
  0x20   : > { %v610_v54 = vrot.slane %v596_v50, %v2107_v18  ;;  %v697_v57 = vrot.slane %v683_v52, %v2107_v18  ;;  %v969_v15 = vrot.slane %v961_v37, %v2107_v18  ;;  %v976_v43 = vrot.slane %v962_v38, %v2107_v18 }
  0x21   : > { %v690_v60 = vrot.slane %v682_v56, %v2107_v18  ;;  %v784_v6 = vrot.slane %v777_v0, %v2107_v18  ;;  %v1138_v44 = vrot.slane %v528_v26, 1  ;;  %v1140_v45 = vrot.slane %v535_v28, 1  ;;  %v1963_v28 = vld [vmem:[%s2392_s3 + $0xe0] sm:$0xff]   ;;  %v1969_v56 = vld [vmem:[%s2392_s3 + $0xa8] sm:$0xff]   ;;  %v1972_v0 = vld [vmem:[%s2392_s3 + $0x118] sm:$0xff]  }
  0x22   : > { %v611_v59 = vcombine.low %v603_v53, %v610_v54  ;;  %v1142_v17 = vrot.slane %v542_v30, 1  ;;  %v1064_v41 = vrot.slane %v1057_v42, %v2107_v18  ;;  %v1144_v26 = vrot.slane %v549_v32, 1  ;;  %v1968_v53 = vld [vmem:[%s2392_s3 + $0x48] sm:$0xff]  }
  0x23   : > { %v698_v62 = vcombine.low %v690_v60, %v697_v57  ;;  %v785_v11 = vcombine.low %v697_v57, %v784_v6  ;;  %v977_v30 = vcombine.low %v969_v15, %v976_v43  ;;  %v1137_v46 = vor.u32 %v1136_v13, %v518_v40 }
  0x24   : > { %1813 = vmatmul.mubr.msk.bf16.vlgmr.msra.gmra.mxu0 %vm636_vm4, %v611_v59  ;;  %v1139_v48 = vor.u32 %v1138_v44, %v525_v25  ;;  %v1141_v32 = vor.u32 %v1140_v45, %v532_v27  ;;  %v1143_v49 = vor.u32 %v1142_v17, %v539_v29  ;;  %v1065_v40 = vcombine.low %v880_v10, %v1064_v41  ;;  %v1970_v59 = vld [vmem:[%s2392_s3 + $0x40] sm:$0xff]  }
  0x25   : > { %1829 = vmatpush3.bf16.msra.mxu0 %v1948_v58  ;;  %1836 = vmatprep.mubr.msk.bf16.mxu0 %vm2001_vm0, %v2000_v1  ;;  %v1145_v20 = vor.u32 %v1144_v26, %v546_v31  ;;  %v1157_v25 = vsel %vm2293_vm7, %v1137_v46, 0  ;;  %v1967_v31 = vld [vmem:[%s2392_s3 + $0xb0] sm:$0xff]  }
  0x26   : > { %1830 = vmatprep.subr.bf16.mxu0 %v2000_v1  ;;  %1825 = vmatmul.mubr.msk.bf16.vlgmr.msra.gmra.mxu1 %vm636_vm4, %v698_v62  ;;  %v1158_v27 = vsel %vm2293_vm7, %v1139_v48, 0  ;;  %v1159_v29 = vsel %vm2293_vm7, %v1141_v32, 0  ;;  %v1160_v22 = vsel %vm2293_vm7, %v1143_v49, 0  ;;  %v1971_v62 = vld [vmem:[%s2392_s3 + $0xa0] sm:$0xff]  }
  0x27   : > { %1841 = vmatpush3.bf16.msra.mxu1 %v1949_v61  ;;  %1848 = vmatprep.mubr.msk.bf16.mxu1 %vm2001_vm0, %v2000_v1  ;;  %v1176_v50 = vcombine.low %v1157_v25, %v1158_v27  ;;  %v1177_v51 = vcombine.low %v1159_v29, %v1160_v22  ;;  %v1161_v52 = vsel %vm2293_vm7, %v1145_v20, 0  ;;  %v1273_v54 = vcombine.low %v1158_v27, %v1159_v29 }
  0x28   : > { %1842 = vmatprep.subr.bf16.mxu1 %v2000_v1  ;;  %v1274_v55 = vcombine.low %v1160_v22, %v1161_v52  ;;  %v1370_v4 = vcombine.low %v1161_v52, %v1157_v25 }
  0x29   : > { %1831 = vmatpush3.bf16.msra.mxu0 %v1950_v63  ;;  %v1184_v57 = vrot.slane %v1176_v50, %v2107_v18  ;;  %v1191_v58 = vrot.slane %v1177_v51, %v2107_v18  ;;  %v1281_v60 = vrot.slane %v1273_v54, %v2107_v18  ;;  %v1464_v51 = vld [vmem:[%s433_s11] sm:$0x3] }
  0x2a   : > { %1832 = vmatprep.subr.bf16.mxu0 %v2000_v1  ;;  %v1288_v61 = vrot.slane %v1274_v55, %v2107_v18  ;;  %v1377_v6 = vrot.slane %v1370_v4, %v2107_v18  ;;  %v1750_v55 = vld [vmem:[%s2393_s4] ss:$0 sm:$0xff] }
  0x2b   : > { %1843 = vmatpush3.bf16.msra.mxu1 %v1951_v2  ;;  %v1192_v63 = vcombine.low %v1184_v57, %v1191_v58 }
  0x2c   : > { %1844 = vmatprep.subr.bf16.mxu1 %v2000_v1  ;;  %v1289_v2 = vcombine.low %v1281_v60, %v1288_v61  ;;  %v1466_v60 = vld [vmem:[%s433_s11 + $0x4] sm:$0x3] }
  0x2d   : > { %1833 = vmatpush3.bf16.msra.mxu0 %v1952_v3  ;;  %v1973_v3 = vld [vmem:[%s2392_s3 + $0x110] sm:$0xff]  }
  0x2e   : > { %1834 = vmatprep.subr.bf16.mxu0 %v2000_v1 }
  0x2f   : > { %1845 = vmatpush3.bf16.msra.mxu1 %v1953_v7  ;;  %v1975_v7 = vld [vmem:[%s2392_s3 + $0x100] sm:$0xff]  }
  0x30   : > { %1846 = vmatprep.subr.bf16.mxu1 %v2000_v1 }
  0x31   : > { %1835 = vmatpush3.bf16.msra.mxu0 %v1954_v8  ;;  %v1378_v8 = vcombine.low %v1191_v58, %v1377_v6  ;;  %v1468_v58 = vunpack.c.l.bf16 %v1464_v51  ;;  %v1470_v6 = vunpack.c.l.bf16 %v1466_v60 }
  0x32   : > { %1852 = vmatprep.subr.bf16.mxu0 %v2000_v1 }
  0x33   : > { %1847 = vmatpush3.bf16.msra.mxu1 %v1955_v12 }
  0x34   : > { %1837 = vmatmul.mubr.msk.bf16.vlgmr.msra.gmra.mxu0 %vm636_vm4, %v785_v11  ;;  %1864 = vmatprep.subr.bf16.mxu1 %v2000_v1 }
  0x35   : > { %1853 = vmatpush3.bf16.msra.mxu0 %v1956_v16  ;;  %1860 = vmatprep.mubr.msk.bf16.mxu0 %vm2001_vm0, %v2000_v1 }
  0x36   : > { %1854 = vmatprep.subr.bf16.mxu0 %v2000_v1  ;;  %1849 = vmatmul.mubr.msk.bf16.vlgmr.msra.gmra.mxu1 %vm636_vm4, %v881_v33 }
  0x37   : > { %1865 = vmatpush3.bf16.msra.mxu1 %v1957_v34  ;;  %1872 = vmatprep.mubr.msk.bf16.mxu1 %vm2001_vm0, %v2000_v1 }
  0x38   : > { %1866 = vmatprep.subr.bf16.mxu1 %v2000_v1 }
  0x39   : > { %1855 = vmatpush3.bf16.msra.mxu0 %v1958_v35 }
  0x3a   : > { %1856 = vmatprep.subr.bf16.mxu0 %v2000_v1 }
  0x3b   : > { %1867 = vmatpush3.bf16.msra.mxu1 %v1959_v36 }
  0x3c   : > { %1868 = vmatprep.subr.bf16.mxu1 %v2000_v1 }
  0x3d   : > { %1857 = vmatpush3.bf16.msra.mxu0 %v1960_v39 }
  0x3e   : > { %1858 = vmatprep.subr.bf16.mxu0 %v2000_v1 }
  0x3f   : > { %1869 = vmatpush3.bf16.msra.mxu1 %v1961_v14 }
  0x40   : > { %1870 = vmatprep.subr.bf16.mxu1 %v2000_v1 }
  0x41   : > { %1859 = vmatpush3.bf16.msra.mxu0 %v1962_v23 }
  0x42   : > { %1876 = vmatprep.subr.bf16.mxu0 %v2000_v1 }
  0x43   : > { %1871 = vmatpush3.bf16.msra.mxu1 %v1963_v28 }
  0x44   : > { %1861 = vmatmul.mubr.msk.bf16.vlgmr.msra.gmra.mxu0 %vm636_vm4, %v977_v30  ;;  %1888 = vmatprep.subr.bf16.mxu1 %v2000_v1 }
  0x45   : > { %1877 = vmatpush3.bf16.msra.mxu0 %v1964_v47  ;;  %1884 = vmatprep.mubr.msk.bf16.mxu0 %vm2001_vm0, %v2000_v1 }
  0x46   : > { %1878 = vmatprep.subr.bf16.mxu0 %v2000_v1  ;;  %1873 = vmatmul.mubr.msk.bf16.vlgmr.msra.gmra.mxu1 %vm636_vm4, %v1065_v40 }
  0x47   : > { %1889 = vmatpush3.bf16.msra.mxu1 %v1965_v19  ;;  %1896 = vmatprep.mubr.msk.bf16.mxu1 %vm2001_vm0, %v2000_v1 }
  0x48   : > { %1890 = vmatprep.subr.bf16.mxu1 %v2000_v1 }
  0x49   : > { %1879 = vmatpush3.bf16.msra.mxu0 %v1966_v21 }
  0x4a   : > { %1880 = vmatprep.subr.bf16.mxu0 %v2000_v1 }
  0x4b   : > { %1891 = vmatpush3.bf16.msra.mxu1 %v1967_v31 }
  0x4c   : > { %1892 = vmatprep.subr.bf16.mxu1 %v2000_v1 }
  0x4d   : > { %1881 = vmatpush3.bf16.msra.mxu0 %v1968_v53 }
  0x4e   : > { %1882 = vmatprep.subr.bf16.mxu0 %v2000_v1 }
  0x4f   : > { %1893 = vmatpush3.bf16.msra.mxu1 %v1969_v56  ;;  %v1465_v56 = vld [vmem:[%s433_s11 + $0x2] sm:$0x3] }
  0x50   : > { %1894 = vmatprep.subr.bf16.mxu1 %v2000_v1 }
  0x51   : > { %1883 = vmatpush3.bf16.msra.mxu0 %v1970_v59 }
  0x52   : > { %1900 = vmatprep.subr.bf16.mxu0 %v2000_v1 }
  0x53   : > { %1895 = vmatpush3.bf16.msra.mxu1 %v1971_v62 }
  0x54   : > { %1885 = vmatmul.mubr.msk.bf16.vlgmr.msra.gmra.mxu0 %vm636_vm4, %v1192_v63  ;;  %v1469_v63 = vunpack.c.l.bf16 %v1465_v56 }
  0x55   : > { %1901 = vmatpush3.bf16.msra.mxu0 %v1972_v0  ;;  %1908 = vmatprep.mubr.msk.bf16.mxu0 %vm2001_vm0, %v2000_v1 }
  0x56   : > { %1902 = vmatprep.subr.bf16.mxu0 %v2000_v1  ;;  %1897 = vmatmul.mubr.msk.bf16.vlgmr.msra.gmra.mxu1 %vm636_vm4, %v1289_v2  ;;  %v1467_v2 = vld [vmem:[%s433_s11 + $0x6] sm:$0x3] }
  0x59   : > { %1903 = vmatpush3.bf16.msra.mxu0 %v1973_v3 }
  0x5a   : > { %1904 = vmatprep.subr.bf16.mxu0 %v2000_v1 }
  0x5d   : > { %1905 = vmatpush3.bf16.msra.mxu0 %v1974_v5 }
  0x5e   : > { %1906 = vmatprep.subr.bf16.mxu0 %v2000_v1 }
  0x61   : > { %1907 = vmatpush3.bf16.msra.mxu0 %v1975_v7 }
  0x64   : > { %1909 = vmatmul.mubr.msk.bf16.vlgmr.msra.gmra.mxu0 %vm636_vm4, %v1378_v8 }
  0xe4   : > { %v674_v9 = vpop.f32.mrf.mxu0 }
  0xe6   : > { %v1814_v10 = vpop.f32.mrf.mxu0  ;;  %v760_v11 = vpop.f32.mrf.mxu1 }
  0xe7   : > { %v761_v26 = vadd.f32 %v760_v11, %v674_v9  ;;  %v1471_v11 = vunpack.c.l.bf16 %v1467_v2 }
  0xe8   : > { %v677_v12 = vpop.f32.mrf.mxu0  ;;  %v1826_v16 = vpop.f32.mrf.mxu1 }
  0xea   : > { %v1815_v33 = vpop.f32.mrf.mxu0  ;;  %v763_v34 = vpop.f32.mrf.mxu1 }
  0xeb   : > { %v764_v46 = vadd.f32 %v763_v34, %v677_v12 }
  0xec   : > { %v1827_v35 = vpop.f32.mrf.mxu1 }
  0xf4   : > { %v847_v18 = vpop.f32.mrf.mxu0 }
  0xf5   : > { %v854_v28 = vadd.f32 %v847_v18, %v761_v26 }
  0xf6   : > { %v1838_v36 = vpop.f32.mrf.mxu0  ;;  %v943_v37 = vpop.f32.mrf.mxu1 }
  0xf7   : > { %v950_v48 = vadd.f32 %v943_v37, %v854_v28 }
  0xf8   : > { %v850_v38 = vpop.f32.mrf.mxu0  ;;  %v1850_v39 = vpop.f32.mrf.mxu1 }
  0xf9   : > { %v855_v32 = vadd.f32 %v850_v38, %v764_v46 }
  0xfa   : > { %v1839_v42 = vpop.f32.mrf.mxu0  ;;  %v946_v13 = vpop.f32.mrf.mxu1 }
  0xfb   : > { %v951_v21 = vadd.f32 %v946_v13, %v855_v32 }
  0xfc   : > { %v1851_v1 = vpop.f32.mrf.mxu1 }
 0x104   : > { %v1039_v14 = vpop.f32.mrf.mxu0 }
 0x105   : > { %v1046_v40 = vadd.f32 %v1039_v14, %v950_v48 }
 0x106   : > { %v1862_v15 = vpop.f32.mrf.mxu0  ;;  %v1127_v43 = vpop.f32.mrf.mxu1 }
 0x107   : > { %v1134_v27 = vadd.f32 %v1127_v43, %v1046_v40 }
 0x108   : > { %v1042_v44 = vpop.f32.mrf.mxu0  ;;  %v1874_v45 = vpop.f32.mrf.mxu1 }
 0x109   : > { %v1047_v29 = vadd.f32 %v1042_v44, %v951_v21 }
 0x10a   : > { %v1863_v17 = vpop.f32.mrf.mxu0  ;;  %v1130_v23 = vpop.f32.mrf.mxu1 }
 0x10b   : > { %v1135_v50 = vadd.f32 %v1130_v23, %v1047_v29 }
 0x10c   : > { %v1875_v41 = vpop.f32.mrf.mxu1 }
 0x114   : > { %v1254_v30 = vpop.f32.mrf.mxu0 }
 0x115   : > { %v1261_v31 = vadd.f32 %v1254_v30, %v1134_v27 }
 0x116   : > { %v1886_v47 = vpop.f32.mrf.mxu0  ;;  %v1351_v49 = vpop.f32.mrf.mxu1 }
 0x117   : > { %v1358_v52 = vadd.f32 %v1351_v49, %v1261_v31 }
 0x118   : > { %v1257_v24 = vpop.f32.mrf.mxu0  ;;  %v1898_v19 = vpop.f32.mrf.mxu1 }
 0x119   : > { %v1262_v53 = vadd.f32 %v1257_v24, %v1135_v50 }
 0x11a   : > { %v1887_v20 = vpop.f32.mrf.mxu0  ;;  %v1354_v25 = vpop.f32.mrf.mxu1 }
 0x11b   : > { %v1359_v61 = vadd.f32 %v1354_v25, %v1262_v53 }
 0x11c   : > { %v1899_v22 = vpop.f32.mrf.mxu1 }
 0x124   : > { %v1440_v54 = vpop.f32.mrf.mxu0 }
 0x125   : > { %v1447_v57 = vadd.f32 %v1440_v54, %v1358_v52 }
 0x126   : > { %v1910_v59 = vpop.f32.mrf.mxu0 }
 0x127   : > { %v1456_v62 = vadd.f32 %v1750_v55, %v1447_v57 }
 0x128   : > { %v1443_v0 = vpop.f32.mrf.mxu0 }
 0x129   : > { %v1460_v3 = vcombine.high %v1456_v62, %v1456_v62  ;;  %v1472_v4 = vadd.f32 %v1468_v58, %v1456_v62  ;;  %v1448_v5 = vadd.f32 %v1443_v0, %v1359_v61 }
 0x12a   : > { %v1911_v7 = vpop.f32.mrf.mxu0 }
 0x12b   : > { %v1473_v8 = vadd.f32 %v1469_v63, %v1460_v3  ;;  %v1476_v9 = vpack.c.bf16 %v1472_v4, %v1472_v4  ;;  %v1457_v10 = vadd.f32 %v1750_v55, %v1448_v5 }
 0x12d   : > { %v1477_v12 = vpack.c.bf16 %v1473_v8, %v1473_v8  ;;  %1481 = vst.msk [vmem:[%s443_s16] sm:$0x3] %vm1480_vm8, %v1476_v9  ;;  %v1461_v16 = vcombine.high %v1457_v10, %v1457_v10  ;;  %v1474_v33 = vadd.f32 %v1470_v6, %v1457_v10 }
 0x12f   : > { %1482 = vst.msk [vmem:[%s443_s16 + $0x2] sm:$0x3] %vm1480_vm8, %v1477_v12  ;;  %v1475_v34 = vadd.f32 %v1471_v11, %v1461_v16  ;;  %v1478_v35 = vpack.c.bf16 %v1474_v33, %v1474_v33 }
 0x131   : > { %v1479_v18 = vpack.c.bf16 %v1475_v34, %v1475_v34  ;;  %1483 = vst.msk [vmem:[%s443_s16 + $0x4] sm:$0x3] %vm1480_vm8, %v1478_v35 }
 0x133   : > { %1484 = vst.msk [vmem:[%s443_s16 + $0x6] sm:$0x3] %vm1480_vm8, %v1479_v18 }
 0x134 PF: > { %s16_s22 = sadd.s32 1, %s1998_s22   ;;  %s2400_s21 = smov %s1994_s0 }
 0x135   : > { %p13_p5 = scmp.ge.s32.totalorder %s16_s22, 4   ;;  %s2401_s0 = smov %s2403_s2 }
 0x137   :  { %15 = sbr.rel (!%p13_p5) target bundleno = 2 (0x2), region = 91 }

// kernel: decoder_forward.53
= control target key start
LH: loop header
LB: loop body
LE: loop exit
PB: predicated region body
PF: predicated region fallthrough
CT: control target
= control target key end

     0   :  { %vm68_vm0 = vcmask 523264   ;;  %vm140_vm1 = vcmask 519168   ;;  %s243_s1 = inlined_call_operand.vmem [shape: bf16[64,64], index: 1, kind: input, shape index: {}]   ;;  %s244_s0 = inlined_call_operand.vmem [shape: bf16[32,64], index: 0, kind: input, shape index: {}]   ;;  %s245_s2 = inlined_call_operand.vmem [shape: f32[1,64], index: 2, kind: input, shape index: {}]   ;;  %s246_s3 = inlined_call_operand.vmem [shape: bf16[32,64], index: 3, kind: output, shape index: {}]  }
   0x1   :  { %v184_v0 = vld [vmem:[%s243_s1 + $0x18] sm:$0xff]   ;;  %v185_v1 = vld [vmem:[%s243_s1 + $0x10] sm:$0xff]   ;;  %v186_v2 = vld [vmem:[%s243_s1 + $0x8] sm:$0xff]  }
   0x2   :  { %172 = vmatprep.subr.bf16.mxu0 %v184_v0  ;;  %v188_v3 = vld [vmem:[%s244_s0] sm:$0xff]   ;;  %v189_v5 = vld [vmem:[%s244_s0 + $0x8] sm:$0xff]  }
   0x3   :  { %173 = vmatpush3.bf16.msra.mxu0 %v184_v0  ;;  %180 = vmatprep.mubr.msk.bf16.mxu0 %vm68_vm0, %v188_v3  ;;  %v187_v4 = vld [vmem:[%s243_s1] sm:$0xff]  }
   0x4   :  { %174 = vmatprep.subr.bf16.mxu0 %v185_v1  ;;  %v149_v6 = vld [vmem:[%s245_s2] ss:$0 sm:$0xff] }
   0x7   :  { %175 = vmatpush3.bf16.msra.mxu0 %v185_v1 }
   0x8   :  { %176 = vmatprep.subr.bf16.mxu0 %v186_v2 }
   0xb   :  { %177 = vmatpush3.bf16.msra.mxu0 %v186_v2 }
   0xc   :  { %178 = vmatprep.subr.bf16.mxu0 %v187_v4 }
   0xf   :  { %179 = vmatpush3.bf16.msra.mxu0 %v187_v4 }
  0x12   :  { %181 = vmatmul.mubr.msk.bf16.vlgmr.msra.gmra.mxu0 %vm68_vm0, %v189_v5 }
  0xd2   :  { %v182_v7 = vpop.f32.mrf.mxu0 }
  0xd3   :  { %v118_v8 = vadd.f32 %v182_v7, %v149_v6 }
  0xd4   :  { %v109_v9 = vpop.f32.mrf.mxu0 }
  0xd5   :  { %v164_v10 = vpack.c.bf16 %v118_v8, %v118_v8  ;;  %v110_v11 = vadd.f32 %v149_v6, %v109_v9 }
  0xd6   :  { %v183_v12 = vpop.f32.mrf.mxu0 }
  0xd7   :  { %143 = vst.msk [vmem:[%s246_s3 + $0x8] sm:$0xf] %vm140_vm1, %v164_v10  ;;  %v162_v13 = vpack.c.bf16 %v110_v11, %v110_v11  ;;  %v121_v14 = vadd.f32 %v183_v12, %v149_v6 }
  0xd8   :  { %v112_v15 = vpop.f32.mrf.mxu0 }
  0xd9   :  { %141 = vst.msk [vmem:[%s246_s3] sm:$0xf] %vm140_vm1, %v162_v13  ;;  %v165_v16 = vpack.c.bf16 %v121_v14, %v121_v14  ;;  %v113_v17 = vadd.f32 %v149_v6, %v112_v15 }
  0xdb   :  { %144 = vst.msk [vmem:[%s246_s3 + $0xc] sm:$0xf] %vm140_vm1, %v165_v16  ;;  %v163_v18 = vpack.c.bf16 %v113_v17, %v113_v17 }
  0xdd   :  { %142 = vst.msk [vmem:[%s246_s3 + $0x4] sm:$0xf] %vm140_vm1, %v163_v18 }

// kernel: decoder_forward.56
= control target key start
LH: loop header
LB: loop body
LE: loop exit
PB: predicated region body
PF: predicated region fallthrough
CT: control target
= control target key end

     0   :  { %s535_s12 = smov 0   ;;  %s569_s0 = inlined_call_operand.vmem [shape: bf16[2,16,64], index: 0, kind: input, shape index: {}]   ;;  %s570_s1 = inlined_call_operand.vmem [shape: bf16[2,16,64], index: 1, kind: input, shape index: {}]   ;;  %s571_s2 = inlined_call_operand.vmem [shape: bf16[2,16,64], index: 2, kind: input, shape index: {}]   ;;  %s572_s3 = inlined_call_operand.vmem [shape: bf16[2,16,64], index: 3, kind: output, shape index: {}]  }
   0x1 LB: > { %s440_s13 = sadd.s32 4294967295, %s511_s12   ;;  %p444_p0 = scmp.ge.s32.totalorder %s511_s12, 1  ;;  %s511_s12 = sphi %s535_s12, %s13_s12  }
   0x2   : > { %p157_p1 = scmp.lt.s32.totalorder %s511_s12, 3 }
   0x4   : > { %p158_p2 = pnand %p444_p0, %p157_p1 }
   0x5   : > { %p191_p3 = scmp.lt.s32.totalorder (!%p158_p2), %s440_s13, 1 }
   0x6   : > { %161 = sbr.rel (%p158_p2) target bundleno = 734 (0x2de), region = 32 }
   0xb   : > { %v513_v0 = vmov 0.0   ;;  %vm514_vm0 = vmmov 0   ;;  %s574_s13 = smov (!%p191_p3, %s440_s13), 1  ;;  %vm228_vm1 = vcmask 523264   ;;  %vm276_vm2 = vcmask 130048  }
   0xc   : > { %472 = vmatprep.subr.bf16.mxu0 %v513_v0  ;;  %474 = vmatprep.mubr.msk.bf16.mxu0 %vm514_vm0, %v513_v0  ;;  %s543_s14 = sshll.u32 %s574_s13, 3  ;;  %vm358_vm3 = vcmask 519168  }
   0xd   : > { %478 = vmatprep.subr.bf16.mxu1 %v513_v0  ;;  %480 = vmatprep.mubr.msk.bf16.mxu1 %vm514_vm0, %v513_v0  ;;  %s200_s17 = scalar_lea.vmem %s570_s1, %s543_s14  ;;  %s195_s20 = scalar_lea.vmem %s569_s0, %s543_s14 }
   0xe   : > { %v494_v1 = vld [vmem:[%s200_s17] sm:$0xff]   ;;  %s205_s23 = scalar_lea.vmem %s571_s2, %s543_s14  ;;  %s210_s26 = scalar_lea.vmem %s572_s3, %s543_s14 }
   0xf   : > { %v233_v2 = vsel %vm228_vm1, %v494_v1, 0  ;;  %v495_v3 = vld [vmem:[%s195_s20] sm:$0xff]  }
  0x10   : > { %473 = vmatpush3.bf16.xpose.msra.mxu0 %v233_v2  ;;  %v496_v20 = vld [vmem:[%s205_s23] sm:$0xff]  }
  0x11   : > { %479 = vmatpush3.bf16.msra.mxu1 %v496_v20 }
  0x17   : > { %475 = vmatmul.mubr.msk.bf16.vlgmr.msra.gmra.mxu0 %vm228_vm1, %v495_v3 }
  0xd7   : > { %v269_v4 = vpop.f32.mrf.mxu0 }
  0xd8   : > { %v277_v5 = vsel %vm276_vm2, %v269_v4, -inf }
  0xd9   : > { %278 = vmax.xlane.f32.xlu0 %v277_v5  ;;  %v476_v6 = vpop.f32.mrf.mxu0 }
  0xdb   : > { %v272_v7 = vpop.f32.mrf.mxu0 }
  0xdc   : > { %v280_v8 = vsel %vm276_vm2, %v272_v7, -inf }
  0xdd   : > { %281 = vmax.xlane.f32.xlu0 %v280_v8  ;;  %v477_v9 = vpop.f32.mrf.mxu0 }
 0x162   : > { %v279_v10 = vpop.xlane.xlu0 %278 }
 0x163   : > { %v283_v11 = vsub.f32 %v269_v4, %v279_v10 }
 0x165   : > { %v285_v12 = vmul.f32 1.442695, %v283_v11 }
 0x166   : > { %v282_v13 = vpop.xlane.xlu0 %281 }
 0x167   : > { %497 = vpow2.f32 %v285_v12  ;;  %v284_v14 = vsub.f32 %v272_v7, %v282_v13 }
 0x169   : > { %v287_v15 = vmul.f32 1.442695, %v284_v14 }
 0x16b   : > { %499 = vpow2.f32 %v287_v15 }
 0x174   : > { %v498_v16 = vpop.eup %497 }
 0x175   : > { %v289_v17 = vsel %vm276_vm2, %v498_v16, 0.0 }
 0x176   : > { %290 = vadd.xlane.f32.xlu1 %v289_v17 }
 0x178   : > { %v500_v18 = vpop.eup %499 }
 0x179   : > { %v292_v19 = vsel %vm276_vm2, %v500_v18, 0.0 }
 0x17a   : > { %293 = vadd.xlane.f32.xlu1 %v292_v19 }
 0x1ff   : > { %v291_v21 = vpop.xlane.xlu1 %290 }
 0x200   : > { %501 = vrcp.f32 %v291_v21 }
 0x203   : > { %v294_v22 = vpop.xlane.xlu1 %293 }
 0x204   : > { %503 = vrcp.f32 %v294_v22 }
 0x20d   : > { %v502_v23 = vpop.eup %501 }
 0x20e   : > { %v297_v25 = vmul.f32 %v502_v23, %v498_v16 }
 0x211   : > { %v504_v24 = vpop.eup %503 }
 0x212   : > { %v298_v26 = vmul.f32 %v504_v24, %v500_v18 }
 0x214   : > { %v299_v27 = vpack.c.bf16 %v298_v26, %v297_v25 }
 0x216   : > { %481 = vmatmul.mubr.msk.bf16.vlgmr.msra.gmra.mxu1 %vm276_vm2, %v299_v27 }
 0x2d6   : > { %v343_v28 = vpop.f32.mrf.mxu1 }
 0x2d7   : > { %v466_v29 = vpack.c.bf16 %v343_v28, %v343_v28 }
 0x2d8   : > { %v482_v30 = vpop.f32.mrf.mxu1 }
 0x2d9   : > { %359 = vst.msk [vmem:[%s210_s26] sm:$0xf] %vm358_vm3, %v466_v29 }
 0x2da   : > { %v346_v31 = vpop.f32.mrf.mxu1 }
 0x2db   : > { %v467_v32 = vpack.c.bf16 %v346_v31, %v346_v31 }
 0x2dc   : > { %v483_v33 = vpop.f32.mrf.mxu1 }
 0x2dd   : > { %360 = vst.msk [vmem:[%s210_s26 + $0x4] sm:$0xf] %vm358_vm3, %v467_v32 }
 0x2de PF: > { %s13_s12 = sadd.s32 1, %s511_s12  }
 0x2df   : > { %p10_p4 = scmp.ge.s32.totalorder %s13_s12, 4  }
 0x2e1   :  { %12 = sbr.rel (!%p10_p4) target bundleno = 1 (0x1), region = 68 }

// kernel: decoder_forward.57
= control target key start
LH: loop header
LB: loop body
LE: loop exit
PB: predicated region body
PF: predicated region fallthrough
CT: control target
= control target key end

     0   :  { %vm71_vm0 = vcmask 523264   ;;  %vm155_vm1 = vcmask 519168   ;;  %s282_s1 = inlined_call_operand.vmem [shape: bf16[64,64], index: 1, kind: input, shape index: {}]   ;;  %s283_s0 = inlined_call_operand.vmem [shape: bf16[32,64], index: 0, kind: input, shape index: {}]   ;;  %s284_s3 = inlined_call_operand.vmem [shape: bf16[32,64], index: 3, kind: input, shape index: {}]   ;;  %s285_s2 = inlined_call_operand.vmem [shape: f32[1,64], index: 2, kind: input, shape index: {}]   ;;  %s286_s4 = inlined_call_operand.vmem [shape: bf16[32,64], index: 4, kind: output, shape index: {}]  }
   0x1   :  { %v208_v0 = vld [vmem:[%s282_s1 + $0x18] sm:$0xff]   ;;  %v209_v1 = vld [vmem:[%s282_s1 + $0x10] sm:$0xff]   ;;  %v210_v2 = vld [vmem:[%s282_s1 + $0x8] sm:$0xff]  }
   0x2   :  { %196 = vmatprep.subr.bf16.mxu0 %v208_v0  ;;  %v212_v3 = vld [vmem:[%s283_s0] sm:$0xff]   ;;  %v213_v5 = vld [vmem:[%s283_s0 + $0x8] sm:$0xff]  }
   0x3   :  { %197 = vmatpush3.bf16.msra.mxu0 %v208_v0  ;;  %204 = vmatprep.mubr.msk.bf16.mxu0 %vm71_vm0, %v212_v3  ;;  %v211_v4 = vld [vmem:[%s282_s1] sm:$0xff]   ;;  %v189_v6 = vld [vmem:[%s284_s3 + $0x8] sm:$0xff]  }
   0x4   :  { %198 = vmatprep.subr.bf16.mxu0 %v209_v1  ;;  %v164_v7 = vld [vmem:[%s285_s2] ss:$0 sm:$0xff]  ;;  %v187_v9 = vunpack.c.l.bf16 %v189_v6  ;;  %v188_v16 = vunpack.c.h.bf16 %v189_v6 }
   0x5   :  { %v182_v8 = vld [vmem:[%s284_s3] sm:$0xff]  }
   0x6   :  { %v183_v12 = vunpack.c.l.bf16 %v182_v8  ;;  %v184_v21 = vunpack.c.h.bf16 %v182_v8 }
   0x7   :  { %199 = vmatpush3.bf16.msra.mxu0 %v209_v1 }
   0x8   :  { %200 = vmatprep.subr.bf16.mxu0 %v210_v2 }
   0xb   :  { %201 = vmatpush3.bf16.msra.mxu0 %v210_v2 }
   0xc   :  { %202 = vmatprep.subr.bf16.mxu0 %v211_v4 }
   0xf   :  { %203 = vmatpush3.bf16.msra.mxu0 %v211_v4 }
  0x12   :  { %205 = vmatmul.mubr.msk.bf16.vlgmr.msra.gmra.mxu0 %vm71_vm0, %v213_v5 }
  0xd2   :  { %v206_v10 = vpop.f32.mrf.mxu0 }
  0xd3   :  { %v121_v11 = vadd.f32 %v206_v10, %v164_v7 }
  0xd4   :  { %v112_v13 = vpop.f32.mrf.mxu0 }
  0xd5   :  { %v137_v14 = vadd.f32 %v187_v9, %v121_v11  ;;  %v113_v15 = vadd.f32 %v164_v7, %v112_v13 }
  0xd6   :  { %v207_v17 = vpop.f32.mrf.mxu0 }
  0xd7   :  { %v179_v18 = vpack.c.bf16 %v137_v14, %v137_v14  ;;  %v135_v19 = vadd.f32 %v183_v12, %v113_v15  ;;  %v124_v20 = vadd.f32 %v207_v17, %v164_v7 }
  0xd8   :  { %v115_v22 = vpop.f32.mrf.mxu0 }
  0xd9   :  { %158 = vst.msk [vmem:[%s286_s4 + $0x8] sm:$0xf] %vm155_vm1, %v179_v18  ;;  %v177_v23 = vpack.c.bf16 %v135_v19, %v135_v19  ;;  %v138_v24 = vadd.f32 %v188_v16, %v124_v20  ;;  %v116_v25 = vadd.f32 %v164_v7, %v115_v22 }
  0xdb   :  { %156 = vst.msk [vmem:[%s286_s4] sm:$0xf] %vm155_vm1, %v177_v23  ;;  %v180_v26 = vpack.c.bf16 %v138_v24, %v138_v24  ;;  %v136_v27 = vadd.f32 %v184_v21, %v116_v25 }
  0xdd   :  { %159 = vst.msk [vmem:[%s286_s4 + $0xc] sm:$0xf] %vm155_vm1, %v180_v26  ;;  %v178_v28 = vpack.c.bf16 %v136_v27, %v136_v27 }
  0xdf   :  { %157 = vst.msk [vmem:[%s286_s4 + $0x4] sm:$0xf] %vm155_vm1, %v178_v28 }

// kernel: decoder_forward.83
= control target key start
LH: loop header
LB: loop body
LE: loop exit
PB: predicated region body
PF: predicated region fallthrough
CT: control target
= control target key end

     0   :  { %s754_s15 = smov 0   ;;  %s922_s0 = inlined_call_operand.vmem [shape: bf16[2,8,8,64], index: 0, kind: input, shape index: {}]   ;;  %s923_s1 = inlined_call_operand.vmem [shape: f32[1,64], index: 1, kind: input, shape index: {}]   ;;  %s924_s2 = inlined_call_operand.vmem [shape: f32[1,64], index: 2, kind: input, shape index: {}]   ;;  %s925_s3 = inlined_call_operand.vmem [shape: f32[64,64], index: 3, kind: input, shape index: {}]   ;;  %s926_s4 = inlined_call_operand.vmem [shape: bf16[2,8,8,64], index: 4, kind: output, shape index: {}]  }
   0x1 LB: > { %s584_s16 = sadd.s32 4294967295, %s725_s15   ;;  %p588_p0 = scmp.ge.s32.totalorder %s725_s15, 1  ;;  %s725_s15 = sphi %s754_s15, %s14_s15  }
   0x2   : > { %p162_p1 = scmp.lt.s32.totalorder %s725_s15, 3 }
   0x4   : > { %p163_p2 = pnand %p588_p0, %p162_p1 }
   0x5   : > { %p188_p3 = scmp.lt.s32.totalorder (!%p163_p2), %s584_s16, 1 }
   0x6   : > { %166 = sbr.rel (%p163_p2) target bundleno = 312 (0x138), region = 36 }
   0xb   : > { %v272_v0 = vld [vmem:[%s925_s3 + $0x38] sm:$0xff]  ;;  %v727_v1 = vmov 0.0   ;;  %v271_v2 = vld [vmem:[%s925_s3 + $0x30] sm:$0xff]  ;;  %s928_s16 = smov (!%p188_p3, %s584_s16), 1  ;;  %v270_v3 = vld [vmem:[%s925_s3 + $0x28] sm:$0xff]  ;;  %vm214_vm0 = vcmask 523264  }
   0xc   : > { %637 = vmatprep.subr.mxu0 %v727_v1  ;;  %656 = vmatprep.subr.mxu1 %v727_v1  ;;  %s598_s23 = sshll.u32 %s928_s16, 5  ;;  %v269_v4 = vld [vmem:[%s925_s3 + $0x20] sm:$0xff]  ;;  %v268_v8 = vld [vmem:[%s925_s3 + $0x18] sm:$0xff]  ;;  %v267_v13 = vld [vmem:[%s925_s3 + $0x10] sm:$0xff]  ;;  %vm728_vm1 = vmmov 0   ;;  %vm520_vm2 = vcmask 519168  }
   0xd   : > { %638 = vmatpush3.msra.mxu0 %v272_v0  ;;  %657 = vmatpush3.msra.mxu1 %v272_v0  ;;  %s192_s28 = scalar_lea.vmem %s922_s0, %s598_s23  ;;  %v266_v21 = vld [vmem:[%s925_s3 + $0x8] sm:$0xff]  ;;  %v265_v28 = vld [vmem:[%s925_s3] sm:$0xff]  ;;  %s197_s19 = scalar_lea.vmem %s926_s4, %s598_s23 }
   0xe   : > { %639 = vmatprep.subr.mxu0 %v727_v1  ;;  %658 = vmatprep.subr.mxu1 %v727_v1  ;;  %v601_v5 = vld [vmem:[%s192_s28] sm:$0xff]   ;;  %v616_v6 = vld [vmem:[%s192_s28 + $0x8] sm:$0xff]   ;;  %v617_v7 = vld [vmem:[%s192_s28 + $0x10] sm:$0xff]  }
   0xf   : > { %640 = vmatpush3.msra.mxu0 %v271_v2  ;;  %659 = vmatpush3.msra.mxu1 %v271_v2  ;;  %v793_v9 = vunpack.c.l.bf16 %v601_v5  ;;  %v795_v10 = vunpack.c.h.bf16 %v601_v5  ;;  %v797_v11 = vunpack.c.l.bf16 %v616_v6  ;;  %v799_v12 = vunpack.c.h.bf16 %v616_v6  ;;  %v618_v19 = vld [vmem:[%s192_s28 + $0x18] sm:$0xff]  }
  0x10   : > { %641 = vmatprep.subr.mxu0 %v727_v1  ;;  %660 = vmatprep.subr.mxu1 %v727_v1  ;;  %v806_v14 = vunpack.c.l.bf16 %v617_v7  ;;  %v814_v18 = vunpack.c.h.bf16 %v617_v7  ;;  %v836_v29 = vunpack.c.l.bf16 %v618_v19  ;;  %v848_v36 = vunpack.c.h.bf16 %v618_v19 }
  0x11   : > { %642 = vmatpush3.msra.mxu0 %v270_v3  ;;  %661 = vmatpush3.msra.mxu1 %v270_v3  ;;  %v215_v15 = vsel %vm214_vm0, %v793_v9, 0.0  ;;  %v216_v16 = vsel %vm214_vm0, %v795_v10, 0.0  ;;  %v218_v17 = vsel %vm214_vm0, %v797_v11, 0.0  ;;  %v220_v22 = vsel %vm214_vm0, %v799_v12, 0.0 }
  0x12   : > { %643 = vmatprep.subr.mxu0 %v727_v1  ;;  %662 = vmatprep.subr.mxu1 %v727_v1  ;;  %v217_v20 = vadd.f32 %v216_v16, %v215_v15  ;;  %v236_v23 = vmul.f32 %v793_v9, %v793_v9  ;;  %v237_v24 = vmul.f32 %v795_v10, %v795_v10  ;;  %v222_v30 = vsel %vm214_vm0, %v806_v14, 0.0 }
  0x13   : > { %644 = vmatpush3.msra.mxu0 %v269_v4  ;;  %663 = vmatpush3.msra.mxu1 %v269_v4  ;;  %v238_v25 = vmul.f32 %v797_v11, %v797_v11  ;;  %v239_v27 = vmul.f32 %v799_v12, %v799_v12  ;;  %v240_v33 = vmul.f32 %v806_v14, %v806_v14  ;;  %v224_v37 = vsel %vm214_vm0, %v814_v18, 0.0 }
  0x14   : > { %645 = vmatprep.subr.mxu0 %v727_v1  ;;  %664 = vmatprep.subr.mxu1 %v727_v1  ;;  %v219_v26 = vadd.f32 %v218_v17, %v217_v20  ;;  %v244_v31 = vsel %vm214_vm0, %v236_v23, 0.0  ;;  %v245_v34 = vsel %vm214_vm0, %v237_v24, 0.0  ;;  %v241_v40 = vmul.f32 %v814_v18, %v814_v18  ;;  %v435_v24 = vld [vmem:[%s923_s1] sm:$0x1] }
  0x15   : > { %646 = vmatpush3.msra.mxu0 %v268_v8  ;;  %665 = vmatpush3.msra.mxu1 %v268_v8  ;;  %v247_v35 = vsel %vm214_vm0, %v238_v25, 0.0  ;;  %v246_v38 = vadd.f32 %v245_v34, %v244_v31  ;;  %v249_v41 = vsel %vm214_vm0, %v239_v27, 0.0  ;;  %v226_v42 = vsel %vm214_vm0, %v836_v29, 0.0 }
  0x16   : > { %647 = vmatprep.subr.mxu0 %v727_v1  ;;  %666 = vmatprep.subr.mxu1 %v727_v1  ;;  %v221_v32 = vadd.f32 %v220_v22, %v219_v26  ;;  %v242_v45 = vmul.f32 %v836_v29, %v836_v29  ;;  %v251_v46 = vsel %vm214_vm0, %v240_v33, 0.0  ;;  %v228_v47 = vsel %vm214_vm0, %v848_v36, 0.0 }
  0x17   : > { %648 = vmatpush3.msra.mxu0 %v267_v13  ;;  %667 = vmatpush3.msra.mxu1 %v267_v13  ;;  %v248_v43 = vadd.f32 %v247_v35, %v246_v38  ;;  %v243_v50 = vmul.f32 %v848_v36, %v848_v36  ;;  %v253_v51 = vsel %vm214_vm0, %v241_v40, 0.0  ;;  %v423_v20 = vlaneseq  ;;  %v595_v38 = vld [vmem:[%s924_s2] ss:$0 sm:$0xff] }
  0x18   : > { %649 = vmatprep.subr.mxu0 %v727_v1  ;;  %668 = vmatprep.subr.mxu1 %v727_v1  ;;  %v223_v39 = vadd.f32 %v222_v30, %v221_v32  ;;  %v255_v54 = vsel %vm214_vm0, %v242_v45, 0.0 }
  0x19   : > { %650 = vmatpush3.msra.mxu0 %v266_v21  ;;  %653 = vmatprep.mubr.msk.f32.mxu0 %vm728_vm1, %v727_v1  ;;  %v250_v48 = vadd.f32 %v249_v41, %v248_v43  ;;  %v257_v57 = vsel %vm214_vm0, %v243_v50, 0.0 }
  0x1a   : > { %651 = vmatprep.subr.mxu0 %v727_v1  ;;  %669 = vmatpush3.msra.mxu1 %v266_v21  ;;  %v225_v44 = vadd.f32 %v224_v37, %v223_v39  ;;  %v424_v21 = vshrl.u32 %v423_v20, 7 }
  0x1b   : > { %652 = vmatpush3.msra.mxu0 %v265_v28  ;;  %670 = vmatprep.subr.mxu1 %v727_v1  ;;  %v252_v52 = vadd.f32 %v251_v46, %v250_v48 }
  0x1c   : > { %671 = vmatpush3.msra.mxu1 %v265_v28  ;;  %672 = vmatprep.mubr.msk.f32.mxu1 %vm728_vm1, %v727_v1  ;;  %v227_v49 = vadd.f32 %v226_v42, %v225_v44  ;;  %v425_v22 = vsub.s32 0, %v424_v21 }
  0x1d   : > { %v254_v55 = vadd.f32 %v253_v51, %v252_v52 }
  0x1e   : > { %v229_v53 = vadd.f32 %v228_v47, %v227_v49 }
  0x1f   : > { %v256_v58 = vadd.f32 %v255_v54, %v254_v55 }
  0x20   : > { %v230_v56 = vrot.slane %v229_v53, 4 }
  0x21   : > { %v258_v60 = vadd.f32 %v257_v57, %v256_v58 }
  0x22   : > { %v231_v59 = vadd.f32 %v230_v56, %v229_v53 }
  0x23   : > { %v259_v62 = vrot.slane %v258_v60, 4 }
  0x24   : > { %v232_v61 = vrot.slane %v231_v59, 2 }
  0x25   : > { %v260_v0 = vadd.f32 %v259_v62, %v258_v60 }
  0x26   : > { %v233_v63 = vadd.f32 %v232_v61, %v231_v59 }
  0x27   : > { %v261_v2 = vrot.slane %v260_v0, 2 }
  0x28   : > { %v234_v1 = vrot.slane %v233_v63, 1 }
  0x29   : > { %v262_v4 = vadd.f32 %v261_v2, %v260_v0 }
  0x2a   : > { %v235_v3 = vadd.f32 %v234_v1, %v233_v63 }
  0x2b   : > { %v263_v5 = vrot.slane %v262_v4, 1 }
  0x2c   : > { %654 = vmatmul.mubr.msk.f32.vlgmr.msra.gmra.mxu0 %vm214_vm0, %v235_v3 }
  0x2d   : > { %v264_v6 = vadd.f32 %v263_v5, %v262_v4 }
  0x2f   : > { %673 = vmatmul.mubr.msk.f32.vlgmr.msra.gmra.mxu1 %vm214_vm0, %v264_v6 }
  0xec   : > { %v342_v7 = vpop.f32.mrf.mxu0 }
  0xed   : > { %v419_v8 = vmul.f32 %v342_v7, %v342_v7  ;;  %v426_v23 = vrot.slane %v342_v7, %v425_v22 }
  0xee   : > { %v655_v13 = vpop.f32.mrf.mxu0 }
  0xef   : > { %v415_v15 = vpop.f32.mrf.mxu1  ;;  %v427_v27 = vsub.f32 %v793_v9, %v426_v23  ;;  %v428_v28 = vsub.f32 %v795_v10, %v426_v23  ;;  %v429_v30 = vsub.f32 %v797_v11, %v426_v23  ;;  %v430_v31 = vsub.f32 %v799_v12, %v426_v23 }
  0xf0   : > { %v420_v16 = vsub.f32 %v415_v15, %v419_v8  ;;  %v431_v33 = vsub.f32 %v806_v14, %v426_v23  ;;  %v432_v34 = vsub.f32 %v814_v18, %v426_v23  ;;  %v433_v35 = vsub.f32 %v836_v29, %v426_v23 }
  0xf1   : > { %v674_v17 = vpop.f32.mrf.mxu1  ;;  %v434_v37 = vsub.f32 %v848_v36, %v426_v23 }
  0xf2   : > { %v421_v19 = vadd.f32 1e-06, %v420_v16 }
  0xf4   : > { %685 = vrsqrt.f32 %v421_v19 }
 0x101   : > { %v686_v25 = vpop.eup %685 }
 0x102   : > { %v436_v26 = vmul.f32 %v686_v25, %v435_v24 }
 0x104   : > { %v440_v32 = vrot.slane %v436_v26, %v425_v22 }
 0x106   : > { %v441_v9 = vmul.f32 %v440_v32, %v427_v27  ;;  %v442_v39 = vmul.f32 %v440_v32, %v428_v28  ;;  %v443_v10 = vmul.f32 %v440_v32, %v429_v30  ;;  %v444_v40 = vmul.f32 %v440_v32, %v430_v31 }
 0x107   : > { %v445_v11 = vmul.f32 %v440_v32, %v431_v33  ;;  %v446_v41 = vmul.f32 %v440_v32, %v432_v34  ;;  %v447_v12 = vmul.f32 %v440_v32, %v433_v35  ;;  %v448_v42 = vmul.f32 %v440_v32, %v434_v37 }
 0x108   : > { %v456_v43 = vadd.f32 %v595_v38, %v441_v9  ;;  %v457_v14 = vadd.f32 %v595_v38, %v442_v39  ;;  %v458_v44 = vadd.f32 %v595_v38, %v443_v10  ;;  %v886_v18 = vadd.f32 %v595_v38, %v444_v40 }
 0x109   : > { %v888_v29 = vadd.f32 %v595_v38, %v445_v11  ;;  %v890_v36 = vadd.f32 %v595_v38, %v446_v41  ;;  %v892_v45 = vadd.f32 %v595_v38, %v447_v12  ;;  %v894_v46 = vadd.f32 %v595_v38, %v448_v42 }
 0x10a   : > { %v464_v47 = vsub.f32 0.0, %v456_v43  ;;  %v465_v48 = vsub.f32 0.0, %v457_v14  ;;  %v466_v49 = vsub.f32 0.0, %v458_v44  ;;  %v467_v50 = vsub.f32 0.0, %v886_v18 }
 0x10b   : > { %v468_v51 = vsub.f32 0.0, %v888_v29  ;;  %v469_v52 = vsub.f32 0.0, %v890_v36  ;;  %v470_v53 = vsub.f32 0.0, %v892_v45  ;;  %v471_v57 = vsub.f32 0.0, %v894_v46 }
 0x10c   : > { %v472_v54 = vmul.f32 1.442695, %v464_v47  ;;  %v474_v55 = vmul.f32 1.442695, %v465_v48  ;;  %v476_v56 = vmul.f32 1.442695, %v466_v49 }
 0x10d   : > { %v478_v58 = vmul.f32 1.442695, %v467_v50  ;;  %v480_v59 = vmul.f32 1.442695, %v468_v51  ;;  %v482_v60 = vmul.f32 1.442695, %v469_v52 }
 0x10e   : > { %687 = vpow2.f32 %v472_v54  ;;  %v484_v61 = vmul.f32 1.442695, %v470_v53  ;;  %v486_v62 = vmul.f32 1.442695, %v471_v57 }
 0x10f   : > { %689 = vpow2.f32 %v474_v55 }
 0x110   : > { %691 = vpow2.f32 %v476_v56 }
 0x111   : > { %693 = vpow2.f32 %v478_v58 }
 0x112   : > { %695 = vpow2.f32 %v480_v59 }
 0x113   : > { %697 = vpow2.f32 %v482_v60 }
 0x114   : > { %699 = vpow2.f32 %v484_v61 }
 0x115   : > { %701 = vpow2.f32 %v486_v62 }
 0x11b   : > { %v688_v63 = vpop.eup %687 }
 0x11c   : > { %v690_v0 = vpop.eup %689  ;;  %v488_v1 = vadd.f32 1.0, %v688_v63 }
 0x11d   : > { %v692_v2 = vpop.eup %691  ;;  %v489_v3 = vadd.f32 1.0, %v690_v0 }
 0x11e   : > { %v694_v4 = vpop.eup %693  ;;  %v490_v5 = vadd.f32 1.0, %v692_v2  ;;  %703 = vrcp.f32 %v488_v1 }
 0x11f   : > { %v696_v6 = vpop.eup %695  ;;  %v491_v7 = vadd.f32 1.0, %v694_v4  ;;  %705 = vrcp.f32 %v489_v3 }
 0x120   : > { %v698_v8 = vpop.eup %697  ;;  %v492_v13 = vadd.f32 1.0, %v696_v6  ;;  %707 = vrcp.f32 %v490_v5 }
 0x121   : > { %v700_v15 = vpop.eup %699  ;;  %v493_v16 = vadd.f32 1.0, %v698_v8  ;;  %709 = vrcp.f32 %v491_v7 }
 0x122   : > { %v702_v17 = vpop.eup %701  ;;  %v494_v19 = vadd.f32 1.0, %v700_v15  ;;  %711 = vrcp.f32 %v492_v13 }
 0x123   : > { %v495_v20 = vadd.f32 1.0, %v702_v17  ;;  %713 = vrcp.f32 %v493_v16 }
 0x124   : > { %715 = vrcp.f32 %v494_v19 }
 0x125   : > { %717 = vrcp.f32 %v495_v20 }
 0x12b   : > { %v704_v21 = vpop.eup %703 }
 0x12c   : > { %v706_v22 = vpop.eup %705  ;;  %v497_v23 = vmul.f32 %v704_v21, %v456_v43 }
 0x12d   : > { %v708_v24 = vpop.eup %707  ;;  %v499_v25 = vmul.f32 %v706_v22, %v457_v14 }
 0x12e   : > { %v710_v26 = vpop.eup %709  ;;  %v501_v27 = vmul.f32 %v708_v24, %v458_v44  ;;  %v512_v28 = vpack.c.bf16 %v497_v23, %v497_v23 }
 0x12f   : > { %v712_v30 = vpop.eup %711  ;;  %v503_v31 = vmul.f32 %v710_v26, %v886_v18  ;;  %v513_v32 = vpack.c.bf16 %v499_v25, %v499_v25 }
 0x130   : > { %v714_v33 = vpop.eup %713  ;;  %v505_v34 = vmul.f32 %v712_v30, %v888_v29  ;;  %v514_v35 = vpack.c.bf16 %v501_v27, %v501_v27  ;;  %521 = vst.msk [vmem:[%s197_s19] sm:$0xf] %vm520_vm2, %v512_v28 }
 0x131   : > { %v716_v37 = vpop.eup %715  ;;  %v507_v38 = vmul.f32 %v714_v33, %v890_v36  ;;  %v515_v9 = vpack.c.bf16 %v503_v31, %v503_v31  ;;  %522 = vst.msk [vmem:[%s197_s19 + $0x4] sm:$0xf] %vm520_vm2, %v513_v32 }
 0x132   : > { %v718_v39 = vpop.eup %717  ;;  %v509_v10 = vmul.f32 %v716_v37, %v892_v45  ;;  %v516_v40 = vpack.c.bf16 %v505_v34, %v505_v34  ;;  %523 = vst.msk [vmem:[%s197_s19 + $0x8] sm:$0xf] %vm520_vm2, %v514_v35 }
 0x133   : > { %v511_v11 = vmul.f32 %v718_v39, %v894_v46  ;;  %v517_v41 = vpack.c.bf16 %v507_v38, %v507_v38  ;;  %524 = vst.msk [vmem:[%s197_s19 + $0xc] sm:$0xf] %vm520_vm2, %v515_v9 }
 0x134   : > { %v518_v12 = vpack.c.bf16 %v509_v10, %v509_v10  ;;  %525 = vst.msk [vmem:[%s197_s19 + $0x10] sm:$0xf] %vm520_vm2, %v516_v40 }
 0x135   : > { %v519_v42 = vpack.c.bf16 %v511_v11, %v511_v11  ;;  %526 = vst.msk [vmem:[%s197_s19 + $0x14] sm:$0xf] %vm520_vm2, %v517_v41 }
 0x136   : > { %527 = vst.msk [vmem:[%s197_s19 + $0x18] sm:$0xf] %vm520_vm2, %v518_v12 }
 0x137   : > { %528 = vst.msk [vmem:[%s197_s19 + $0x1c] sm:$0xf] %vm520_vm2, %v519_v42 }
 0x138 PF: > { %s14_s15 = sadd.s32 1, %s725_s15  }
 0x139   : > { %p11_p4 = scmp.ge.s32.totalorder %s14_s15, 4  }
 0x13b   :  { %13 = sbr.rel (!%p11_p4) target bundleno = 1 (0x1), region = 66 }

// kernel: decoder_forward.85
= control target key start
LH: loop header
LB: loop body
LE: loop exit
PB: predicated region body
PF: predicated region fallthrough
CT: control target
= control target key end

     0   :  { %s726_s15 = smov 0   ;;  %s864_s0 = inlined_call_operand.vmem [shape: bf16[2,8,8,32], index: 0, kind: input, shape index: {}]   ;;  %s865_s1 = inlined_call_operand.vmem [shape: f32[1,32], index: 1, kind: input, shape index: {}]   ;;  %s866_s2 = inlined_call_operand.vmem [shape: f32[1,32], index: 2, kind: input, shape index: {}]   ;;  %s867_s3 = inlined_call_operand.vmem [shape: f32[32,32], index: 3, kind: input, shape index: {}]   ;;  %s868_s4 = inlined_call_operand.vmem [shape: bf16[2,8,8,32], index: 4, kind: output, shape index: {}]  }
   0x1 LB: > { %s580_s16 = sadd.s32 4294967295, %s697_s15   ;;  %p584_p0 = scmp.ge.s32.totalorder %s697_s15, 1  ;;  %s697_s15 = sphi %s726_s15, %s14_s15  }
   0x2   : > { %p162_p1 = scmp.lt.s32.totalorder %s697_s15, 3 }
   0x4   : > { %p163_p2 = pnand %p584_p0, %p162_p1 }
   0x5   : > { %p188_p3 = scmp.lt.s32.totalorder (!%p163_p2), %s580_s16, 1 }
   0x6   : > { %166 = sbr.rel (%p163_p2) target bundleno = 312 (0x138), region = 36 }
   0xb   : > { %v268_v0 = vld [vmem:[%s867_s3 + $0x18] sm:$0xff]  ;;  %v699_v1 = vmov 0.0   ;;  %v267_v2 = vld [vmem:[%s867_s3 + $0x10] sm:$0xff]  ;;  %s870_s16 = smov (!%p188_p3, %s580_s16), 1  ;;  %v266_v3 = vld [vmem:[%s867_s3 + $0x8] sm:$0xff]  ;;  %vm700_vm0 = vmmov 0  }
   0xc   : > { %625 = vmatprep.subr.mxu0 %v699_v1  ;;  %636 = vmatprep.subr.mxu1 %v699_v1  ;;  %s594_s23 = sshll.u32 %s870_s16, 5  ;;  %v265_v4 = vld [vmem:[%s867_s3] sm:$0xff]  ;;  %vm214_vm1 = vcmask 261120   ;;  %vm516_vm2 = vcmask 257024  }
   0xd   : > { %626 = vmatpush3.msra.mxu0 %v268_v0  ;;  %637 = vmatpush3.msra.mxu1 %v268_v0  ;;  %s192_s28 = scalar_lea.vmem %s864_s0, %s594_s23  ;;  %s197_s9 = scalar_lea.vmem %s868_s4, %s594_s23 }
   0xe   : > { %627 = vmatprep.subr.mxu0 %v699_v1  ;;  %638 = vmatprep.subr.mxu1 %v699_v1  ;;  %v597_v5 = vld [vmem:[%s192_s28] sm:$0xff]   ;;  %v612_v6 = vld [vmem:[%s192_s28 + $0x8] sm:$0xff]   ;;  %v613_v7 = vld [vmem:[%s192_s28 + $0x10] sm:$0xff]  }
   0xf   : > { %628 = vmatpush3.msra.mxu0 %v267_v2  ;;  %639 = vmatpush3.msra.mxu1 %v267_v2  ;;  %v755_v8 = vunpack.c.l.bf16 %v597_v5  ;;  %v757_v9 = vunpack.c.h.bf16 %v597_v5  ;;  %v759_v10 = vunpack.c.l.bf16 %v612_v6  ;;  %v761_v11 = vunpack.c.h.bf16 %v612_v6  ;;  %v614_v13 = vld [vmem:[%s192_s28 + $0x18] sm:$0xff]  }
  0x10   : > { %629 = vmatprep.subr.mxu0 %v699_v1  ;;  %640 = vmatprep.subr.mxu1 %v699_v1  ;;  %v763_v12 = vunpack.c.l.bf16 %v613_v7  ;;  %v772_v17 = vunpack.c.h.bf16 %v613_v7  ;;  %v782_v23 = vunpack.c.l.bf16 %v614_v13  ;;  %v793_v33 = vunpack.c.h.bf16 %v614_v13 }
  0x11   : > { %630 = vmatpush3.msra.mxu0 %v266_v3  ;;  %633 = vmatprep.mubr.msk.f32.mxu0 %vm700_vm0, %v699_v1  ;;  %v215_v14 = vsel %vm214_vm1, %v755_v8, 0.0  ;;  %v216_v15 = vsel %vm214_vm1, %v757_v9, 0.0  ;;  %v218_v16 = vsel %vm214_vm1, %v759_v10, 0.0  ;;  %v220_v19 = vsel %vm214_vm1, %v761_v11, 0.0 }
  0x12   : > { %631 = vmatprep.subr.mxu0 %v699_v1  ;;  %641 = vmatpush3.msra.mxu1 %v266_v3  ;;  %v217_v18 = vadd.f32 %v216_v15, %v215_v14  ;;  %v236_v20 = vmul.f32 %v755_v8, %v755_v8  ;;  %v237_v21 = vmul.f32 %v757_v9, %v757_v9  ;;  %v222_v26 = vsel %vm214_vm1, %v763_v12, 0.0 }
  0x13   : > { %632 = vmatpush3.msra.mxu0 %v265_v4  ;;  %642 = vmatprep.subr.mxu1 %v699_v1  ;;  %v238_v22 = vmul.f32 %v759_v10, %v759_v10  ;;  %v239_v25 = vmul.f32 %v761_v11, %v761_v11  ;;  %v240_v27 = vmul.f32 %v763_v12, %v763_v12  ;;  %v224_v34 = vsel %vm214_vm1, %v772_v17, 0.0 }
  0x14   : > { %643 = vmatpush3.msra.mxu1 %v265_v4  ;;  %644 = vmatprep.mubr.msk.f32.mxu1 %vm700_vm0, %v699_v1  ;;  %v219_v24 = vadd.f32 %v218_v16, %v217_v18  ;;  %v244_v28 = vsel %vm214_vm1, %v236_v20, 0.0  ;;  %v245_v29 = vsel %vm214_vm1, %v237_v21, 0.0  ;;  %v241_v35 = vmul.f32 %v772_v17, %v772_v17  ;;  %v431_v20 = vld [vmem:[%s865_s1] sm:$0x1] }
  0x15   : > { %v246_v31 = vadd.f32 %v245_v29, %v244_v28  ;;  %v247_v32 = vsel %vm214_vm1, %v238_v22, 0.0  ;;  %v249_v36 = vsel %vm214_vm1, %v239_v25, 0.0  ;;  %v226_v39 = vsel %vm214_vm1, %v782_v23, 0.0 }
  0x16   : > { %v221_v30 = vadd.f32 %v220_v19, %v219_v24  ;;  %v242_v40 = vmul.f32 %v782_v23, %v782_v23  ;;  %v251_v41 = vsel %vm214_vm1, %v240_v27, 0.0  ;;  %v228_v44 = vsel %vm214_vm1, %v793_v33, 0.0 }
  0x17   : > { %v248_v38 = vadd.f32 %v247_v32, %v246_v31  ;;  %v243_v45 = vmul.f32 %v793_v33, %v793_v33  ;;  %v253_v46 = vsel %vm214_vm1, %v241_v35, 0.0  ;;  %v419_v15 = vlaneseq }
  0x18   : > { %v223_v37 = vadd.f32 %v222_v26, %v221_v30  ;;  %v255_v49 = vsel %vm214_vm1, %v242_v40, 0.0 }
  0x19   : > { %v250_v43 = vadd.f32 %v249_v36, %v248_v38  ;;  %v257_v52 = vsel %vm214_vm1, %v243_v45, 0.0  ;;  %v420_v16 = vshrl.u32 %v419_v15, 7 }
  0x1a   : > { %v225_v42 = vadd.f32 %v224_v34, %v223_v37  ;;  %v591_v34 = vld [vmem:[%s866_s2] ss:$0 sm:$0xff] }
  0x1b   : > { %v252_v48 = vadd.f32 %v251_v41, %v250_v43  ;;  %v421_v18 = vsub.s32 0, %v420_v16 }
  0x1c   : > { %v227_v47 = vadd.f32 %v226_v39, %v225_v42 }
  0x1d   : > { %v254_v51 = vadd.f32 %v253_v46, %v252_v48 }
  0x1e   : > { %v229_v50 = vadd.f32 %v228_v44, %v227_v47 }
  0x1f   : > { %v256_v54 = vadd.f32 %v255_v49, %v254_v51 }
  0x20   : > { %v230_v53 = vrot.slane %v229_v50, 4 }
  0x21   : > { %v258_v56 = vadd.f32 %v257_v52, %v256_v54 }
  0x22   : > { %v231_v55 = vadd.f32 %v230_v53, %v229_v50 }
  0x23   : > { %v259_v58 = vrot.slane %v258_v56, 4 }
  0x24   : > { %v232_v57 = vrot.slane %v231_v55, 2 }
  0x25   : > { %v260_v60 = vadd.f32 %v259_v58, %v258_v56 }
  0x26   : > { %v233_v59 = vadd.f32 %v232_v57, %v231_v55 }
  0x27   : > { %v261_v62 = vrot.slane %v260_v60, 2 }
  0x28   : > { %v234_v61 = vrot.slane %v233_v59, 1 }
  0x29   : > { %v262_v0 = vadd.f32 %v261_v62, %v260_v60 }
  0x2a   : > { %v235_v63 = vadd.f32 %v234_v61, %v233_v59 }
  0x2b   : > { %v263_v1 = vrot.slane %v262_v0, 1 }
  0x2c   : > { %634 = vmatmul.mubr.msk.f32.vlgmr.msra.gmra.mxu0 %vm214_vm1, %v235_v63 }
  0x2d   : > { %v264_v2 = vadd.f32 %v263_v1, %v262_v0 }
  0x2f   : > { %645 = vmatmul.mubr.msk.f32.vlgmr.msra.gmra.mxu1 %vm214_vm1, %v264_v2 }
  0xec   : > { %v338_v3 = vpop.f32.mrf.mxu0 }
  0xed   : > { %v415_v4 = vmul.f32 %v338_v3, %v338_v3  ;;  %v422_v19 = vrot.slane %v338_v3, %v421_v18 }
  0xee   : > { %v635_v5 = vpop.f32.mrf.mxu0 }
  0xef   : > { %v411_v6 = vpop.f32.mrf.mxu1  ;;  %v423_v24 = vsub.f32 %v755_v8, %v422_v19  ;;  %v424_v25 = vsub.f32 %v757_v9, %v422_v19  ;;  %v425_v26 = vsub.f32 %v759_v10, %v422_v19  ;;  %v426_v27 = vsub.f32 %v761_v11, %v422_v19 }
  0xf0   : > { %v416_v7 = vsub.f32 %v411_v6, %v415_v4  ;;  %v427_v29 = vsub.f32 %v763_v12, %v422_v19  ;;  %v428_v30 = vsub.f32 %v772_v17, %v422_v19  ;;  %v429_v31 = vsub.f32 %v782_v23, %v422_v19 }
  0xf1   : > { %v646_v13 = vpop.f32.mrf.mxu1  ;;  %v430_v32 = vsub.f32 %v793_v33, %v422_v19 }
  0xf2   : > { %v417_v14 = vadd.f32 1e-06, %v416_v7 }
  0xf4   : > { %657 = vrsqrt.f32 %v417_v14 }
 0x101   : > { %v658_v21 = vpop.eup %657 }
 0x102   : > { %v432_v22 = vmul.f32 %v658_v21, %v431_v20 }
 0x104   : > { %v436_v28 = vrot.slane %v432_v22, %v421_v18 }
 0x106   : > { %v437_v8 = vmul.f32 %v436_v28, %v423_v24  ;;  %v438_v35 = vmul.f32 %v436_v28, %v424_v25  ;;  %v439_v9 = vmul.f32 %v436_v28, %v425_v26  ;;  %v440_v36 = vmul.f32 %v436_v28, %v426_v27 }
 0x107   : > { %v441_v10 = vmul.f32 %v436_v28, %v427_v29  ;;  %v442_v37 = vmul.f32 %v436_v28, %v428_v30  ;;  %v443_v11 = vmul.f32 %v436_v28, %v429_v31  ;;  %v444_v38 = vmul.f32 %v436_v28, %v430_v32 }
 0x108   : > { %v452_v39 = vadd.f32 %v591_v34, %v437_v8  ;;  %v453_v12 = vadd.f32 %v591_v34, %v438_v35  ;;  %v454_v40 = vadd.f32 %v591_v34, %v439_v9  ;;  %v828_v17 = vadd.f32 %v591_v34, %v440_v36 }
 0x109   : > { %v830_v23 = vadd.f32 %v591_v34, %v441_v10  ;;  %v832_v33 = vadd.f32 %v591_v34, %v442_v37  ;;  %v834_v41 = vadd.f32 %v591_v34, %v443_v11  ;;  %v836_v42 = vadd.f32 %v591_v34, %v444_v38 }
 0x10a   : > { %v460_v43 = vsub.f32 0.0, %v452_v39  ;;  %v461_v44 = vsub.f32 0.0, %v453_v12  ;;  %v462_v45 = vsub.f32 0.0, %v454_v40  ;;  %v463_v46 = vsub.f32 0.0, %v828_v17 }
 0x10b   : > { %v464_v47 = vsub.f32 0.0, %v830_v23  ;;  %v465_v48 = vsub.f32 0.0, %v832_v33  ;;  %v466_v49 = vsub.f32 0.0, %v834_v41  ;;  %v467_v53 = vsub.f32 0.0, %v836_v42 }
 0x10c   : > { %v468_v50 = vmul.f32 1.442695, %v460_v43  ;;  %v470_v51 = vmul.f32 1.442695, %v461_v44  ;;  %v472_v52 = vmul.f32 1.442695, %v462_v45 }
 0x10d   : > { %v474_v54 = vmul.f32 1.442695, %v463_v46  ;;  %v476_v55 = vmul.f32 1.442695, %v464_v47  ;;  %v478_v56 = vmul.f32 1.442695, %v465_v48 }
 0x10e   : > { %659 = vpow2.f32 %v468_v50  ;;  %v480_v57 = vmul.f32 1.442695, %v466_v49  ;;  %v482_v58 = vmul.f32 1.442695, %v467_v53 }
 0x10f   : > { %661 = vpow2.f32 %v470_v51 }
 0x110   : > { %663 = vpow2.f32 %v472_v52 }
 0x111   : > { %665 = vpow2.f32 %v474_v54 }
 0x112   : > { %667 = vpow2.f32 %v476_v55 }
 0x113   : > { %669 = vpow2.f32 %v478_v56 }
 0x114   : > { %671 = vpow2.f32 %v480_v57 }
 0x115   : > { %673 = vpow2.f32 %v482_v58 }
 0x11b   : > { %v660_v59 = vpop.eup %659 }
 0x11c   : > { %v662_v60 = vpop.eup %661  ;;  %v484_v61 = vadd.f32 1.0, %v660_v59 }
 0x11d   : > { %v664_v62 = vpop.eup %663  ;;  %v485_v63 = vadd.f32 1.0, %v662_v60 }
 0x11e   : > { %v666_v0 = vpop.eup %665  ;;  %v486_v1 = vadd.f32 1.0, %v664_v62  ;;  %675 = vrcp.f32 %v484_v61 }
 0x11f   : > { %v668_v2 = vpop.eup %667  ;;  %v487_v3 = vadd.f32 1.0, %v666_v0  ;;  %677 = vrcp.f32 %v485_v63 }
 0x120   : > { %v670_v4 = vpop.eup %669  ;;  %v488_v5 = vadd.f32 1.0, %v668_v2  ;;  %679 = vrcp.f32 %v486_v1 }
 0x121   : > { %v672_v6 = vpop.eup %671  ;;  %v489_v7 = vadd.f32 1.0, %v670_v4  ;;  %681 = vrcp.f32 %v487_v3 }
 0x122   : > { %v674_v13 = vpop.eup %673  ;;  %v490_v14 = vadd.f32 1.0, %v672_v6  ;;  %683 = vrcp.f32 %v488_v5 }
 0x123   : > { %v491_v15 = vadd.f32 1.0, %v674_v13  ;;  %685 = vrcp.f32 %v489_v7 }
 0x124   : > { %687 = vrcp.f32 %v490_v14 }
 0x125   : > { %689 = vrcp.f32 %v491_v15 }
 0x12b   : > { %v676_v16 = vpop.eup %675 }
 0x12c   : > { %v678_v18 = vpop.eup %677  ;;  %v493_v19 = vmul.f32 %v676_v16, %v452_v39 }
 0x12d   : > { %v680_v20 = vpop.eup %679  ;;  %v495_v21 = vmul.f32 %v678_v18, %v453_v12 }
 0x12e   : > { %v682_v22 = vpop.eup %681  ;;  %v497_v24 = vmul.f32 %v680_v20, %v454_v40  ;;  %v508_v25 = vpack.c.bf16 %v493_v19, %v493_v19 }
 0x12f   : > { %v684_v26 = vpop.eup %683  ;;  %v499_v27 = vmul.f32 %v682_v22, %v828_v17  ;;  %v509_v28 = vpack.c.bf16 %v495_v21, %v495_v21 }
 0x130   : > { %v686_v29 = vpop.eup %685  ;;  %v501_v30 = vmul.f32 %v684_v26, %v830_v23  ;;  %v510_v31 = vpack.c.bf16 %v497_v24, %v497_v24  ;;  %517 = vst.msk [vmem:[%s197_s9] sm:$0xf] %vm516_vm2, %v508_v25 }
 0x131   : > { %v688_v32 = vpop.eup %687  ;;  %v503_v34 = vmul.f32 %v686_v29, %v832_v33  ;;  %v511_v8 = vpack.c.bf16 %v499_v27, %v499_v27  ;;  %518 = vst.msk [vmem:[%s197_s9 + $0x4] sm:$0xf] %vm516_vm2, %v509_v28 }
 0x132   : > { %v690_v35 = vpop.eup %689  ;;  %v505_v9 = vmul.f32 %v688_v32, %v834_v41  ;;  %v512_v36 = vpack.c.bf16 %v501_v30, %v501_v30  ;;  %519 = vst.msk [vmem:[%s197_s9 + $0x8] sm:$0xf] %vm516_vm2, %v510_v31 }
 0x133   : > { %v507_v10 = vmul.f32 %v690_v35, %v836_v42  ;;  %v513_v37 = vpack.c.bf16 %v503_v34, %v503_v34  ;;  %520 = vst.msk [vmem:[%s197_s9 + $0xc] sm:$0xf] %vm516_vm2, %v511_v8 }
 0x134   : > { %v514_v11 = vpack.c.bf16 %v505_v9, %v505_v9  ;;  %521 = vst.msk [vmem:[%s197_s9 + $0x10] sm:$0xf] %vm516_vm2, %v512_v36 }
 0x135   : > { %v515_v38 = vpack.c.bf16 %v507_v10, %v507_v10  ;;  %522 = vst.msk [vmem:[%s197_s9 + $0x14] sm:$0xf] %vm516_vm2, %v513_v37 }
 0x136   : > { %523 = vst.msk [vmem:[%s197_s9 + $0x18] sm:$0xf] %vm516_vm2, %v514_v11 }
 0x137   : > { %524 = vst.msk [vmem:[%s197_s9 + $0x1c] sm:$0xf] %vm516_vm2, %v515_v38 }
 0x138 PF: > { %s14_s15 = sadd.s32 1, %s697_s15  }
 0x139   : > { %p11_p4 = scmp.ge.s32.totalorder %s14_s15, 4  }
 0x13b   :  { %13 = sbr.rel (!%p11_p4) target bundleno = 1 (0x1), region = 66 }

// kernel: decoder_forward.84
= control target key start
LH: loop header
LB: loop body
LE: loop exit
PB: predicated region body
PF: predicated region fallthrough
CT: control target
= control target key end

     0   :  { %s2359_s18 = smov 0   ;;  %s2361_s19 = smov 0   ;;  %s2784_s0 = inlined_call_operand.vmem [shape: bf16[2,8,8,64], index: 0, kind: input, shape index: {}, may-alias: {0,1,2}]   ;;  %s2785_s1 = inlined_call_operand.vmem [shape: bf16[2,8,8,64], index: 1, kind: input, shape index: {}, may-alias: {0,1,2}]   ;;  %s2786_s2 = inlined_call_operand.vmem [shape: bf16[2,8,8,64], index: 2, kind: input, shape index: {}, may-alias: {0,1,2}]   ;;  %s2787_s3 = inlined_call_operand.vmem [shape: bf16[9,64,32], index: 3, kind: input, shape index: {}]   ;;  %s2788_s4 = inlined_call_operand.vmem [shape: f32[1,32], index: 4, kind: input, shape index: {}]   ;;  %s2789_s5 = inlined_call_operand.vmem [shape: bf16[2,8,8,32], index: 5, kind: output, shape index: {}]  }
   0x1   :  { %s2363_s0 = smov 0  }
   0x2 LB: > { %s27_s2 = sadd.s32 1, %s2322_s19  ;;  %p1814_p0 = scmp.ge.s32.totalorder %s2326_s0, 1  ;;  %s2326_s0 = sphi %s2363_s0, %s15_s0   ;;  %s2322_s19 = sphi %s2361_s19, %s2799_s19   ;;  %s2318_s18 = sphi %s2359_s18, %s2798_s18  }
   0x3   : > { %p29_p1 = scmp.ge.s32.totalorder %s27_s2, 2  ;;  %p270_p2 = scmp.lt.s32.totalorder %s2326_s0, 3 }
   0x5   : > { %s2801_s2 = smov (%p29_p1, %s27_s2), 0  ;;  %p271_p3 = pnand %p1814_p0, %p270_p2 }
   0x7   : > { %274 = sbr.rel (%p271_p3) target bundleno = 303 (0x12f), region = 40 }
   0xc   : > { %v2253_v0 = vld [vmem:[%s2787_s3 + $0x78] sm:$0xff]   ;;  %p347_p4 = scmp.lt.s32.totalorder %s2318_s18, 1  ;;  %v2255_v2 = vld [vmem:[%s2787_s3 + $0x70] sm:$0xff]   ;;  %v2257_v4 = vld [vmem:[%s2787_s3 + $0x68] sm:$0xff]   ;;  %vm513_vm0 = vcmask 1040384   ;;  %v2328_v18 = vmov 0  }
   0xd   : > { %v2254_v1 = vld [vmem:[%s2787_s3 + $0x18] sm:$0xff]   ;;  %2076 = vmatprep.subr.bf16.mxu0 %v2253_v0  ;;  %v2256_v3 = vld [vmem:[%s2787_s3 + $0x10] sm:$0xff]   ;;  %v2258_v5 = vld [vmem:[%s2787_s3 + $0x8] sm:$0xff]   ;;  %vm514_vm1 = vsmask.f32 256  ;;  %v2447_v19 = vcombine.low %v2328_v18, %v2328_v18  ;;  %vm587_vm3 = vcmask 523264  }
   0xe   : > { %s2803_s18 = smov (!%p347_p4, %s2318_s18), 1  ;;  %2092 = vmatprep.subr.bf16.mxu1 %v2254_v1  ;;  %2077 = vmatpush3.bf16.msra.mxu0 %v2253_v0  ;;  %v2259_v6 = vld [vmem:[%s2787_s3 + $0x60] sm:$0xff]   ;;  %v2269_v29 = vld [vmem:[%s2787_s3 + $0xd8] sm:$0xff]   ;;  %vm2477_vm2 = vmand %vm513_vm0, %vm514_vm1  ;;  %vm1268_vm4 = vcmask 1043456   ;;  %vm1269_vm5 = vsmask.f32 3328 }
   0xf   : > { %2093 = vmatpush3.bf16.msra.mxu1 %v2254_v1  ;;  %2078 = vmatprep.subr.bf16.mxu0 %v2255_v2  ;;  %s2000_s30 = sshll.u32 %s2803_s18, 5  ;;  %v2260_v10 = vld [vmem:[%s2787_s3] sm:$0xff]   ;;  %v2270_v32 = vld [vmem:[%s2787_s3 + $0x38] sm:$0xff]   ;;  %v434_v39 = vshrl.u32 %v2447_v19, 16  ;;  %v437_v42 = vshll.u32 %v2447_v19, 16  ;;  %v2271_v56 = vld [vmem:[%s2787_s3 + $0xd0] sm:$0xff]  }
  0x10   : > { %2094 = vmatprep.subr.bf16.mxu1 %v2256_v3  ;;  %s2403_s10 = scalar_lea.vmem %s2785_s1, %s2000_s30  ;;  %v2279_v35 = vld [vmem:[%s2787_s3 + $0x98] sm:$0xff]   ;;  %vm2663_vm6 = vmand %vm1268_vm4, %vm1269_vm5  ;;  %vm1678_vm7 = vcmask 257024   ;;  %s380_s9 = scalar_lea.vmem %s2789_s5, %s2000_s30 }
  0x11   : > { %v2409_v7 = vld [vmem:[%s2403_s10] sm:$0xf]  ;;  %v2412_v8 = vld [vmem:[%s2403_s10 + $0x4] sm:$0xf]  ;;  %v2415_v9 = vld [vmem:[%s2403_s10 + $0x8] sm:$0xf] }
  0x12   : > { %2079 = vmatpush3.bf16.msra.mxu0 %v2255_v2  ;;  %v2421_v11 = vld [vmem:[%s2403_s10 + $0xc] sm:$0xf]  ;;  %v2425_v12 = vcombine.low %v2409_v7, %v2409_v7  ;;  %v2429_v13 = vcombine.low %v2412_v8, %v2412_v8  ;;  %v2433_v14 = vcombine.low %v2415_v9, %v2415_v9  ;;  %v2436_v15 = vld [vmem:[%s2403_s10 + $0x18] sm:$0xf]  ;;  %v2443_v17 = vld [vmem:[%s2403_s10 + $0x1c] sm:$0xf] }
  0x13   : > { %2095 = vmatpush3.bf16.msra.mxu1 %v2256_v3  ;;  %2080 = vmatprep.subr.bf16.mxu0 %v2257_v4  ;;  %v2440_v16 = vcombine.low %v2421_v11, %v2421_v11  ;;  %v2451_v20 = vcombine.low %v2436_v15, %v2436_v15  ;;  %v2487_v38 = vcombine.low %v2443_v17, %v2443_v17  ;;  %v436_v46 = vrot.slane %v434_v39, 7  ;;  %v2510_v52 = vld [vmem:[%s2403_s10 + $0x10] sm:$0xf]  ;;  %v2519_v57 = vld [vmem:[%s2403_s10 + $0x14] sm:$0xf] }
  0x14   : > { %2096 = vmatprep.subr.bf16.mxu1 %v2258_v5  ;;  %v441_v21 = vshrl.u32 %v2425_v12, 16  ;;  %v444_v22 = vshll.u32 %v2425_v12, 16  ;;  %v448_v23 = vshrl.u32 %v2429_v13, 16  ;;  %v451_v24 = vshll.u32 %v2429_v13, 16  ;;  %v2272_v2 = vld [vmem:[%s2787_s3 + $0x30] sm:$0xff]   ;;  %v2296_v12 = vld [vmem:[%s2787_s3 + $0x48] sm:$0xff]  }
  0x15   : > { %v455_v25 = vshrl.u32 %v2433_v14, 16  ;;  %v458_v26 = vshll.u32 %v2433_v14, 16  ;;  %v462_v27 = vshrl.u32 %v2440_v16, 16  ;;  %v465_v28 = vshll.u32 %v2440_v16, 16  ;;  %v2297_v13 = vld [vmem:[%s2787_s3 + $0xa8] sm:$0xff]  }
  0x16   : > { %2081 = vmatpush3.bf16.msra.mxu0 %v2257_v4  ;;  %v443_v30 = vrot.slane %v441_v21, 7  ;;  %v450_v31 = vrot.slane %v448_v23, 7  ;;  %v483_v43 = vshrl.u32 %v2451_v20, 16  ;;  %v486_v47 = vshll.u32 %v2451_v20, 16 }
  0x17   : > { %2097 = vmatpush3.bf16.msra.mxu1 %v2258_v5  ;;  %2082 = vmatprep.subr.bf16.mxu0 %v2259_v6  ;;  %v457_v33 = vrot.slane %v455_v25, 7  ;;  %v464_v34 = vrot.slane %v462_v27, 7  ;;  %v439_v54 = vor.u32 %v437_v42, %v436_v46  ;;  %v490_v55 = vshrl.u32 %v2487_v38, 16 }
  0x18   : > { %2098 = vmatprep.subr.bf16.mxu1 %v2260_v10  ;;  %v446_v36 = vor.u32 %v444_v22, %v443_v30  ;;  %v453_v37 = vor.u32 %v451_v24, %v450_v31  ;;  %v485_v51 = vrot.slane %v483_v43, 7  ;;  %v493_v59 = vshll.u32 %v2487_v38, 16 }
  0x19   : > { %v460_v40 = vor.u32 %v458_v26, %v457_v33  ;;  %v467_v41 = vor.u32 %v465_v28, %v464_v34  ;;  %v2527_v60 = vcombine.low %v2510_v52, %v2510_v52  ;;  %v492_v62 = vrot.slane %v490_v55, 7 }
  0x1a   : > { %2083 = vmatpush3.bf16.msra.mxu0 %v2259_v6  ;;  %v517_v44 = vsel %vm2477_vm2, 0, %v446_v36  ;;  %v518_v45 = vsel %vm2477_vm2, 0, %v453_v37  ;;  %v488_v58 = vor.u32 %v486_v47, %v485_v51  ;;  %v2533_v63 = vsel %vm2477_vm2, 0, %v439_v54  ;;  %v2278_v51 = vld [vmem:[%s2787_s3 + $0x20] sm:$0xff]  }
  0x1b   : > { %2099 = vmatpush3.bf16.msra.mxu1 %v2260_v10  ;;  %2108 = vmatprep.subr.bf16.mxu0 %v2269_v29  ;;  %v519_v48 = vsel %vm2477_vm2, 0, %v460_v40  ;;  %v520_v49 = vsel %vm2477_vm2, 0, %v467_v41  ;;  %v1841_v50 = vcombine.low %v517_v44, %v518_v45  ;;  %v2538_v0 = vcombine.low %v2519_v57, %v2519_v57  ;;  %v2276_v40 = vld [vmem:[%s2787_s3 + $0x28] sm:$0xff]  }
  0x1c   : > { %2124 = vmatprep.subr.bf16.mxu1 %v2270_v32  ;;  %v1842_v53 = vcombine.low %v519_v48, %v520_v49  ;;  %v1854_v61 = vcombine.low %v518_v45, %v519_v48  ;;  %v1853_v1 = vcombine.low %v2533_v63, %v517_v44  ;;  %v469_v3 = vshrl.u32 %v2527_v60, 16 }
  0x1d   : > { %2084 = vmatprep.mubr.msk.bf16.mxu0 %vm587_vm3, %v1841_v50  ;;  %v495_v4 = vor.u32 %v493_v59, %v492_v62  ;;  %v472_v5 = vshll.u32 %v2527_v60, 16  ;;  %v476_v6 = vshrl.u32 %v2538_v0, 16  ;;  %v479_v10 = vshll.u32 %v2538_v0, 16  ;;  %v2285_v62 = vld [vmem:[%s2787_s3 + $0x88] sm:$0xff]   ;;  %v2300_v60 = vld [vmem:[%s2787_s3 + $0x118] sm:$0xff]  }
  0x1e   : > { %2085 = vmatmul.mubr.msk.bf16.vlgmr.msra.gmra.mxu0 %vm587_vm3, %v1842_v53  ;;  %v523_v30 = vsel %vm2477_vm2, 0, %v488_v58  ;;  %2100 = vmatprep.mubr.msk.bf16.mxu1 %vm587_vm3, %v1853_v1  ;;  %v471_v31 = vrot.slane %v469_v3, 7  ;;  %v1890_v53 = vcombine.low %v2328_v18, %v2409_v7  ;;  %v1891_v54 = vcombine.low %v2412_v8, %v2415_v9  ;;  %v2282_v58 = vld [vmem:[%s2787_s3 + $0xf0] sm:$0xff]   ;;  %v2286_v1 = vld [vmem:[%s2787_s3 + $0xe8] sm:$0xff]  }
  0x1f   : > { %2109 = vmatpush3.bf16.msra.mxu0 %v2269_v29  ;;  %v2275_v29 = vld [vmem:[%s2787_s3 + $0xc8] sm:$0xff]   ;;  %v524_v33 = vsel %vm2477_vm2, 0, %v495_v4  ;;  %2101 = vmatmul.mubr.msk.bf16.vlgmr.msra.gmra.mxu1 %vm587_vm3, %v1854_v61  ;;  %v478_v34 = vrot.slane %v476_v6, 7  ;;  %v1893_v4 = vcombine.low %v2519_v57, %v2436_v15  ;;  %v1913_v19 = vcombine.low %v2436_v15, %v2443_v17 }
  0x20   : > { %2110 = vmatprep.subr.bf16.mxu0 %v2271_v56  ;;  %2125 = vmatpush3.bf16.msra.mxu1 %v2270_v32  ;;  %v474_v36 = vor.u32 %v472_v5, %v471_v31  ;;  %v2277_v32 = vld [vmem:[%s2787_s3 + $0xc0] sm:$0xff]   ;;  %v1844_v44 = vcombine.low %v523_v30, %v524_v33  ;;  %v1910_v31 = vcombine.low %v2409_v7, %v2412_v8  ;;  %v1240_v8 = vrot.slane %v444_v22, 1 }
  0x21   : > { %2126 = vmatprep.subr.bf16.mxu1 %v2272_v2  ;;  %v481_v37 = vor.u32 %v479_v10, %v478_v34  ;;  %v1911_v7 = vcombine.low %v2415_v9, %v2421_v11  ;;  %v1242_v34 = vrot.slane %v451_v24, 1  ;;  %v2293_v9 = vld [vmem:[%s2787_s3 + $0xb0] sm:$0xff]  }
  0x22   : > { %v521_v41 = vsel %vm2477_vm2, 0, %v474_v36  ;;  %v1238_v36 = vrot.slane %v437_v42, 1  ;;  %v1241_v24 = vor.u32 %v1240_v8, %v441_v21  ;;  %v1930_v21 = vcombine.low %v2443_v17, %v2328_v18  ;;  %v2298_v18 = vld [vmem:[%s2787_s3 + $0x40] sm:$0xff]  }
  0x23   : > { %2111 = vmatpush3.bf16.msra.mxu0 %v2271_v56  ;;  %v522_v45 = vsel %vm2477_vm2, 0, %v481_v37  ;;  %v1855_v46 = vcombine.low %v520_v49, %v521_v41  ;;  %v2280_v49 = vld [vmem:[%s2787_s3 + $0xf8] sm:$0xff]   ;;  %v2281_v56 = vld [vmem:[%s2787_s3 + $0x90] sm:$0xff]   ;;  %v1243_v42 = vor.u32 %v1242_v34, %v448_v23  ;;  %v1248_v23 = vrot.slane %v472_v5, 1  ;;  %v2299_v5 = vld [vmem:[%s2787_s3 + $0xa0] sm:$0xff]  }
  0x24   : > { %2112 = vmatprep.subr.bf16.mxu0 %v2275_v29  ;;  %2127 = vmatpush3.bf16.msra.mxu1 %v2272_v2  ;;  %v1843_v48 = vcombine.low %v521_v41, %v522_v45  ;;  %v1856_v50 = vcombine.low %v522_v45, %v523_v30  ;;  %v1873_v2 = vcombine.low %v524_v33, %v2533_v63  ;;  %v2288_v30 = vld [vmem:[%s2787_s3 + $0xe0] sm:$0xff]   ;;  %v2290_v63 = vld [vmem:[%s2787_s3 + $0x58] sm:$0xff]   ;;  %v2292_v37 = vld [vmem:[%s2787_s3 + $0x50] sm:$0xff]   ;;  %v1246_v41 = vrot.slane %v465_v28, 1 }
  0x25   : > { %2104 = vmatprep.mubr.msk.bf16.mxu1 %vm587_vm3, %v1855_v46  ;;  %2128 = vmatprep.subr.bf16.mxu1 %v2276_v40  ;;  %v2291_v33 = vld [vmem:[%s2787_s3 + $0xb8] sm:$0xff]   ;;  %v1239_v22 = vor.u32 %v1238_v36, %v434_v39  ;;  %v1272_v28 = vsel %vm2663_vm6, %v1241_v24, 0  ;;  %v1273_v39 = vsel %vm2663_vm6, %v1243_v42, 0  ;;  %v1249_v14 = vor.u32 %v1248_v23, %v469_v3 }
  0x26   : > { %2088 = vmatprep.mubr.msk.bf16.mxu0 %vm587_vm3, %v1843_v48  ;;  %v1247_v17 = vor.u32 %v1246_v41, %v462_v27  ;;  %v1252_v45 = vrot.slane %v486_v47, 1  ;;  %v2301_v48 = vld [vmem:[%s2787_s3 + $0x110] sm:$0xff]  }
  0x27   : > { %2113 = vmatpush3.bf16.msra.mxu0 %v2275_v29  ;;  %2105 = vmatmul.mubr.msk.bf16.gmra.mxu1 %vm587_vm3, %v1856_v50  ;;  %v2287_v29 = vld [vmem:[%s2787_s3 + $0x80] sm:$0xff]   ;;  %v1276_v3 = vsel %vm2663_vm6, %v1249_v14, 0 }
  0x28   : > { %2114 = vmatprep.subr.bf16.mxu0 %v2277_v32  ;;  %2089 = vmatmul.mubr.msk.bf16.gmra.mxu0 %vm587_vm3, %v1844_v44  ;;  %v1275_v44 = vsel %vm2663_vm6, %v1247_v17, 0  ;;  %v1253_v47 = vor.u32 %v1252_v45, %v483_v43  ;;  %v2302_v43 = vld [vmem:[%s2787_s3 + $0x108] sm:$0xff]  }
  0x29   : > { %2129 = vmatpush3.bf16.msra.mxu1 %v2276_v40  ;;  %2116 = vmatprep.mubr.msk.bf16.mxu0 %vm587_vm3, %v1854_v61  ;;  %v1892_v61 = vcombine.low %v2421_v11, %v2510_v52  ;;  %v1912_v11 = vcombine.low %v2510_v52, %v2519_v57  ;;  %v1244_v40 = vrot.slane %v458_v26, 1  ;;  %v2683_v26 = vsel %vm2663_vm6, %v1239_v22, 0 }
  0x2a   : > { %2130 = vmatprep.subr.bf16.mxu1 %v2278_v51  ;;  %2132 = vmatprep.mubr.msk.bf16.mxu1 %vm587_vm3, %v1890_v53  ;;  %v1250_v57 = vrot.slane %v479_v10, 1  ;;  %v1947_v10 = vcombine.low %v2683_v26, %v1272_v28  ;;  %v1278_v20 = vsel %vm2663_vm6, %v1253_v47, 0 }
  0x2b   : > { %2115 = vmatpush3.bf16.msra.mxu0 %v2277_v32  ;;  %v1245_v15 = vor.u32 %v1244_v40, %v455_v25  ;;  %v1967_v32 = vcombine.low %v1272_v28, %v1273_v39  ;;  %v1254_v25 = vrot.slane %v493_v59, 1 }
  0x2c   : > { %2140 = vmatprep.subr.bf16.mxu0 %v2279_v35  ;;  %v1251_v16 = vor.u32 %v1250_v57, %v476_v6 }
  0x2d   : > { %2131 = vmatpush3.bf16.msra.mxu1 %v2278_v51  ;;  %v1274_v27 = vsel %vm2663_vm6, %v1245_v15, 0 }
  0x2e   : > { %2156 = vmatprep.subr.bf16.mxu1 %v2280_v49  ;;  %v1948_v59 = vcombine.low %v1273_v39, %v1274_v27  ;;  %v1968_v0 = vcombine.low %v1274_v27, %v1275_v44  ;;  %v1277_v6 = vsel %vm2663_vm6, %v1251_v16, 0 }
  0x2f   : > { %v1969_v51 = vcombine.low %v1276_v3, %v1277_v6 }
  0x30   : > { %2117 = vmatmul.mubr.msk.bf16.vlgmr.msra.gmra.mxu0 %vm587_vm3, %v1855_v46  ;;  %2133 = vmatmul.mubr.msk.bf16.vlgmr.msra.gmra.mxu1 %vm587_vm3, %v1891_v54  ;;  %v1255_v46 = vor.u32 %v1254_v25, %v490_v55  ;;  %v1950_v55 = vcombine.low %v1277_v6, %v1278_v20 }
  0x31   : > { %2141 = vmatpush3.bf16.msra.mxu0 %v2279_v35  ;;  %2157 = vmatpush3.bf16.msra.mxu1 %v2280_v49  ;;  %v2303_v35 = vld [vmem:[%s2787_s3 + $0x100] sm:$0xff]  }
  0x32   : > { %2142 = vmatprep.subr.bf16.mxu0 %v2281_v56  ;;  %2158 = vmatprep.subr.bf16.mxu1 %v2282_v58  ;;  %v1279_v38 = vsel %vm2663_vm6, %v1255_v46, 0 }
  0x33   : > { %2120 = vmatprep.mubr.msk.bf16.mxu0 %vm587_vm3, %v1856_v50  ;;  %2136 = vmatprep.mubr.msk.bf16.mxu1 %vm587_vm3, %v1892_v61  ;;  %v1949_v50 = vcombine.low %v1275_v44, %v1276_v3  ;;  %v1970_v53 = vcombine.low %v1278_v20, %v1279_v38  ;;  %v1987_v49 = vcombine.low %v1279_v38, %v2683_v26 }
  0x35   : > { %2143 = vmatpush3.bf16.msra.mxu0 %v2281_v56  ;;  %2159 = vmatpush3.bf16.msra.mxu1 %v2282_v58 }
  0x36   : > { %2144 = vmatprep.subr.bf16.mxu0 %v2285_v62  ;;  %2160 = vmatprep.subr.bf16.mxu1 %v2286_v1 }
  0x38   : > { %2121 = vmatmul.mubr.msk.bf16.gmra.mxu0 %vm587_vm3, %v1873_v2  ;;  %2137 = vmatmul.mubr.msk.bf16.gmra.mxu1 %vm587_vm3, %v1893_v4 }
  0x39   : > { %2145 = vmatpush3.bf16.msra.mxu0 %v2285_v62  ;;  %2161 = vmatpush3.bf16.msra.mxu1 %v2286_v1 }
  0x3a   : > { %2146 = vmatprep.subr.bf16.mxu0 %v2287_v29  ;;  %2162 = vmatprep.subr.bf16.mxu1 %v2288_v30 }
  0x3b   : > { %2148 = vmatprep.mubr.msk.bf16.mxu0 %vm587_vm3, %v1910_v31  ;;  %2164 = vmatprep.mubr.msk.bf16.mxu1 %vm587_vm3, %v1891_v54 }
  0x3d   : > { %2147 = vmatpush3.bf16.msra.mxu0 %v2287_v29  ;;  %2163 = vmatpush3.bf16.msra.mxu1 %v2288_v30 }
  0x3e   : > { %2172 = vmatprep.subr.bf16.mxu0 %v2290_v63  ;;  %2188 = vmatprep.subr.bf16.mxu1 %v2291_v33 }
  0x40   : > { %2149 = vmatmul.mubr.msk.bf16.vlgmr.msra.gmra.mxu0 %vm587_vm3, %v1911_v7  ;;  %2165 = vmatmul.mubr.msk.bf16.vlgmr.msra.gmra.mxu1 %vm587_vm3, %v1892_v61 }
  0x41   : > { %2173 = vmatpush3.bf16.msra.mxu0 %v2290_v63  ;;  %2189 = vmatpush3.bf16.msra.mxu1 %v2291_v33 }
  0x42   : > { %2174 = vmatprep.subr.bf16.mxu0 %v2292_v37  ;;  %2190 = vmatprep.subr.bf16.mxu1 %v2293_v9 }
  0x43   : > { %2152 = vmatprep.mubr.msk.bf16.mxu0 %vm587_vm3, %v1912_v11  ;;  %2168 = vmatprep.mubr.msk.bf16.mxu1 %vm587_vm3, %v1893_v4 }
  0x45   : > { %2175 = vmatpush3.bf16.msra.mxu0 %v2292_v37  ;;  %2191 = vmatpush3.bf16.msra.mxu1 %v2293_v9 }
  0x46   : > { %2176 = vmatprep.subr.bf16.mxu0 %v2296_v12  ;;  %2192 = vmatprep.subr.bf16.mxu1 %v2297_v13 }
  0x48   : > { %2153 = vmatmul.mubr.msk.bf16.gmra.mxu0 %vm587_vm3, %v1913_v19  ;;  %2169 = vmatmul.mubr.msk.bf16.gmra.mxu1 %vm587_vm3, %v1930_v21 }
  0x49   : > { %2177 = vmatpush3.bf16.msra.mxu0 %v2296_v12  ;;  %2193 = vmatpush3.bf16.msra.mxu1 %v2297_v13 }
  0x4a   : > { %2178 = vmatprep.subr.bf16.mxu0 %v2298_v18  ;;  %2194 = vmatprep.subr.bf16.mxu1 %v2299_v5 }
  0x4b   : > { %2180 = vmatprep.mubr.msk.bf16.mxu0 %vm587_vm3, %v1947_v10  ;;  %2196 = vmatprep.mubr.msk.bf16.mxu1 %vm587_vm3, %v1967_v32 }
  0x4d   : > { %2179 = vmatpush3.bf16.msra.mxu0 %v2298_v18  ;;  %2195 = vmatpush3.bf16.msra.mxu1 %v2299_v5 }
  0x4e   : > { %2204 = vmatprep.subr.bf16.mxu0 %v2300_v60  ;;  %2220 = vmatprep.subr.bf16.mxu1 %v2300_v60 }
  0x50   : > { %2181 = vmatmul.mubr.msk.bf16.vlgmr.msra.gmra.mxu0 %vm587_vm3, %v1948_v59  ;;  %2197 = vmatmul.mubr.msk.bf16.vlgmr.msra.gmra.mxu1 %vm587_vm3, %v1968_v0 }
  0x51   : > { %2205 = vmatpush3.bf16.msra.mxu0 %v2300_v60  ;;  %2224 = vmatpush3.bf16.msra.mxu1 %v2300_v60 }
  0x52   : > { %2206 = vmatprep.subr.bf16.mxu0 %v2301_v48  ;;  %2221 = vmatprep.subr.bf16.mxu1 %v2301_v48 }
  0x53   : > { %2184 = vmatprep.mubr.msk.bf16.mxu0 %vm587_vm3, %v1949_v50  ;;  %2200 = vmatprep.mubr.msk.bf16.mxu1 %vm587_vm3, %v1969_v51 }
  0x55   : > { %2207 = vmatpush3.bf16.msra.mxu0 %v2301_v48  ;;  %2225 = vmatpush3.bf16.msra.mxu1 %v2301_v48 }
  0x56   : > { %2208 = vmatprep.subr.bf16.mxu0 %v2302_v43  ;;  %2222 = vmatprep.subr.bf16.mxu1 %v2302_v43 }
  0x58   : > { %2185 = vmatmul.mubr.msk.bf16.gmra.mxu0 %vm587_vm3, %v1950_v55  ;;  %2201 = vmatmul.mubr.msk.bf16.gmra.mxu1 %vm587_vm3, %v1970_v53 }
  0x59   : > { %2209 = vmatpush3.bf16.msra.mxu0 %v2302_v43  ;;  %2226 = vmatpush3.bf16.msra.mxu1 %v2302_v43 }
  0x5a   : > { %2210 = vmatprep.subr.bf16.mxu0 %v2303_v35  ;;  %2223 = vmatprep.subr.bf16.mxu1 %v2303_v35 }
  0x5b   : > { %2212 = vmatprep.mubr.msk.bf16.mxu0 %vm587_vm3, %v1948_v59  ;;  %2216 = vmatprep.mubr.msk.bf16.mxu1 %vm587_vm3, %v1950_v55 }
  0x5d   : > { %2211 = vmatpush3.bf16.msra.mxu0 %v2303_v35  ;;  %2227 = vmatpush3.bf16.msra.mxu1 %v2303_v35 }
  0x60   : > { %2213 = vmatmul.mubr.msk.bf16.vlgmr.msra.gmra.mxu0 %vm587_vm3, %v1949_v50  ;;  %2217 = vmatmul.mubr.msk.bf16.vlgmr.msra.gmra.mxu1 %vm587_vm3, %v1987_v49 }
  0xde   : > { %v2086_v54 = vpop.f32.mrf.mxu0 }
  0xdf   : > { %v2102_v58 = vpop.f32.mrf.mxu1 }
  0xe0   : > { %v634_v56 = vpop.f32.mrf.mxu0  ;;  %v750_v45 = vadd.f32 %v2102_v58, %v2086_v54 }
  0xe1   : > { %v741_v62 = vpop.f32.mrf.mxu1 }
  0xe2   : > { %v2087_v61 = vpop.f32.mrf.mxu0  ;;  %v742_v3 = vadd.f32 %v741_v62, %v634_v56 }
  0xe3   : > { %v2103_v1 = vpop.f32.mrf.mxu1 }
  0xe4   : > { %v637_v2 = vpop.f32.mrf.mxu0  ;;  %v753_v38 = vadd.f32 %v2103_v1, %v2087_v61 }
  0xe5   : > { %v744_v4 = vpop.f32.mrf.mxu1 }
  0xe6   : > { %v745_v43 = vadd.f32 %v744_v4, %v637_v2 }
  0xe7   : > { %v2106_v30 = vpop.f32.mrf.mxu1 }
  0xe8   : > { %v2090_v29 = vpop.f32.mrf.mxu0 }
  0xe9   : > { %v757_v63 = vpop.f32.mrf.mxu1  ;;  %v766_v60 = vadd.f32 %v2106_v30, %v2090_v29 }
  0xea   : > { %v650_v31 = vpop.f32.mrf.mxu0 }
  0xeb   : > { %v2107_v7 = vpop.f32.mrf.mxu1  ;;  %v758_v6 = vadd.f32 %v757_v63, %v650_v31 }
  0xec   : > { %v2091_v33 = vpop.f32.mrf.mxu0 }
  0xed   : > { %v760_v34 = vpop.f32.mrf.mxu1  ;;  %v769_v55 = vadd.f32 %v2107_v7, %v2091_v33 }
  0xee   : > { %v653_v8 = vpop.f32.mrf.mxu0 }
  0xef   : > { %v761_v53 = vadd.f32 %v760_v34, %v653_v8 }
  0xf0   : > { %v2118_v36 = vpop.f32.mrf.mxu0  ;;  %v2134_v37 = vpop.f32.mrf.mxu1 }
  0xf1   : > { %v878_v47 = vadd.f32 %v2118_v36, %v750_v45 }
  0xf2   : > { %v845_v9 = vpop.f32.mrf.mxu0  ;;  %v967_v11 = vpop.f32.mrf.mxu1 }
  0xf3   : > { %v876_v51 = vadd.f32 %v845_v9, %v742_v3 }
  0xf4   : > { %v2119_v22 = vpop.f32.mrf.mxu0  ;;  %v2135_v24 = vpop.f32.mrf.mxu1 }
  0xf5   : > { %v879_v54 = vadd.f32 %v2119_v22, %v753_v38  ;;  %v998_v31 = vadd.f32 %v967_v11, %v876_v51 }
  0xf6   : > { %v848_v42 = vpop.f32.mrf.mxu0  ;;  %v970_v40 = vpop.f32.mrf.mxu1 }
  0xf7   : > { %v877_v58 = vadd.f32 %v848_v42, %v745_v43  ;;  %v1001_v2 = vadd.f32 %v2135_v24, %v879_v54 }
  0xf8   : > { %v2122_v41 = vpop.f32.mrf.mxu0  ;;  %v2138_v52 = vpop.f32.mrf.mxu1 }
  0xf9   : > { %v882_v46 = vadd.f32 %v2122_v41, %v766_v60  ;;  %v999_v4 = vadd.f32 %v970_v40, %v877_v58 }
  0xfa   : > { %v861_v12 = vpop.f32.mrf.mxu0  ;;  %v983_v13 = vpop.f32.mrf.mxu1 }
  0xfb   : > { %v880_v20 = vadd.f32 %v861_v12, %v758_v6 }
  0xfc   : > { %v2123_v19 = vpop.f32.mrf.mxu0  ;;  %v2139_v21 = vpop.f32.mrf.mxu1 }
  0xfd   : > { %v883_v29 = vadd.f32 %v2123_v19, %v769_v55  ;;  %v1002_v63 = vadd.f32 %v983_v13, %v880_v20 }
  0xfe   : > { %v864_v23 = vpop.f32.mrf.mxu0  ;;  %v986_v26 = vpop.f32.mrf.mxu1 }
  0xff   : > { %v881_v30 = vadd.f32 %v864_v23, %v761_v53  ;;  %v1005_v33 = vadd.f32 %v2139_v21, %v883_v29 }
 0x100   : > { %v2150_v28 = vpop.f32.mrf.mxu0  ;;  %v2166_v39 = vpop.f32.mrf.mxu1 }
 0x101   : > { %v1003_v7 = vadd.f32 %v986_v26, %v881_v30 }
 0x102   : > { %v1089_v57 = vpop.f32.mrf.mxu0  ;;  %v1199_v15 = vpop.f32.mrf.mxu1 }
 0x103   : > { %v1120_v61 = vadd.f32 %v1089_v57, %v998_v31 }
 0x104   : > { %v2151_v17 = vpop.f32.mrf.mxu0  ;;  %v2753_v18 = vpop.f32.mrf.mxu1 }
 0x105   : > { %2794 = vst [vmem:[#allocation2_spill] sm:$0xff] %v2753_v18  ;;  %v1004_v18 = vadd.f32 %v2138_v52, %v882_v46  ;;  %v1123_v42 = vadd.f32 %v2151_v17, %v1001_v2  ;;  %v1996_v46 = vld [vmem:[%s2788_s4] ss:$0 sm:$0xff] }
 0x106   : > { %v1092_v5 = vpop.f32.mrf.mxu0  ;;  %v2755_v10 = vpop.f32.mrf.mxu1 }
 0x107   : > { %2795 = vst [vmem:[#allocation3_spill] sm:$0xff] %v2755_v10  ;;  %v1000_v10 = vadd.f32 %v2134_v37, %v878_v47  ;;  %v1121_v52 = vadd.f32 %v1092_v5, %v999_v4 }
 0x108   : > { %v2154_v32 = vpop.f32.mrf.mxu0  ;;  %v2170_v14 = vpop.f32.mrf.mxu1 }
 0x109   : > { %v1122_v36 = vadd.f32 %v2150_v28, %v1000_v10  ;;  %v1126_v41 = vadd.f32 %v2154_v32, %v1004_v18  ;;  %v1230_v28 = vadd.f32 %v1199_v15, %v1120_v61 }
 0x10a   : > { %v1105_v16 = vpop.f32.mrf.mxu0  ;;  %v1215_v25 = vpop.f32.mrf.mxu1 }
 0x10b   : > { %v1124_v1 = vadd.f32 %v1105_v16, %v1002_v63  ;;  %v1232_v37 = vadd.f32 %v2166_v39, %v1122_v36  ;;  %v1236_v22 = vadd.f32 %v2170_v14, %v1126_v41 }
 0x10c   : > { %v2155_v27 = vpop.f32.mrf.mxu0  ;;  %v2171_v44 = vpop.f32.mrf.mxu1  ;;  %v2796_v21 = vld [vmem:[#allocation2_spill] sm:$0xff] }
 0x10d   : > { %v1127_v19 = vadd.f32 %v2155_v27, %v1005_v33  ;;  %v1234_v18 = vadd.f32 %v1215_v25, %v1124_v1  ;;  %v1233_v26 = vadd.f32 %v2796_v21, %v1123_v42 }
 0x10e   : > { %v1108_v59 = vpop.f32.mrf.mxu0  ;;  %v1218_v0 = vpop.f32.mrf.mxu1  ;;  %v2797_v45 = vld [vmem:[#allocation3_spill] sm:$0xff] }
 0x10f   : > { %v1125_v23 = vadd.f32 %v1108_v59, %v1003_v7  ;;  %v1231_v60 = vadd.f32 %v2797_v45, %v1121_v52  ;;  %v1237_v39 = vadd.f32 %v2171_v44, %v1127_v19 }
 0x110   : > { %v2182_v48 = vpop.f32.mrf.mxu0  ;;  %v2198_v50 = vpop.f32.mrf.mxu1 }
 0x111   : > { %v1413_v10 = vadd.f32 %v2182_v48, %v1232_v37  ;;  %v1235_v14 = vadd.f32 %v1218_v0, %v1125_v23 }
 0x112   : > { %v1380_v35 = vpop.f32.mrf.mxu0  ;;  %v1504_v49 = vpop.f32.mrf.mxu1 }
 0x113   : > { %v1411_v24 = vadd.f32 %v1380_v35, %v1230_v28  ;;  %v1537_v27 = vadd.f32 %v2198_v50, %v1413_v10 }
 0x114   : > { %v2183_v56 = vpop.f32.mrf.mxu0  ;;  %v2199_v62 = vpop.f32.mrf.mxu1 }
 0x115   : > { %v1414_v3 = vadd.f32 %v2183_v56, %v1233_v26  ;;  %v1535_v51 = vadd.f32 %v1504_v49, %v1411_v24 }
 0x116   : > { %v1383_v9 = vpop.f32.mrf.mxu0  ;;  %v1507_v12 = vpop.f32.mrf.mxu1 }
 0x117   : > { %v1412_v6 = vadd.f32 %v1383_v9, %v1231_v60  ;;  %v1538_v54 = vadd.f32 %v2199_v62, %v1414_v3 }
 0x118   : > { %v2186_v8 = vpop.f32.mrf.mxu0  ;;  %v2202_v34 = vpop.f32.mrf.mxu1 }
 0x119   : > { %v1417_v32 = vadd.f32 %v2186_v8, %v1236_v22  ;;  %v1536_v58 = vadd.f32 %v1507_v12, %v1412_v6 }
 0x11a   : > { %v1396_v11 = vpop.f32.mrf.mxu0  ;;  %v1520_v13 = vpop.f32.mrf.mxu1 }
 0x11b   : > { %v1415_v40 = vadd.f32 %v1396_v11, %v1234_v18  ;;  %v1541_v59 = vadd.f32 %v2202_v34, %v1417_v32 }
 0x11c   : > { %v2187_v57 = vpop.f32.mrf.mxu0  ;;  %v2203_v16 = vpop.f32.mrf.mxu1 }
 0x11d   : > { %v1418_v15 = vadd.f32 %v2187_v57, %v1237_v39  ;;  %v1539_v20 = vadd.f32 %v1520_v13, %v1415_v40 }
 0x11e   : > { %v1399_v17 = vpop.f32.mrf.mxu0  ;;  %v1523_v5 = vpop.f32.mrf.mxu1 }
 0x11f   : > { %v1416_v25 = vadd.f32 %v1399_v17, %v1235_v14  ;;  %v1542_v29 = vadd.f32 %v2203_v16, %v1418_v15 }
 0x120   : > { %v2214_v47 = vpop.f32.mrf.mxu0  ;;  %v2218_v48 = vpop.f32.mrf.mxu1 }
 0x121   : > { %v1649_v38 = vadd.f32 %v2214_v47, %v1537_v27  ;;  %v1653_v44 = vadd.f32 %v2218_v48, %v1541_v59  ;;  %v1540_v30 = vadd.f32 %v1523_v5, %v1416_v25 }
 0x122   : > { %v1616_v0 = vpop.f32.mrf.mxu0  ;;  %v1632_v43 = vpop.f32.mrf.mxu1 }
 0x123   : > { %v1664_v50 = vadd.f32 %v1996_v46, %v1649_v38  ;;  %v1668_v55 = vadd.f32 %v1996_v46, %v1653_v44  ;;  %v1647_v53 = vadd.f32 %v1616_v0, %v1535_v51  ;;  %v1651_v35 = vadd.f32 %v1632_v43, %v1539_v20 }
 0x124   : > { %v2215_v49 = vpop.f32.mrf.mxu0  ;;  %v2219_v56 = vpop.f32.mrf.mxu1 }
 0x125   : > { %v1672_v31 = vpack.c.bf16 %v1664_v50, %v1664_v50  ;;  %v1676_v63 = vpack.c.bf16 %v1668_v55, %v1668_v55  ;;  %v1662_v36 = vadd.f32 %v1996_v46, %v1647_v53  ;;  %v1666_v41 = vadd.f32 %v1996_v46, %v1651_v35 }
 0x126   : > { %v1650_v9 = vadd.f32 %v2215_v49, %v1538_v54  ;;  %v1654_v61 = vadd.f32 %v2219_v56, %v1542_v29  ;;  %v1619_v1 = vpop.f32.mrf.mxu0  ;;  %v1635_v2 = vpop.f32.mrf.mxu1 }
 0x127   : > { %1681 = vst.msk [vmem:[%s380_s9 + $0x8] sm:$0xf] %vm1678_vm7, %v1672_v31  ;;  %1685 = vst.msk [vmem:[%s380_s9 + $0x18] sm:$0xf] %vm1678_vm7, %v1676_v63  ;;  %v1670_v62 = vpack.c.bf16 %v1662_v36, %v1662_v36  ;;  %v1674_v12 = vpack.c.bf16 %v1666_v41, %v1666_v41  ;;  %v1648_v4 = vadd.f32 %v1619_v1, %v1536_v58 }
 0x128   : > { %v1652_v33 = vadd.f32 %v1635_v2, %v1540_v30  ;;  %v1665_v7 = vadd.f32 %v1996_v46, %v1650_v9  ;;  %v1669_v8 = vadd.f32 %v1996_v46, %v1654_v61 }
 0x129   : > { %1679 = vst.msk [vmem:[%s380_s9] sm:$0xf] %vm1678_vm7, %v1670_v62  ;;  %1683 = vst.msk [vmem:[%s380_s9 + $0x10] sm:$0xf] %vm1678_vm7, %v1674_v12  ;;  %v1663_v34 = vadd.f32 %v1996_v46, %v1648_v4 }
 0x12a   : > { %v1667_v37 = vadd.f32 %v1996_v46, %v1652_v33  ;;  %v1673_v22 = vpack.c.bf16 %v1665_v7, %v1665_v7  ;;  %v1677_v42 = vpack.c.bf16 %v1669_v8, %v1669_v8 }
 0x12b   : > { %v1671_v52 = vpack.c.bf16 %v1663_v34, %v1663_v34 }
 0x12c   : > { %v1675_v19 = vpack.c.bf16 %v1667_v37, %v1667_v37  ;;  %1682 = vst.msk [vmem:[%s380_s9 + $0xc] sm:$0xf] %vm1678_vm7, %v1673_v22  ;;  %1686 = vst.msk [vmem:[%s380_s9 + $0x1c] sm:$0xf] %vm1678_vm7, %v1677_v42 }
 0x12d   : > { %1680 = vst.msk [vmem:[%s380_s9 + $0x4] sm:$0xf] %vm1678_vm7, %v1671_v52 }
 0x12e   : > { %1684 = vst.msk [vmem:[%s380_s9 + $0x14] sm:$0xf] %vm1678_vm7, %v1675_v19 }
 0x12f PF: > { %s15_s0 = sadd.s32 1, %s2326_s0   ;;  %s2798_s18 = smov %s2322_s19 }
 0x130   : > { %p12_p5 = scmp.ge.s32.totalorder %s15_s0, 4   ;;  %s2799_s19 = smov %s2801_s2 }
 0x132   :  { %14 = sbr.rel (!%p12_p5) target bundleno = 2 (0x2), region = 84 }

// kernel: decoder_forward.86
= control target key start
LH: loop header
LB: loop body
LE: loop exit
PB: predicated region body
PF: predicated region fallthrough
CT: control target
= control target key end

     0   :  { %vm110_vm0 = vcmask 523264   ;;  %vm296_vm1 = vcmask 257024   ;;  %s557_s1 = inlined_call_operand.vmem [shape: bf16[64,32], index: 1, kind: input, shape index: {}]   ;;  %s558_s0 = inlined_call_operand.vmem [shape: bf16[128,64], index: 0, kind: input, shape index: {}]   ;;  %s559_s2 = inlined_call_operand.vmem [shape: f32[1,32], index: 2, kind: input, shape index: {}]   ;;  %s560_s3 = inlined_call_operand.vmem [shape: bf16[128,32], index: 3, kind: output, shape index: {}]  }
   0x1   :  { %v414_v0 = vld [vmem:[%s557_s1 + $0x18] sm:$0xff]   ;;  %v415_v1 = vld [vmem:[%s557_s1 + $0x10] sm:$0xff]   ;;  %v416_v2 = vld [vmem:[%s557_s1 + $0x8] sm:$0xff]  }
   0x2   :  { %382 = vmatprep.subr.bf16.mxu0 %v414_v0  ;;  %406 = vmatprep.subr.bf16.mxu1 %v414_v0  ;;  %v418_v3 = vld [vmem:[%s558_s0] sm:$0xff]   ;;  %v420_v6 = vld [vmem:[%s558_s0 + $0x8] sm:$0xff]   ;;  %v422_v8 = vld [vmem:[%s558_s0 + $0x10] sm:$0xff]  }
   0x3   :  { %383 = vmatpush3.bf16.msra.mxu0 %v414_v0  ;;  %410 = vmatpush3.bf16.msra.mxu1 %v414_v0  ;;  %v419_v4 = vld [vmem:[%s558_s0 + $0x20] sm:$0xff]   ;;  %v421_v7 = vld [vmem:[%s558_s0 + $0x28] sm:$0xff]   ;;  %v423_v9 = vld [vmem:[%s558_s0 + $0x30] sm:$0xff]  }
   0x4   :  { %384 = vmatprep.subr.bf16.mxu0 %v415_v1  ;;  %407 = vmatprep.subr.bf16.mxu1 %v415_v1  ;;  %v417_v5 = vld [vmem:[%s557_s1] sm:$0xff]   ;;  %v424_v10 = vld [vmem:[%s558_s0 + $0x18] sm:$0xff]  }
   0x5   :  { %390 = vmatprep.mubr.msk.bf16.mxu0 %vm110_vm0, %v418_v3  ;;  %398 = vmatprep.mubr.msk.bf16.mxu1 %vm110_vm0, %v419_v4  ;;  %v425_v11 = vld [vmem:[%s558_s0 + $0x38] sm:$0xff]   ;;  %v317_v12 = vld [vmem:[%s559_s2] ss:$0 sm:$0xff] }
   0x7   :  { %385 = vmatpush3.bf16.msra.mxu0 %v415_v1  ;;  %411 = vmatpush3.bf16.msra.mxu1 %v415_v1 }
   0x8   :  { %386 = vmatprep.subr.bf16.mxu0 %v416_v2  ;;  %408 = vmatprep.subr.bf16.mxu1 %v416_v2 }
   0xb   :  { %387 = vmatpush3.bf16.msra.mxu0 %v416_v2  ;;  %412 = vmatpush3.bf16.msra.mxu1 %v416_v2 }
   0xc   :  { %388 = vmatprep.subr.bf16.mxu0 %v417_v5  ;;  %409 = vmatprep.subr.bf16.mxu1 %v417_v5 }
   0xf   :  { %389 = vmatpush3.bf16.msra.mxu0 %v417_v5  ;;  %413 = vmatpush3.bf16.msra.mxu1 %v417_v5 }
  0x12   :  { %391 = vmatmul.mubr.msk.bf16.vlgmr.msra.gmra.mxu0 %vm110_vm0, %v420_v6  ;;  %399 = vmatmul.mubr.msk.bf16.vlgmr.msra.gmra.mxu1 %vm110_vm0, %v421_v7 }
  0x13   :  { %394 = vmatprep.mubr.msk.bf16.mxu0 %vm110_vm0, %v422_v8  ;;  %402 = vmatprep.mubr.msk.bf16.mxu1 %vm110_vm0, %v423_v9 }
  0x1a   :  { %395 = vmatmul.mubr.msk.bf16.gmra.mxu0 %vm110_vm0, %v424_v10  ;;  %403 = vmatmul.mubr.msk.bf16.gmra.mxu1 %vm110_vm0, %v425_v11 }
  0xd2   :  { %v392_v13 = vpop.f32.mrf.mxu0  ;;  %v400_v14 = vpop.f32.mrf.mxu1 }
  0xd3   :  { %v178_v15 = vadd.f32 %v392_v13, %v317_v12  ;;  %v210_v16 = vadd.f32 %v400_v14, %v317_v12 }
  0xd4   :  { %v169_v17 = vpop.f32.mrf.mxu0  ;;  %v201_v18 = vpop.f32.mrf.mxu1 }
  0xd5   :  { %v356_v19 = vpack.c.bf16 %v178_v15, %v178_v15  ;;  %v364_v20 = vpack.c.bf16 %v210_v16, %v210_v16  ;;  %v170_v21 = vadd.f32 %v317_v12, %v169_v17  ;;  %v202_v22 = vadd.f32 %v317_v12, %v201_v18 }
  0xd6   :  { %v393_v23 = vpop.f32.mrf.mxu0  ;;  %v401_v24 = vpop.f32.mrf.mxu1 }
  0xd7   :  { %299 = vst.msk [vmem:[%s560_s3 + $0x8] sm:$0xf] %vm296_vm1, %v356_v19  ;;  %307 = vst.msk [vmem:[%s560_s3 + $0x28] sm:$0xf] %vm296_vm1, %v364_v20  ;;  %v354_v25 = vpack.c.bf16 %v170_v21, %v170_v21  ;;  %v362_v26 = vpack.c.bf16 %v202_v22, %v202_v22  ;;  %v181_v27 = vadd.f32 %v393_v23, %v317_v12 }
  0xd8   :  { %v213_v28 = vadd.f32 %v401_v24, %v317_v12  ;;  %v172_v29 = vpop.f32.mrf.mxu0  ;;  %v204_v30 = vpop.f32.mrf.mxu1 }
  0xd9   :  { %297 = vst.msk [vmem:[%s560_s3] sm:$0xf] %vm296_vm1, %v354_v25  ;;  %305 = vst.msk [vmem:[%s560_s3 + $0x20] sm:$0xf] %vm296_vm1, %v362_v26  ;;  %v357_v31 = vpack.c.bf16 %v181_v27, %v181_v27  ;;  %v173_v33 = vadd.f32 %v317_v12, %v172_v29  ;;  %v205_v34 = vadd.f32 %v317_v12, %v204_v30 }
  0xda   :  { %v365_v32 = vpack.c.bf16 %v213_v28, %v213_v28  ;;  %v396_v35 = vpop.f32.mrf.mxu0  ;;  %v404_v36 = vpop.f32.mrf.mxu1 }
  0xdb   :  { %300 = vst.msk [vmem:[%s560_s3 + $0xc] sm:$0xf] %vm296_vm1, %v357_v31  ;;  %v355_v37 = vpack.c.bf16 %v173_v33, %v173_v33  ;;  %v363_v38 = vpack.c.bf16 %v205_v34, %v205_v34  ;;  %v194_v39 = vadd.f32 %v396_v35, %v317_v12  ;;  %v226_v40 = vadd.f32 %v404_v36, %v317_v12 }
  0xdc   :  { %308 = vst.msk [vmem:[%s560_s3 + $0x2c] sm:$0xf] %vm296_vm1, %v365_v32  ;;  %v185_v41 = vpop.f32.mrf.mxu0  ;;  %v217_v42 = vpop.f32.mrf.mxu1 }
  0xdd   :  { %298 = vst.msk [vmem:[%s560_s3 + $0x4] sm:$0xf] %vm296_vm1, %v355_v37  ;;  %306 = vst.msk [vmem:[%s560_s3 + $0x24] sm:$0xf] %vm296_vm1, %v363_v38  ;;  %v360_v43 = vpack.c.bf16 %v194_v39, %v194_v39  ;;  %v368_v44 = vpack.c.bf16 %v226_v40, %v226_v40  ;;  %v186_v45 = vadd.f32 %v317_v12, %v185_v41 }
  0xde   :  { %v218_v46 = vadd.f32 %v317_v12, %v217_v42  ;;  %v397_v47 = vpop.f32.mrf.mxu0  ;;  %v405_v48 = vpop.f32.mrf.mxu1 }
  0xdf   :  { %303 = vst.msk [vmem:[%s560_s3 + $0x18] sm:$0xf] %vm296_vm1, %v360_v43  ;;  %311 = vst.msk [vmem:[%s560_s3 + $0x38] sm:$0xf] %vm296_vm1, %v368_v44  ;;  %v358_v49 = vpack.c.bf16 %v186_v45, %v186_v45  ;;  %v197_v51 = vadd.f32 %v397_v47, %v317_v12  ;;  %v229_v52 = vadd.f32 %v405_v48, %v317_v12 }
  0xe0   :  { %v366_v50 = vpack.c.bf16 %v218_v46, %v218_v46  ;;  %v188_v53 = vpop.f32.mrf.mxu0  ;;  %v220_v54 = vpop.f32.mrf.mxu1 }
  0xe1   :  { %301 = vst.msk [vmem:[%s560_s3 + $0x10] sm:$0xf] %vm296_vm1, %v358_v49  ;;  %v361_v55 = vpack.c.bf16 %v197_v51, %v197_v51  ;;  %v369_v56 = vpack.c.bf16 %v229_v52, %v229_v52  ;;  %v189_v57 = vadd.f32 %v317_v12, %v188_v53  ;;  %v221_v58 = vadd.f32 %v317_v12, %v220_v54 }
  0xe2   :  { %309 = vst.msk [vmem:[%s560_s3 + $0x30] sm:$0xf] %vm296_vm1, %v366_v50 }
  0xe3   :  { %304 = vst.msk [vmem:[%s560_s3 + $0x1c] sm:$0xf] %vm296_vm1, %v361_v55  ;;  %312 = vst.msk [vmem:[%s560_s3 + $0x3c] sm:$0xf] %vm296_vm1, %v369_v56  ;;  %v359_v59 = vpack.c.bf16 %v189_v57, %v189_v57  ;;  %v367_v60 = vpack.c.bf16 %v221_v58, %v221_v58 }
  0xe5   :  { %302 = vst.msk [vmem:[%s560_s3 + $0x14] sm:$0xf] %vm296_vm1, %v359_v59  ;;  %310 = vst.msk [vmem:[%s560_s3 + $0x34] sm:$0xf] %vm296_vm1, %v367_v60 }

// kernel: decoder_forward.82
= control target key start
LH: loop header
LB: loop body
LE: loop exit
PB: predicated region body
PF: predicated region fallthrough
CT: control target
= control target key end

     0   :  { %s2251_s12 = smov 0   ;;  %s2605_s0 = inlined_call_operand.vmem [shape: bf16[2,4,4,64], index: 0, kind: input, shape index: {}]   ;;  %s2606_s1 = inlined_call_operand.vmem [shape: bf16[9,64,64], index: 1, kind: input, shape index: {}]   ;;  %s2607_s2 = inlined_call_operand.vmem [shape: f32[1,64], index: 2, kind: input, shape index: {}]   ;;  %s2608_s3 = inlined_call_operand.vmem [shape: bf16[2,8,8,64], index: 3, kind: output, shape index: {}]  }
   0x1 LB: > { %s1762_s13 = sadd.s32 4294967295, %s2227_s12   ;;  %p1766_p0 = scmp.ge.s32.totalorder %s2227_s12, 1  ;;  %s2227_s12 = sphi %s2251_s12, %s13_s12  }
   0x2   : > { %p137_p1 = scmp.lt.s32.totalorder %s2227_s12, 3 }
   0x4   : > { %p138_p2 = pnand %p1766_p0, %p137_p1 }
   0x6   : > { %141 = sbr.rel (%p138_p2) target bundleno = 327 (0x147), region = 32 }
   0xb   : > { %v2185_v0 = vld [vmem:[%s2606_s1 + $0x78] sm:$0xff]   ;;  %p161_p3 = scmp.lt.s32.totalorder %s1762_s13, 1  ;;  %v244_v1 = vlaneseq  ;;  %v2187_v3 = vld [vmem:[%s2606_s1 + $0x70] sm:$0xff]   ;;  %v2189_v6 = vld [vmem:[%s2606_s1 + $0x68] sm:$0xff]   ;;  %v2229_v19 = vmov 1966171168  }
   0xc   : > { %v2186_v2 = vld [vmem:[%s2606_s1 + $0x18] sm:$0xff]   ;;  %2023 = vmatprep.subr.bf16.mxu0 %v2185_v0  ;;  %v2188_v4 = vld [vmem:[%s2606_s1 + $0x10] sm:$0xff]   ;;  %v2190_v7 = vld [vmem:[%s2606_s1 + $0x8] sm:$0xff]   ;;  %v439_v20 = vunpack.c.l.s4 %v2229_v19  ;;  %vm572_vm0 = vcmask 1040384   ;;  %vm573_vm1 = vsmask.f32 256 }
   0xd   : > { %s2618_s13 = smov (!%p161_p3, %s1762_s13), 1  ;;  %2039 = vmatprep.subr.bf16.mxu1 %v2186_v2  ;;  %2024 = vmatpush3.bf16.msra.mxu0 %v2185_v0  ;;  %v2273_v5 = vshrl.u32 %v244_v1, 7  ;;  %v2191_v8 = vld [vmem:[%s2606_s1 + $0x60] sm:$0xff]   ;;  %v2303_v29 = vld [vmem:[%s2606_s1 + $0xd8] sm:$0xff]   ;;  %vm2354_vm2 = vmand %vm572_vm0, %vm573_vm1  ;;  %vm633_vm3 = vcmask 523264   ;;  %vm1303_vm4 = vcmask 1043456  }
   0xe   : > { %2040 = vmatpush3.bf16.msra.mxu1 %v2186_v2  ;;  %2025 = vmatprep.subr.bf16.mxu0 %v2187_v3  ;;  %s1949_s24 = sshll.u32 %s2618_s13, 3  ;;  %v2192_v10 = vld [vmem:[%s2606_s1] sm:$0xff]   ;;  %v2310_v34 = vld [vmem:[%s2606_s1 + $0x38] sm:$0xff]   ;;  %v440_v51 = vunpack.c.0.s8 %v439_v20  ;;  %v2230_v20 = vmov 0   ;;  %vm1304_vm5 = vsmask.f32 3328 }
   0xf   : > { %2041 = vmatprep.subr.bf16.mxu1 %v2188_v4  ;;  %s2285_s29 = scalar_lea.vmem %s2605_s0, %s1949_s24  ;;  %v2291_v9 = vsub.s32 0, %v2273_v5  ;;  %vm2509_vm6 = vmand %vm1303_vm4, %vm1304_vm5  ;;  %s1950_s17 = sshll.u32 %s2618_s13, 5  ;;  %vm1698_vm7 = vcmask 519168  }
  0x10   : > { %v1771_v11 = vld.sshfl [vmem:[%s2285_s29] sm:$0x11 pattern:$0x75316420]  ;;  %v2327_v58 = vsub.s32 %v440_v51, %v2273_v5  ;;  %s170_s20 = scalar_lea.vmem %s2608_s3, %s1950_s17 }
  0x11   : > { %2026 = vmatpush3.bf16.msra.mxu0 %v2187_v3  ;;  %v1772_v12 = vld.sshfl [vmem:[%s2285_s29 + $0x2] sm:$0x11 pattern:$0x75316420]  ;;  %v187_v13 = vcombine.high %v1771_v11, %v1771_v11  ;;  %v213_v14 = vunpack.i.h.s16 %v1771_v11  ;;  %v1775_v15 = vpack.i.b16 %v1771_v11, %v1771_v11 }
  0x12   : > { %2042 = vmatpush3.bf16.msra.mxu1 %v2188_v4  ;;  %2027 = vmatprep.subr.bf16.mxu0 %v2189_v6  ;;  %v195_v16 = vcombine.high %v1772_v12, %v1772_v12  ;;  %v217_v17 = vunpack.i.h.s16 %v1772_v12  ;;  %v1777_v18 = vpack.i.b16 %v1772_v12, %v1772_v12  ;;  %v1774_v43 = vld.sshfl [vmem:[%s2285_s29 + $0x6] sm:$0x11 pattern:$0x75316420] }
  0x13   : > { %2043 = vmatprep.subr.bf16.mxu1 %v2190_v7  ;;  %v215_v21 = vunpack.i.h.s16 %v187_v13  ;;  %v229_v22 = vpack.i.b16 %v213_v14, %v213_v14  ;;  %v1776_v23 = vpack.i.b16 %v187_v13, %v187_v13  ;;  %v247_v24 = vrot.slane %v1775_v15, %v2291_v9  ;;  %v1773_v60 = vld.sshfl [vmem:[%s2285_s29 + $0x4] sm:$0x11 pattern:$0x75316420] }
  0x14   : > { %v219_v25 = vunpack.i.h.s16 %v195_v16  ;;  %v233_v26 = vpack.i.b16 %v217_v17, %v217_v17  ;;  %v1778_v27 = vpack.i.b16 %v195_v16, %v195_v16  ;;  %v263_v28 = vrot.slane %v1777_v18, %v2291_v9 }
  0x15   : > { %2028 = vmatpush3.bf16.msra.mxu0 %v2189_v6  ;;  %v231_v30 = vpack.i.b16 %v215_v21, %v215_v21  ;;  %v251_v31 = vrot.slane %v229_v22, %v2291_v9  ;;  %v255_v32 = vrot.slane %v1776_v23, %v2291_v9  ;;  %v309_v33 = vpack.i.b16 %v247_v24, %v247_v24 }
  0x16   : > { %2044 = vmatpush3.bf16.msra.mxu1 %v2190_v7  ;;  %2029 = vmatprep.subr.bf16.mxu0 %v2191_v8  ;;  %v235_v35 = vpack.i.b16 %v219_v25, %v219_v25  ;;  %v267_v36 = vrot.slane %v233_v26, %v2291_v9  ;;  %v271_v37 = vrot.slane %v1778_v27, %v2291_v9  ;;  %v225_v59 = vunpack.i.h.s16 %v1774_v43 }
  0x17   : > { %2045 = vmatprep.subr.bf16.mxu1 %v2192_v10  ;;  %v337_v38 = vpack.i.b16 %v263_v28, %v263_v28  ;;  %v259_v39 = vrot.slane %v231_v30, %v2291_v9  ;;  %v314_v40 = vrot.slane %v309_v33, %v2291_v9  ;;  %v316_v41 = vpack.i.b16 %v251_v31, %v251_v31 }
  0x18   : > { %v323_v42 = vpack.i.b16 %v255_v32, %v255_v32  ;;  %v275_v44 = vrot.slane %v235_v35, %v2291_v9  ;;  %v344_v46 = vpack.i.b16 %v267_v36, %v267_v36  ;;  %v351_v47 = vpack.i.b16 %v271_v37, %v271_v37 }
  0x19   : > { %2030 = vmatpush3.bf16.msra.mxu0 %v2191_v8  ;;  %v342_v45 = vrot.slane %v337_v38, %v2291_v9  ;;  %v321_v48 = vrot.slane %v316_v41, %v2291_v9  ;;  %v330_v50 = vpack.i.b16 %v259_v39, %v259_v39  ;;  %v211_v55 = vcombine.high %v1774_v43, %v1774_v43 }
  0x1a   : > { %2046 = vmatpush3.bf16.msra.mxu1 %v2192_v10  ;;  %v328_v49 = vrot.slane %v323_v42, %v2291_v9  ;;  %2055 = vmatprep.subr.bf16.mxu0 %v2303_v29  ;;  %v349_v52 = vrot.slane %v344_v46, %v2291_v9  ;;  %v356_v53 = vrot.slane %v351_v47, %v2291_v9  ;;  %v535_v21 = vrot.slane %v2230_v20, 7 }
  0x1b   : > { %2071 = vmatprep.subr.bf16.mxu1 %v2310_v34  ;;  %v358_v54 = vpack.i.b16 %v275_v44, %v275_v44  ;;  %v335_v56 = vrot.slane %v330_v50, %v2291_v9  ;;  %v436_v57 = vcombine.low %v314_v40, %v321_v48  ;;  %v227_v63 = vunpack.i.h.s16 %v211_v55 }
  0x1c   : > { %v460_v62 = vcombine.low %v342_v45, %v349_v52  ;;  %v1781_v0 = vpack.i.b16 %v1774_v43, %v1774_v43  ;;  %v241_v3 = vpack.i.b16 %v225_v59, %v225_v59  ;;  %v1782_v4 = vpack.i.b16 %v211_v55, %v211_v55 }
  0x1d   : > { %v363_v61 = vrot.slane %v358_v54, %v2291_v9  ;;  %v437_v1 = vcombine.low %v328_v49, %v335_v56  ;;  %v444_v2 = vrot.slane %v436_v57, %v2327_v58  ;;  %v243_v8 = vpack.i.b16 %v227_v63, %v227_v63 }
  0x1e   : > { %v468_v7 = vrot.slane %v460_v62, %v2327_v58  ;;  %v295_v10 = vrot.slane %v1781_v0, %v2291_v9  ;;  %v299_v11 = vrot.slane %v241_v3, %v2291_v9  ;;  %v303_v12 = vrot.slane %v1782_v4, %v2291_v9  ;;  %v2195_v4 = vld [vmem:[%s2606_s1 + $0xd0] sm:$0xff]  }
  0x1f   : > { %v461_v6 = vcombine.low %v356_v53, %v363_v61  ;;  %v451_v5 = vrot.slane %v437_v1, %v2327_v58  ;;  %v307_v14 = vrot.slane %v243_v8, %v2291_v9  ;;  %v203_v16 = vcombine.high %v1773_v60, %v1773_v60  ;;  %v2196_v8 = vld [vmem:[%s2606_s1 + $0x30] sm:$0xff]  }
  0x20   : > { %v393_v15 = vpack.i.b16 %v295_v10, %v295_v10  ;;  %v400_v18 = vpack.i.b16 %v299_v11, %v299_v11  ;;  %v407_v19 = vpack.i.b16 %v303_v12, %v303_v12  ;;  %v221_v25 = vunpack.i.h.s16 %v1773_v60 }
  0x21   : > { %v475_v13 = vrot.slane %v461_v6, %v2327_v58  ;;  %v452_v17 = vcombine.low %v444_v2, %v451_v5  ;;  %v414_v24 = vpack.i.b16 %v307_v14, %v307_v14  ;;  %v223_v30 = vunpack.i.h.s16 %v203_v16 }
  0x22   : > { %v398_v23 = vrot.slane %v393_v15, %v2291_v9  ;;  %v405_v27 = vrot.slane %v400_v18, %v2291_v9  ;;  %v412_v28 = vrot.slane %v407_v19, %v2291_v9  ;;  %v1779_v33 = vpack.i.b16 %v1773_v60, %v1773_v60  ;;  %v2199_v19 = vld [vmem:[%s2606_s1 + $0xc0] sm:$0xff]  }
  0x23   : > { %v476_v22 = vcombine.low %v468_v7, %v475_v13  ;;  %v2342_v26 = vrot.slane %v452_v17, %v2327_v58  ;;  %v419_v32 = vrot.slane %v414_v24, %v2291_v9  ;;  %v237_v35 = vpack.i.b16 %v221_v25, %v221_v25 }
  0x24   : > { %v508_v39 = vcombine.low %v398_v23, %v405_v27  ;;  %v1780_v40 = vpack.i.b16 %v203_v16, %v203_v16  ;;  %v239_v44 = vpack.i.b16 %v223_v30, %v223_v30  ;;  %v279_v47 = vrot.slane %v1779_v33, %v2291_v9  ;;  %v2198_v16 = vld [vmem:[%s2606_s1 + $0x28] sm:$0xff]   ;;  %v2201_v27 = vld [vmem:[%s2606_s1 + $0x98] sm:$0xff]  }
  0x25   : > { %v2347_v31 = vrot.slane %v476_v22, %v2327_v58  ;;  %v540_v36 = vshrl.u32 %v2342_v26, 16  ;;  %v543_v37 = vshll.u32 %v2342_v26, 16  ;;  %v509_v43 = vcombine.low %v412_v28, %v419_v32 }
  0x26   : > { %v516_v46 = vrot.slane %v508_v39, %v2327_v58  ;;  %v2369_v50 = vsel %vm2354_vm2, 0, %v535_v21  ;;  %v283_v51 = vrot.slane %v237_v35, %v2291_v9  ;;  %v287_v53 = vrot.slane %v1780_v40, %v2291_v9  ;;  %v2200_v21 = vld [vmem:[%s2606_s1 + $0x20] sm:$0xff]  }
  0x27   : > { %v547_v41 = vshrl.u32 %v2347_v31, 16  ;;  %v550_v42 = vshll.u32 %v2347_v31, 16  ;;  %v542_v45 = vrot.slane %v540_v36, 7  ;;  %v523_v49 = vrot.slane %v509_v43, %v2327_v58 }
  0x28   : > { %v291_v54 = vrot.slane %v239_v44, %v2291_v9  ;;  %v365_v55 = vpack.i.b16 %v279_v47, %v279_v47  ;;  %v372_v59 = vpack.i.b16 %v283_v51, %v283_v51  ;;  %v379_v62 = vpack.i.b16 %v287_v53, %v287_v53  ;;  %v2207_v53 = vld [vmem:[%s2606_s1 + $0x80] sm:$0xff]  }
  0x29   : > { %v549_v48 = vrot.slane %v547_v41, 7  ;;  %v545_v52 = vor.u32 %v543_v37, %v542_v45  ;;  %v524_v57 = vcombine.low %v516_v46, %v523_v49  ;;  %v1840_v44 = vcombine.low %v2230_v20, %v2342_v26  ;;  %v2203_v45 = vld [vmem:[%s2606_s1 + $0x90] sm:$0xff]   ;;  %v2206_v49 = vld [vmem:[%s2606_s1 + $0xe8] sm:$0xff]  }
  0x2a   : > { %v370_v61 = vrot.slane %v365_v55, %v2291_v9  ;;  %v386_v63 = vpack.i.b16 %v291_v54, %v291_v54  ;;  %v377_v10 = vrot.slane %v372_v59, %v2291_v9  ;;  %v384_v5 = vrot.slane %v379_v62, %v2291_v9  ;;  %v2204_v46 = vld [vmem:[%s2606_s1 + $0xf0] sm:$0xff]   ;;  %v2208_v54 = vld [vmem:[%s2606_s1 + $0xe0] sm:$0xff]  }
  0x2b   : > { %v552_v56 = vor.u32 %v550_v42, %v549_v48  ;;  %v576_v60 = vsel %vm2354_vm2, 0, %v545_v52  ;;  %v2384_v2 = vrot.slane %v524_v57, %v2327_v58  ;;  %v1841_v38 = vcombine.low %v2342_v26, %v2347_v31  ;;  %v2205_v48 = vld [vmem:[%s2606_s1 + $0x88] sm:$0xff]  }
  0x2c   : > { %v1791_v1 = vcombine.low %v576_v60, %v576_v60  ;;  %v1803_v3 = vcombine.low %v2369_v50, %v576_v60  ;;  %v391_v11 = vrot.slane %v386_v63, %v2291_v9  ;;  %v484_v13 = vcombine.low %v370_v61, %v377_v10  ;;  %v2197_v9 = vld [vmem:[%s2606_s1 + $0xc8] sm:$0xff]   ;;  %v2212_v61 = vld [vmem:[%s2606_s1 + $0xb0] sm:$0xff]   ;;  %v2216_v10 = vld [vmem:[%s2606_s1 + $0xa0] sm:$0xff]  }
  0x2d   : > { %v577_v0 = vsel %vm2354_vm2, 0, %v552_v56  ;;  %v561_v12 = vshrl.u32 %v2384_v2, 16  ;;  %v1860_v55 = vcombine.low %v2342_v26, %v2342_v26  ;;  %v2210_v56 = vld [vmem:[%s2606_s1 + $0xb8] sm:$0xff]   ;;  %v1290_v57 = vrot.slane %v543_v37, 1  ;;  %v2214_v26 = vld [vmem:[%s2606_s1 + $0xa8] sm:$0xff]  }
  0x2e   : > { %v1804_v6 = vcombine.low %v576_v60, %v577_v0  ;;  %v1792_v7 = vcombine.low %v577_v0, %v577_v0  ;;  %2031 = vmatprep.mubr.msk.bf16.mxu0 %vm633_vm3, %v1791_v1  ;;  %2047 = vmatprep.mubr.msk.bf16.mxu1 %vm633_vm3, %v1803_v3  ;;  %v485_v14 = vcombine.low %v384_v5, %v391_v11  ;;  %v2211_v60 = vld [vmem:[%s2606_s1 + $0x50] sm:$0xff]   ;;  %v1288_v62 = vrot.slane %v2230_v20, 1  ;;  %v2213_v3 = vld [vmem:[%s2606_s1 + $0x48] sm:$0xff]  }
  0x2f   : > { %v492_v15 = vrot.slane %v484_v13, %v2327_v58  ;;  %v1861_v59 = vcombine.low %v2347_v31, %v2347_v31  ;;  %v1291_v63 = vor.u32 %v1290_v57, %v540_v36  ;;  %v1863_v36 = vcombine.low %v2384_v2, %v2384_v2 }
  0x30   : > { %2032 = vmatmul.mubr.msk.bf16.vlgmr.msra.gmra.mxu0 %vm633_vm3, %v1792_v7  ;;  %2048 = vmatmul.mubr.msk.bf16.vlgmr.msra.gmra.mxu1 %vm633_vm3, %v1804_v6  ;;  %v499_v17 = vrot.slane %v485_v14, %v2327_v58  ;;  %v2217_v14 = vld [vmem:[%s2606_s1 + $0x118] sm:$0xff]  }
  0x31   : > { %2056 = vmatpush3.bf16.msra.mxu0 %v2303_v29  ;;  %2072 = vmatpush3.bf16.msra.mxu1 %v2310_v34  ;;  %v563_v29 = vrot.slane %v561_v12, 7  ;;  %v564_v34 = vshll.u32 %v2384_v2, 16 }
  0x32   : > { %2057 = vmatprep.subr.bf16.mxu0 %v2195_v4  ;;  %2073 = vmatprep.subr.bf16.mxu1 %v2196_v8  ;;  %v500_v18 = vcombine.low %v492_v15, %v499_v17 }
  0x33   : > { %v566_v23 = vor.u32 %v564_v34, %v563_v29  ;;  %v2218_v29 = vld [vmem:[%s2606_s1 + $0x110] sm:$0xff]  }
  0x34   : > { %v2421_v22 = vrot.slane %v500_v18, %v2327_v58  ;;  %v2202_v58 = vld [vmem:[%s2606_s1 + $0xf8] sm:$0xff]  }
  0x35   : > { %2058 = vmatpush3.bf16.msra.mxu0 %v2195_v4  ;;  %2074 = vmatpush3.bf16.msra.mxu1 %v2196_v8  ;;  %v579_v30 = vsel %vm2354_vm2, 0, %v566_v23  ;;  %v2527_v4 = vsel %vm2509_vm6, %v1288_v62, 0 }
  0x36   : > { %2059 = vmatprep.subr.bf16.mxu0 %v2197_v9  ;;  %2075 = vmatprep.subr.bf16.mxu1 %v2198_v16  ;;  %v554_v24 = vshrl.u32 %v2421_v22, 16  ;;  %v557_v25 = vshll.u32 %v2421_v22, 16  ;;  %v1794_v35 = vcombine.low %v579_v30, %v579_v30  ;;  %v1842_v47 = vcombine.low %v2347_v31, %v2421_v22 }
  0x37   : > { %v1823_v51 = vcombine.low %v579_v30, %v2369_v50  ;;  %v1843_v52 = vcombine.low %v2421_v22, %v2384_v2  ;;  %v2209_v50 = vld [vmem:[%s2606_s1 + $0x58] sm:$0xff]   ;;  %v1862_v37 = vcombine.low %v2421_v22, %v2421_v22  ;;  %v2220_v22 = vld [vmem:[%s2606_s1 + $0x100] sm:$0xff]  }
  0x38   : > { %v556_v28 = vrot.slane %v554_v24, 7  ;;  %v1294_v7 = vrot.slane %v557_v25, 1 }
  0x39   : > { %2060 = vmatpush3.bf16.msra.mxu0 %v2197_v9  ;;  %2076 = vmatpush3.bf16.msra.mxu1 %v2198_v16 }
  0x3a   : > { %2061 = vmatprep.subr.bf16.mxu0 %v2199_v19  ;;  %2077 = vmatprep.subr.bf16.mxu1 %v2200_v21  ;;  %v559_v32 = vor.u32 %v557_v25, %v556_v28  ;;  %v1295_v31 = vor.u32 %v1294_v7, %v554_v24 }
  0x3c   : > { %v578_v33 = vsel %vm2354_vm2, 0, %v559_v32  ;;  %v1309_v16 = vsel %vm2509_vm6, %v1295_v31, 0 }
  0x3d   : > { %2062 = vmatpush3.bf16.msra.mxu0 %v2199_v19  ;;  %2078 = vmatpush3.bf16.msra.mxu1 %v2200_v21  ;;  %v1793_v39 = vcombine.low %v578_v33, %v578_v33  ;;  %v1805_v40 = vcombine.low %v577_v0, %v578_v33  ;;  %v1806_v43 = vcombine.low %v578_v33, %v579_v30  ;;  %v1292_v0 = vrot.slane %v550_v42, 1 }
  0x3e   : > { %2087 = vmatprep.subr.bf16.mxu0 %v2201_v27  ;;  %2103 = vmatprep.subr.bf16.mxu1 %v2202_v58  ;;  %v1880_v42 = vcombine.low %v2384_v2, %v2230_v20  ;;  %v2215_v20 = vld [vmem:[%s2606_s1 + $0x40] sm:$0xff]   ;;  %v1919_v18 = vcombine.low %v1309_v16, %v1309_v16  ;;  %v2219_v2 = vld [vmem:[%s2606_s1 + $0x108] sm:$0xff]  }
  0x3f   : > { %2035 = vmatprep.mubr.msk.bf16.mxu0 %vm633_vm3, %v1793_v39  ;;  %2051 = vmatprep.mubr.msk.bf16.mxu1 %vm633_vm3, %v1805_v40  ;;  %v1293_v8 = vor.u32 %v1292_v0, %v547_v41  ;;  %v1296_v41 = vrot.slane %v564_v34, 1 }
  0x40   : > { %2036 = vmatmul.mubr.msk.bf16.gmra.mxu0 %vm633_vm3, %v1794_v35  ;;  %2052 = vmatmul.mubr.msk.bf16.gmra.mxu1 %vm633_vm3, %v1806_v43 }
  0x41   : > { %2063 = vmatprep.mubr.msk.bf16.mxu0 %vm633_vm3, %v1804_v6  ;;  %2079 = vmatprep.mubr.msk.bf16.mxu1 %vm633_vm3, %v1840_v44  ;;  %v1307_v6 = vsel %vm2509_vm6, %v1291_v63, 0  ;;  %v1308_v13 = vsel %vm2509_vm6, %v1293_v8, 0  ;;  %v1297_v17 = vor.u32 %v1296_v41, %v561_v12 }
  0x42   : > { %v1897_v5 = vcombine.low %v2527_v4, %v1307_v6  ;;  %v1917_v11 = vcombine.low %v1307_v6, %v1307_v6  ;;  %v1898_v15 = vcombine.low %v1307_v6, %v1308_v13  ;;  %v1918_v9 = vcombine.low %v1308_v13, %v1308_v13 }
  0x43   : > { %v1899_v34 = vcombine.low %v1308_v13, %v1309_v16  ;;  %v1310_v19 = vsel %vm2509_vm6, %v1297_v17, 0 }
  0x44   : > { %v1900_v12 = vcombine.low %v1309_v16, %v1310_v19  ;;  %v1920_v21 = vcombine.low %v1310_v19, %v1310_v19  ;;  %v1937_v23 = vcombine.low %v1310_v19, %v2527_v4 }
  0x48   : > { %2064 = vmatmul.mubr.msk.bf16.vlgmr.msra.gmra.mxu0 %vm633_vm3, %v1805_v40  ;;  %2080 = vmatmul.mubr.msk.bf16.vlgmr.msra.gmra.mxu1 %vm633_vm3, %v1841_v38 }
  0x49   : > { %2088 = vmatpush3.bf16.msra.mxu0 %v2201_v27  ;;  %2104 = vmatpush3.bf16.msra.mxu1 %v2202_v58 }
  0x4a   : > { %2089 = vmatprep.subr.bf16.mxu0 %v2203_v45  ;;  %2105 = vmatprep.subr.bf16.mxu1 %v2204_v46 }
  0x4b   : > { %2067 = vmatprep.mubr.msk.bf16.mxu0 %vm633_vm3, %v1806_v43  ;;  %2083 = vmatprep.mubr.msk.bf16.mxu1 %vm633_vm3, %v1842_v47 }
  0x4d   : > { %2090 = vmatpush3.bf16.msra.mxu0 %v2203_v45  ;;  %2106 = vmatpush3.bf16.msra.mxu1 %v2204_v46 }
  0x4e   : > { %2091 = vmatprep.subr.bf16.mxu0 %v2205_v48  ;;  %2107 = vmatprep.subr.bf16.mxu1 %v2206_v49 }
  0x50   : > { %2068 = vmatmul.mubr.msk.bf16.gmra.mxu0 %vm633_vm3, %v1823_v51  ;;  %2084 = vmatmul.mubr.msk.bf16.gmra.mxu1 %vm633_vm3, %v1843_v52 }
  0x51   : > { %2092 = vmatpush3.bf16.msra.mxu0 %v2205_v48  ;;  %2108 = vmatpush3.bf16.msra.mxu1 %v2206_v49 }
  0x52   : > { %2093 = vmatprep.subr.bf16.mxu0 %v2207_v53  ;;  %2109 = vmatprep.subr.bf16.mxu1 %v2208_v54 }
  0x53   : > { %2095 = vmatprep.mubr.msk.bf16.mxu0 %vm633_vm3, %v1860_v55  ;;  %2111 = vmatprep.mubr.msk.bf16.mxu1 %vm633_vm3, %v1841_v38 }
  0x55   : > { %2094 = vmatpush3.bf16.msra.mxu0 %v2207_v53  ;;  %2110 = vmatpush3.bf16.msra.mxu1 %v2208_v54 }
  0x56   : > { %2119 = vmatprep.subr.bf16.mxu0 %v2209_v50  ;;  %2135 = vmatprep.subr.bf16.mxu1 %v2210_v56 }
  0x58   : > { %2096 = vmatmul.mubr.msk.bf16.vlgmr.msra.gmra.mxu0 %vm633_vm3, %v1861_v59  ;;  %2112 = vmatmul.mubr.msk.bf16.vlgmr.msra.gmra.mxu1 %vm633_vm3, %v1842_v47 }
  0x59   : > { %2120 = vmatpush3.bf16.msra.mxu0 %v2209_v50  ;;  %2136 = vmatpush3.bf16.msra.mxu1 %v2210_v56 }
  0x5a   : > { %2121 = vmatprep.subr.bf16.mxu0 %v2211_v60  ;;  %2137 = vmatprep.subr.bf16.mxu1 %v2212_v61 }
  0x5b   : > { %2099 = vmatprep.mubr.msk.bf16.mxu0 %vm633_vm3, %v1862_v37  ;;  %2115 = vmatprep.mubr.msk.bf16.mxu1 %vm633_vm3, %v1843_v52 }
  0x5d   : > { %2122 = vmatpush3.bf16.msra.mxu0 %v2211_v60  ;;  %2138 = vmatpush3.bf16.msra.mxu1 %v2212_v61 }
  0x5e   : > { %2123 = vmatprep.subr.bf16.mxu0 %v2213_v3  ;;  %2139 = vmatprep.subr.bf16.mxu1 %v2214_v26 }
  0x60   : > { %2100 = vmatmul.mubr.msk.bf16.gmra.mxu0 %vm633_vm3, %v1863_v36  ;;  %2116 = vmatmul.mubr.msk.bf16.gmra.mxu1 %vm633_vm3, %v1880_v42 }
  0x61   : > { %2124 = vmatpush3.bf16.msra.mxu0 %v2213_v3  ;;  %2140 = vmatpush3.bf16.msra.mxu1 %v2214_v26 }
  0x62   : > { %2125 = vmatprep.subr.bf16.mxu0 %v2215_v20  ;;  %2141 = vmatprep.subr.bf16.mxu1 %v2216_v10 }
  0x63   : > { %2127 = vmatprep.mubr.msk.bf16.mxu0 %vm633_vm3, %v1897_v5  ;;  %2143 = vmatprep.mubr.msk.bf16.mxu1 %vm633_vm3, %v1917_v11 }
  0x65   : > { %2126 = vmatpush3.bf16.msra.mxu0 %v2215_v20  ;;  %2142 = vmatpush3.bf16.msra.mxu1 %v2216_v10 }
  0x66   : > { %2151 = vmatprep.subr.bf16.mxu0 %v2217_v14  ;;  %2167 = vmatprep.subr.bf16.mxu1 %v2217_v14 }
  0x68   : > { %2128 = vmatmul.mubr.msk.bf16.vlgmr.msra.gmra.mxu0 %vm633_vm3, %v1898_v15  ;;  %2144 = vmatmul.mubr.msk.bf16.vlgmr.msra.gmra.mxu1 %vm633_vm3, %v1918_v9 }
  0x69   : > { %2152 = vmatpush3.bf16.msra.mxu0 %v2217_v14  ;;  %2171 = vmatpush3.bf16.msra.mxu1 %v2217_v14 }
  0x6a   : > { %2153 = vmatprep.subr.bf16.mxu0 %v2218_v29  ;;  %2168 = vmatprep.subr.bf16.mxu1 %v2218_v29 }
  0x6b   : > { %2131 = vmatprep.mubr.msk.bf16.mxu0 %vm633_vm3, %v1899_v34  ;;  %2147 = vmatprep.mubr.msk.bf16.mxu1 %vm633_vm3, %v1919_v18 }
  0x6d   : > { %2154 = vmatpush3.bf16.msra.mxu0 %v2218_v29  ;;  %2172 = vmatpush3.bf16.msra.mxu1 %v2218_v29 }
  0x6e   : > { %2155 = vmatprep.subr.bf16.mxu0 %v2219_v2  ;;  %2169 = vmatprep.subr.bf16.mxu1 %v2219_v2 }
  0x70   : > { %2132 = vmatmul.mubr.msk.bf16.gmra.mxu0 %vm633_vm3, %v1900_v12  ;;  %2148 = vmatmul.mubr.msk.bf16.gmra.mxu1 %vm633_vm3, %v1920_v21 }
  0x71   : > { %2156 = vmatpush3.bf16.msra.mxu0 %v2219_v2  ;;  %2173 = vmatpush3.bf16.msra.mxu1 %v2219_v2 }
  0x72   : > { %2157 = vmatprep.subr.bf16.mxu0 %v2220_v22  ;;  %2170 = vmatprep.subr.bf16.mxu1 %v2220_v22 }
  0x73   : > { %2159 = vmatprep.mubr.msk.bf16.mxu0 %vm633_vm3, %v1898_v15  ;;  %2163 = vmatprep.mubr.msk.bf16.mxu1 %vm633_vm3, %v1900_v12 }
  0x75   : > { %2158 = vmatpush3.bf16.msra.mxu0 %v2220_v22  ;;  %2174 = vmatpush3.bf16.msra.mxu1 %v2220_v22 }
  0x78   : > { %2160 = vmatmul.mubr.msk.bf16.vlgmr.msra.gmra.mxu0 %vm633_vm3, %v1899_v34  ;;  %2164 = vmatmul.mubr.msk.bf16.vlgmr.msra.gmra.mxu1 %vm633_vm3, %v1937_v23 }
  0xf0   : > { %v2033_v24 = vpop.f32.mrf.mxu0  ;;  %v2049_v25 = vpop.f32.mrf.mxu1 }
  0xf1   : > { %v796_v11 = vadd.f32 %v2049_v25, %v2033_v24 }
  0xf2   : > { %v680_v27 = vpop.f32.mrf.mxu0  ;;  %v787_v58 = vpop.f32.mrf.mxu1 }
  0xf3   : > { %v788_v14 = vadd.f32 %v787_v58, %v680_v27 }
  0xf4   : > { %v2034_v28 = vpop.f32.mrf.mxu0  ;;  %v2050_v30 = vpop.f32.mrf.mxu1 }
  0xf5   : > { %v799_v19 = vadd.f32 %v2050_v30, %v2034_v28 }
  0xf6   : > { %v683_v32 = vpop.f32.mrf.mxu0  ;;  %v790_v33 = vpop.f32.mrf.mxu1 }
  0xf7   : > { %v791_v2 = vadd.f32 %v790_v33, %v683_v32 }
 0x100   : > { %v2037_v35 = vpop.f32.mrf.mxu0  ;;  %v2053_v39 = vpop.f32.mrf.mxu1 }
 0x101   : > { %v812_v31 = vadd.f32 %v2053_v39, %v2037_v35 }
 0x102   : > { %v696_v40 = vpop.f32.mrf.mxu0  ;;  %v803_v43 = vpop.f32.mrf.mxu1 }
 0x103   : > { %v804_v15 = vadd.f32 %v803_v43, %v696_v40 }
 0x104   : > { %v2038_v44 = vpop.f32.mrf.mxu0  ;;  %v2054_v38 = vpop.f32.mrf.mxu1 }
 0x105   : > { %v815_v12 = vadd.f32 %v2054_v38, %v2038_v44 }
 0x106   : > { %v699_v45 = vpop.f32.mrf.mxu0  ;;  %v806_v46 = vpop.f32.mrf.mxu1 }
 0x107   : > { %v807_v21 = vadd.f32 %v806_v46, %v699_v45 }
 0x108   : > { %v2065_v47 = vpop.f32.mrf.mxu0  ;;  %v2081_v48 = vpop.f32.mrf.mxu1 }
 0x109   : > { %v922_v9 = vadd.f32 %v2065_v47, %v796_v11 }
 0x10a   : > { %v889_v49 = vpop.f32.mrf.mxu0  ;;  %v1017_v51 = vpop.f32.mrf.mxu1 }
 0x10b   : > { %v920_v34 = vadd.f32 %v889_v49, %v788_v14 }
 0x10c   : > { %v2066_v52 = vpop.f32.mrf.mxu0  ;;  %v2082_v53 = vpop.f32.mrf.mxu1 }
 0x10d   : > { %v923_v24 = vadd.f32 %v2066_v52, %v799_v19  ;;  %v1048_v40 = vadd.f32 %v1017_v51, %v920_v34 }
 0x10e   : > { %v892_v54 = vpop.f32.mrf.mxu0  ;;  %v1020_v55 = vpop.f32.mrf.mxu1 }
 0x10f   : > { %v921_v25 = vadd.f32 %v892_v54, %v791_v2  ;;  %v1051_v32 = vadd.f32 %v2082_v53, %v923_v24 }
 0x110   : > { %v2069_v50 = vpop.f32.mrf.mxu0  ;;  %v2085_v56 = vpop.f32.mrf.mxu1 }
 0x111   : > { %v926_v16 = vadd.f32 %v2069_v50, %v812_v31  ;;  %v1049_v33 = vadd.f32 %v1020_v55, %v921_v25 }
 0x112   : > { %v905_v57 = vpop.f32.mrf.mxu0  ;;  %v1033_v59 = vpop.f32.mrf.mxu1 }
 0x113   : > { %v924_v18 = vadd.f32 %v905_v57, %v804_v15 }
 0x114   : > { %v2070_v60 = vpop.f32.mrf.mxu0  ;;  %v2086_v61 = vpop.f32.mrf.mxu1 }
 0x115   : > { %v927_v35 = vadd.f32 %v2070_v60, %v815_v12  ;;  %v1052_v43 = vadd.f32 %v1033_v59, %v924_v18 }
 0x116   : > { %v908_v37 = vpop.f32.mrf.mxu0  ;;  %v1036_v62 = vpop.f32.mrf.mxu1 }
 0x117   : > { %v925_v39 = vadd.f32 %v908_v37, %v807_v21  ;;  %v1055_v44 = vadd.f32 %v2086_v61, %v927_v35 }
 0x118   : > { %v2097_v63 = vpop.f32.mrf.mxu0  ;;  %v2113_v0 = vpop.f32.mrf.mxu1 }
 0x119   : > { %v1053_v38 = vadd.f32 %v1036_v62, %v925_v39 }
 0x11a   : > { %v1139_v1 = vpop.f32.mrf.mxu0  ;;  %v1249_v3 = vpop.f32.mrf.mxu1 }
 0x11b   : > { %v1170_v28 = vadd.f32 %v1139_v1, %v1048_v40 }
 0x11c   : > { %v2098_v26 = vpop.f32.mrf.mxu0  ;;  %v2581_v36 = vpop.f32.mrf.mxu1 }
 0x11d   : > { %2613 = vst [vmem:[#allocation2_spill] sm:$0xff] %v2581_v36  ;;  %v1054_v36 = vadd.f32 %v2085_v56, %v926_v16  ;;  %v1173_v54 = vadd.f32 %v2098_v26, %v1051_v32  ;;  %v1946_v16 = vld [vmem:[%s2607_s2] ss:$0 sm:$0xff] }
 0x11e   : > { %v1142_v42 = vpop.f32.mrf.mxu0  ;;  %v2583_v4 = vpop.f32.mrf.mxu1 }
 0x11f   : > { %2614 = vst [vmem:[#allocation3_spill] sm:$0xff] %v2583_v4  ;;  %v1050_v4 = vadd.f32 %v2081_v48, %v922_v9  ;;  %v1171_v56 = vadd.f32 %v1142_v42, %v1049_v33 }
 0x120   : > { %v2101_v6 = vpop.f32.mrf.mxu0  ;;  %v2117_v7 = vpop.f32.mrf.mxu1 }
 0x121   : > { %v1172_v47 = vadd.f32 %v2097_v63, %v1050_v4  ;;  %v1176_v50 = vadd.f32 %v2101_v6, %v1054_v36  ;;  %v1280_v63 = vadd.f32 %v1249_v3, %v1170_v28 }
 0x122   : > { %v1155_v8 = vpop.f32.mrf.mxu0  ;;  %v1265_v20 = vpop.f32.mrf.mxu1 }
 0x123   : > { %v1174_v30 = vadd.f32 %v1155_v8, %v1052_v43  ;;  %v1282_v48 = vadd.f32 %v2113_v0, %v1172_v47  ;;  %v1286_v52 = vadd.f32 %v2117_v7, %v1176_v50 }
 0x124   : > { %v2102_v10 = vpop.f32.mrf.mxu0  ;;  %v2118_v5 = vpop.f32.mrf.mxu1  ;;  %v2615_v61 = vld [vmem:[#allocation2_spill] sm:$0xff] }
 0x125   : > { %v1177_v60 = vadd.f32 %v2102_v10, %v1055_v44  ;;  %v1284_v36 = vadd.f32 %v1265_v20, %v1174_v30  ;;  %v1283_v62 = vadd.f32 %v2615_v61, %v1173_v54 }
 0x126   : > { %v1158_v41 = vpop.f32.mrf.mxu0  ;;  %v1268_v13 = vpop.f32.mrf.mxu1  ;;  %v2616_v11 = vld [vmem:[#allocation3_spill] sm:$0xff] }
 0x127   : > { %v1175_v37 = vadd.f32 %v1158_v41, %v1053_v38  ;;  %v1281_v31 = vadd.f32 %v2616_v11, %v1171_v56  ;;  %v1287_v0 = vadd.f32 %v2118_v5, %v1177_v60 }
 0x128   : > { %v2129_v17 = vpop.f32.mrf.mxu0  ;;  %v2145_v29 = vpop.f32.mrf.mxu1 }
 0x129   : > { %v1437_v4 = vadd.f32 %v2129_v17, %v1282_v48  ;;  %v1285_v26 = vadd.f32 %v1268_v13, %v1175_v37 }
 0x12a   : > { %v1404_v22 = vpop.f32.mrf.mxu0  ;;  %v1526_v23 = vpop.f32.mrf.mxu1 }
 0x12b   : > { %v1435_v53 = vadd.f32 %v1404_v22, %v1280_v63  ;;  %v1559_v10 = vadd.f32 %v2145_v29, %v1437_v4 }
 0x12c   : > { %v2130_v27 = vpop.f32.mrf.mxu0  ;;  %v2146_v58 = vpop.f32.mrf.mxu1 }
 0x12d   : > { %v1438_v14 = vadd.f32 %v2130_v27, %v1283_v62  ;;  %v1557_v34 = vadd.f32 %v1526_v23, %v1435_v53 }
 0x12e   : > { %v1407_v49 = vpop.f32.mrf.mxu0  ;;  %v1529_v57 = vpop.f32.mrf.mxu1 }
 0x12f   : > { %v1436_v3 = vadd.f32 %v1407_v49, %v1281_v31  ;;  %v1560_v24 = vadd.f32 %v2146_v58, %v1438_v14 }
 0x130   : > { %v2133_v45 = vpop.f32.mrf.mxu0  ;;  %v2149_v46 = vpop.f32.mrf.mxu1 }
 0x131   : > { %v1441_v6 = vadd.f32 %v2133_v45, %v1286_v52  ;;  %v1558_v25 = vadd.f32 %v1529_v57, %v1436_v3 }
 0x132   : > { %v1420_v51 = vpop.f32.mrf.mxu0  ;;  %v1542_v59 = vpop.f32.mrf.mxu1 }
 0x133   : > { %v1439_v55 = vadd.f32 %v1420_v51, %v1284_v36  ;;  %v1563_v41 = vadd.f32 %v2149_v46, %v1441_v6 }
 0x134   : > { %v2134_v1 = vpop.f32.mrf.mxu0  ;;  %v2150_v8 = vpop.f32.mrf.mxu1 }
 0x135   : > { %v1442_v20 = vadd.f32 %v2134_v1, %v1287_v0  ;;  %v1561_v18 = vadd.f32 %v1542_v59, %v1439_v55 }
 0x136   : > { %v1423_v42 = vpop.f32.mrf.mxu0  ;;  %v1545_v7 = vpop.f32.mrf.mxu1 }
 0x137   : > { %v1440_v15 = vadd.f32 %v1423_v42, %v1285_v26  ;;  %v1564_v35 = vadd.f32 %v2150_v8, %v1442_v20 }
 0x138   : > { %v2161_v9 = vpop.f32.mrf.mxu0  ;;  %v2165_v17 = vpop.f32.mrf.mxu1 }
 0x139   : > { %v1669_v19 = vadd.f32 %v2161_v9, %v1559_v10  ;;  %v1673_v5 = vadd.f32 %v2165_v17, %v1563_v41  ;;  %v1562_v39 = vadd.f32 %v1545_v7, %v1440_v15 }
 0x13a   : > { %v1636_v13 = vpop.f32.mrf.mxu0  ;;  %v1652_v2 = vpop.f32.mrf.mxu1 }
 0x13b   : > { %v1684_v29 = vadd.f32 %v1946_v16, %v1669_v19  ;;  %v1688_v12 = vadd.f32 %v1946_v16, %v1673_v5  ;;  %v1667_v21 = vadd.f32 %v1636_v13, %v1557_v34  ;;  %v1671_v22 = vadd.f32 %v1652_v2, %v1561_v18 }
 0x13c   : > { %v2162_v23 = vpop.f32.mrf.mxu0  ;;  %v2166_v27 = vpop.f32.mrf.mxu1 }
 0x13d   : > { %v1692_v40 = vpack.c.bf16 %v1684_v29, %v1684_v29  ;;  %v1696_v43 = vpack.c.bf16 %v1688_v12, %v1688_v12  ;;  %v1682_v47 = vadd.f32 %v1946_v16, %v1667_v21  ;;  %v1686_v50 = vadd.f32 %v1946_v16, %v1671_v22 }
 0x13e   : > { %v1670_v49 = vadd.f32 %v2162_v23, %v1560_v24  ;;  %v1674_v28 = vadd.f32 %v2166_v27, %v1564_v35  ;;  %v1639_v30 = vpop.f32.mrf.mxu0  ;;  %v1655_v32 = vpop.f32.mrf.mxu1 }
 0x13f   : > { %1701 = vst.msk [vmem:[%s170_s20 + $0x8] sm:$0xf] %vm1698_vm7, %v1692_v40  ;;  %1705 = vst.msk [vmem:[%s170_s20 + $0x18] sm:$0xf] %vm1698_vm7, %v1696_v43  ;;  %v1690_v58 = vpack.c.bf16 %v1682_v47, %v1682_v47  ;;  %v1694_v57 = vpack.c.bf16 %v1686_v50, %v1686_v50  ;;  %v1668_v33 = vadd.f32 %v1639_v30, %v1558_v25 }
 0x140   : > { %v1672_v44 = vadd.f32 %v1655_v32, %v1562_v39  ;;  %v1685_v38 = vadd.f32 %v1946_v16, %v1670_v49  ;;  %v1689_v45 = vadd.f32 %v1946_v16, %v1674_v28 }
 0x141   : > { %1699 = vst.msk [vmem:[%s170_s20] sm:$0xf] %vm1698_vm7, %v1690_v58  ;;  %1703 = vst.msk [vmem:[%s170_s20 + $0x10] sm:$0xf] %vm1698_vm7, %v1694_v57  ;;  %v1683_v46 = vadd.f32 %v1946_v16, %v1668_v33 }
 0x142   : > { %v1687_v48 = vadd.f32 %v1946_v16, %v1672_v44  ;;  %v1693_v52 = vpack.c.bf16 %v1685_v38, %v1685_v38  ;;  %v1697_v54 = vpack.c.bf16 %v1689_v45, %v1689_v45 }
 0x143   : > { %v1691_v56 = vpack.c.bf16 %v1683_v46, %v1683_v46 }
 0x144   : > { %v1695_v60 = vpack.c.bf16 %v1687_v48, %v1687_v48  ;;  %1702 = vst.msk [vmem:[%s170_s20 + $0xc] sm:$0xf] %vm1698_vm7, %v1693_v52  ;;  %1706 = vst.msk [vmem:[%s170_s20 + $0x1c] sm:$0xf] %vm1698_vm7, %v1697_v54 }
 0x145   : > { %1700 = vst.msk [vmem:[%s170_s20 + $0x4] sm:$0xf] %vm1698_vm7, %v1691_v56 }
 0x146   : > { %1704 = vst.msk [vmem:[%s170_s20 + $0x14] sm:$0xf] %vm1698_vm7, %v1695_v60 }
 0x147 PF: > { %s13_s12 = sadd.s32 1, %s2227_s12  }
 0x148   : > { %p10_p4 = scmp.ge.s32.totalorder %s13_s12, 4  }
 0x14a   :  { %12 = sbr.rel (!%p10_p4) target bundleno = 1 (0x1), region = 70 }

// kernel: decoder_forward.89
= control target key start
LH: loop header
LB: loop body
LE: loop exit
PB: predicated region body
PF: predicated region fallthrough
CT: control target
= control target key end

     0   :  { %s2089_s18 = smov 0   ;;  %s2091_s19 = smov 0   ;;  %s2483_s0 = inlined_call_operand.vmem [shape: bf16[2,8,8,32], index: 0, kind: input, shape index: {}, may-alias: {0,1,2}]   ;;  %s2484_s1 = inlined_call_operand.vmem [shape: bf16[2,8,8,32], index: 1, kind: input, shape index: {}, may-alias: {0,1,2}]   ;;  %s2485_s2 = inlined_call_operand.vmem [shape: bf16[2,8,8,32], index: 2, kind: input, shape index: {}, may-alias: {0,1,2}]   ;;  %s2486_s3 = inlined_call_operand.vmem [shape: bf16[9,32,32], index: 3, kind: input, shape index: {}]   ;;  %s2487_s4 = inlined_call_operand.vmem [shape: f32[1,32], index: 4, kind: input, shape index: {}]   ;;  %s2488_s5 = inlined_call_operand.vmem [shape: bf16[2,8,8,32], index: 5, kind: output, shape index: {}]  }
   0x1   :  { %s2093_s0 = smov 0  }
   0x2 LB: > { %s27_s2 = sadd.s32 1, %s2052_s19  ;;  %p1670_p0 = scmp.ge.s32.totalorder %s2056_s0, 1  ;;  %s2056_s0 = sphi %s2093_s0, %s15_s0   ;;  %s2052_s19 = sphi %s2091_s19, %s2494_s19   ;;  %s2048_s18 = sphi %s2089_s18, %s2493_s18  }
   0x3   : > { %p29_p1 = scmp.ge.s32.totalorder %s27_s2, 2  ;;  %p270_p2 = scmp.lt.s32.totalorder %s2056_s0, 3 }
   0x5   : > { %s2496_s2 = smov (%p29_p1, %s27_s2), 0  ;;  %p271_p3 = pnand %p1670_p0, %p270_p2 }
   0x6   : > { %p347_p4 = scmp.lt.s32.totalorder (!%p271_p3), %s2048_s18, 1 }
   0x7   : > { %274 = sbr.rel (%p271_p3) target bundleno = 306 (0x132), region = 40 }
   0xc   : > { %v2001_v0 = vld [vmem:[%s2486_s3 + $0x38] sm:$0xff]   ;;  %v2002_v1 = vld [vmem:[%s2486_s3 + $0x30] sm:$0xff]   ;;  %s2498_s18 = smov (!%p347_p4, %s2048_s18), 1  ;;  %v2058_v2 = vmov 0   ;;  %v2124_v5 = vld [vmem:[%s2486_s3 + $0x8] sm:$0xff]   ;;  %vm513_vm0 = vcmask 1040384  }
   0xd   : > { %1972 = vmatprep.subr.bf16.mxu1 %v2001_v0  ;;  %1864 = vmatprep.subr.bf16.mxu0 %v2001_v0  ;;  %v2117_v3 = vcombine.low %v2058_v2, %v2058_v2  ;;  %s1806_s24 = sshll.u32 %s2498_s18, 5  ;;  %v2129_v6 = vld [vmem:[%s2486_s3 + $0x68] sm:$0xff]   ;;  %vm514_vm1 = vsmask.f32 256  ;;  %vm567_vm2 = vcmask 261120   ;;  %vm1172_vm4 = vcmask 1043456  }
   0xe   : > { %1974 = vmatpush3.bf16.msra.mxu1 %v2001_v0  ;;  %1865 = vmatpush3.bf16.msra.mxu0 %v2001_v0  ;;  %s2136_s6 = scalar_lea.vmem %s2484_s1, %s1806_s24  ;;  %vm2194_vm3 = vmand %vm513_vm0, %vm514_vm1  ;;  %v2018_v30 = vld [vmem:[%s2486_s3 + $0x48] sm:$0xff]   ;;  %vm1173_vm5 = vsmask.f32 3328  ;;  %s2455_s17 = scalar_lea.vmem %s2488_s5, %s1806_s24  ;;  %vm1534_vm7 = vcmask 257024  }
   0xf   : > { %1973 = vmatprep.subr.bf16.mxu1 %v2002_v1  ;;  %1866 = vmatprep.subr.bf16.mxu0 %v2002_v1  ;;  %v434_v4 = vshrl.u32 %v2117_v3, 16  ;;  %v2139_v7 = vld [vmem:[%s2136_s6] sm:$0xf]  ;;  %v2142_v8 = vld [vmem:[%s2136_s6 + $0x4] sm:$0xf]  ;;  %v437_v15 = vshll.u32 %v2117_v3, 16  ;;  %vm2334_vm6 = vmand %vm1172_vm4, %vm1173_vm5 }
  0x10   : > { %v2145_v9 = vld [vmem:[%s2136_s6 + $0x8] sm:$0xf]  ;;  %v2148_v10 = vld [vmem:[%s2136_s6 + $0x1c] sm:$0xf]  ;;  %v2152_v11 = vcombine.low %v2139_v7, %v2139_v7  ;;  %v2156_v12 = vcombine.low %v2142_v8, %v2142_v8  ;;  %v2173_v19 = vld [vmem:[%s2136_s6 + $0xc] sm:$0xf] }
  0x11   : > { %v2160_v13 = vcombine.low %v2145_v9, %v2145_v9  ;;  %v2164_v14 = vcombine.low %v2148_v10, %v2148_v10  ;;  %v2176_v20 = vld [vmem:[%s2136_s6 + $0x10] sm:$0xf]  ;;  %v436_v21 = vrot.slane %v434_v4, 7  ;;  %v2188_v27 = vld [vmem:[%s2136_s6 + $0x14] sm:$0xf]  ;;  %v2211_v36 = vcombine.low %v2173_v19, %v2173_v19 }
  0x12   : > { %1975 = vmatpush3.bf16.msra.mxu1 %v2002_v1  ;;  %1867 = vmatpush3.bf16.msra.mxu0 %v2002_v1  ;;  %v441_v16 = vshrl.u32 %v2152_v11, 16  ;;  %v444_v17 = vshll.u32 %v2152_v11, 16  ;;  %v448_v18 = vshrl.u32 %v2156_v12, 16  ;;  %v451_v22 = vshll.u32 %v2156_v12, 16  ;;  %v2199_v31 = vld [vmem:[%s2136_s6 + $0x18] sm:$0xf] }
  0x13   : > { %1876 = vmatprep.subr.bf16.mxu1 %v2124_v5  ;;  %1888 = vmatprep.subr.bf16.mxu0 %v2129_v6  ;;  %v455_v23 = vshrl.u32 %v2160_v13, 16  ;;  %v490_v24 = vshrl.u32 %v2164_v14, 16  ;;  %v458_v28 = vshll.u32 %v2160_v13, 16  ;;  %v493_v29 = vshll.u32 %v2164_v14, 16 }
  0x14   : > { %v443_v25 = vrot.slane %v441_v16, 7  ;;  %v450_v26 = vrot.slane %v448_v18, 7  ;;  %v2215_v37 = vcombine.low %v2176_v20, %v2176_v20  ;;  %v2223_v40 = vcombine.low %v2188_v27, %v2188_v27 }
  0x15   : > { %v457_v34 = vrot.slane %v455_v23, 7  ;;  %v492_v35 = vrot.slane %v490_v24, 7  ;;  %v2227_v41 = vcombine.low %v2199_v31, %v2199_v31  ;;  %v439_v43 = vor.u32 %v437_v15, %v436_v21 }
  0x16   : > { %v446_v32 = vor.u32 %v444_v17, %v443_v25  ;;  %v453_v33 = vor.u32 %v451_v22, %v450_v26  ;;  %v462_v46 = vshrl.u32 %v2211_v36, 16  ;;  %v465_v47 = vshll.u32 %v2211_v36, 16  ;;  %v2016_v25 = vld [vmem:[%s2486_s3 + $0x60] sm:$0xff]  }
  0x17   : > { %v460_v44 = vor.u32 %v458_v28, %v457_v34  ;;  %v495_v45 = vor.u32 %v493_v29, %v492_v35  ;;  %v469_v48 = vshrl.u32 %v2215_v37, 16  ;;  %v472_v49 = vshll.u32 %v2215_v37, 16 }
  0x18   : > { %v517_v38 = vsel %vm2194_vm3, 0, %v446_v32  ;;  %v518_v39 = vsel %vm2194_vm3, 0, %v453_v33  ;;  %v476_v50 = vshrl.u32 %v2223_v40, 16  ;;  %v479_v51 = vshll.u32 %v2223_v40, 16 }
  0x19   : > { %v1693_v42 = vcombine.low %v517_v38, %v518_v39  ;;  %v483_v52 = vshrl.u32 %v2227_v41, 16  ;;  %v464_v53 = vrot.slane %v462_v46, 7  ;;  %v471_v54 = vrot.slane %v469_v48, 7 }
  0x1a   : > { %v486_v55 = vshll.u32 %v2227_v41, 16  ;;  %v478_v56 = vrot.slane %v476_v50, 7  ;;  %v519_v58 = vsel %vm2194_vm3, 0, %v460_v44  ;;  %v516_v61 = vsel %vm2194_vm3, 0, %v439_v43  ;;  %v2015_v44 = vld [vmem:[%s2486_s3] sm:$0xff]  }
  0x1b   : > { %1868 = vmatprep.mubr.msk.bf16.mxu0 %vm567_vm2, %v1693_v42  ;;  %v485_v57 = vrot.slane %v483_v52, 7  ;;  %v467_v59 = vor.u32 %v465_v47, %v464_v53  ;;  %v474_v60 = vor.u32 %v472_v49, %v471_v54  ;;  %v524_v62 = vsel %vm2194_vm3, 0, %v495_v45  ;;  %v2020_v45 = vld [vmem:[%s2486_s3 + $0x40] sm:$0xff]   ;;  %v2023_v53 = vld [vmem:[%s2486_s3 + $0x28] sm:$0xff]  }
  0x1c   : > { %v481_v63 = vor.u32 %v479_v51, %v478_v56  ;;  %v1703_v34 = vcombine.low %v516_v61, %v517_v38  ;;  %v1704_v43 = vcombine.low %v518_v39, %v519_v58  ;;  %v2017_v39 = vld [vmem:[%s2486_s3 + $0x18] sm:$0xff]   ;;  %v1717_v54 = vcombine.low %v524_v62, %v516_v61 }
  0x1d   : > { %v488_v0 = vor.u32 %v486_v55, %v485_v57  ;;  %v520_v1 = vsel %vm2194_vm3, 0, %v467_v59  ;;  %v521_v21 = vsel %vm2194_vm3, 0, %v474_v60  ;;  %v2022_v56 = vld [vmem:[%s2486_s3 + $0x78] sm:$0xff]   ;;  %v1742_v57 = vcombine.low %v2139_v7, %v2142_v8 }
  0x1e   : > { %v522_v26 = vsel %vm2194_vm3, 0, %v481_v63  ;;  %v1694_v33 = vcombine.low %v519_v58, %v520_v1  ;;  %v1705_v38 = vcombine.low %v520_v1, %v521_v21  ;;  %v1728_v58 = vcombine.low %v2058_v2, %v2139_v7 }
  0x1f   : > { %v523_v32 = vsel %vm2194_vm3, 0, %v488_v0  ;;  %v1695_v35 = vcombine.low %v521_v21, %v522_v26  ;;  %v1142_v59 = vrot.slane %v437_v15, 1  ;;  %v1144_v60 = vrot.slane %v444_v17, 1  ;;  %v2029_v15 = vld [vmem:[%s2486_s3 + $0x20] sm:$0xff]  }
  0x20   : > { %v1696_v42 = vcombine.low %v523_v32, %v524_v62  ;;  %1869 = vmatmul.mubr.msk.bf16.vlgmr.msra.gmra.mxu0 %vm567_vm2, %v1694_v33  ;;  %v1743_v7 = vcombine.low %v2145_v9, %v2173_v19  ;;  %v1744_v61 = vcombine.low %v2176_v20, %v2188_v27  ;;  %v1729_v62 = vcombine.low %v2142_v8, %v2145_v9  ;;  %v2026_v8 = vld [vmem:[%s2486_s3 + $0x70] sm:$0xff]  }
  0x21   : > { %1872 = vmatprep.mubr.msk.bf16.mxu1 %vm567_vm2, %v1695_v35  ;;  %1889 = vmatpush3.bf16.msra.mxu0 %v2129_v6  ;;  %v1706_v6 = vcombine.low %v522_v26, %v523_v32  ;;  %v1143_v17 = vor.u32 %v1142_v59, %v434_v4  ;;  %v1145_v63 = vor.u32 %v1144_v60, %v441_v16  ;;  %v1146_v3 = vrot.slane %v451_v22, 1 }
  0x22   : > { %1873 = vmatmul.mubr.msk.bf16.vlgmr.msra.gmra.mxu1 %vm567_vm2, %v1696_v42  ;;  %1890 = vmatprep.subr.bf16.mxu0 %v2016_v25  ;;  %v1730_v1 = vcombine.low %v2173_v19, %v2176_v20  ;;  %v1148_v4 = vrot.slane %v458_v28, 1  ;;  %v1150_v9 = vrot.slane %v465_v47, 1  ;;  %v1152_v11 = vrot.slane %v472_v49, 1  ;;  %v2031_v20 = vld [vmem:[%s2486_s3 + $0x88] sm:$0xff]   ;;  %v2030_v28 = vld [vmem:[%s2486_s3 + $0x58] sm:$0xff]  }
  0x23   : > { %1877 = vmatpush3.bf16.msra.mxu1 %v2124_v5  ;;  %1880 = vmatprep.mubr.msk.bf16.mxu1 %vm567_vm2, %v1703_v34  ;;  %v2019_v5 = vld [vmem:[%s2486_s3 + $0x10] sm:$0xff]   ;;  %v2356_v16 = vsel %vm2334_vm6, %v1143_v17, 0  ;;  %v1176_v19 = vsel %vm2334_vm6, %v1145_v63, 0  ;;  %v1745_v22 = vcombine.low %v2199_v31, %v2148_v10  ;;  %v1147_v47 = vor.u32 %v1146_v3, %v448_v18 }
  0x24   : > { %1878 = vmatprep.subr.bf16.mxu1 %v2015_v44  ;;  %1892 = vmatprep.mubr.msk.bf16.mxu0 %vm567_vm2, %v1704_v43  ;;  %v1149_v49 = vor.u32 %v1148_v4, %v455_v23  ;;  %v1767_v21 = vcombine.low %v2356_v16, %v1176_v19  ;;  %v1151_v26 = vor.u32 %v1150_v9, %v462_v46  ;;  %v1154_v18 = vrot.slane %v479_v51, 1  ;;  %v2033_v51 = vld [vmem:[%s2486_s3 + $0x80] sm:$0xff]  }
  0x25   : > { %1891 = vmatpush3.bf16.msra.mxu0 %v2016_v25  ;;  %v1731_v25 = vcombine.low %v2188_v27, %v2199_v31  ;;  %v1153_v32 = vor.u32 %v1152_v11, %v469_v48  ;;  %v1177_v12 = vsel %vm2334_vm6, %v1147_v47, 0  ;;  %v1156_v23 = vrot.slane %v486_v55, 1  ;;  %v2032_v55 = vld [vmem:[%s2486_s3 + $0x50] sm:$0xff]  }
  0x26   : > { %1912 = vmatprep.subr.bf16.mxu0 %v2018_v30  ;;  %v1178_v13 = vsel %vm2334_vm6, %v1149_v49, 0  ;;  %v1179_v27 = vsel %vm2334_vm6, %v1151_v26, 0  ;;  %v1155_v46 = vor.u32 %v1154_v18, %v476_v50  ;;  %v1781_v33 = vcombine.low %v1176_v19, %v1177_v12 }
  0x27   : > { %1879 = vmatpush3.bf16.msra.mxu1 %v2015_v44  ;;  %v1180_v31 = vsel %vm2334_vm6, %v1153_v32, 0  ;;  %v1768_v36 = vcombine.low %v1177_v12, %v1178_v13  ;;  %v1157_v48 = vor.u32 %v1156_v23, %v483_v52  ;;  %v1756_v52 = vcombine.low %v2148_v10, %v2058_v2 }
  0x28   : > { %1900 = vmatprep.subr.bf16.mxu1 %v2017_v39  ;;  %1893 = vmatmul.mubr.msk.bf16.vlgmr.msra.gmra.mxu0 %vm567_vm2, %v1705_v38  ;;  %v1769_v37 = vcombine.low %v1179_v27, %v1180_v31  ;;  %v1181_v40 = vsel %vm2334_vm6, %v1155_v46, 0  ;;  %v1158_v34 = vrot.slane %v493_v29, 1  ;;  %v1782_v42 = vcombine.low %v1178_v13, %v1179_v27 }
  0x29   : > { %1913 = vmatpush3.bf16.msra.mxu0 %v2018_v30  ;;  %1896 = vmatprep.mubr.msk.bf16.mxu0 %vm567_vm2, %v1706_v6  ;;  %v1182_v41 = vsel %vm2334_vm6, %v1157_v48, 0 }
  0x2a   : > { %1881 = vmatmul.mubr.msk.bf16.vlgmr.msra.gmra.mxu1 %vm567_vm2, %v1704_v43  ;;  %1914 = vmatprep.subr.bf16.mxu0 %v2020_v45  ;;  %v1770_v50 = vcombine.low %v1181_v40, %v1182_v41  ;;  %v1159_v35 = vor.u32 %v1158_v34, %v490_v24  ;;  %v1783_v43 = vcombine.low %v1180_v31, %v1181_v40 }
  0x2b   : > { %1901 = vmatpush3.bf16.msra.mxu1 %v2017_v39  ;;  %1884 = vmatprep.mubr.msk.bf16.mxu1 %vm567_vm2, %v1705_v38 }
  0x2c   : > { %1902 = vmatprep.subr.bf16.mxu1 %v2019_v5  ;;  %v1183_v2 = vsel %vm2334_vm6, %v1159_v35, 0 }
  0x2d   : > { %1915 = vmatpush3.bf16.msra.mxu0 %v2020_v45  ;;  %v1795_v10 = vcombine.low %v1183_v2, %v2356_v16  ;;  %v1784_v29 = vcombine.low %v1182_v41, %v1183_v2 }
  0x2e   : > { %1936 = vmatprep.subr.bf16.mxu0 %v2023_v53 }
  0x2f   : > { %1903 = vmatpush3.bf16.msra.mxu1 %v2019_v5 }
  0x30   : > { %1897 = vmatmul.mubr.msk.bf16.gmra.mxu0 %vm567_vm2, %v1717_v54  ;;  %1924 = vmatprep.subr.bf16.mxu1 %v2022_v56 }
  0x31   : > { %1916 = vmatprep.mubr.msk.bf16.mxu0 %vm567_vm2, %v1742_v57 }
  0x32   : > { %1885 = vmatmul.mubr.msk.bf16.gmra.mxu1 %vm567_vm2, %v1706_v6 }
  0x33   : > { %1904 = vmatprep.mubr.msk.bf16.mxu1 %vm567_vm2, %v1728_v58 }
  0x38   : > { %1917 = vmatmul.mubr.msk.bf16.vlgmr.msra.gmra.mxu0 %vm567_vm2, %v1743_v7 }
  0x39   : > { %1937 = vmatpush3.bf16.msra.mxu0 %v2023_v53  ;;  %1920 = vmatprep.mubr.msk.bf16.mxu0 %vm567_vm2, %v1744_v61 }
  0x3a   : > { %1905 = vmatmul.mubr.msk.bf16.vlgmr.msra.gmra.mxu1 %vm567_vm2, %v1729_v62  ;;  %1938 = vmatprep.subr.bf16.mxu0 %v2029_v15 }
  0x3b   : > { %1925 = vmatpush3.bf16.msra.mxu1 %v2022_v56  ;;  %1908 = vmatprep.mubr.msk.bf16.mxu1 %vm567_vm2, %v1730_v1 }
  0x3c   : > { %1926 = vmatprep.subr.bf16.mxu1 %v2026_v8 }
  0x3d   : > { %1939 = vmatpush3.bf16.msra.mxu0 %v2029_v15 }
  0x3e   : > { %1960 = vmatprep.subr.bf16.mxu0 %v2031_v20 }
  0x3f   : > { %1927 = vmatpush3.bf16.msra.mxu1 %v2026_v8 }
  0x40   : > { %1921 = vmatmul.mubr.msk.bf16.gmra.mxu0 %vm567_vm2, %v1745_v22  ;;  %1948 = vmatprep.subr.bf16.mxu1 %v2030_v28 }
  0x41   : > { %1940 = vmatprep.mubr.msk.bf16.mxu0 %vm567_vm2, %v1767_v21 }
  0x42   : > { %1909 = vmatmul.mubr.msk.bf16.gmra.mxu1 %vm567_vm2, %v1731_v25 }
  0x43   : > { %1928 = vmatprep.mubr.msk.bf16.mxu1 %vm567_vm2, %v1729_v62 }
  0x48   : > { %1941 = vmatmul.mubr.msk.bf16.vlgmr.msra.gmra.mxu0 %vm567_vm2, %v1768_v36 }
  0x49   : > { %1961 = vmatpush3.bf16.msra.mxu0 %v2031_v20  ;;  %1944 = vmatprep.mubr.msk.bf16.mxu0 %vm567_vm2, %v1769_v37 }
  0x4a   : > { %1929 = vmatmul.mubr.msk.bf16.vlgmr.msra.gmra.mxu1 %vm567_vm2, %v1730_v1  ;;  %1962 = vmatprep.subr.bf16.mxu0 %v2033_v51 }
  0x4b   : > { %1949 = vmatpush3.bf16.msra.mxu1 %v2030_v28  ;;  %1932 = vmatprep.mubr.msk.bf16.mxu1 %vm567_vm2, %v1731_v25 }
  0x4c   : > { %1950 = vmatprep.subr.bf16.mxu1 %v2032_v55 }
  0x4d   : > { %1963 = vmatpush3.bf16.msra.mxu0 %v2033_v51 }
  0x4f   : > { %1951 = vmatpush3.bf16.msra.mxu1 %v2032_v55 }
  0x50   : > { %1945 = vmatmul.mubr.msk.bf16.gmra.mxu0 %vm567_vm2, %v1770_v50 }
  0x51   : > { %1964 = vmatprep.mubr.msk.bf16.mxu0 %vm567_vm2, %v1768_v36 }
  0x52   : > { %1933 = vmatmul.mubr.msk.bf16.gmra.mxu1 %vm567_vm2, %v1756_v52 }
  0x53   : > { %1952 = vmatprep.mubr.msk.bf16.mxu1 %vm567_vm2, %v1781_v33 }
  0x58   : > { %1965 = vmatmul.mubr.msk.bf16.vlgmr.msra.gmra.mxu0 %vm567_vm2, %v1769_v37 }
  0x59   : > { %1968 = vmatprep.mubr.msk.bf16.mxu0 %vm567_vm2, %v1770_v50 }
  0x5a   : > { %1953 = vmatmul.mubr.msk.bf16.vlgmr.msra.gmra.mxu1 %vm567_vm2, %v1782_v42 }
  0x5b   : > { %1956 = vmatprep.mubr.msk.bf16.mxu1 %vm567_vm2, %v1783_v43 }
  0x60   : > { %1969 = vmatmul.mubr.msk.bf16.gmra.mxu0 %vm567_vm2, %v1795_v10 }
  0x62   : > { %1957 = vmatmul.mubr.msk.bf16.gmra.mxu1 %vm567_vm2, %v1784_v29 }
  0xe0   : > { %v1870_v14 = vpop.f32.mrf.mxu0 }
  0xe2   : > { %v1874_v24 = vpop.f32.mrf.mxu1  ;;  %v614_v44 = vpop.f32.mrf.mxu0 }
  0xe4   : > { %v630_v30 = vpop.f32.mrf.mxu1  ;;  %v1871_v38 = vpop.f32.mrf.mxu0 }
  0xe6   : > { %v1875_v39 = vpop.f32.mrf.mxu1  ;;  %v617_v6 = vpop.f32.mrf.mxu0 }
  0xe8   : > { %v2433_v45 = vpop.f32.mrf.mxu1  ;;  %v1894_v5 = vpop.f32.mrf.mxu0 }
  0xea   : > { %v1882_v53 = vpop.f32.mrf.mxu1  ;;  %v797_v54 = vpop.f32.mrf.mxu0 }
  0xeb   : > { %v718_v13 = vadd.f32 %v1882_v53, %v1870_v14 }
  0xec   : > { %v709_v56 = vpop.f32.mrf.mxu1  ;;  %v1895_v57 = vpop.f32.mrf.mxu0 }
  0xed   : > { %v710_v27 = vadd.f32 %v709_v56, %v614_v44  ;;  %v830_v37 = vadd.f32 %v1894_v5, %v718_v13 }
  0xee   : > { %v1883_v58 = vpop.f32.mrf.mxu1  ;;  %v800_v59 = vpop.f32.mrf.mxu0 }
  0xef   : > { %v721_v46 = vadd.f32 %v1883_v58, %v1871_v38  ;;  %v828_v55 = vadd.f32 %v797_v54, %v710_v27 }
  0xf0   : > { %v712_v60 = vpop.f32.mrf.mxu1  ;;  %v1898_v7 = vpop.f32.mrf.mxu0 }
  0xf1   : > { %v713_v40 = vadd.f32 %v712_v60, %v617_v6  ;;  %v831_v34 = vadd.f32 %v1895_v57, %v721_v46 }
  0xf2   : > { %v1886_v61 = vpop.f32.mrf.mxu1  ;;  %v813_v62 = vpop.f32.mrf.mxu0 }
  0xf3   : > { %v734_v50 = vadd.f32 %v1886_v61, %v1874_v24  ;;  %v829_v10 = vadd.f32 %v800_v59, %v713_v40 }
  0xf4   : > { %v725_v15 = vpop.f32.mrf.mxu1  ;;  %v1899_v17 = vpop.f32.mrf.mxu0 }
  0xf5   : > { %v726_v42 = vadd.f32 %v725_v15, %v630_v30  ;;  %v834_v44 = vadd.f32 %v1898_v7, %v734_v50 }
  0xf6   : > { %v1887_v63 = vpop.f32.mrf.mxu1  ;;  %v2435_v0 = vpop.f32.mrf.mxu0 }
  0xf7   : > { %v737_v53 = vadd.f32 %v1887_v63, %v1875_v39  ;;  %v832_v58 = vadd.f32 %v813_v62, %v726_v42 }
  0xf8   : > { %v728_v1 = vpop.f32.mrf.mxu1  ;;  %v1918_v8 = vpop.f32.mrf.mxu0 }
  0xf9   : > { %v729_v24 = vadd.f32 %v728_v1, %v2433_v45 }
  0xfa   : > { %v1906_v3 = vpop.f32.mrf.mxu1  ;;  %v1009_v4 = vpop.f32.mrf.mxu0 }
  0xfb   : > { %v936_v41 = vadd.f32 %v1906_v3, %v830_v37  ;;  %v835_v3 = vadd.f32 %v1899_v17, %v737_v53  ;;  %v1802_v17 = vld [vmem:[%s2487_s4] ss:$0 sm:$0xff] }
  0xfc   : > { %v903_v9 = vpop.f32.mrf.mxu1  ;;  %v1919_v11 = vpop.f32.mrf.mxu0 }
  0xfd   : > { %v934_v35 = vadd.f32 %v903_v9, %v828_v55  ;;  %v1042_v29 = vadd.f32 %v1918_v8, %v936_v41 }
  0xfe   : > { %v1907_v16 = vpop.f32.mrf.mxu1  ;;  %v1012_v19 = vpop.f32.mrf.mxu0 }
  0xff   : > { %v937_v14 = vadd.f32 %v1907_v16, %v831_v34  ;;  %v1040_v56 = vadd.f32 %v1009_v4, %v934_v35  ;;  %v833_v16 = vadd.f32 %v2435_v0, %v729_v24 }
 0x100   : > { %v906_v20 = vpop.f32.mrf.mxu1  ;;  %v1922_v22 = vpop.f32.mrf.mxu0 }
 0x101   : > { %v935_v54 = vadd.f32 %v906_v20, %v829_v10  ;;  %v1043_v30 = vadd.f32 %v1919_v11, %v937_v14 }
 0x102   : > { %v1910_v28 = vpop.f32.mrf.mxu1  ;;  %v1025_v47 = vpop.f32.mrf.mxu0 }
 0x103   : > { %v940_v60 = vadd.f32 %v1910_v28, %v834_v44  ;;  %v1041_v7 = vadd.f32 %v1012_v19, %v935_v54 }
 0x104   : > { %v919_v49 = vpop.f32.mrf.mxu1  ;;  %v2437_v21 = vpop.f32.mrf.mxu0 }
 0x105   : > { %v938_v59 = vadd.f32 %v919_v49, %v832_v58  ;;  %v1046_v4 = vadd.f32 %v1922_v22, %v940_v60 }
 0x106   : > { %v1911_v25 = vpop.f32.mrf.mxu1  ;;  %v2439_v26 = vpop.f32.mrf.mxu0 }
 0x107   : > { %v941_v20 = vadd.f32 %v1911_v25, %v835_v3  ;;  %v1044_v28 = vadd.f32 %v1025_v47, %v938_v59 }
 0x108   : > { %v922_v32 = vpop.f32.mrf.mxu1  ;;  %v1942_v12 = vpop.f32.mrf.mxu0 }
 0x109   : > { %v939_v27 = vadd.f32 %v922_v32, %v833_v16  ;;  %v1047_v22 = vadd.f32 %v2437_v21, %v941_v20 }
 0x10a   : > { %v1930_v18 = vpop.f32.mrf.mxu1  ;;  %v1268_v23 = vpop.f32.mrf.mxu0 }
 0x10b   : > { %v1136_v6 = vadd.f32 %v1930_v18, %v1042_v29  ;;  %v1045_v55 = vadd.f32 %v2439_v26, %v939_v27 }
 0x10c   : > { %v1103_v31 = vpop.f32.mrf.mxu1  ;;  %v1943_v36 = vpop.f32.mrf.mxu0 }
 0x10d   : > { %v1134_v15 = vadd.f32 %v1103_v31, %v1040_v56  ;;  %v1301_v39 = vadd.f32 %v1942_v12, %v1136_v6 }
 0x10e   : > { %v1931_v48 = vpop.f32.mrf.mxu1  ;;  %v1271_v51 = vpop.f32.mrf.mxu0 }
 0x10f   : > { %v1137_v63 = vadd.f32 %v1931_v48, %v1043_v30  ;;  %v1299_v18 = vadd.f32 %v1268_v23, %v1134_v15 }
 0x110   : > { %v1106_v52 = vpop.f32.mrf.mxu1  ;;  %v1946_v33 = vpop.f32.mrf.mxu0 }
 0x111   : > { %v1135_v45 = vadd.f32 %v1106_v52, %v1041_v7  ;;  %v1302_v12 = vadd.f32 %v1943_v36, %v1137_v63 }
 0x112   : > { %v1934_v43 = vpop.f32.mrf.mxu1  ;;  %v1284_v2 = vpop.f32.mrf.mxu0 }
 0x113   : > { %v1140_v11 = vadd.f32 %v1934_v43, %v1046_v4  ;;  %v1300_v46 = vadd.f32 %v1271_v51, %v1135_v45 }
 0x114   : > { %v1119_v5 = vpop.f32.mrf.mxu1  ;;  %v2441_v38 = vpop.f32.mrf.mxu0 }
 0x115   : > { %v1138_v25 = vadd.f32 %v1119_v5, %v1044_v28  ;;  %v1305_v40 = vadd.f32 %v1946_v33, %v1140_v11 }
 0x116   : > { %v1935_v57 = vpop.f32.mrf.mxu1  ;;  %v1287_v61 = vpop.f32.mrf.mxu0 }
 0x117   : > { %v1141_v41 = vadd.f32 %v1935_v57, %v1047_v22  ;;  %v1303_v35 = vadd.f32 %v1284_v2, %v1138_v25 }
 0x118   : > { %v1122_v8 = vpop.f32.mrf.mxu1  ;;  %v1966_v9 = vpop.f32.mrf.mxu0 }
 0x119   : > { %v1139_v42 = vadd.f32 %v1122_v8, %v1045_v55  ;;  %v1306_v44 = vadd.f32 %v2441_v38, %v1141_v41 }
 0x11a   : > { %v1954_v13 = vpop.f32.mrf.mxu1  ;;  %v1472_v62 = vpop.f32.mrf.mxu0 }
 0x11b   : > { %v1409_v1 = vadd.f32 %v1954_v13, %v1301_v39  ;;  %v1304_v6 = vadd.f32 %v1287_v61, %v1139_v42 }
 0x11c   : > { %v1376_v49 = vpop.f32.mrf.mxu1  ;;  %v1967_v19 = vpop.f32.mrf.mxu0 }
 0x11d   : > { %v1505_v31 = vadd.f32 %v1966_v9, %v1409_v1  ;;  %v1407_v0 = vadd.f32 %v1376_v49, %v1299_v18 }
 0x11e   : > { %v1955_v37 = vpop.f32.mrf.mxu1  ;;  %v1475_v23 = vpop.f32.mrf.mxu0 }
 0x11f   : > { %v1520_v48 = vadd.f32 %v1802_v17, %v1505_v31  ;;  %v1503_v47 = vadd.f32 %v1472_v62, %v1407_v0  ;;  %v1410_v32 = vadd.f32 %v1955_v37, %v1302_v12 }
 0x120   : > { %v1379_v21 = vpop.f32.mrf.mxu1  ;;  %v1970_v36 = vpop.f32.mrf.mxu0 }
 0x121   : > { %v1528_v50 = vpack.c.bf16 %v1520_v48, %v1520_v48  ;;  %v1518_v51 = vadd.f32 %v1802_v17, %v1503_v47  ;;  %v1506_v52 = vadd.f32 %v1967_v19, %v1410_v32  ;;  %v1408_v34 = vadd.f32 %v1379_v21, %v1300_v46 }
 0x122   : > { %v1958_v26 = vpop.f32.mrf.mxu1  ;;  %v1488_v33 = vpop.f32.mrf.mxu0 }
 0x123   : > { %1537 = vst.msk [vmem:[%s2455_s17 + $0x8] sm:$0xf] %vm1534_vm7, %v1528_v50  ;;  %v1526_v43 = vpack.c.bf16 %v1518_v51, %v1518_v51  ;;  %v1521_v10 = vadd.f32 %v1802_v17, %v1506_v52  ;;  %v1504_v29 = vadd.f32 %v1475_v23, %v1408_v34  ;;  %v1413_v14 = vadd.f32 %v1958_v26, %v1305_v40 }
 0x124   : > { %v1392_v53 = vpop.f32.mrf.mxu1  ;;  %v1971_v24 = vpop.f32.mrf.mxu0 }
 0x125   : > { %1535 = vst.msk [vmem:[%s2455_s17] sm:$0xf] %vm1534_vm7, %v1526_v43  ;;  %v1529_v5 = vpack.c.bf16 %v1521_v10, %v1521_v10  ;;  %v1519_v56 = vadd.f32 %v1802_v17, %v1504_v29  ;;  %v1509_v54 = vadd.f32 %v1970_v36, %v1413_v14  ;;  %v1411_v2 = vadd.f32 %v1392_v53, %v1303_v35 }
 0x126   : > { %v1959_v58 = vpop.f32.mrf.mxu1  ;;  %v1491_v7 = vpop.f32.mrf.mxu0 }
 0x127   : > { %1538 = vst.msk [vmem:[%s2455_s17 + $0xc] sm:$0xf] %vm1534_vm7, %v1529_v5  ;;  %v1527_v60 = vpack.c.bf16 %v1519_v56, %v1519_v56  ;;  %v1524_v57 = vadd.f32 %v1802_v17, %v1509_v54  ;;  %v1507_v30 = vadd.f32 %v1488_v33, %v1411_v2  ;;  %v1414_v38 = vadd.f32 %v1959_v58, %v1306_v44 }
 0x128   : > { %v1395_v15 = vpop.f32.mrf.mxu1 }
 0x129   : > { %1536 = vst.msk [vmem:[%s2455_s17 + $0x4] sm:$0xf] %vm1534_vm7, %v1527_v60  ;;  %v1532_v3 = vpack.c.bf16 %v1524_v57, %v1524_v57  ;;  %v1522_v59 = vadd.f32 %v1802_v17, %v1507_v30  ;;  %v1510_v8 = vadd.f32 %v1971_v24, %v1414_v38  ;;  %v1412_v9 = vadd.f32 %v1395_v15, %v1304_v6 }
 0x12b   : > { %1541 = vst.msk [vmem:[%s2455_s17 + $0x18] sm:$0xf] %vm1534_vm7, %v1532_v3  ;;  %v1530_v61 = vpack.c.bf16 %v1522_v59, %v1522_v59  ;;  %v1525_v39 = vadd.f32 %v1802_v17, %v1510_v8  ;;  %v1508_v63 = vadd.f32 %v1491_v7, %v1412_v9 }
 0x12d   : > { %1539 = vst.msk [vmem:[%s2455_s17 + $0x10] sm:$0xf] %vm1534_vm7, %v1530_v61  ;;  %v1533_v16 = vpack.c.bf16 %v1525_v39, %v1525_v39  ;;  %v1523_v4 = vadd.f32 %v1802_v17, %v1508_v63 }
 0x12f   : > { %1542 = vst.msk [vmem:[%s2455_s17 + $0x1c] sm:$0xf] %vm1534_vm7, %v1533_v16  ;;  %v1531_v20 = vpack.c.bf16 %v1523_v4, %v1523_v4 }
 0x131   : > { %1540 = vst.msk [vmem:[%s2455_s17 + $0x14] sm:$0xf] %vm1534_vm7, %v1531_v20 }
 0x132 PF: > { %s15_s0 = sadd.s32 1, %s2056_s0   ;;  %s2493_s18 = smov %s2052_s19 }
 0x133   : > { %p12_p5 = scmp.ge.s32.totalorder %s15_s0, 4   ;;  %s2494_s19 = smov %s2496_s2 }
 0x135   :  { %14 = sbr.rel (!%p12_p5) target bundleno = 2 (0x2), region = 84 }

// kernel: decoder_forward.87
= control target key start
LH: loop header
LB: loop body
LE: loop exit
PB: predicated region body
PF: predicated region fallthrough
CT: control target
= control target key end

     0   :  { %s2221_s21 = smov 0   ;;  %s2223_s0 = smov 0   ;;  %s2647_s0 = inlined_call_operand.vmem [shape: bf16[2,8,8,32], index: 0, kind: input, shape index: {}, may-alias: {0,1,2}]   ;;  %s2648_s1 = inlined_call_operand.vmem [shape: bf16[2,8,8,32], index: 1, kind: input, shape index: {}, may-alias: {0,1,2}]   ;;  %s2649_s2 = inlined_call_operand.vmem [shape: bf16[2,8,8,32], index: 2, kind: input, shape index: {}, may-alias: {0,1,2}]   ;;  %s2650_s3 = inlined_call_operand.vmem [shape: bf16[9,32,32], index: 3, kind: input, shape index: {}]   ;;  %s2651_s4 = inlined_call_operand.vmem [shape: f32[1,32], index: 4, kind: input, shape index: {}]   ;;  %s2652_s5 = inlined_call_operand.vmem [shape: bf16[2,8,8,32], index: 5, kind: input, shape index: {}]   ;;  %s2653_s6 = inlined_call_operand.vmem [shape: bf16[2,8,8,32], index: 6, kind: output, shape index: {}]  }
   0x1   :  { %s2225_s22 = smov 0  }
   0x2 LB: > { %s28_s2 = sadd.s32 1, %s2179_s0  ;;  %p1775_p0 = scmp.ge.s32.totalorder %s2183_s22, 1  ;;  %s2183_s22 = sphi %s2225_s22, %s16_s22   ;;  %s2179_s0 = sphi %s2223_s0, %s2659_s0   ;;  %s2175_s21 = sphi %s2221_s21, %s2658_s21  }
   0x3   : > { %p30_p1 = scmp.ge.s32.totalorder %s28_s2, 2  ;;  %p312_p2 = scmp.lt.s32.totalorder %s2183_s22, 3 }
   0x5   : > { %s2661_s2 = smov (%p30_p1, %s28_s2), 0  ;;  %p313_p3 = pnand %p1775_p0, %p312_p2 }
   0x6   : > { %p400_p4 = scmp.lt.s32.totalorder (!%p313_p3), %s2175_s21, 1 }
   0x7   : > { %316 = sbr.rel (%p313_p3) target bundleno = 308 (0x134), region = 44 }
   0xc   : > { %v2128_v0 = vld [vmem:[%s2650_s3 + $0x38] sm:$0xff]   ;;  %v2129_v1 = vld [vmem:[%s2650_s3 + $0x30] sm:$0xff]   ;;  %s2663_s21 = smov (!%p400_p4, %s2175_s21), 1  ;;  %v2185_v2 = vmov 0   ;;  %v2255_v5 = vld [vmem:[%s2650_s3 + $0x8] sm:$0xff]   ;;  %vm576_vm0 = vcmask 1040384  }
   0xd   : > { %2099 = vmatprep.subr.bf16.mxu1 %v2128_v0  ;;  %1991 = vmatprep.subr.bf16.mxu0 %v2128_v0  ;;  %v2247_v3 = vcombine.low %v2185_v2, %v2185_v2  ;;  %s2249_s27 = sshll.u32 %s2663_s21, 5  ;;  %v2260_v6 = vld [vmem:[%s2650_s3 + $0x68] sm:$0xff]   ;;  %vm577_vm1 = vsmask.f32 256  ;;  %vm630_vm2 = vcmask 261120   ;;  %vm1235_vm4 = vcmask 1043456  }
   0xe   : > { %2101 = vmatpush3.bf16.msra.mxu1 %v2128_v0  ;;  %1992 = vmatpush3.bf16.msra.mxu0 %v2128_v0  ;;  %s2266_s10 = scalar_lea.vmem %s2648_s1, %s2249_s27  ;;  %vm2324_vm3 = vmand %vm576_vm0, %vm577_vm1  ;;  %v2145_v30 = vld [vmem:[%s2650_s3 + $0x48] sm:$0xff]   ;;  %vm1236_vm5 = vsmask.f32 3328  ;;  %s2588_s19 = scalar_lea.vmem %s2652_s5, %s2249_s27  ;;  %vm1621_vm7 = vcmask 257024  }
   0xf   : > { %2100 = vmatprep.subr.bf16.mxu1 %v2129_v1  ;;  %1993 = vmatprep.subr.bf16.mxu0 %v2129_v1  ;;  %v497_v4 = vshrl.u32 %v2247_v3, 16  ;;  %v2269_v7 = vld [vmem:[%s2266_s10] sm:$0xf]  ;;  %v2272_v8 = vld [vmem:[%s2266_s10 + $0x4] sm:$0xf]  ;;  %v500_v15 = vshll.u32 %v2247_v3, 16  ;;  %vm2464_vm6 = vmand %vm1235_vm4, %vm1236_vm5  ;;  %s2610_s25 = scalar_lea.vmem %s2653_s6, %s2249_s27 }
  0x10   : > { %v2275_v9 = vld [vmem:[%s2266_s10 + $0x8] sm:$0xf]  ;;  %v2278_v10 = vld [vmem:[%s2266_s10 + $0x1c] sm:$0xf]  ;;  %v2282_v11 = vcombine.low %v2269_v7, %v2269_v7  ;;  %v2286_v12 = vcombine.low %v2272_v8, %v2272_v8  ;;  %v2303_v19 = vld [vmem:[%s2266_s10 + $0xc] sm:$0xf] }
  0x11   : > { %v2290_v13 = vcombine.low %v2275_v9, %v2275_v9  ;;  %v2294_v14 = vcombine.low %v2278_v10, %v2278_v10  ;;  %v2306_v20 = vld [vmem:[%s2266_s10 + $0x10] sm:$0xf]  ;;  %v499_v21 = vrot.slane %v497_v4, 7  ;;  %v2318_v27 = vld [vmem:[%s2266_s10 + $0x14] sm:$0xf]  ;;  %v2341_v36 = vcombine.low %v2303_v19, %v2303_v19 }
  0x12   : > { %2102 = vmatpush3.bf16.msra.mxu1 %v2129_v1  ;;  %1994 = vmatpush3.bf16.msra.mxu0 %v2129_v1  ;;  %v504_v16 = vshrl.u32 %v2282_v11, 16  ;;  %v507_v17 = vshll.u32 %v2282_v11, 16  ;;  %v511_v18 = vshrl.u32 %v2286_v12, 16  ;;  %v514_v22 = vshll.u32 %v2286_v12, 16  ;;  %v2329_v31 = vld [vmem:[%s2266_s10 + $0x18] sm:$0xf] }
  0x13   : > { %2003 = vmatprep.subr.bf16.mxu1 %v2255_v5  ;;  %2015 = vmatprep.subr.bf16.mxu0 %v2260_v6  ;;  %v518_v23 = vshrl.u32 %v2290_v13, 16  ;;  %v553_v24 = vshrl.u32 %v2294_v14, 16  ;;  %v521_v28 = vshll.u32 %v2290_v13, 16  ;;  %v556_v29 = vshll.u32 %v2294_v14, 16 }
  0x14   : > { %v506_v25 = vrot.slane %v504_v16, 7  ;;  %v513_v26 = vrot.slane %v511_v18, 7  ;;  %v2345_v37 = vcombine.low %v2306_v20, %v2306_v20  ;;  %v2353_v40 = vcombine.low %v2318_v27, %v2318_v27 }
  0x15   : > { %v520_v34 = vrot.slane %v518_v23, 7  ;;  %v555_v35 = vrot.slane %v553_v24, 7  ;;  %v2357_v41 = vcombine.low %v2329_v31, %v2329_v31  ;;  %v502_v43 = vor.u32 %v500_v15, %v499_v21 }
  0x16   : > { %v509_v32 = vor.u32 %v507_v17, %v506_v25  ;;  %v516_v33 = vor.u32 %v514_v22, %v513_v26  ;;  %v525_v46 = vshrl.u32 %v2341_v36, 16  ;;  %v528_v47 = vshll.u32 %v2341_v36, 16  ;;  %v2143_v25 = vld [vmem:[%s2650_s3 + $0x60] sm:$0xff]  }
  0x17   : > { %v523_v44 = vor.u32 %v521_v28, %v520_v34  ;;  %v558_v45 = vor.u32 %v556_v29, %v555_v35  ;;  %v532_v48 = vshrl.u32 %v2345_v37, 16  ;;  %v535_v49 = vshll.u32 %v2345_v37, 16 }
  0x18   : > { %v580_v38 = vsel %vm2324_vm3, 0, %v509_v32  ;;  %v581_v39 = vsel %vm2324_vm3, 0, %v516_v33  ;;  %v539_v50 = vshrl.u32 %v2353_v40, 16  ;;  %v542_v51 = vshll.u32 %v2353_v40, 16 }
  0x19   : > { %v1800_v42 = vcombine.low %v580_v38, %v581_v39  ;;  %v546_v52 = vshrl.u32 %v2357_v41, 16  ;;  %v527_v53 = vrot.slane %v525_v46, 7  ;;  %v534_v54 = vrot.slane %v532_v48, 7 }
  0x1a   : > { %v549_v55 = vshll.u32 %v2357_v41, 16  ;;  %v541_v56 = vrot.slane %v539_v50, 7  ;;  %v582_v58 = vsel %vm2324_vm3, 0, %v523_v44  ;;  %v579_v61 = vsel %vm2324_vm3, 0, %v502_v43  ;;  %v2142_v44 = vld [vmem:[%s2650_s3] sm:$0xff]  }
  0x1b   : > { %1995 = vmatprep.mubr.msk.bf16.mxu0 %vm630_vm2, %v1800_v42  ;;  %v548_v57 = vrot.slane %v546_v52, 7  ;;  %v530_v59 = vor.u32 %v528_v47, %v527_v53  ;;  %v537_v60 = vor.u32 %v535_v49, %v534_v54  ;;  %v587_v62 = vsel %vm2324_vm3, 0, %v558_v45  ;;  %v2147_v45 = vld [vmem:[%s2650_s3 + $0x40] sm:$0xff]   ;;  %v2150_v53 = vld [vmem:[%s2650_s3 + $0x28] sm:$0xff]  }
  0x1c   : > { %v544_v63 = vor.u32 %v542_v51, %v541_v56  ;;  %v1810_v34 = vcombine.low %v579_v61, %v580_v38  ;;  %v1811_v43 = vcombine.low %v581_v39, %v582_v58  ;;  %v2144_v39 = vld [vmem:[%s2650_s3 + $0x18] sm:$0xff]   ;;  %v1824_v54 = vcombine.low %v587_v62, %v579_v61 }
  0x1d   : > { %v551_v0 = vor.u32 %v549_v55, %v548_v57  ;;  %v583_v1 = vsel %vm2324_vm3, 0, %v530_v59  ;;  %v584_v21 = vsel %vm2324_vm3, 0, %v537_v60  ;;  %v2149_v56 = vld [vmem:[%s2650_s3 + $0x78] sm:$0xff]   ;;  %v1849_v57 = vcombine.low %v2269_v7, %v2272_v8 }
  0x1e   : > { %v585_v26 = vsel %vm2324_vm3, 0, %v544_v63  ;;  %v1801_v33 = vcombine.low %v582_v58, %v583_v1  ;;  %v1812_v38 = vcombine.low %v583_v1, %v584_v21  ;;  %v1835_v58 = vcombine.low %v2185_v2, %v2269_v7 }
  0x1f   : > { %v586_v32 = vsel %vm2324_vm3, 0, %v551_v0  ;;  %v1802_v35 = vcombine.low %v584_v21, %v585_v26  ;;  %v1205_v59 = vrot.slane %v500_v15, 1  ;;  %v1207_v60 = vrot.slane %v507_v17, 1  ;;  %v2156_v15 = vld [vmem:[%s2650_s3 + $0x20] sm:$0xff]  }
  0x20   : > { %v1803_v42 = vcombine.low %v586_v32, %v587_v62  ;;  %1996 = vmatmul.mubr.msk.bf16.vlgmr.msra.gmra.mxu0 %vm630_vm2, %v1801_v33  ;;  %v1850_v7 = vcombine.low %v2275_v9, %v2303_v19  ;;  %v1851_v61 = vcombine.low %v2306_v20, %v2318_v27  ;;  %v1836_v62 = vcombine.low %v2272_v8, %v2275_v9  ;;  %v2153_v8 = vld [vmem:[%s2650_s3 + $0x70] sm:$0xff]  }
  0x21   : > { %1999 = vmatprep.mubr.msk.bf16.mxu1 %vm630_vm2, %v1802_v35  ;;  %2016 = vmatpush3.bf16.msra.mxu0 %v2260_v6  ;;  %v1813_v6 = vcombine.low %v585_v26, %v586_v32  ;;  %v1206_v17 = vor.u32 %v1205_v59, %v497_v4  ;;  %v1208_v63 = vor.u32 %v1207_v60, %v504_v16  ;;  %v1209_v3 = vrot.slane %v514_v22, 1 }
  0x22   : > { %2000 = vmatmul.mubr.msk.bf16.vlgmr.msra.gmra.mxu1 %vm630_vm2, %v1803_v42  ;;  %2017 = vmatprep.subr.bf16.mxu0 %v2143_v25  ;;  %v1837_v1 = vcombine.low %v2303_v19, %v2306_v20  ;;  %v1211_v4 = vrot.slane %v521_v28, 1  ;;  %v1213_v9 = vrot.slane %v528_v47, 1  ;;  %v1215_v11 = vrot.slane %v535_v49, 1  ;;  %v2158_v20 = vld [vmem:[%s2650_s3 + $0x88] sm:$0xff]   ;;  %v2157_v28 = vld [vmem:[%s2650_s3 + $0x58] sm:$0xff]  }
  0x23   : > { %2004 = vmatpush3.bf16.msra.mxu1 %v2255_v5  ;;  %2007 = vmatprep.mubr.msk.bf16.mxu1 %vm630_vm2, %v1810_v34  ;;  %v2146_v5 = vld [vmem:[%s2650_s3 + $0x10] sm:$0xff]   ;;  %v2486_v16 = vsel %vm2464_vm6, %v1206_v17, 0  ;;  %v1239_v19 = vsel %vm2464_vm6, %v1208_v63, 0  ;;  %v1852_v22 = vcombine.low %v2329_v31, %v2278_v10  ;;  %v1210_v47 = vor.u32 %v1209_v3, %v511_v18 }
  0x24   : > { %2005 = vmatprep.subr.bf16.mxu1 %v2142_v44  ;;  %2019 = vmatprep.mubr.msk.bf16.mxu0 %vm630_vm2, %v1811_v43  ;;  %v1212_v49 = vor.u32 %v1211_v4, %v518_v23  ;;  %v1874_v21 = vcombine.low %v2486_v16, %v1239_v19  ;;  %v1214_v26 = vor.u32 %v1213_v9, %v525_v46  ;;  %v1217_v18 = vrot.slane %v542_v51, 1  ;;  %v2160_v51 = vld [vmem:[%s2650_s3 + $0x80] sm:$0xff]  }
  0x25   : > { %2018 = vmatpush3.bf16.msra.mxu0 %v2143_v25  ;;  %v1838_v25 = vcombine.low %v2318_v27, %v2329_v31  ;;  %v1216_v32 = vor.u32 %v1215_v11, %v532_v48  ;;  %v1240_v12 = vsel %vm2464_vm6, %v1210_v47, 0  ;;  %v1219_v23 = vrot.slane %v549_v55, 1  ;;  %v2159_v55 = vld [vmem:[%s2650_s3 + $0x50] sm:$0xff]  }
  0x26   : > { %2039 = vmatprep.subr.bf16.mxu0 %v2145_v30  ;;  %v1241_v13 = vsel %vm2464_vm6, %v1212_v49, 0  ;;  %v1242_v27 = vsel %vm2464_vm6, %v1214_v26, 0  ;;  %v1218_v46 = vor.u32 %v1217_v18, %v539_v50  ;;  %v1888_v33 = vcombine.low %v1239_v19, %v1240_v12 }
  0x27   : > { %2006 = vmatpush3.bf16.msra.mxu1 %v2142_v44  ;;  %v1243_v31 = vsel %vm2464_vm6, %v1216_v32, 0  ;;  %v1875_v36 = vcombine.low %v1240_v12, %v1241_v13  ;;  %v1220_v48 = vor.u32 %v1219_v23, %v546_v52  ;;  %v1863_v52 = vcombine.low %v2278_v10, %v2185_v2 }
  0x28   : > { %2027 = vmatprep.subr.bf16.mxu1 %v2144_v39  ;;  %2020 = vmatmul.mubr.msk.bf16.vlgmr.msra.gmra.mxu0 %vm630_vm2, %v1812_v38  ;;  %v1876_v37 = vcombine.low %v1242_v27, %v1243_v31  ;;  %v1244_v40 = vsel %vm2464_vm6, %v1218_v46, 0  ;;  %v1221_v34 = vrot.slane %v556_v29, 1  ;;  %v1889_v42 = vcombine.low %v1241_v13, %v1242_v27 }
  0x29   : > { %2040 = vmatpush3.bf16.msra.mxu0 %v2145_v30  ;;  %2023 = vmatprep.mubr.msk.bf16.mxu0 %vm630_vm2, %v1813_v6  ;;  %v1245_v41 = vsel %vm2464_vm6, %v1220_v48, 0 }
  0x2a   : > { %2008 = vmatmul.mubr.msk.bf16.vlgmr.msra.gmra.mxu1 %vm630_vm2, %v1811_v43  ;;  %2041 = vmatprep.subr.bf16.mxu0 %v2147_v45  ;;  %v1877_v50 = vcombine.low %v1244_v40, %v1245_v41  ;;  %v1222_v35 = vor.u32 %v1221_v34, %v553_v24  ;;  %v1890_v43 = vcombine.low %v1243_v31, %v1244_v40 }
  0x2b   : > { %2028 = vmatpush3.bf16.msra.mxu1 %v2144_v39  ;;  %2011 = vmatprep.mubr.msk.bf16.mxu1 %vm630_vm2, %v1812_v38 }
  0x2c   : > { %2029 = vmatprep.subr.bf16.mxu1 %v2146_v5  ;;  %v1246_v2 = vsel %vm2464_vm6, %v1222_v35, 0 }
  0x2d   : > { %2042 = vmatpush3.bf16.msra.mxu0 %v2147_v45  ;;  %v1902_v10 = vcombine.low %v1246_v2, %v2486_v16  ;;  %v1891_v29 = vcombine.low %v1245_v41, %v1246_v2 }
  0x2e   : > { %2063 = vmatprep.subr.bf16.mxu0 %v2150_v53 }
  0x2f   : > { %2030 = vmatpush3.bf16.msra.mxu1 %v2146_v5 }
  0x30   : > { %2024 = vmatmul.mubr.msk.bf16.gmra.mxu0 %vm630_vm2, %v1824_v54  ;;  %2051 = vmatprep.subr.bf16.mxu1 %v2149_v56 }
  0x31   : > { %2043 = vmatprep.mubr.msk.bf16.mxu0 %vm630_vm2, %v1849_v57 }
  0x32   : > { %2012 = vmatmul.mubr.msk.bf16.gmra.mxu1 %vm630_vm2, %v1813_v6 }
  0x33   : > { %2031 = vmatprep.mubr.msk.bf16.mxu1 %vm630_vm2, %v1835_v58 }
  0x38   : > { %2044 = vmatmul.mubr.msk.bf16.vlgmr.msra.gmra.mxu0 %vm630_vm2, %v1850_v7 }
  0x39   : > { %2064 = vmatpush3.bf16.msra.mxu0 %v2150_v53  ;;  %2047 = vmatprep.mubr.msk.bf16.mxu0 %vm630_vm2, %v1851_v61 }
  0x3a   : > { %2032 = vmatmul.mubr.msk.bf16.vlgmr.msra.gmra.mxu1 %vm630_vm2, %v1836_v62  ;;  %2065 = vmatprep.subr.bf16.mxu0 %v2156_v15 }
  0x3b   : > { %2052 = vmatpush3.bf16.msra.mxu1 %v2149_v56  ;;  %2035 = vmatprep.mubr.msk.bf16.mxu1 %vm630_vm2, %v1837_v1 }
  0x3c   : > { %2053 = vmatprep.subr.bf16.mxu1 %v2153_v8 }
  0x3d   : > { %2066 = vmatpush3.bf16.msra.mxu0 %v2156_v15 }
  0x3e   : > { %2087 = vmatprep.subr.bf16.mxu0 %v2158_v20 }
  0x3f   : > { %2054 = vmatpush3.bf16.msra.mxu1 %v2153_v8 }
  0x40   : > { %2048 = vmatmul.mubr.msk.bf16.gmra.mxu0 %vm630_vm2, %v1852_v22  ;;  %2075 = vmatprep.subr.bf16.mxu1 %v2157_v28 }
  0x41   : > { %2067 = vmatprep.mubr.msk.bf16.mxu0 %vm630_vm2, %v1874_v21 }
  0x42   : > { %2036 = vmatmul.mubr.msk.bf16.gmra.mxu1 %vm630_vm2, %v1838_v25 }
  0x43   : > { %2055 = vmatprep.mubr.msk.bf16.mxu1 %vm630_vm2, %v1836_v62 }
  0x48   : > { %2068 = vmatmul.mubr.msk.bf16.vlgmr.msra.gmra.mxu0 %vm630_vm2, %v1875_v36 }
  0x49   : > { %2088 = vmatpush3.bf16.msra.mxu0 %v2158_v20  ;;  %2071 = vmatprep.mubr.msk.bf16.mxu0 %vm630_vm2, %v1876_v37 }
  0x4a   : > { %2056 = vmatmul.mubr.msk.bf16.vlgmr.msra.gmra.mxu1 %vm630_vm2, %v1837_v1  ;;  %2089 = vmatprep.subr.bf16.mxu0 %v2160_v51 }
  0x4b   : > { %2076 = vmatpush3.bf16.msra.mxu1 %v2157_v28  ;;  %2059 = vmatprep.mubr.msk.bf16.mxu1 %vm630_vm2, %v1838_v25 }
  0x4c   : > { %2077 = vmatprep.subr.bf16.mxu1 %v2159_v55 }
  0x4d   : > { %2090 = vmatpush3.bf16.msra.mxu0 %v2160_v51 }
  0x4f   : > { %2078 = vmatpush3.bf16.msra.mxu1 %v2159_v55 }
  0x50   : > { %2072 = vmatmul.mubr.msk.bf16.gmra.mxu0 %vm630_vm2, %v1877_v50 }
  0x51   : > { %2091 = vmatprep.mubr.msk.bf16.mxu0 %vm630_vm2, %v1875_v36 }
  0x52   : > { %2060 = vmatmul.mubr.msk.bf16.gmra.mxu1 %vm630_vm2, %v1863_v52 }
  0x53   : > { %2079 = vmatprep.mubr.msk.bf16.mxu1 %vm630_vm2, %v1888_v33 }
  0x58   : > { %2092 = vmatmul.mubr.msk.bf16.vlgmr.msra.gmra.mxu0 %vm630_vm2, %v1876_v37 }
  0x59   : > { %2095 = vmatprep.mubr.msk.bf16.mxu0 %vm630_vm2, %v1877_v50 }
  0x5a   : > { %2080 = vmatmul.mubr.msk.bf16.vlgmr.msra.gmra.mxu1 %vm630_vm2, %v1889_v42 }
  0x5b   : > { %2083 = vmatprep.mubr.msk.bf16.mxu1 %vm630_vm2, %v1890_v43 }
  0x60   : > { %2096 = vmatmul.mubr.msk.bf16.gmra.mxu0 %vm630_vm2, %v1902_v10 }
  0x62   : > { %2084 = vmatmul.mubr.msk.bf16.gmra.mxu1 %vm630_vm2, %v1891_v29 }
  0xe0   : > { %v1997_v14 = vpop.f32.mrf.mxu0 }
  0xe2   : > { %v2001_v24 = vpop.f32.mrf.mxu1  ;;  %v677_v44 = vpop.f32.mrf.mxu0 }
  0xe4   : > { %v693_v30 = vpop.f32.mrf.mxu1  ;;  %v1998_v38 = vpop.f32.mrf.mxu0 }
  0xe6   : > { %v2002_v39 = vpop.f32.mrf.mxu1  ;;  %v680_v6 = vpop.f32.mrf.mxu0 }
  0xe8   : > { %v2563_v45 = vpop.f32.mrf.mxu1  ;;  %v2021_v5 = vpop.f32.mrf.mxu0 }
  0xea   : > { %v2009_v53 = vpop.f32.mrf.mxu1  ;;  %v860_v54 = vpop.f32.mrf.mxu0 }
  0xeb   : > { %v781_v13 = vadd.f32 %v2009_v53, %v1997_v14 }
  0xec   : > { %v772_v56 = vpop.f32.mrf.mxu1  ;;  %v2022_v57 = vpop.f32.mrf.mxu0 }
  0xed   : > { %v773_v27 = vadd.f32 %v772_v56, %v677_v44  ;;  %v893_v37 = vadd.f32 %v2021_v5, %v781_v13 }
  0xee   : > { %v2010_v58 = vpop.f32.mrf.mxu1  ;;  %v863_v59 = vpop.f32.mrf.mxu0 }
  0xef   : > { %v784_v46 = vadd.f32 %v2010_v58, %v1998_v38  ;;  %v891_v55 = vadd.f32 %v860_v54, %v773_v27 }
  0xf0   : > { %v775_v60 = vpop.f32.mrf.mxu1  ;;  %v2025_v7 = vpop.f32.mrf.mxu0 }
  0xf1   : > { %v776_v40 = vadd.f32 %v775_v60, %v680_v6  ;;  %v894_v33 = vadd.f32 %v2022_v57, %v784_v46 }
  0xf2   : > { %v2013_v61 = vpop.f32.mrf.mxu1  ;;  %v876_v62 = vpop.f32.mrf.mxu0 }
  0xf3   : > { %v797_v35 = vadd.f32 %v2013_v61, %v2001_v24  ;;  %v892_v10 = vadd.f32 %v863_v59, %v776_v40 }
  0xf4   : > { %v788_v15 = vpop.f32.mrf.mxu1  ;;  %v2026_v17 = vpop.f32.mrf.mxu0 }
  0xf5   : > { %v789_v42 = vadd.f32 %v788_v15, %v693_v30  ;;  %v897_v56 = vadd.f32 %v2025_v7, %v797_v35 }
  0xf6   : > { %v2014_v63 = vpop.f32.mrf.mxu1  ;;  %v2565_v0 = vpop.f32.mrf.mxu0 }
  0xf7   : > { %v800_v44 = vadd.f32 %v2014_v63, %v2002_v39  ;;  %v895_v58 = vadd.f32 %v876_v62, %v789_v42 }
  0xf8   : > { %v791_v1 = vpop.f32.mrf.mxu1  ;;  %v2045_v8 = vpop.f32.mrf.mxu0 }
  0xf9   : > { %v792_v57 = vadd.f32 %v791_v1, %v2563_v45  ;;  %v898_v39 = vadd.f32 %v2026_v17, %v800_v44 }
  0xfa   : > { %v2033_v3 = vpop.f32.mrf.mxu1  ;;  %v1072_v4 = vpop.f32.mrf.mxu0 }
  0xfb   : > { %v999_v41 = vadd.f32 %v2033_v3, %v893_v37  ;;  %v896_v1 = vadd.f32 %v2565_v0, %v792_v57  ;;  %v1936_v57 = vld [vmem:[%s2588_s19 + $0x18] sm:$0xff]  }
  0xfc   : > { %v966_v9 = vpop.f32.mrf.mxu1  ;;  %v2046_v11 = vpop.f32.mrf.mxu0 }
  0xfd   : > { %v997_v34 = vadd.f32 %v966_v9, %v891_v55  ;;  %v1105_v29 = vadd.f32 %v2045_v8, %v999_v41  ;;  %v1934_v9 = vld [vmem:[%s2588_s19 + $0x8] sm:$0xff]  }
  0xfe   : > { %v2034_v16 = vpop.f32.mrf.mxu1  ;;  %v1075_v19 = vpop.f32.mrf.mxu0 }
  0xff   : > { %v1000_v14 = vadd.f32 %v2034_v16, %v894_v33  ;;  %v1103_v6 = vadd.f32 %v1072_v4, %v997_v34 }
 0x100   : > { %v969_v20 = vpop.f32.mrf.mxu1  ;;  %v2567_v22 = vpop.f32.mrf.mxu0 }
 0x101   : > { %v998_v53 = vadd.f32 %v969_v20, %v892_v10  ;;  %v1106_v60 = vadd.f32 %v2046_v11, %v1000_v14 }
 0x102   : > { %v2037_v28 = vpop.f32.mrf.mxu1  ;;  %v2569_v47 = vpop.f32.mrf.mxu0 }
 0x103   : > { %v1003_v59 = vadd.f32 %v2037_v28, %v897_v56  ;;  %v1104_v62 = vadd.f32 %v1075_v19, %v998_v53  ;;  %v2598_v19 = vld [vmem:[%s2651_s4] ss:$0 sm:$0xff] }
 0x104   : > { %v982_v49 = vpop.f32.mrf.mxu1  ;;  %v2571_v21 = vpop.f32.mrf.mxu0 }
 0x105   : > { %v1001_v15 = vadd.f32 %v982_v49, %v895_v58  ;;  %v1109_v17 = vadd.f32 %v2567_v22, %v1003_v59 }
 0x106   : > { %v2038_v25 = vpop.f32.mrf.mxu1  ;;  %v2573_v26 = vpop.f32.mrf.mxu0 }
 0x107   : > { %v1004_v3 = vadd.f32 %v2038_v25, %v898_v39  ;;  %v1107_v28 = vadd.f32 %v2569_v47, %v1001_v15 }
 0x108   : > { %v985_v32 = vpop.f32.mrf.mxu1  ;;  %v2069_v12 = vpop.f32.mrf.mxu0 }
 0x109   : > { %v1002_v49 = vadd.f32 %v985_v32, %v896_v1 }
 0x10a   : > { %v2057_v18 = vpop.f32.mrf.mxu1  ;;  %v1331_v23 = vpop.f32.mrf.mxu0 }
 0x10b   : > { %v1199_v54 = vadd.f32 %v2057_v18, %v1105_v29  ;;  %v1919_v18 = vld [vmem:[%s2588_s19] sm:$0xff]   ;;  %v1108_v33 = vadd.f32 %v2573_v26, %v1002_v49 }
 0x10c   : > { %v1166_v31 = vpop.f32.mrf.mxu1  ;;  %v2070_v36 = vpop.f32.mrf.mxu0  ;;  %v1920_v55 = vunpack.c.l.bf16 %v1919_v18  ;;  %v1921_v26 = vunpack.c.h.bf16 %v1919_v18 }
 0x10d   : > { %v1197_v61 = vadd.f32 %v1166_v31, %v1103_v6  ;;  %v1364_v8 = vadd.f32 %v2069_v12, %v1199_v54  ;;  %v1924_v31 = vunpack.c.l.bf16 %v1934_v9 }
 0x10e   : > { %v2058_v48 = vpop.f32.mrf.mxu1  ;;  %v1334_v51 = vpop.f32.mrf.mxu0 }
 0x10f   : > { %v1200_v45 = vadd.f32 %v2058_v48, %v1106_v60  ;;  %v1362_v16 = vadd.f32 %v1331_v23, %v1197_v61  ;;  %v1110_v23 = vadd.f32 %v2571_v21, %v1004_v3 }
 0x110   : > { %v1169_v50 = vpop.f32.mrf.mxu1  ;;  %v2575_v52 = vpop.f32.mrf.mxu0 }
 0x111   : > { %v1198_v20 = vadd.f32 %v1169_v50, %v1104_v62  ;;  %v1365_v25 = vadd.f32 %v2070_v36, %v1200_v45  ;;  %v1925_v36 = vunpack.c.h.bf16 %v1934_v9  ;;  %v1932_v62 = vunpack.c.l.bf16 %v1936_v57 }
 0x112   : > { %v2061_v43 = vpop.f32.mrf.mxu1  ;;  %v2577_v2 = vpop.f32.mrf.mxu0 }
 0x113   : > { %v1203_v46 = vadd.f32 %v2061_v43, %v1109_v17  ;;  %v1363_v47 = vadd.f32 %v1334_v51, %v1198_v20 }
 0x114   : > { %v1182_v38 = vpop.f32.mrf.mxu1  ;;  %v2579_v5 = vpop.f32.mrf.mxu0 }
 0x115   : > { %v1201_v48 = vadd.f32 %v1182_v38, %v1107_v28  ;;  %v1368_v51 = vadd.f32 %v2575_v52, %v1203_v46  ;;  %v1935_v52 = vld [vmem:[%s2588_s19 + $0x10] sm:$0xff]  }
 0x116   : > { %v2062_v24 = vpop.f32.mrf.mxu1  ;;  %v2582_v30 = vpop.f32.mrf.mxu0 }
 0x117   : > { %v1204_v34 = vadd.f32 %v2062_v24, %v1110_v23  ;;  %v1366_v14 = vadd.f32 %v2577_v2, %v1201_v48 }
 0x118   : > { %v1185_v63 = vpop.f32.mrf.mxu1  ;;  %v2093_v7 = vpop.f32.mrf.mxu0 }
 0x119   : > { %v1202_v44 = vadd.f32 %v1185_v63, %v1108_v33  ;;  %v1369_v2 = vadd.f32 %v2579_v5, %v1204_v34 }
 0x11a   : > { %v2081_v4 = vpop.f32.mrf.mxu1  ;;  %v1535_v11 = vpop.f32.mrf.mxu0 }
 0x11b   : > { %v1472_v13 = vadd.f32 %v2081_v4, %v1364_v8  ;;  %v1367_v63 = vadd.f32 %v2582_v30, %v1202_v44  ;;  %v1928_v8 = vunpack.c.l.bf16 %v1935_v52 }
 0x11c   : > { %v1439_v12 = vpop.f32.mrf.mxu1  ;;  %v2094_v0 = vpop.f32.mrf.mxu0 }
 0x11d   : > { %v1568_v27 = vadd.f32 %v2093_v7, %v1472_v13  ;;  %v1470_v37 = vadd.f32 %v1439_v12, %v1362_v16  ;;  %v1933_v16 = vunpack.c.h.bf16 %v1936_v57 }
 0x11e   : > { %v2082_v22 = vpop.f32.mrf.mxu1  ;;  %v1538_v40 = vpop.f32.mrf.mxu0 }
 0x11f   : > { %v1583_v32 = vadd.f32 %v2598_v19, %v1568_v27  ;;  %v1566_v41 = vadd.f32 %v1535_v11, %v1470_v37  ;;  %v1473_v50 = vadd.f32 %v2082_v22, %v1365_v25  ;;  %v1929_v27 = vunpack.c.h.bf16 %v1935_v52 }
 0x120   : > { %v1442_v35 = vpop.f32.mrf.mxu1  ;;  %v2097_v42 = vpop.f32.mrf.mxu0 }
 0x121   : > { %v1607_v21 = vadd.f32 %v1924_v31, %v1583_v32  ;;  %v1581_v43 = vadd.f32 %v2598_v19, %v1566_v41  ;;  %v1569_v10 = vadd.f32 %v2094_v0, %v1473_v50  ;;  %v1471_v29 = vadd.f32 %v1442_v35, %v1363_v47 }
 0x122   : > { %v2085_v38 = vpop.f32.mrf.mxu1  ;;  %v1551_v6 = vpop.f32.mrf.mxu0 }
 0x123   : > { %v1615_v53 = vpack.c.bf16 %v1607_v21, %v1607_v21  ;;  %v1605_v54 = vadd.f32 %v1920_v55, %v1581_v43  ;;  %v1584_v56 = vadd.f32 %v2598_v19, %v1569_v10  ;;  %v1567_v58 = vadd.f32 %v1538_v40, %v1471_v29 }
 0x124   : > { %v1476_v24 = vadd.f32 %v2085_v38, %v1368_v51  ;;  %v1455_v60 = vpop.f32.mrf.mxu1  ;;  %v2098_v1 = vpop.f32.mrf.mxu0 }
 0x125   : > { %1624 = vst.msk [vmem:[%s2610_s25 + $0x8] sm:$0xf] %vm1621_vm7, %v1615_v53  ;;  %v1613_v61 = vpack.c.bf16 %v1605_v54, %v1605_v54  ;;  %v1608_v39 = vadd.f32 %v1925_v36, %v1584_v56  ;;  %v1582_v59 = vadd.f32 %v2598_v19, %v1567_v58  ;;  %v1474_v15 = vadd.f32 %v1455_v60, %v1366_v14 }
 0x126   : > { %v1572_v7 = vadd.f32 %v2097_v42, %v1476_v24  ;;  %v2086_v45 = vpop.f32.mrf.mxu1  ;;  %v1554_v49 = vpop.f32.mrf.mxu0 }
 0x127   : > { %1622 = vst.msk [vmem:[%s2610_s25] sm:$0xf] %vm1621_vm7, %v1613_v61  ;;  %v1616_v5 = vpack.c.bf16 %v1608_v39, %v1608_v39  ;;  %v1606_v3 = vadd.f32 %v1921_v26, %v1582_v59  ;;  %v1570_v4 = vadd.f32 %v1551_v6, %v1474_v15  ;;  %v1477_v9 = vadd.f32 %v2086_v45, %v1369_v2 }
 0x128   : > { %v1587_v11 = vadd.f32 %v2598_v19, %v1572_v7  ;;  %v1458_v20 = vpop.f32.mrf.mxu1 }
 0x129   : > { %1625 = vst.msk [vmem:[%s2610_s25 + $0xc] sm:$0xf] %vm1621_vm7, %v1616_v5  ;;  %v1614_v30 = vpack.c.bf16 %v1606_v3, %v1606_v3  ;;  %v1585_v13 = vadd.f32 %v2598_v19, %v1570_v4  ;;  %v1573_v18 = vadd.f32 %v2098_v1, %v1477_v9  ;;  %v1475_v17 = vadd.f32 %v1458_v20, %v1367_v63 }
 0x12a   : > { %v1611_v28 = vadd.f32 %v1932_v62, %v1587_v11 }
 0x12b   : > { %1623 = vst.msk [vmem:[%s2610_s25 + $0x4] sm:$0xf] %vm1621_vm7, %v1614_v30  ;;  %v1609_v12 = vadd.f32 %v1928_v8, %v1585_v13  ;;  %v1588_v0 = vadd.f32 %v2598_v19, %v1573_v18  ;;  %v1571_v25 = vadd.f32 %v1554_v49, %v1475_v17 }
 0x12c   : > { %v1619_v31 = vpack.c.bf16 %v1611_v28, %v1611_v28 }
 0x12d   : > { %v1617_v37 = vpack.c.bf16 %v1609_v12, %v1609_v12  ;;  %v1612_v23 = vadd.f32 %v1933_v16, %v1588_v0  ;;  %v1586_v46 = vadd.f32 %v2598_v19, %v1571_v25 }
 0x12e   : > { %1628 = vst.msk [vmem:[%s2610_s25 + $0x18] sm:$0xf] %vm1621_vm7, %v1619_v31 }
 0x12f   : > { %1626 = vst.msk [vmem:[%s2610_s25 + $0x10] sm:$0xf] %vm1621_vm7, %v1617_v37  ;;  %v1620_v48 = vpack.c.bf16 %v1612_v23, %v1612_v23  ;;  %v1610_v55 = vadd.f32 %v1929_v27, %v1586_v46 }
 0x131   : > { %1629 = vst.msk [vmem:[%s2610_s25 + $0x1c] sm:$0xf] %vm1621_vm7, %v1620_v48  ;;  %v1618_v22 = vpack.c.bf16 %v1610_v55, %v1610_v55 }
 0x133   : > { %1627 = vst.msk [vmem:[%s2610_s25 + $0x14] sm:$0xf] %vm1621_vm7, %v1618_v22 }
 0x134 PF: > { %s16_s22 = sadd.s32 1, %s2183_s22   ;;  %s2658_s21 = smov %s2179_s0 }
 0x135   : > { %p13_p5 = scmp.ge.s32.totalorder %s16_s22, 4   ;;  %s2659_s0 = smov %s2661_s2 }
 0x137   :  { %15 = sbr.rel (!%p13_p5) target bundleno = 2 (0x2), region = 91 }

// kernel: decoder_forward.93
= control target key start
LH: loop header
LB: loop body
LE: loop exit
PB: predicated region body
PF: predicated region fallthrough
CT: control target
= control target key end

     0   :  { %s2081_s18 = smov 0   ;;  %s2083_s19 = smov 0   ;;  %s2475_s0 = inlined_call_operand.vmem [shape: bf16[2,8,8,32], index: 0, kind: input, shape index: {}, may-alias: {0,1,2}]   ;;  %s2476_s1 = inlined_call_operand.vmem [shape: bf16[2,8,8,32], index: 1, kind: input, shape index: {}, may-alias: {0,1,2}]   ;;  %s2477_s2 = inlined_call_operand.vmem [shape: bf16[2,8,8,32], index: 2, kind: input, shape index: {}, may-alias: {0,1,2}]   ;;  %s2478_s3 = inlined_call_operand.vmem [shape: bf16[9,32,3], index: 3, kind: input, shape index: {}]   ;;  %s2479_s4 = inlined_call_operand.vmem [shape: f32[1,3], index: 4, kind: input, shape index: {}]   ;;  %s2480_s5 = inlined_call_operand.vmem [shape: f32[2,8,8,3], index: 5, kind: output, shape index: {}]  }
   0x1   :  { %s2085_s0 = smov 0  }
   0x2 LB: > { %s27_s2 = sadd.s32 1, %s2044_s19  ;;  %p1662_p0 = scmp.ge.s32.totalorder %s2048_s0, 1  ;;  %s2048_s0 = sphi %s2085_s0, %s15_s0   ;;  %s2044_s19 = sphi %s2083_s19, %s2486_s19   ;;  %s2040_s18 = sphi %s2081_s18, %s2485_s18  }
   0x3   : > { %p29_p1 = scmp.ge.s32.totalorder %s27_s2, 2  ;;  %p270_p2 = scmp.lt.s32.totalorder %s2048_s0, 3 }
   0x5   : > { %s2488_s2 = smov (%p29_p1, %s27_s2), 0  ;;  %p271_p3 = pnand %p1662_p0, %p270_p2 }
   0x6   : > { %p347_p4 = scmp.lt.s32.totalorder (!%p271_p3), %s2040_s18, 1 }
   0x7   : > { %274 = sbr.rel (%p271_p3) target bundleno = 304 (0x130), region = 40 }
   0xc   : > { %v1993_v0 = vld [vmem:[%s2478_s3 + $0x38] sm:$0xff]   ;;  %v1994_v1 = vld [vmem:[%s2478_s3 + $0x30] sm:$0xff]   ;;  %s2490_s18 = smov (!%p347_p4, %s2040_s18), 1  ;;  %v2050_v2 = vmov 0   ;;  %v2116_v5 = vld [vmem:[%s2478_s3 + $0x8] sm:$0xff]   ;;  %vm513_vm0 = vcmask 1040384  }
   0xd   : > { %1964 = vmatprep.subr.bf16.mxu1 %v1993_v0  ;;  %1856 = vmatprep.subr.bf16.mxu0 %v1993_v0  ;;  %v2109_v3 = vcombine.low %v2050_v2, %v2050_v2  ;;  %s1798_s24 = sshll.u32 %s2490_s18, 5  ;;  %v2121_v6 = vld [vmem:[%s2478_s3 + $0x68] sm:$0xff]   ;;  %vm514_vm1 = vsmask.f32 256  ;;  %vm567_vm2 = vcmask 261120   ;;  %vm1172_vm4 = vcmask 1043456  }
   0xe   : > { %1966 = vmatpush3.bf16.msra.mxu1 %v1993_v0  ;;  %1857 = vmatpush3.bf16.msra.mxu0 %v1993_v0  ;;  %s2126_s6 = scalar_lea.vmem %s2476_s1, %s1798_s24  ;;  %vm2184_vm3 = vmand %vm513_vm0, %vm514_vm1  ;;  %v2010_v30 = vld [vmem:[%s2478_s3 + $0x48] sm:$0xff]   ;;  %vm1173_vm5 = vsmask.f32 3328  ;;  %s1801_s12 = sshll.u32 %s2490_s18, 6  ;;  %vm1526_vm7 = vcmask 23552  }
   0xf   : > { %1965 = vmatprep.subr.bf16.mxu1 %v1994_v1  ;;  %1858 = vmatprep.subr.bf16.mxu0 %v1994_v1  ;;  %v434_v4 = vshrl.u32 %v2109_v3, 16  ;;  %v2129_v7 = vld [vmem:[%s2126_s6] sm:$0xf]  ;;  %v2132_v8 = vld [vmem:[%s2126_s6 + $0x4] sm:$0xf]  ;;  %v437_v15 = vshll.u32 %v2109_v3, 16  ;;  %vm2324_vm6 = vmand %vm1172_vm4, %vm1173_vm5  ;;  %s2445_s17 = scalar_lea.vmem %s2480_s5, %s1801_s12 }
  0x10   : > { %v2135_v9 = vld [vmem:[%s2126_s6 + $0x8] sm:$0xf]  ;;  %v2138_v10 = vld [vmem:[%s2126_s6 + $0x1c] sm:$0xf]  ;;  %v2142_v11 = vcombine.low %v2129_v7, %v2129_v7  ;;  %v2146_v12 = vcombine.low %v2132_v8, %v2132_v8  ;;  %v2163_v19 = vld [vmem:[%s2126_s6 + $0xc] sm:$0xf] }
  0x11   : > { %v2150_v13 = vcombine.low %v2135_v9, %v2135_v9  ;;  %v2154_v14 = vcombine.low %v2138_v10, %v2138_v10  ;;  %v2166_v20 = vld [vmem:[%s2126_s6 + $0x10] sm:$0xf]  ;;  %v436_v21 = vrot.slane %v434_v4, 7  ;;  %v2178_v27 = vld [vmem:[%s2126_s6 + $0x14] sm:$0xf]  ;;  %v2201_v36 = vcombine.low %v2163_v19, %v2163_v19 }
  0x12   : > { %1967 = vmatpush3.bf16.msra.mxu1 %v1994_v1  ;;  %1859 = vmatpush3.bf16.msra.mxu0 %v1994_v1  ;;  %v441_v16 = vshrl.u32 %v2142_v11, 16  ;;  %v444_v17 = vshll.u32 %v2142_v11, 16  ;;  %v448_v18 = vshrl.u32 %v2146_v12, 16  ;;  %v451_v22 = vshll.u32 %v2146_v12, 16  ;;  %v2189_v31 = vld [vmem:[%s2126_s6 + $0x18] sm:$0xf] }
  0x13   : > { %1868 = vmatprep.subr.bf16.mxu1 %v2116_v5  ;;  %1880 = vmatprep.subr.bf16.mxu0 %v2121_v6  ;;  %v455_v23 = vshrl.u32 %v2150_v13, 16  ;;  %v490_v24 = vshrl.u32 %v2154_v14, 16  ;;  %v458_v28 = vshll.u32 %v2150_v13, 16  ;;  %v493_v29 = vshll.u32 %v2154_v14, 16 }
  0x14   : > { %v443_v25 = vrot.slane %v441_v16, 7  ;;  %v450_v26 = vrot.slane %v448_v18, 7  ;;  %v2205_v37 = vcombine.low %v2166_v20, %v2166_v20  ;;  %v2213_v40 = vcombine.low %v2178_v27, %v2178_v27 }
  0x15   : > { %v457_v34 = vrot.slane %v455_v23, 7  ;;  %v492_v35 = vrot.slane %v490_v24, 7  ;;  %v2217_v41 = vcombine.low %v2189_v31, %v2189_v31  ;;  %v439_v43 = vor.u32 %v437_v15, %v436_v21 }
  0x16   : > { %v446_v32 = vor.u32 %v444_v17, %v443_v25  ;;  %v453_v33 = vor.u32 %v451_v22, %v450_v26  ;;  %v462_v46 = vshrl.u32 %v2201_v36, 16  ;;  %v465_v47 = vshll.u32 %v2201_v36, 16  ;;  %v2008_v25 = vld [vmem:[%s2478_s3 + $0x60] sm:$0xff]  }
  0x17   : > { %v460_v44 = vor.u32 %v458_v28, %v457_v34  ;;  %v495_v45 = vor.u32 %v493_v29, %v492_v35  ;;  %v469_v48 = vshrl.u32 %v2205_v37, 16  ;;  %v472_v49 = vshll.u32 %v2205_v37, 16 }
  0x18   : > { %v517_v38 = vsel %vm2184_vm3, 0, %v446_v32  ;;  %v518_v39 = vsel %vm2184_vm3, 0, %v453_v33  ;;  %v476_v50 = vshrl.u32 %v2213_v40, 16  ;;  %v479_v51 = vshll.u32 %v2213_v40, 16 }
  0x19   : > { %v1685_v42 = vcombine.low %v517_v38, %v518_v39  ;;  %v483_v52 = vshrl.u32 %v2217_v41, 16  ;;  %v464_v53 = vrot.slane %v462_v46, 7  ;;  %v471_v54 = vrot.slane %v469_v48, 7 }
  0x1a   : > { %v486_v55 = vshll.u32 %v2217_v41, 16  ;;  %v478_v56 = vrot.slane %v476_v50, 7  ;;  %v519_v58 = vsel %vm2184_vm3, 0, %v460_v44  ;;  %v516_v61 = vsel %vm2184_vm3, 0, %v439_v43  ;;  %v2007_v44 = vld [vmem:[%s2478_s3] sm:$0xff]  }
  0x1b   : > { %1860 = vmatprep.mubr.msk.bf16.mxu0 %vm567_vm2, %v1685_v42  ;;  %v485_v57 = vrot.slane %v483_v52, 7  ;;  %v467_v59 = vor.u32 %v465_v47, %v464_v53  ;;  %v474_v60 = vor.u32 %v472_v49, %v471_v54  ;;  %v524_v62 = vsel %vm2184_vm3, 0, %v495_v45  ;;  %v2012_v45 = vld [vmem:[%s2478_s3 + $0x40] sm:$0xff]   ;;  %v2015_v53 = vld [vmem:[%s2478_s3 + $0x28] sm:$0xff]  }
  0x1c   : > { %v481_v63 = vor.u32 %v479_v51, %v478_v56  ;;  %v1695_v34 = vcombine.low %v516_v61, %v517_v38  ;;  %v1696_v43 = vcombine.low %v518_v39, %v519_v58  ;;  %v2009_v39 = vld [vmem:[%s2478_s3 + $0x18] sm:$0xff]   ;;  %v1709_v54 = vcombine.low %v524_v62, %v516_v61 }
  0x1d   : > { %v488_v0 = vor.u32 %v486_v55, %v485_v57  ;;  %v520_v1 = vsel %vm2184_vm3, 0, %v467_v59  ;;  %v521_v21 = vsel %vm2184_vm3, 0, %v474_v60  ;;  %v2014_v56 = vld [vmem:[%s2478_s3 + $0x78] sm:$0xff]   ;;  %v1734_v57 = vcombine.low %v2129_v7, %v2132_v8 }
  0x1e   : > { %v522_v26 = vsel %vm2184_vm3, 0, %v481_v63  ;;  %v1686_v33 = vcombine.low %v519_v58, %v520_v1  ;;  %v1697_v38 = vcombine.low %v520_v1, %v521_v21  ;;  %v1720_v58 = vcombine.low %v2050_v2, %v2129_v7 }
  0x1f   : > { %v523_v32 = vsel %vm2184_vm3, 0, %v488_v0  ;;  %v1687_v35 = vcombine.low %v521_v21, %v522_v26  ;;  %v1142_v59 = vrot.slane %v437_v15, 1  ;;  %v1144_v60 = vrot.slane %v444_v17, 1  ;;  %v2021_v15 = vld [vmem:[%s2478_s3 + $0x20] sm:$0xff]  }
  0x20   : > { %v1688_v42 = vcombine.low %v523_v32, %v524_v62  ;;  %1861 = vmatmul.mubr.msk.bf16.vlgmr.msra.gmra.mxu0 %vm567_vm2, %v1686_v33  ;;  %v1735_v7 = vcombine.low %v2135_v9, %v2163_v19  ;;  %v1736_v61 = vcombine.low %v2166_v20, %v2178_v27  ;;  %v1721_v62 = vcombine.low %v2132_v8, %v2135_v9  ;;  %v2018_v8 = vld [vmem:[%s2478_s3 + $0x70] sm:$0xff]  }
  0x21   : > { %1864 = vmatprep.mubr.msk.bf16.mxu1 %vm567_vm2, %v1687_v35  ;;  %1881 = vmatpush3.bf16.msra.mxu0 %v2121_v6  ;;  %v1698_v6 = vcombine.low %v522_v26, %v523_v32  ;;  %v1143_v17 = vor.u32 %v1142_v59, %v434_v4  ;;  %v1145_v63 = vor.u32 %v1144_v60, %v441_v16  ;;  %v1146_v3 = vrot.slane %v451_v22, 1 }
  0x22   : > { %1865 = vmatmul.mubr.msk.bf16.vlgmr.msra.gmra.mxu1 %vm567_vm2, %v1688_v42  ;;  %1882 = vmatprep.subr.bf16.mxu0 %v2008_v25  ;;  %v1722_v1 = vcombine.low %v2163_v19, %v2166_v20  ;;  %v1148_v4 = vrot.slane %v458_v28, 1  ;;  %v1150_v9 = vrot.slane %v465_v47, 1  ;;  %v1152_v11 = vrot.slane %v472_v49, 1  ;;  %v2023_v20 = vld [vmem:[%s2478_s3 + $0x88] sm:$0xff]   ;;  %v2022_v28 = vld [vmem:[%s2478_s3 + $0x58] sm:$0xff]  }
  0x23   : > { %1869 = vmatpush3.bf16.msra.mxu1 %v2116_v5  ;;  %1872 = vmatprep.mubr.msk.bf16.mxu1 %vm567_vm2, %v1695_v34  ;;  %v2011_v5 = vld [vmem:[%s2478_s3 + $0x10] sm:$0xff]   ;;  %v2346_v16 = vsel %vm2324_vm6, %v1143_v17, 0  ;;  %v1176_v19 = vsel %vm2324_vm6, %v1145_v63, 0  ;;  %v1737_v22 = vcombine.low %v2189_v31, %v2138_v10  ;;  %v1147_v47 = vor.u32 %v1146_v3, %v448_v18 }
  0x24   : > { %1870 = vmatprep.subr.bf16.mxu1 %v2007_v44  ;;  %1884 = vmatprep.mubr.msk.bf16.mxu0 %vm567_vm2, %v1696_v43  ;;  %v1149_v49 = vor.u32 %v1148_v4, %v455_v23  ;;  %v1759_v21 = vcombine.low %v2346_v16, %v1176_v19  ;;  %v1151_v26 = vor.u32 %v1150_v9, %v462_v46  ;;  %v1154_v18 = vrot.slane %v479_v51, 1  ;;  %v2025_v51 = vld [vmem:[%s2478_s3 + $0x80] sm:$0xff]  }
  0x25   : > { %1883 = vmatpush3.bf16.msra.mxu0 %v2008_v25  ;;  %v1723_v25 = vcombine.low %v2178_v27, %v2189_v31  ;;  %v1153_v32 = vor.u32 %v1152_v11, %v469_v48  ;;  %v1177_v12 = vsel %vm2324_vm6, %v1147_v47, 0  ;;  %v1156_v23 = vrot.slane %v486_v55, 1  ;;  %v2024_v55 = vld [vmem:[%s2478_s3 + $0x50] sm:$0xff]  }
  0x26   : > { %1904 = vmatprep.subr.bf16.mxu0 %v2010_v30  ;;  %v1178_v13 = vsel %vm2324_vm6, %v1149_v49, 0  ;;  %v1179_v27 = vsel %vm2324_vm6, %v1151_v26, 0  ;;  %v1155_v46 = vor.u32 %v1154_v18, %v476_v50  ;;  %v1773_v33 = vcombine.low %v1176_v19, %v1177_v12 }
  0x27   : > { %1871 = vmatpush3.bf16.msra.mxu1 %v2007_v44  ;;  %v1180_v31 = vsel %vm2324_vm6, %v1153_v32, 0  ;;  %v1760_v36 = vcombine.low %v1177_v12, %v1178_v13  ;;  %v1157_v48 = vor.u32 %v1156_v23, %v483_v52  ;;  %v1748_v52 = vcombine.low %v2138_v10, %v2050_v2 }
  0x28   : > { %1892 = vmatprep.subr.bf16.mxu1 %v2009_v39  ;;  %1885 = vmatmul.mubr.msk.bf16.vlgmr.msra.gmra.mxu0 %vm567_vm2, %v1697_v38  ;;  %v1761_v37 = vcombine.low %v1179_v27, %v1180_v31  ;;  %v1181_v40 = vsel %vm2324_vm6, %v1155_v46, 0  ;;  %v1158_v34 = vrot.slane %v493_v29, 1  ;;  %v1774_v42 = vcombine.low %v1178_v13, %v1179_v27 }
  0x29   : > { %1905 = vmatpush3.bf16.msra.mxu0 %v2010_v30  ;;  %1888 = vmatprep.mubr.msk.bf16.mxu0 %vm567_vm2, %v1698_v6  ;;  %v1182_v41 = vsel %vm2324_vm6, %v1157_v48, 0 }
  0x2a   : > { %1873 = vmatmul.mubr.msk.bf16.vlgmr.msra.gmra.mxu1 %vm567_vm2, %v1696_v43  ;;  %1906 = vmatprep.subr.bf16.mxu0 %v2012_v45  ;;  %v1762_v50 = vcombine.low %v1181_v40, %v1182_v41  ;;  %v1159_v35 = vor.u32 %v1158_v34, %v490_v24  ;;  %v1775_v43 = vcombine.low %v1180_v31, %v1181_v40 }
  0x2b   : > { %1893 = vmatpush3.bf16.msra.mxu1 %v2009_v39  ;;  %1876 = vmatprep.mubr.msk.bf16.mxu1 %vm567_vm2, %v1697_v38 }
  0x2c   : > { %1894 = vmatprep.subr.bf16.mxu1 %v2011_v5  ;;  %v1183_v2 = vsel %vm2324_vm6, %v1159_v35, 0 }
  0x2d   : > { %1907 = vmatpush3.bf16.msra.mxu0 %v2012_v45  ;;  %v1787_v10 = vcombine.low %v1183_v2, %v2346_v16  ;;  %v1776_v29 = vcombine.low %v1182_v41, %v1183_v2 }
  0x2e   : > { %1928 = vmatprep.subr.bf16.mxu0 %v2015_v53 }
  0x2f   : > { %1895 = vmatpush3.bf16.msra.mxu1 %v2011_v5 }
  0x30   : > { %1889 = vmatmul.mubr.msk.bf16.gmra.mxu0 %vm567_vm2, %v1709_v54  ;;  %1916 = vmatprep.subr.bf16.mxu1 %v2014_v56 }
  0x31   : > { %1908 = vmatprep.mubr.msk.bf16.mxu0 %vm567_vm2, %v1734_v57 }
  0x32   : > { %1877 = vmatmul.mubr.msk.bf16.gmra.mxu1 %vm567_vm2, %v1698_v6 }
  0x33   : > { %1896 = vmatprep.mubr.msk.bf16.mxu1 %vm567_vm2, %v1720_v58 }
  0x38   : > { %1909 = vmatmul.mubr.msk.bf16.vlgmr.msra.gmra.mxu0 %vm567_vm2, %v1735_v7 }
  0x39   : > { %1929 = vmatpush3.bf16.msra.mxu0 %v2015_v53  ;;  %1912 = vmatprep.mubr.msk.bf16.mxu0 %vm567_vm2, %v1736_v61 }
  0x3a   : > { %1897 = vmatmul.mubr.msk.bf16.vlgmr.msra.gmra.mxu1 %vm567_vm2, %v1721_v62  ;;  %1930 = vmatprep.subr.bf16.mxu0 %v2021_v15 }
  0x3b   : > { %1917 = vmatpush3.bf16.msra.mxu1 %v2014_v56  ;;  %1900 = vmatprep.mubr.msk.bf16.mxu1 %vm567_vm2, %v1722_v1 }
  0x3c   : > { %1918 = vmatprep.subr.bf16.mxu1 %v2018_v8 }
  0x3d   : > { %1931 = vmatpush3.bf16.msra.mxu0 %v2021_v15 }
  0x3e   : > { %1952 = vmatprep.subr.bf16.mxu0 %v2023_v20 }
  0x3f   : > { %1919 = vmatpush3.bf16.msra.mxu1 %v2018_v8 }
  0x40   : > { %1913 = vmatmul.mubr.msk.bf16.gmra.mxu0 %vm567_vm2, %v1737_v22  ;;  %1940 = vmatprep.subr.bf16.mxu1 %v2022_v28 }
  0x41   : > { %1932 = vmatprep.mubr.msk.bf16.mxu0 %vm567_vm2, %v1759_v21 }
  0x42   : > { %1901 = vmatmul.mubr.msk.bf16.gmra.mxu1 %vm567_vm2, %v1723_v25 }
  0x43   : > { %1920 = vmatprep.mubr.msk.bf16.mxu1 %vm567_vm2, %v1721_v62 }
  0x48   : > { %1933 = vmatmul.mubr.msk.bf16.vlgmr.msra.gmra.mxu0 %vm567_vm2, %v1760_v36 }
  0x49   : > { %1953 = vmatpush3.bf16.msra.mxu0 %v2023_v20  ;;  %1936 = vmatprep.mubr.msk.bf16.mxu0 %vm567_vm2, %v1761_v37 }
  0x4a   : > { %1921 = vmatmul.mubr.msk.bf16.vlgmr.msra.gmra.mxu1 %vm567_vm2, %v1722_v1  ;;  %1954 = vmatprep.subr.bf16.mxu0 %v2025_v51 }
  0x4b   : > { %1941 = vmatpush3.bf16.msra.mxu1 %v2022_v28  ;;  %1924 = vmatprep.mubr.msk.bf16.mxu1 %vm567_vm2, %v1723_v25 }
  0x4c   : > { %1942 = vmatprep.subr.bf16.mxu1 %v2024_v55 }
  0x4d   : > { %1955 = vmatpush3.bf16.msra.mxu0 %v2025_v51 }
  0x4f   : > { %1943 = vmatpush3.bf16.msra.mxu1 %v2024_v55 }
  0x50   : > { %1937 = vmatmul.mubr.msk.bf16.gmra.mxu0 %vm567_vm2, %v1762_v50 }
  0x51   : > { %1956 = vmatprep.mubr.msk.bf16.mxu0 %vm567_vm2, %v1760_v36 }
  0x52   : > { %1925 = vmatmul.mubr.msk.bf16.gmra.mxu1 %vm567_vm2, %v1748_v52 }
  0x53   : > { %1944 = vmatprep.mubr.msk.bf16.mxu1 %vm567_vm2, %v1773_v33 }
  0x58   : > { %1957 = vmatmul.mubr.msk.bf16.vlgmr.msra.gmra.mxu0 %vm567_vm2, %v1761_v37 }
  0x59   : > { %1960 = vmatprep.mubr.msk.bf16.mxu0 %vm567_vm2, %v1762_v50 }
  0x5a   : > { %1945 = vmatmul.mubr.msk.bf16.vlgmr.msra.gmra.mxu1 %vm567_vm2, %v1774_v42 }
  0x5b   : > { %1948 = vmatprep.mubr.msk.bf16.mxu1 %vm567_vm2, %v1775_v43 }
  0x60   : > { %1961 = vmatmul.mubr.msk.bf16.gmra.mxu0 %vm567_vm2, %v1787_v10 }
  0x62   : > { %1949 = vmatmul.mubr.msk.bf16.gmra.mxu1 %vm567_vm2, %v1776_v29 }
  0xe0   : > { %v1862_v14 = vpop.f32.mrf.mxu0 }
  0xe2   : > { %v1866_v24 = vpop.f32.mrf.mxu1  ;;  %v614_v44 = vpop.f32.mrf.mxu0 }
  0xe4   : > { %v630_v30 = vpop.f32.mrf.mxu1  ;;  %v1863_v38 = vpop.f32.mrf.mxu0 }
  0xe6   : > { %v1867_v39 = vpop.f32.mrf.mxu1  ;;  %v617_v6 = vpop.f32.mrf.mxu0 }
  0xe8   : > { %v2423_v45 = vpop.f32.mrf.mxu1  ;;  %v1886_v5 = vpop.f32.mrf.mxu0 }
  0xea   : > { %v1874_v53 = vpop.f32.mrf.mxu1  ;;  %v797_v54 = vpop.f32.mrf.mxu0 }
  0xeb   : > { %v718_v13 = vadd.f32 %v1874_v53, %v1862_v14 }
  0xec   : > { %v709_v56 = vpop.f32.mrf.mxu1  ;;  %v1887_v57 = vpop.f32.mrf.mxu0 }
  0xed   : > { %v710_v27 = vadd.f32 %v709_v56, %v614_v44  ;;  %v830_v37 = vadd.f32 %v1886_v5, %v718_v13 }
  0xee   : > { %v1875_v58 = vpop.f32.mrf.mxu1  ;;  %v800_v59 = vpop.f32.mrf.mxu0 }
  0xef   : > { %v721_v46 = vadd.f32 %v1875_v58, %v1863_v38  ;;  %v828_v55 = vadd.f32 %v797_v54, %v710_v27 }
  0xf0   : > { %v712_v60 = vpop.f32.mrf.mxu1  ;;  %v1890_v7 = vpop.f32.mrf.mxu0 }
  0xf1   : > { %v713_v40 = vadd.f32 %v712_v60, %v617_v6  ;;  %v831_v34 = vadd.f32 %v1887_v57, %v721_v46 }
  0xf2   : > { %v1878_v61 = vpop.f32.mrf.mxu1  ;;  %v813_v62 = vpop.f32.mrf.mxu0 }
  0xf3   : > { %v734_v50 = vadd.f32 %v1878_v61, %v1866_v24  ;;  %v829_v10 = vadd.f32 %v800_v59, %v713_v40 }
  0xf4   : > { %v725_v15 = vpop.f32.mrf.mxu1  ;;  %v1891_v17 = vpop.f32.mrf.mxu0 }
  0xf5   : > { %v726_v42 = vadd.f32 %v725_v15, %v630_v30  ;;  %v834_v44 = vadd.f32 %v1890_v7, %v734_v50 }
  0xf6   : > { %v1879_v63 = vpop.f32.mrf.mxu1  ;;  %v2425_v0 = vpop.f32.mrf.mxu0 }
  0xf7   : > { %v737_v53 = vadd.f32 %v1879_v63, %v1867_v39  ;;  %v832_v58 = vadd.f32 %v813_v62, %v726_v42 }
  0xf8   : > { %v728_v1 = vpop.f32.mrf.mxu1  ;;  %v1910_v8 = vpop.f32.mrf.mxu0 }
  0xf9   : > { %v729_v24 = vadd.f32 %v728_v1, %v2423_v45  ;;  %v835_v59 = vadd.f32 %v1891_v17, %v737_v53  ;;  %v1794_v17 = vld [vmem:[%s2479_s4] ss:$0 sm:$0xff] }
  0xfa   : > { %v1898_v3 = vpop.f32.mrf.mxu1  ;;  %v1009_v4 = vpop.f32.mrf.mxu0 }
  0xfb   : > { %v936_v41 = vadd.f32 %v1898_v3, %v830_v37 }
  0xfc   : > { %v903_v9 = vpop.f32.mrf.mxu1  ;;  %v1911_v11 = vpop.f32.mrf.mxu0 }
  0xfd   : > { %v934_v35 = vadd.f32 %v903_v9, %v828_v55  ;;  %v1042_v29 = vadd.f32 %v1910_v8, %v936_v41 }
  0xfe   : > { %v1899_v16 = vpop.f32.mrf.mxu1  ;;  %v1012_v19 = vpop.f32.mrf.mxu0 }
  0xff   : > { %v937_v14 = vadd.f32 %v1899_v16, %v831_v34  ;;  %v1040_v56 = vadd.f32 %v1009_v4, %v934_v35  ;;  %v833_v4 = vadd.f32 %v2425_v0, %v729_v24 }
 0x100   : > { %v906_v20 = vpop.f32.mrf.mxu1  ;;  %v1914_v22 = vpop.f32.mrf.mxu0 }
 0x101   : > { %v935_v54 = vadd.f32 %v906_v20, %v829_v10  ;;  %v1043_v30 = vadd.f32 %v1911_v11, %v937_v14 }
 0x102   : > { %v1902_v28 = vpop.f32.mrf.mxu1  ;;  %v1025_v47 = vpop.f32.mrf.mxu0 }
 0x103   : > { %v940_v60 = vadd.f32 %v1902_v28, %v834_v44  ;;  %v1041_v63 = vadd.f32 %v1012_v19, %v935_v54 }
 0x104   : > { %v919_v49 = vpop.f32.mrf.mxu1  ;;  %v2427_v21 = vpop.f32.mrf.mxu0 }
 0x105   : > { %v938_v8 = vadd.f32 %v919_v49, %v832_v58  ;;  %v1046_v16 = vadd.f32 %v1914_v22, %v940_v60 }
 0x106   : > { %v1903_v25 = vpop.f32.mrf.mxu1  ;;  %v2429_v26 = vpop.f32.mrf.mxu0 }
 0x107   : > { %v941_v62 = vadd.f32 %v1903_v25, %v835_v59  ;;  %v1044_v11 = vadd.f32 %v1025_v47, %v938_v8 }
 0x108   : > { %v922_v32 = vpop.f32.mrf.mxu1  ;;  %v1934_v12 = vpop.f32.mrf.mxu0 }
 0x109   : > { %v1047_v22 = vadd.f32 %v2427_v21, %v941_v62 }
 0x10a   : > { %v1922_v18 = vpop.f32.mrf.mxu1  ;;  %v1268_v23 = vpop.f32.mrf.mxu0 }
 0x10b   : > { %v1136_v6 = vadd.f32 %v1922_v18, %v1042_v29  ;;  %v939_v18 = vadd.f32 %v922_v32, %v833_v4 }
 0x10c   : > { %v1103_v31 = vpop.f32.mrf.mxu1  ;;  %v1935_v36 = vpop.f32.mrf.mxu0 }
 0x10d   : > { %v1134_v15 = vadd.f32 %v1103_v31, %v1040_v56  ;;  %v1301_v3 = vadd.f32 %v1934_v12, %v1136_v6 }
 0x10e   : > { %v1923_v48 = vpop.f32.mrf.mxu1  ;;  %v1271_v51 = vpop.f32.mrf.mxu0 }
 0x10f   : > { %v1137_v9 = vadd.f32 %v1923_v48, %v1043_v30  ;;  %v1299_v1 = vadd.f32 %v1268_v23, %v1134_v15 }
 0x110   : > { %v1106_v52 = vpop.f32.mrf.mxu1  ;;  %v1938_v33 = vpop.f32.mrf.mxu0 }
 0x111   : > { %v1135_v28 = vadd.f32 %v1106_v52, %v1041_v63  ;;  %v1302_v12 = vadd.f32 %v1935_v36, %v1137_v9  ;;  %v1045_v36 = vadd.f32 %v2429_v26, %v939_v18 }
 0x112   : > { %v1926_v43 = vpop.f32.mrf.mxu1  ;;  %v1284_v2 = vpop.f32.mrf.mxu0 }
 0x113   : > { %v1140_v27 = vadd.f32 %v1926_v43, %v1046_v16  ;;  %v1300_v23 = vadd.f32 %v1271_v51, %v1135_v28 }
 0x114   : > { %v1119_v5 = vpop.f32.mrf.mxu1  ;;  %v2431_v38 = vpop.f32.mrf.mxu0 }
 0x115   : > { %v1138_v25 = vadd.f32 %v1119_v5, %v1044_v11  ;;  %v1305_v55 = vadd.f32 %v1938_v33, %v1140_v27 }
 0x116   : > { %v1927_v57 = vpop.f32.mrf.mxu1  ;;  %v2434_v61 = vpop.f32.mrf.mxu0 }
 0x117   : > { %v1141_v41 = vadd.f32 %v1927_v57, %v1047_v22  ;;  %v1303_v35 = vadd.f32 %v1284_v2, %v1138_v25 }
 0x118   : > { %v1122_v7 = vpop.f32.mrf.mxu1  ;;  %v1958_v39 = vpop.f32.mrf.mxu0 }
 0x119   : > { %v1139_v43 = vadd.f32 %v1122_v7, %v1045_v36  ;;  %v1306_v14 = vadd.f32 %v2431_v38, %v1141_v41 }
 0x11a   : > { %v1946_v20 = vpop.f32.mrf.mxu1  ;;  %v1472_v45 = vpop.f32.mrf.mxu0 }
 0x11b   : > { %v1409_v13 = vadd.f32 %v1946_v20, %v1301_v3  ;;  %v1304_v54 = vadd.f32 %v2434_v61, %v1139_v43 }
 0x11c   : > { %v1376_v19 = vpop.f32.mrf.mxu1  ;;  %v1959_v49 = vpop.f32.mrf.mxu0 }
 0x11d   : > { %v1505_v31 = vadd.f32 %v1958_v39, %v1409_v13  ;;  %v1407_v0 = vadd.f32 %v1376_v19, %v1299_v1 }
 0x11e   : > { %v1947_v47 = vpop.f32.mrf.mxu1  ;;  %v1475_v32 = vpop.f32.mrf.mxu0 }
 0x11f   : > { %v1520_v37 = vadd.f32 %v1794_v17, %v1505_v31  ;;  %v1503_v46 = vadd.f32 %v1472_v45, %v1407_v0  ;;  %v1410_v48 = vadd.f32 %v1947_v47, %v1302_v12 }
 0x120   : > { %v1379_v40 = vpop.f32.mrf.mxu1  ;;  %v1962_v21 = vpop.f32.mrf.mxu0 }
 0x121   : > { %1529 = vst.msk [vmem:[%s2445_s17 + $0x10] sm:$0xff] %vm1526_vm7, %v1520_v37  ;;  %v1518_v50 = vadd.f32 %v1794_v17, %v1503_v46  ;;  %v1506_v52 = vadd.f32 %v1959_v49, %v1410_v48  ;;  %v1408_v34 = vadd.f32 %v1379_v40, %v1300_v23 }
 0x122   : > { %v1950_v42 = vpop.f32.mrf.mxu1  ;;  %v1488_v51 = vpop.f32.mrf.mxu0 }
 0x123   : > { %1527 = vst.msk [vmem:[%s2445_s17] sm:$0xff] %vm1526_vm7, %v1518_v50  ;;  %v1521_v10 = vadd.f32 %v1794_v17, %v1506_v52  ;;  %v1504_v29 = vadd.f32 %v1475_v32, %v1408_v34  ;;  %v1413_v26 = vadd.f32 %v1950_v42, %v1305_v55 }
 0x124   : > { %v1392_v33 = vpop.f32.mrf.mxu1  ;;  %v1963_v56 = vpop.f32.mrf.mxu0 }
 0x125   : > { %1530 = vst.msk [vmem:[%s2445_s17 + $0x18] sm:$0xff] %vm1526_vm7, %v1521_v10  ;;  %v1519_v44 = vadd.f32 %v1794_v17, %v1504_v29  ;;  %v1509_v53 = vadd.f32 %v1962_v21, %v1413_v26  ;;  %v1411_v5 = vadd.f32 %v1392_v33, %v1303_v35 }
 0x126   : > { %v1951_v2 = vpop.f32.mrf.mxu1  ;;  %v1491_v15 = vpop.f32.mrf.mxu0 }
 0x127   : > { %1528 = vst.msk [vmem:[%s2445_s17 + $0x8] sm:$0xff] %vm1526_vm7, %v1519_v44  ;;  %v1524_v6 = vadd.f32 %v1794_v17, %v1509_v53  ;;  %v1507_v58 = vadd.f32 %v1488_v51, %v1411_v5  ;;  %v1414_v24 = vadd.f32 %v1951_v2, %v1306_v14 }
 0x128   : > { %v1395_v60 = vpop.f32.mrf.mxu1 }
 0x129   : > { %1533 = vst.msk [vmem:[%s2445_s17 + $0x30] sm:$0xff] %vm1526_vm7, %v1524_v6  ;;  %v1522_v38 = vadd.f32 %v1794_v17, %v1507_v58  ;;  %v1510_v57 = vadd.f32 %v1963_v56, %v1414_v24  ;;  %v1412_v30 = vadd.f32 %v1395_v60, %v1304_v54 }
 0x12b   : > { %1531 = vst.msk [vmem:[%s2445_s17 + $0x20] sm:$0xff] %vm1526_vm7, %v1522_v38  ;;  %v1525_v59 = vadd.f32 %v1794_v17, %v1510_v57  ;;  %v1508_v8 = vadd.f32 %v1491_v15, %v1412_v30 }
 0x12d   : > { %1534 = vst.msk [vmem:[%s2445_s17 + $0x38] sm:$0xff] %vm1526_vm7, %v1525_v59  ;;  %v1523_v61 = vadd.f32 %v1794_v17, %v1508_v8 }
 0x12f   : > { %1532 = vst.msk [vmem:[%s2445_s17 + $0x28] sm:$0xff] %vm1526_vm7, %v1523_v61 }
 0x130 PF: > { %s15_s0 = sadd.s32 1, %s2048_s0   ;;  %s2485_s18 = smov %s2044_s19 }
 0x131   : > { %p12_p5 = scmp.ge.s32.totalorder %s15_s0, 4   ;;  %s2486_s19 = smov %s2488_s2 }
 0x133   :  { %14 = sbr.rel (!%p12_p5) target bundleno = 2 (0x2), region = 84 }

</bundles_post_ra>
